<compile_context>
chip_gen: v7x
topology: tpu7x:2x2x1
jax: 0.10.0
libtpu: 0.0.40
codegen_flags: <defaults>
</compile_context>

<pallas_src>
import functools
import math

import jax
import jax.numpy as jnp
from jax import lax
from jax.experimental import pallas as pl
from jax.experimental.pallas import tpu as pltpu


# ----------------------------- per-block body (traced inline) ----------------------
def _encoder_block_body(x, wq_ref, wk_ref, wv_ref, wo_ref, w1_ref, b1_ref, w2_ref,
                        b2_ref, *, h, dk, eps):
    # --- LayerNorm over the entire (S, D) slab, single pass for both moments ---
    mu = jnp.mean(x)
    msq = jnp.mean(x * x)
    var = msq - mu * mu
    xn = (x - mu) * lax.rsqrt(var + eps)

    scale = 1.0 / math.sqrt(dk)
    attn = jnp.zeros_like(x)  # (S, D) accumulator (replaces heads-concat + Wo matmul)
    for i in range(h):  # static unroll, h is small; wX_ref[i] is a free leading-axis pick
        q = jnp.dot(xn, wq_ref[i], preferred_element_type=jnp.float32)   # (S, dk)
        k = jnp.dot(xn, wk_ref[i], preferred_element_type=jnp.float32)   # (S, dk)
        v = jnp.dot(xn, wv_ref[i], preferred_element_type=jnp.float32)   # (S, dv)
        # scores: contract on dk without materializing k.T
        s = lax.dot_general(q, k, (((1,), (1,)), ((), ())),
                            preferred_element_type=jnp.float32) * scale  # (S, S)
        s = s - jnp.max(s, axis=-1, keepdims=True)
        p = jnp.exp(s)
        p = p / jnp.sum(p, axis=-1, keepdims=True)                        # exact divide
        head = jnp.dot(p, v, preferred_element_type=jnp.float32)          # (S, dv)
        attn = attn + jnp.dot(head, wo_ref[i],
                              preferred_element_type=jnp.float32)         # (S, D)

    # TODO(synk): nn.Dropout treated as identity (eval-mode semantics).
    cur = x + attn

    # --- second full-slab LayerNorm (fused moments) ---
    mu2 = jnp.mean(cur)
    msq2 = jnp.mean(cur * cur)
    var2 = msq2 - mu2 * mu2
    cn = (cur - mu2) * lax.rsqrt(var2 + eps)

    # --- FeedForward: Linear -> ReLU -> Linear ---
    hdn = jnp.dot(cn, w1_ref[...], preferred_element_type=jnp.float32) + b1_ref[...]
    hdn = jnp.maximum(hdn, 0.0)
    ff = jnp.dot(hdn, w2_ref[...], preferred_element_type=jnp.float32) + b2_ref[...]

    return cur + ff


# ----------------------------- fused 3-block Pallas kernel -------------------------
def encoder_fused_kernel(x_ref, *refs, n_blocks, h, dk, eps):
    # refs = 8 * n_blocks weight refs, then the output ref
    o_ref = refs[-1]
    wrefs = refs[:-1]

    b_tile = x_ref.shape[0]
    for bi in range(b_tile):          # static unroll; iterations are independent, so the
        x = x_ref[bi].astype(jnp.float32)   # scheduler can interleave them (v5e/v6e path)
        for blk in range(n_blocks):
            x = _encoder_block_body(x, *wrefs[8 * blk: 8 * blk + 8],
                                    h=h, dk=dk, eps=eps)
        o_ref[bi] = x.astype(o_ref.dtype)


# ----------------------------- wrapper --------------------------------------------
def _pack_block_params(params):
    """Keep per-head weights stacked on a leading axis; reshape Wo to (h, dv, D)."""
    wq, wk, wv, wo, w1, b1, w2, b2 = params
    h, D, dv = wv.shape
    wo_s = wo.reshape(h, dv, D)       # head i's (dv, D) slice is a leading-axis index
    return (wq, wk, wv, wo_s, w1, b1, w2, b2)


def _tensorcores_per_chip():
    try:
        kind = jax.devices()[0].device_kind.lower()
    except Exception:
        return 1
    return 2 if "v7" in kind else 1


def encoder(x, block_params, *, h, dk, dv, eps=1e-5, batch_parallel=None):
    B, S, D = x.shape
    packed = [_pack_block_params(p) for p in block_params]
    flat_w = [w for blk in packed for w in blk]

    # v7x (2 TCs/chip): one batch element per core via a parallel grid.
    # v5e/v6e (1 TC/chip): fold the batch into a single kernel step.
    if batch_parallel is None:
        batch_parallel = (_tensorcores_per_chip() >= 2) and (B >= 2)
    b_tile = 1 if batch_parallel else B
    grid = (B // b_tile,)

    def w_spec(arr):
        nd = arr.ndim
        return pl.BlockSpec(arr.shape, lambda g, _nd=nd: (0,) * _nd)

    kernel = functools.partial(encoder_fused_kernel,
                               n_blocks=len(block_params), h=h, dk=dk, eps=eps)
    return pl.pallas_call(
        kernel,
        out_shape=jax.ShapeDtypeStruct((B, S, D), x.dtype),
        grid=grid,
        in_specs=[pl.BlockSpec((b_tile, S, D), lambda g: (g, 0, 0))]  # activations
                 + [w_spec(w) for w in flat_w],                       # all blocks' weights
        out_specs=pl.BlockSpec((b_tile, S, D), lambda g: (g, 0, 0)),
        compiler_params=pltpu.CompilerParams(
            dimension_semantics=("parallel",) if batch_parallel else ("arbitrary",)),
    )(x, *flat_w)


# ----------------------------- parameter init (deterministic) ---------------------
def _linear_init(key, fan_in, shape):
    bound = 1.0 / math.sqrt(fan_in)
    return jax.random.uniform(key, shape, jnp.float32, -bound, bound)


def init_block_params(key, h, dmodel, dk, dv, dff):
    ks = jax.random.split(key, 8)
    wq = _linear_init(ks[0], dmodel, (h, dmodel, dk))        # per-head Wq^T
    wk = _linear_init(ks[1], dmodel, (h, dmodel, dk))        # per-head Wk^T
    wv = _linear_init(ks[2], dmodel, (h, dmodel, dv))        # per-head Wv^T
    wo = _linear_init(ks[3], h * dv, (h * dv, dmodel))       # Wo^T (no bias)
    w1 = _linear_init(ks[4], dmodel, (dmodel, dff))          # linear1 W^T
    b1 = _linear_init(ks[5], dmodel, (1, dff))               # linear1 bias
    w2 = _linear_init(ks[6], dff, (dff, dmodel))             # linear2 W^T
    b2 = _linear_init(ks[7], dff, (1, dmodel))               # linear2 bias
    return (wq, wk, wv, wo, w1, b1, w2, b2)


# ----------------------------- pure-JAX reference ---------------------------------
def ref_block(x, params, h, dk, eps=1e-5):
    wq, wk, wv, wo, w1, b1, w2, b2 = params
    mu = jnp.mean(x, axis=(1, 2), keepdims=True)
    var = jnp.mean((x - mu) ** 2, axis=(1, 2), keepdims=True)
    xn = (x - mu) / jnp.sqrt(var + eps)
    heads = []
    for i in range(h):
        q = xn @ wq[i]
        k = xn @ wk[i]
        v = xn @ wv[i]
        w = jnp.einsum("bqd,bkd->bqk", q, k) / math.sqrt(dk)
        w = jax.nn.softmax(w, axis=-1)
        heads.append(jnp.einsum("bqk,bkd->bqd", w, v))
    attn = jnp.concatenate(heads, axis=-1) @ wo
    cur = x + attn
    mu2 = jnp.mean(cur, axis=(1, 2), keepdims=True)
    var2 = jnp.mean((cur - mu2) ** 2, axis=(1, 2), keepdims=True)
    cn = (cur - mu2) / jnp.sqrt(var2 + eps)
    ff = jnp.maximum(cn @ w1 + b1, 0.0) @ w2 + b2
    return cur + ff


def ref_encoder(x, block_params, h, dk):
    out = x
    for p in block_params:
        out = ref_block(out, p, h, dk)
    return out


# ----------------------------- main -------------------------------------------------
if __name__ == "__main__":
    # Small shapes consistent with the module's structure.
    B, S, D = 2, 8, 32        # batch, seq, dmodel
    H, DK, DV, DFF = 4, 8, 8, 64

    root = jax.random.PRNGKey(0)
    kx, k1, k2, k3 = jax.random.split(root, 4)
    x = jax.random.normal(kx, (B, S, D), dtype=jnp.float32)

    block_params = [
        init_block_params(k1, H, D, DK, DV, DFF),
        init_block_params(k2, H, D, DK, DV, DFF),
        init_block_params(k3, H, D, DK, DV, DFF),
    ]

    out = encoder(x, block_params, h=H, dk=DK, dv=DV)
    out = jax.block_until_ready(out)

    ref = ref_encoder(x, block_params, H, DK)
    assert out.shape == (B, S, D)
    # Exact softmax divide + f32 matmuls: tolerance tightened vs previous 1e-2 version.
    assert jnp.allclose(out, ref, atol=1e-3, rtol=1e-3), "mismatch vs pure-JAX reference"

    print("KERNEL_OK")
</pallas_src>

<mosaic_0001>
module attributes {stable_mosaic.version = 11 : i64} {
  func.func @encoder_fused_kernel(%arg0: i32, %arg1: memref<2x8x32xf32, #tpu.memory_space<vmem>>, %arg2: memref<4x32x8xf32, #tpu.memory_space<vmem>>, %arg3: memref<4x32x8xf32, #tpu.memory_space<vmem>>, %arg4: memref<4x32x8xf32, #tpu.memory_space<vmem>>, %arg5: memref<4x8x32xf32, #tpu.memory_space<vmem>>, %arg6: memref<32x64xf32, #tpu.memory_space<vmem>>, %arg7: memref<1x64xf32, #tpu.memory_space<vmem>>, %arg8: memref<64x32xf32, #tpu.memory_space<vmem>>, %arg9: memref<1x32xf32, #tpu.memory_space<vmem>>, %arg10: memref<4x32x8xf32, #tpu.memory_space<vmem>>, %arg11: memref<4x32x8xf32, #tpu.memory_space<vmem>>, %arg12: memref<4x32x8xf32, #tpu.memory_space<vmem>>, %arg13: memref<4x8x32xf32, #tpu.memory_space<vmem>>, %arg14: memref<32x64xf32, #tpu.memory_space<vmem>>, %arg15: memref<1x64xf32, #tpu.memory_space<vmem>>, %arg16: memref<64x32xf32, #tpu.memory_space<vmem>>, %arg17: memref<1x32xf32, #tpu.memory_space<vmem>>, %arg18: memref<4x32x8xf32, #tpu.memory_space<vmem>>, %arg19: memref<4x32x8xf32, #tpu.memory_space<vmem>>, %arg20: memref<4x32x8xf32, #tpu.memory_space<vmem>>, %arg21: memref<4x8x32xf32, #tpu.memory_space<vmem>>, %arg22: memref<32x64xf32, #tpu.memory_space<vmem>>, %arg23: memref<1x64xf32, #tpu.memory_space<vmem>>, %arg24: memref<64x32xf32, #tpu.memory_space<vmem>>, %arg25: memref<1x32xf32, #tpu.memory_space<vmem>>, %arg26: memref<2x8x32xf32, #tpu.memory_space<vmem>>) attributes {dimension_semantics = [#tpu.dimension_semantics<arbitrary>], iteration_bounds = array<i64: 1>, scalar_prefetch = 0 : i64, scratch_operands = 0 : i64, tpu.core_type = #tpu.core_type<tc>, window_params = [{transform_indices = @transform_0, window_bounds = array<i64: 2, 8, 32>}, {pipeline_mode = #tpu.pipeline_mode<synchronous>, transform_indices = @transform_1, window_bounds = array<i64: 4, 32, 8>}, {pipeline_mode = #tpu.pipeline_mode<synchronous>, transform_indices = @transform_2, window_bounds = array<i64: 4, 32, 8>}, {pipeline_mode = #tpu.pipeline_mode<synchronous>, transform_indices = @transform_3, window_bounds = array<i64: 4, 32, 8>}, {pipeline_mode = #tpu.pipeline_mode<synchronous>, transform_indices = @transform_4, window_bounds = array<i64: 4, 8, 32>}, {pipeline_mode = #tpu.pipeline_mode<synchronous>, transform_indices = @transform_5, window_bounds = array<i64: 32, 64>}, {pipeline_mode = #tpu.pipeline_mode<synchronous>, transform_indices = @transform_6, window_bounds = array<i64: 1, 64>}, {pipeline_mode = #tpu.pipeline_mode<synchronous>, transform_indices = @transform_7, window_bounds = array<i64: 64, 32>}, {pipeline_mode = #tpu.pipeline_mode<synchronous>, transform_indices = @transform_8, window_bounds = array<i64: 1, 32>}, {pipeline_mode = #tpu.pipeline_mode<synchronous>, transform_indices = @transform_9, window_bounds = array<i64: 4, 32, 8>}, {pipeline_mode = #tpu.pipeline_mode<synchronous>, transform_indices = @transform_10, window_bounds = array<i64: 4, 32, 8>}, {pipeline_mode = #tpu.pipeline_mode<synchronous>, transform_indices = @transform_11, window_bounds = array<i64: 4, 32, 8>}, {pipeline_mode = #tpu.pipeline_mode<synchronous>, transform_indices = @transform_12, window_bounds = array<i64: 4, 8, 32>}, {pipeline_mode = #tpu.pipeline_mode<synchronous>, transform_indices = @transform_13, window_bounds = array<i64: 32, 64>}, {pipeline_mode = #tpu.pipeline_mode<synchronous>, transform_indices = @transform_14, window_bounds = array<i64: 1, 64>}, {pipeline_mode = #tpu.pipeline_mode<synchronous>, transform_indices = @transform_15, window_bounds = array<i64: 64, 32>}, {pipeline_mode = #tpu.pipeline_mode<synchronous>, transform_indices = @transform_16, window_bounds = array<i64: 1, 32>}, {pipeline_mode = #tpu.pipeline_mode<synchronous>, transform_indices = @transform_17, window_bounds = array<i64: 4, 32, 8>}, {pipeline_mode = #tpu.pipeline_mode<synchronous>, transform_indices = @transform_18, window_bounds = array<i64: 4, 32, 8>}, {pipeline_mode = #tpu.pipeline_mode<synchronous>, transform_indices = @transform_19, window_bounds = array<i64: 4, 32, 8>}, {pipeline_mode = #tpu.pipeline_mode<synchronous>, transform_indices = @transform_20, window_bounds = array<i64: 4, 8, 32>}, {pipeline_mode = #tpu.pipeline_mode<synchronous>, transform_indices = @transform_21, window_bounds = array<i64: 32, 64>}, {pipeline_mode = #tpu.pipeline_mode<synchronous>, transform_indices = @transform_22, window_bounds = array<i64: 1, 64>}, {pipeline_mode = #tpu.pipeline_mode<synchronous>, transform_indices = @transform_23, window_bounds = array<i64: 64, 32>}, {pipeline_mode = #tpu.pipeline_mode<synchronous>, transform_indices = @transform_24, window_bounds = array<i64: 1, 32>}, {transform_indices = @transform_25, window_bounds = array<i64: 2, 8, 32>}]} {
    %c0 = arith.constant 0 : index
    %c0_0 = arith.constant 0 : index
    %c0_1 = arith.constant 0 : index
    %0 = vector.load %arg1[%c0, %c0_0, %c0_1] : memref<2x8x32xf32, #tpu.memory_space<vmem>>, vector<1x8x32xf32>
    %1 = vector.shape_cast %0 : vector<1x8x32xf32> to vector<8x32xf32>
    %2 = vector.shape_cast %1 : vector<8x32xf32> to vector<1x8x32xf32>
    %cst = arith.constant dense<0.000000e+00> : vector<1xf32>
    %3 = vector.multi_reduction <add>, %2, %cst [1, 2] : vector<1x8x32xf32> to vector<1xf32>
    %4 = vector.shape_cast %3 : vector<1xf32> to vector<1x1x1xf32>
    %5 = vector.extract %4[0, 0, 0] : f32 from vector<1x1x1xf32>
    %cst_2 = arith.constant 2.560000e+02 : f32
    %6 = arith.divf %5, %cst_2 : f32
    %7 = arith.mulf %1, %1 : vector<8x32xf32>
    %8 = vector.shape_cast %7 : vector<8x32xf32> to vector<1x8x32xf32>
    %cst_3 = arith.constant dense<0.000000e+00> : vector<1xf32>
    %9 = vector.multi_reduction <add>, %8, %cst_3 [1, 2] : vector<1x8x32xf32> to vector<1xf32>
    %10 = vector.shape_cast %9 : vector<1xf32> to vector<1x1x1xf32>
    %11 = vector.extract %10[0, 0, 0] : f32 from vector<1x1x1xf32>
    %cst_4 = arith.constant 2.560000e+02 : f32
    %12 = arith.divf %11, %cst_4 : f32
    %13 = arith.mulf %6, %6 : f32
    %14 = arith.subf %12, %13 : f32
    %15 = vector.broadcast %6 : f32 to vector<8x32xf32>
    %16 = arith.subf %1, %15 : vector<8x32xf32>
    %cst_5 = arith.constant 9.99999974E-6 : f32
    %17 = arith.addf %14, %cst_5 : f32
    %18 = math.rsqrt %17 : f32
    %19 = vector.broadcast %18 : f32 to vector<8x32xf32>
    %20 = arith.mulf %16, %19 : vector<8x32xf32>
    %cst_6 = arith.constant 0.000000e+00 : f32
    %21 = vector.broadcast %cst_6 : f32 to vector<8x32xf32>
    %c0_7 = arith.constant 0 : index
    %c0_8 = arith.constant 0 : index
    %c0_9 = arith.constant 0 : index
    %22 = vector.load %arg2[%c0_7, %c0_8, %c0_9] : memref<4x32x8xf32, #tpu.memory_space<vmem>>, vector<1x32x8xf32>
    %23 = vector.shape_cast %22 : vector<1x32x8xf32> to vector<32x8xf32>
    %cst_10 = arith.constant dense<0.000000e+00> : vector<8x8xf32>
    %24 = tpu.matmul %20, %23, %cst_10 {dimension_numbers = #tpu.dot_dimension_numbers<[1], [0], [0], [1], [0, 0, 1, 1], [], []>} : vector<8x32xf32>, vector<32x8xf32>, vector<8x8xf32> -> vector<8x8xf32>
    %c0_11 = arith.constant 0 : index
    %c0_12 = arith.constant 0 : index
    %c0_13 = arith.constant 0 : index
    %25 = vector.load %arg3[%c0_11, %c0_12, %c0_13] : memref<4x32x8xf32, #tpu.memory_space<vmem>>, vector<1x32x8xf32>
    %26 = vector.shape_cast %25 : vector<1x32x8xf32> to vector<32x8xf32>
    %cst_14 = arith.constant dense<0.000000e+00> : vector<8x8xf32>
    %27 = tpu.matmul %20, %26, %cst_14 {dimension_numbers = #tpu.dot_dimension_numbers<[1], [0], [0], [1], [0, 0, 1, 1], [], []>} : vector<8x32xf32>, vector<32x8xf32>, vector<8x8xf32> -> vector<8x8xf32>
    %c0_15 = arith.constant 0 : index
    %c0_16 = arith.constant 0 : index
    %c0_17 = arith.constant 0 : index
    %28 = vector.load %arg4[%c0_15, %c0_16, %c0_17] : memref<4x32x8xf32, #tpu.memory_space<vmem>>, vector<1x32x8xf32>
    %29 = vector.shape_cast %28 : vector<1x32x8xf32> to vector<32x8xf32>
    %cst_18 = arith.constant dense<0.000000e+00> : vector<8x8xf32>
    %30 = tpu.matmul %20, %29, %cst_18 {dimension_numbers = #tpu.dot_dimension_numbers<[1], [0], [0], [1], [0, 0, 1, 1], [], []>} : vector<8x32xf32>, vector<32x8xf32>, vector<8x8xf32> -> vector<8x8xf32>
    %cst_19 = arith.constant dense<0.000000e+00> : vector<8x8xf32>
    %31 = tpu.matmul %24, %27, %cst_19 {dimension_numbers = #tpu.dot_dimension_numbers<[1], [1], [0], [0], [0, 0, 1, 0], [], []>} : vector<8x8xf32>, vector<8x8xf32>, vector<8x8xf32> -> vector<8x8xf32>
    %cst_20 = arith.constant 0.353553385 : f32
    %32 = vector.broadcast %cst_20 : f32 to vector<8x8xf32>
    %33 = arith.mulf %31, %32 : vector<8x8xf32>
    %cst_21 = arith.constant dense<0xFF800000> : vector<8xf32>
    %34 = vector.multi_reduction <maximumf>, %33, %cst_21 [1] : vector<8x8xf32> to vector<8xf32>
    %35 = vector.shape_cast %34 : vector<8xf32> to vector<8x1xf32>
    %36 = vector.broadcast %35 : vector<8x1xf32> to vector<8x8xf32>
    %37 = arith.subf %33, %36 : vector<8x8xf32>
    %38 = math.exp %37 : vector<8x8xf32>
    %cst_22 = arith.constant dense<0.000000e+00> : vector<8xf32>
    %39 = vector.multi_reduction <add>, %38, %cst_22 [1] : vector<8x8xf32> to vector<8xf32>
    %40 = vector.shape_cast %39 : vector<8xf32> to vector<8x1xf32>
    %41 = vector.broadcast %40 : vector<8x1xf32> to vector<8x8xf32>
    %42 = arith.divf %38, %41 : vector<8x8xf32>
    %cst_23 = arith.constant dense<0.000000e+00> : vector<8x8xf32>
    %43 = tpu.matmul %42, %30, %cst_23 {dimension_numbers = #tpu.dot_dimension_numbers<[1], [0], [0], [1], [0, 0, 1, 1], [], []>} : vector<8x8xf32>, vector<8x8xf32>, vector<8x8xf32> -> vector<8x8xf32>
    %c0_24 = arith.constant 0 : index
    %c0_25 = arith.constant 0 : index
    %c0_26 = arith.constant 0 : index
    %44 = vector.load %arg5[%c0_24, %c0_25, %c0_26] : memref<4x8x32xf32, #tpu.memory_space<vmem>>, vector<1x8x32xf32>
    %45 = vector.shape_cast %44 : vector<1x8x32xf32> to vector<8x32xf32>
    %cst_27 = arith.constant dense<0.000000e+00> : vector<8x32xf32>
    %46 = tpu.matmul %43, %45, %cst_27 {dimension_numbers = #tpu.dot_dimension_numbers<[1], [0], [0], [1], [0, 0, 1, 1], [], []>} : vector<8x8xf32>, vector<8x32xf32>, vector<8x32xf32> -> vector<8x32xf32>
    %47 = arith.addf %21, %46 : vector<8x32xf32>
    %c1 = arith.constant 1 : index
    %c0_28 = arith.constant 0 : index
    %c0_29 = arith.constant 0 : index
    %48 = vector.load %arg2[%c1, %c0_28, %c0_29] : memref<4x32x8xf32, #tpu.memory_space<vmem>>, vector<1x32x8xf32>
    %49 = vector.shape_cast %48 : vector<1x32x8xf32> to vector<32x8xf32>
    %cst_30 = arith.constant dense<0.000000e+00> : vector<8x8xf32>
    %50 = tpu.matmul %20, %49, %cst_30 {dimension_numbers = #tpu.dot_dimension_numbers<[1], [0], [0], [1], [0, 0, 1, 1], [], []>} : vector<8x32xf32>, vector<32x8xf32>, vector<8x8xf32> -> vector<8x8xf32>
    %c1_31 = arith.constant 1 : index
    %c0_32 = arith.constant 0 : index
    %c0_33 = arith.constant 0 : index
    %51 = vector.load %arg3[%c1_31, %c0_32, %c0_33] : memref<4x32x8xf32, #tpu.memory_space<vmem>>, vector<1x32x8xf32>
    %52 = vector.shape_cast %51 : vector<1x32x8xf32> to vector<32x8xf32>
    %cst_34 = arith.constant dense<0.000000e+00> : vector<8x8xf32>
    %53 = tpu.matmul %20, %52, %cst_34 {dimension_numbers = #tpu.dot_dimension_numbers<[1], [0], [0], [1], [0, 0, 1, 1], [], []>} : vector<8x32xf32>, vector<32x8xf32>, vector<8x8xf32> -> vector<8x8xf32>
    %c1_35 = arith.constant 1 : index
    %c0_36 = arith.constant 0 : index
    %c0_37 = arith.constant 0 : index
    %54 = vector.load %arg4[%c1_35, %c0_36, %c0_37] : memref<4x32x8xf32, #tpu.memory_space<vmem>>, vector<1x32x8xf32>
    %55 = vector.shape_cast %54 : vector<1x32x8xf32> to vector<32x8xf32>
    %cst_38 = arith.constant dense<0.000000e+00> : vector<8x8xf32>
    %56 = tpu.matmul %20, %55, %cst_38 {dimension_numbers = #tpu.dot_dimension_numbers<[1], [0], [0], [1], [0, 0, 1, 1], [], []>} : vector<8x32xf32>, vector<32x8xf32>, vector<8x8xf32> -> vector<8x8xf32>
    %cst_39 = arith.constant dense<0.000000e+00> : vector<8x8xf32>
    %57 = tpu.matmul %50, %53, %cst_39 {dimension_numbers = #tpu.dot_dimension_numbers<[1], [1], [0], [0], [0, 0, 1, 0], [], []>} : vector<8x8xf32>, vector<8x8xf32>, vector<8x8xf32> -> vector<8x8xf32>
    %cst_40 = arith.constant 0.353553385 : f32
    %58 = vector.broadcast %cst_40 : f32 to vector<8x8xf32>
    %59 = arith.mulf %57, %58 : vector<8x8xf32>
    %cst_41 = arith.constant dense<0xFF800000> : vector<8xf32>
    %60 = vector.multi_reduction <maximumf>, %59, %cst_41 [1] : vector<8x8xf32> to vector<8xf32>
    %61 = vector.shape_cast %60 : vector<8xf32> to vector<8x1xf32>
    %62 = vector.broadcast %61 : vector<8x1xf32> to vector<8x8xf32>
    %63 = arith.subf %59, %62 : vector<8x8xf32>
    %64 = math.exp %63 : vector<8x8xf32>
    %cst_42 = arith.constant dense<0.000000e+00> : vector<8xf32>
    %65 = vector.multi_reduction <add>, %64, %cst_42 [1] : vector<8x8xf32> to vector<8xf32>
    %66 = vector.shape_cast %65 : vector<8xf32> to vector<8x1xf32>
    %67 = vector.broadcast %66 : vector<8x1xf32> to vector<8x8xf32>
    %68 = arith.divf %64, %67 : vector<8x8xf32>
    %cst_43 = arith.constant dense<0.000000e+00> : vector<8x8xf32>
    %69 = tpu.matmul %68, %56, %cst_43 {dimension_numbers = #tpu.dot_dimension_numbers<[1], [0], [0], [1], [0, 0, 1, 1], [], []>} : vector<8x8xf32>, vector<8x8xf32>, vector<8x8xf32> -> vector<8x8xf32>
    %c1_44 = arith.constant 1 : index
    %c0_45 = arith.constant 0 : index
    %c0_46 = arith.constant 0 : index
    %70 = vector.load %arg5[%c1_44, %c0_45, %c0_46] : memref<4x8x32xf32, #tpu.memory_space<vmem>>, vector<1x8x32xf32>
    %71 = vector.shape_cast %70 : vector<1x8x32xf32> to vector<8x32xf32>
    %cst_47 = arith.constant dense<0.000000e+00> : vector<8x32xf32>
    %72 = tpu.matmul %69, %71, %cst_47 {dimension_numbers = #tpu.dot_dimension_numbers<[1], [0], [0], [1], [0, 0, 1, 1], [], []>} : vector<8x8xf32>, vector<8x32xf32>, vector<8x32xf32> -> vector<8x32xf32>
    %73 = arith.addf %47, %72 : vector<8x32xf32>
    %c2 = arith.constant 2 : index
    %c0_48 = arith.constant 0 : index
    %c0_49 = arith.constant 0 : index
    %74 = vector.load %arg2[%c2, %c0_48, %c0_49] : memref<4x32x8xf32, #tpu.memory_space<vmem>>, vector<1x32x8xf32>
    %75 = vector.shape_cast %74 : vector<1x32x8xf32> to vector<32x8xf32>
    %cst_50 = arith.constant dense<0.000000e+00> : vector<8x8xf32>
    %76 = tpu.matmul %20, %75, %cst_50 {dimension_numbers = #tpu.dot_dimension_numbers<[1], [0], [0], [1], [0, 0, 1, 1], [], []>} : vector<8x32xf32>, vector<32x8xf32>, vector<8x8xf32> -> vector<8x8xf32>
    %c2_51 = arith.constant 2 : index
    %c0_52 = arith.constant 0 : index
    %c0_53 = arith.constant 0 : index
    %77 = vector.load %arg3[%c2_51, %c0_52, %c0_53] : memref<4x32x8xf32, #tpu.memory_space<vmem>>, vector<1x32x8xf32>
    %78 = vector.shape_cast %77 : vector<1x32x8xf32> to vector<32x8xf32>
    %cst_54 = arith.constant dense<0.000000e+00> : vector<8x8xf32>
    %79 = tpu.matmul %20, %78, %cst_54 {dimension_numbers = #tpu.dot_dimension_numbers<[1], [0], [0], [1], [0, 0, 1, 1], [], []>} : vector<8x32xf32>, vector<32x8xf32>, vector<8x8xf32> -> vector<8x8xf32>
    %c2_55 = arith.constant 2 : index
    %c0_56 = arith.constant 0 : index
    %c0_57 = arith.constant 0 : index
    %80 = vector.load %arg4[%c2_55, %c0_56, %c0_57] : memref<4x32x8xf32, #tpu.memory_space<vmem>>, vector<1x32x8xf32>
    %81 = vector.shape_cast %80 : vector<1x32x8xf32> to vector<32x8xf32>
    %cst_58 = arith.constant dense<0.000000e+00> : vector<8x8xf32>
    %82 = tpu.matmul %20, %81, %cst_58 {dimension_numbers = #tpu.dot_dimension_numbers<[1], [0], [0], [1], [0, 0, 1, 1], [], []>} : vector<8x32xf32>, vector<32x8xf32>, vector<8x8xf32> -> vector<8x8xf32>
    %cst_59 = arith.constant dense<0.000000e+00> : vector<8x8xf32>
    %83 = tpu.matmul %76, %79, %cst_59 {dimension_numbers = #tpu.dot_dimension_numbers<[1], [1], [0], [0], [0, 0, 1, 0], [], []>} : vector<8x8xf32>, vector<8x8xf32>, vector<8x8xf32> -> vector<8x8xf32>
    %cst_60 = arith.constant 0.353553385 : f32
    %84 = vector.broadcast %cst_60 : f32 to vector<8x8xf32>
    %85 = arith.mulf %83, %84 : vector<8x8xf32>
    %cst_61 = arith.constant dense<0xFF800000> : vector<8xf32>
    %86 = vector.multi_reduction <maximumf>, %85, %cst_61 [1] : vector<8x8xf32> to vector<8xf32>
    %87 = vector.shape_cast %86 : vector<8xf32> to vector<8x1xf32>
    %88 = vector.broadcast %87 : vector<8x1xf32> to vector<8x8xf32>
    %89 = arith.subf %85, %88 : vector<8x8xf32>
    %90 = math.exp %89 : vector<8x8xf32>
    %cst_62 = arith.constant dense<0.000000e+00> : vector<8xf32>
    %91 = vector.multi_reduction <add>, %90, %cst_62 [1] : vector<8x8xf32> to vector<8xf32>
    %92 = vector.shape_cast %91 : vector<8xf32> to vector<8x1xf32>
    %93 = vector.broadcast %92 : vector<8x1xf32> to vector<8x8xf32>
    %94 = arith.divf %90, %93 : vector<8x8xf32>
    %cst_63 = arith.constant dense<0.000000e+00> : vector<8x8xf32>
    %95 = tpu.matmul %94, %82, %cst_63 {dimension_numbers = #tpu.dot_dimension_numbers<[1], [0], [0], [1], [0, 0, 1, 1], [], []>} : vector<8x8xf32>, vector<8x8xf32>, vector<8x8xf32> -> vector<8x8xf32>
    %c2_64 = arith.constant 2 : index
    %c0_65 = arith.constant 0 : index
    %c0_66 = arith.constant 0 : index
    %96 = vector.load %arg5[%c2_64, %c0_65, %c0_66] : memref<4x8x32xf32, #tpu.memory_space<vmem>>, vector<1x8x32xf32>
    %97 = vector.shape_cast %96 : vector<1x8x32xf32> to vector<8x32xf32>
    %cst_67 = arith.constant dense<0.000000e+00> : vector<8x32xf32>
    %98 = tpu.matmul %95, %97, %cst_67 {dimension_numbers = #tpu.dot_dimension_numbers<[1], [0], [0], [1], [0, 0, 1, 1], [], []>} : vector<8x8xf32>, vector<8x32xf32>, vector<8x32xf32> -> vector<8x32xf32>
    %99 = arith.addf %73, %98 : vector<8x32xf32>
    %c3 = arith.constant 3 : index
    %c0_68 = arith.constant 0 : index
    %c0_69 = arith.constant 0 : index
    %100 = vector.load %arg2[%c3, %c0_68, %c0_69] : memref<4x32x8xf32, #tpu.memory_space<vmem>>, vector<1x32x8xf32>
    %101 = vector.shape_cast %100 : vector<1x32x8xf32> to vector<32x8xf32>
    %cst_70 = arith.constant dense<0.000000e+00> : vector<8x8xf32>
    %102 = tpu.matmul %20, %101, %cst_70 {dimension_numbers = #tpu.dot_dimension_numbers<[1], [0], [0], [1], [0, 0, 1, 1], [], []>} : vector<8x32xf32>, vector<32x8xf32>, vector<8x8xf32> -> vector<8x8xf32>
    %c3_71 = arith.constant 3 : index
    %c0_72 = arith.constant 0 : index
    %c0_73 = arith.constant 0 : index
    %103 = vector.load %arg3[%c3_71, %c0_72, %c0_73] : memref<4x32x8xf32, #tpu.memory_space<vmem>>, vector<1x32x8xf32>
    %104 = vector.shape_cast %103 : vector<1x32x8xf32> to vector<32x8xf32>
    %cst_74 = arith.constant dense<0.000000e+00> : vector<8x8xf32>
    %105 = tpu.matmul %20, %104, %cst_74 {dimension_numbers = #tpu.dot_dimension_numbers<[1], [0], [0], [1], [0, 0, 1, 1], [], []>} : vector<8x32xf32>, vector<32x8xf32>, vector<8x8xf32> -> vector<8x8xf32>
    %c3_75 = arith.constant 3 : index
    %c0_76 = arith.constant 0 : index
    %c0_77 = arith.constant 0 : index
    %106 = vector.load %arg4[%c3_75, %c0_76, %c0_77] : memref<4x32x8xf32, #tpu.memory_space<vmem>>, vector<1x32x8xf32>
    %107 = vector.shape_cast %106 : vector<1x32x8xf32> to vector<32x8xf32>
    %cst_78 = arith.constant dense<0.000000e+00> : vector<8x8xf32>
    %108 = tpu.matmul %20, %107, %cst_78 {dimension_numbers = #tpu.dot_dimension_numbers<[1], [0], [0], [1], [0, 0, 1, 1], [], []>} : vector<8x32xf32>, vector<32x8xf32>, vector<8x8xf32> -> vector<8x8xf32>
    %cst_79 = arith.constant dense<0.000000e+00> : vector<8x8xf32>
    %109 = tpu.matmul %102, %105, %cst_79 {dimension_numbers = #tpu.dot_dimension_numbers<[1], [1], [0], [0], [0, 0, 1, 0], [], []>} : vector<8x8xf32>, vector<8x8xf32>, vector<8x8xf32> -> vector<8x8xf32>
    %cst_80 = arith.constant 0.353553385 : f32
    %110 = vector.broadcast %cst_80 : f32 to vector<8x8xf32>
    %111 = arith.mulf %109, %110 : vector<8x8xf32>
    %cst_81 = arith.constant dense<0xFF800000> : vector<8xf32>
    %112 = vector.multi_reduction <maximumf>, %111, %cst_81 [1] : vector<8x8xf32> to vector<8xf32>
    %113 = vector.shape_cast %112 : vector<8xf32> to vector<8x1xf32>
    %114 = vector.broadcast %113 : vector<8x1xf32> to vector<8x8xf32>
    %115 = arith.subf %111, %114 : vector<8x8xf32>
    %116 = math.exp %115 : vector<8x8xf32>
    %cst_82 = arith.constant dense<0.000000e+00> : vector<8xf32>
    %117 = vector.multi_reduction <add>, %116, %cst_82 [1] : vector<8x8xf32> to vector<8xf32>
    %118 = vector.shape_cast %117 : vector<8xf32> to vector<8x1xf32>
    %119 = vector.broadcast %118 : vector<8x1xf32> to vector<8x8xf32>
    %120 = arith.divf %116, %119 : vector<8x8xf32>
    %cst_83 = arith.constant dense<0.000000e+00> : vector<8x8xf32>
    %121 = tpu.matmul %120, %108, %cst_83 {dimension_numbers = #tpu.dot_dimension_numbers<[1], [0], [0], [1], [0, 0, 1, 1], [], []>} : vector<8x8xf32>, vector<8x8xf32>, vector<8x8xf32> -> vector<8x8xf32>
    %c3_84 = arith.constant 3 : index
    %c0_85 = arith.constant 0 : index
    %c0_86 = arith.constant 0 : index
    %122 = vector.load %arg5[%c3_84, %c0_85, %c0_86] : memref<4x8x32xf32, #tpu.memory_space<vmem>>, vector<1x8x32xf32>
    %123 = vector.shape_cast %122 : vector<1x8x32xf32> to vector<8x32xf32>
    %cst_87 = arith.constant dense<0.000000e+00> : vector<8x32xf32>
    %124 = tpu.matmul %121, %123, %cst_87 {dimension_numbers = #tpu.dot_dimension_numbers<[1], [0], [0], [1], [0, 0, 1, 1], [], []>} : vector<8x8xf32>, vector<8x32xf32>, vector<8x32xf32> -> vector<8x32xf32>
    %125 = arith.addf %99, %124 : vector<8x32xf32>
    %126 = arith.addf %1, %125 : vector<8x32xf32>
    %127 = vector.shape_cast %126 : vector<8x32xf32> to vector<1x8x32xf32>
    %cst_88 = arith.constant dense<0.000000e+00> : vector<1xf32>
    %128 = vector.multi_reduction <add>, %127, %cst_88 [1, 2] : vector<1x8x32xf32> to vector<1xf32>
    %129 = vector.shape_cast %128 : vector<1xf32> to vector<1x1x1xf32>
    %130 = vector.extract %129[0, 0, 0] : f32 from vector<1x1x1xf32>
    %cst_89 = arith.constant 2.560000e+02 : f32
    %131 = arith.divf %130, %cst_89 : f32
    %132 = arith.mulf %126, %126 : vector<8x32xf32>
    %133 = vector.shape_cast %132 : vector<8x32xf32> to vector<1x8x32xf32>
    %cst_90 = arith.constant dense<0.000000e+00> : vector<1xf32>
    %134 = vector.multi_reduction <add>, %133, %cst_90 [1, 2] : vector<1x8x32xf32> to vector<1xf32>
    %135 = vector.shape_cast %134 : vector<1xf32> to vector<1x1x1xf32>
    %136 = vector.extract %135[0, 0, 0] : f32 from vector<1x1x1xf32>
    %cst_91 = arith.constant 2.560000e+02 : f32
    %137 = arith.divf %136, %cst_91 : f32
    %138 = arith.mulf %131, %131 : f32
    %139 = arith.subf %137, %138 : f32
    %140 = vector.broadcast %131 : f32 to vector<8x32xf32>
    %141 = arith.subf %126, %140 : vector<8x32xf32>
    %cst_92 = arith.constant 9.99999974E-6 : f32
    %142 = arith.addf %139, %cst_92 : f32
    %143 = math.rsqrt %142 : f32
    %144 = vector.broadcast %143 : f32 to vector<8x32xf32>
    %145 = arith.mulf %141, %144 : vector<8x32xf32>
    %c0_93 = arith.constant 0 : index
    %c0_94 = arith.constant 0 : index
    %146 = vector.load %arg6[%c0_93, %c0_94] : memref<32x64xf32, #tpu.memory_space<vmem>>, vector<32x64xf32>
    %cst_95 = arith.constant dense<0.000000e+00> : vector<8x64xf32>
    %147 = tpu.matmul %145, %146, %cst_95 {dimension_numbers = #tpu.dot_dimension_numbers<[1], [0], [0], [1], [0, 0, 1, 1], [], []>} : vector<8x32xf32>, vector<32x64xf32>, vector<8x64xf32> -> vector<8x64xf32>
    %c0_96 = arith.constant 0 : index
    %c0_97 = arith.constant 0 : index
    %148 = vector.load %arg7[%c0_96, %c0_97] : memref<1x64xf32, #tpu.memory_space<vmem>>, vector<1x64xf32>
    %149 = vector.broadcast %148 : vector<1x64xf32> to vector<8x64xf32>
    %150 = arith.addf %147, %149 : vector<8x64xf32>
    %cst_98 = arith.constant 0.000000e+00 : f32
    %151 = vector.broadcast %cst_98 : f32 to vector<8x64xf32>
    %152 = arith.maximumf %150, %151 : vector<8x64xf32>
    %c0_99 = arith.constant 0 : index
    %c0_100 = arith.constant 0 : index
    %153 = vector.load %arg8[%c0_99, %c0_100] : memref<64x32xf32, #tpu.memory_space<vmem>>, vector<64x32xf32>
    %cst_101 = arith.constant dense<0.000000e+00> : vector<8x32xf32>
    %154 = tpu.matmul %152, %153, %cst_101 {dimension_numbers = #tpu.dot_dimension_numbers<[1], [0], [0], [1], [0, 0, 1, 1], [], []>} : vector<8x64xf32>, vector<64x32xf32>, vector<8x32xf32> -> vector<8x32xf32>
    %c0_102 = arith.constant 0 : index
    %c0_103 = arith.constant 0 : index
    %155 = vector.load %arg9[%c0_102, %c0_103] : memref<1x32xf32, #tpu.memory_space<vmem>>, vector<1x32xf32>
    %156 = vector.broadcast %155 : vector<1x32xf32> to vector<8x32xf32>
    %157 = arith.addf %154, %156 : vector<8x32xf32>
    %158 = arith.addf %126, %157 : vector<8x32xf32>
    %159 = vector.shape_cast %158 : vector<8x32xf32> to vector<1x8x32xf32>
    %cst_104 = arith.constant dense<0.000000e+00> : vector<1xf32>
    %160 = vector.multi_reduction <add>, %159, %cst_104 [1, 2] : vector<1x8x32xf32> to vector<1xf32>
    %161 = vector.shape_cast %160 : vector<1xf32> to vector<1x1x1xf32>
    %162 = vector.extract %161[0, 0, 0] : f32 from vector<1x1x1xf32>
    %cst_105 = arith.constant 2.560000e+02 : f32
    %163 = arith.divf %162, %cst_105 : f32
    %164 = arith.mulf %158, %158 : vector<8x32xf32>
    %165 = vector.shape_cast %164 : vector<8x32xf32> to vector<1x8x32xf32>
    %cst_106 = arith.constant dense<0.000000e+00> : vector<1xf32>
    %166 = vector.multi_reduction <add>, %165, %cst_106 [1, 2] : vector<1x8x32xf32> to vector<1xf32>
    %167 = vector.shape_cast %166 : vector<1xf32> to vector<1x1x1xf32>
    %168 = vector.extract %167[0, 0, 0] : f32 from vector<1x1x1xf32>
    %cst_107 = arith.constant 2.560000e+02 : f32
    %169 = arith.divf %168, %cst_107 : f32
    %170 = arith.mulf %163, %163 : f32
    %171 = arith.subf %169, %170 : f32
    %172 = vector.broadcast %163 : f32 to vector<8x32xf32>
    %173 = arith.subf %158, %172 : vector<8x32xf32>
    %cst_108 = arith.constant 9.99999974E-6 : f32
    %174 = arith.addf %171, %cst_108 : f32
    %175 = math.rsqrt %174 : f32
    %176 = vector.broadcast %175 : f32 to vector<8x32xf32>
    %177 = arith.mulf %173, %176 : vector<8x32xf32>
    %cst_109 = arith.constant 0.000000e+00 : f32
    %178 = vector.broadcast %cst_109 : f32 to vector<8x32xf32>
    %c0_110 = arith.constant 0 : index
    %c0_111 = arith.constant 0 : index
    %c0_112 = arith.constant 0 : index
    %179 = vector.load %arg10[%c0_110, %c0_111, %c0_112] : memref<4x32x8xf32, #tpu.memory_space<vmem>>, vector<1x32x8xf32>
    %180 = vector.shape_cast %179 : vector<1x32x8xf32> to vector<32x8xf32>
    %cst_113 = arith.constant dense<0.000000e+00> : vector<8x8xf32>
    %181 = tpu.matmul %177, %180, %cst_113 {dimension_numbers = #tpu.dot_dimension_numbers<[1], [0], [0], [1], [0, 0, 1, 1], [], []>} : vector<8x32xf32>, vector<32x8xf32>, vector<8x8xf32> -> vector<8x8xf32>
    %c0_114 = arith.constant 0 : index
    %c0_115 = arith.constant 0 : index
    %c0_116 = arith.constant 0 : index
    %182 = vector.load %arg11[%c0_114, %c0_115, %c0_116] : memref<4x32x8xf32, #tpu.memory_space<vmem>>, vector<1x32x8xf32>
    %183 = vector.shape_cast %182 : vector<1x32x8xf32> to vector<32x8xf32>
    %cst_117 = arith.constant dense<0.000000e+00> : vector<8x8xf32>
    %184 = tpu.matmul %177, %183, %cst_117 {dimension_numbers = #tpu.dot_dimension_numbers<[1], [0], [0], [1], [0, 0, 1, 1], [], []>} : vector<8x32xf32>, vector<32x8xf32>, vector<8x8xf32> -> vector<8x8xf32>
    %c0_118 = arith.constant 0 : index
    %c0_119 = arith.constant 0 : index
    %c0_120 = arith.constant 0 : index
    %185 = vector.load %arg12[%c0_118, %c0_119, %c0_120] : memref<4x32x8xf32, #tpu.memory_space<vmem>>, vector<1x32x8xf32>
    %186 = vector.shape_cast %185 : vector<1x32x8xf32> to vector<32x8xf32>
    %cst_121 = arith.constant dense<0.000000e+00> : vector<8x8xf32>
    %187 = tpu.matmul %177, %186, %cst_121 {dimension_numbers = #tpu.dot_dimension_numbers<[1], [0], [0], [1], [0, 0, 1, 1], [], []>} : vector<8x32xf32>, vector<32x8xf32>, vector<8x8xf32> -> vector<8x8xf32>
    %cst_122 = arith.constant dense<0.000000e+00> : vector<8x8xf32>
    %188 = tpu.matmul %181, %184, %cst_122 {dimension_numbers = #tpu.dot_dimension_numbers<[1], [1], [0], [0], [0, 0, 1, 0], [], []>} : vector<8x8xf32>, vector<8x8xf32>, vector<8x8xf32> -> vector<8x8xf32>
    %cst_123 = arith.constant 0.353553385 : f32
    %189 = vector.broadcast %cst_123 : f32 to vector<8x8xf32>
    %190 = arith.mulf %188, %189 : vector<8x8xf32>
    %cst_124 = arith.constant dense<0xFF800000> : vector<8xf32>
    %191 = vector.multi_reduction <maximumf>, %190, %cst_124 [1] : vector<8x8xf32> to vector<8xf32>
    %192 = vector.shape_cast %191 : vector<8xf32> to vector<8x1xf32>
    %193 = vector.broadcast %192 : vector<8x1xf32> to vector<8x8xf32>
    %194 = arith.subf %190, %193 : vector<8x8xf32>
    %195 = math.exp %194 : vector<8x8xf32>
    %cst_125 = arith.constant dense<0.000000e+00> : vector<8xf32>
    %196 = vector.multi_reduction <add>, %195, %cst_125 [1] : vector<8x8xf32> to vector<8xf32>
    %197 = vector.shape_cast %196 : vector<8xf32> to vector<8x1xf32>
    %198 = vector.broadcast %197 : vector<8x1xf32> to vector<8x8xf32>
    %199 = arith.divf %195, %198 : vector<8x8xf32>
    %cst_126 = arith.constant dense<0.000000e+00> : vector<8x8xf32>
    %200 = tpu.matmul %199, %187, %cst_126 {dimension_numbers = #tpu.dot_dimension_numbers<[1], [0], [0], [1], [0, 0, 1, 1], [], []>} : vector<8x8xf32>, vector<8x8xf32>, vector<8x8xf32> -> vector<8x8xf32>
    %c0_127 = arith.constant 0 : index
    %c0_128 = arith.constant 0 : index
    %c0_129 = arith.constant 0 : index
    %201 = vector.load %arg13[%c0_127, %c0_128, %c0_129] : memref<4x8x32xf32, #tpu.memory_space<vmem>>, vector<1x8x32xf32>
    %202 = vector.shape_cast %201 : vector<1x8x32xf32> to vector<8x32xf32>
    %cst_130 = arith.constant dense<0.000000e+00> : vector<8x32xf32>
    %203 = tpu.matmul %200, %202, %cst_130 {dimension_numbers = #tpu.dot_dimension_numbers<[1], [0], [0], [1], [0, 0, 1, 1], [], []>} : vector<8x8xf32>, vector<8x32xf32>, vector<8x32xf32> -> vector<8x32xf32>
    %204 = arith.addf %178, %203 : vector<8x32xf32>
    %c1_131 = arith.constant 1 : index
    %c0_132 = arith.constant 0 : index
    %c0_133 = arith.constant 0 : index
    %205 = vector.load %arg10[%c1_131, %c0_132, %c0_133] : memref<4x32x8xf32, #tpu.memory_space<vmem>>, vector<1x32x8xf32>
    %206 = vector.shape_cast %205 : vector<1x32x8xf32> to vector<32x8xf32>
    %cst_134 = arith.constant dense<0.000000e+00> : vector<8x8xf32>
    %207 = tpu.matmul %177, %206, %cst_134 {dimension_numbers = #tpu.dot_dimension_numbers<[1], [0], [0], [1], [0, 0, 1, 1], [], []>} : vector<8x32xf32>, vector<32x8xf32>, vector<8x8xf32> -> vector<8x8xf32>
    %c1_135 = arith.constant 1 : index
    %c0_136 = arith.constant 0 : index
    %c0_137 = arith.constant 0 : index
    %208 = vector.load %arg11[%c1_135, %c0_136, %c0_137] : memref<4x32x8xf32, #tpu.memory_space<vmem>>, vector<1x32x8xf32>
    %209 = vector.shape_cast %208 : vector<1x32x8xf32> to vector<32x8xf32>
    %cst_138 = arith.constant dense<0.000000e+00> : vector<8x8xf32>
    %210 = tpu.matmul %177, %209, %cst_138 {dimension_numbers = #tpu.dot_dimension_numbers<[1], [0], [0], [1], [0, 0, 1, 1], [], []>} : vector<8x32xf32>, vector<32x8xf32>, vector<8x8xf32> -> vector<8x8xf32>
    %c1_139 = arith.constant 1 : index
    %c0_140 = arith.constant 0 : index
    %c0_141 = arith.constant 0 : index
    %211 = vector.load %arg12[%c1_139, %c0_140, %c0_141] : memref<4x32x8xf32, #tpu.memory_space<vmem>>, vector<1x32x8xf32>
    %212 = vector.shape_cast %211 : vector<1x32x8xf32> to vector<32x8xf32>
    %cst_142 = arith.constant dense<0.000000e+00> : vector<8x8xf32>
    %213 = tpu.matmul %177, %212, %cst_142 {dimension_numbers = #tpu.dot_dimension_numbers<[1], [0], [0], [1], [0, 0, 1, 1], [], []>} : vector<8x32xf32>, vector<32x8xf32>, vector<8x8xf32> -> vector<8x8xf32>
    %cst_143 = arith.constant dense<0.000000e+00> : vector<8x8xf32>
    %214 = tpu.matmul %207, %210, %cst_143 {dimension_numbers = #tpu.dot_dimension_numbers<[1], [1], [0], [0], [0, 0, 1, 0], [], []>} : vector<8x8xf32>, vector<8x8xf32>, vector<8x8xf32> -> vector<8x8xf32>
    %cst_144 = arith.constant 0.353553385 : f32
    %215 = vector.broadcast %cst_144 : f32 to vector<8x8xf32>
    %216 = arith.mulf %214, %215 : vector<8x8xf32>
    %cst_145 = arith.constant dense<0xFF800000> : vector<8xf32>
    %217 = vector.multi_reduction <maximumf>, %216, %cst_145 [1] : vector<8x8xf32> to vector<8xf32>
    %218 = vector.shape_cast %217 : vector<8xf32> to vector<8x1xf32>
    %219 = vector.broadcast %218 : vector<8x1xf32> to vector<8x8xf32>
    %220 = arith.subf %216, %219 : vector<8x8xf32>
    %221 = math.exp %220 : vector<8x8xf32>
    %cst_146 = arith.constant dense<0.000000e+00> : vector<8xf32>
    %222 = vector.multi_reduction <add>, %221, %cst_146 [1] : vector<8x8xf32> to vector<8xf32>
    %223 = vector.shape_cast %222 : vector<8xf32> to vector<8x1xf32>
    %224 = vector.broadcast %223 : vector<8x1xf32> to vector<8x8xf32>
    %225 = arith.divf %221, %224 : vector<8x8xf32>
    %cst_147 = arith.constant dense<0.000000e+00> : vector<8x8xf32>
    %226 = tpu.matmul %225, %213, %cst_147 {dimension_numbers = #tpu.dot_dimension_numbers<[1], [0], [0], [1], [0, 0, 1, 1], [], []>} : vector<8x8xf32>, vector<8x8xf32>, vector<8x8xf32> -> vector<8x8xf32>
    %c1_148 = arith.constant 1 : index
    %c0_149 = arith.constant 0 : index
    %c0_150 = arith.constant 0 : index
    %227 = vector.load %arg13[%c1_148, %c0_149, %c0_150] : memref<4x8x32xf32, #tpu.memory_space<vmem>>, vector<1x8x32xf32>
    %228 = vector.shape_cast %227 : vector<1x8x32xf32> to vector<8x32xf32>
    %cst_151 = arith.constant dense<0.000000e+00> : vector<8x32xf32>
    %229 = tpu.matmul %226, %228, %cst_151 {dimension_numbers = #tpu.dot_dimension_numbers<[1], [0], [0], [1], [0, 0, 1, 1], [], []>} : vector<8x8xf32>, vector<8x32xf32>, vector<8x32xf32> -> vector<8x32xf32>
    %230 = arith.addf %204, %229 : vector<8x32xf32>
    %c2_152 = arith.constant 2 : index
    %c0_153 = arith.constant 0 : index
    %c0_154 = arith.constant 0 : index
    %231 = vector.load %arg10[%c2_152, %c0_153, %c0_154] : memref<4x32x8xf32, #tpu.memory_space<vmem>>, vector<1x32x8xf32>
    %232 = vector.shape_cast %231 : vector<1x32x8xf32> to vector<32x8xf32>
    %cst_155 = arith.constant dense<0.000000e+00> : vector<8x8xf32>
    %233 = tpu.matmul %177, %232, %cst_155 {dimension_numbers = #tpu.dot_dimension_numbers<[1], [0], [0], [1], [0, 0, 1, 1], [], []>} : vector<8x32xf32>, vector<32x8xf32>, vector<8x8xf32> -> vector<8x8xf32>
    %c2_156 = arith.constant 2 : index
    %c0_157 = arith.constant 0 : index
    %c0_158 = arith.constant 0 : index
    %234 = vector.load %arg11[%c2_156, %c0_157, %c0_158] : memref<4x32x8xf32, #tpu.memory_space<vmem>>, vector<1x32x8xf32>
    %235 = vector.shape_cast %234 : vector<1x32x8xf32> to vector<32x8xf32>
    %cst_159 = arith.constant dense<0.000000e+00> : vector<8x8xf32>
    %236 = tpu.matmul %177, %235, %cst_159 {dimension_numbers = #tpu.dot_dimension_numbers<[1], [0], [0], [1], [0, 0, 1, 1], [], []>} : vector<8x32xf32>, vector<32x8xf32>, vector<8x8xf32> -> vector<8x8xf32>
    %c2_160 = arith.constant 2 : index
    %c0_161 = arith.constant 0 : index
    %c0_162 = arith.constant 0 : index
    %237 = vector.load %arg12[%c2_160, %c0_161, %c0_162] : memref<4x32x8xf32, #tpu.memory_space<vmem>>, vector<1x32x8xf32>
    %238 = vector.shape_cast %237 : vector<1x32x8xf32> to vector<32x8xf32>
    %cst_163 = arith.constant dense<0.000000e+00> : vector<8x8xf32>
    %239 = tpu.matmul %177, %238, %cst_163 {dimension_numbers = #tpu.dot_dimension_numbers<[1], [0], [0], [1], [0, 0, 1, 1], [], []>} : vector<8x32xf32>, vector<32x8xf32>, vector<8x8xf32> -> vector<8x8xf32>
    %cst_164 = arith.constant dense<0.000000e+00> : vector<8x8xf32>
    %240 = tpu.matmul %233, %236, %cst_164 {dimension_numbers = #tpu.dot_dimension_numbers<[1], [1], [0], [0], [0, 0, 1, 0], [], []>} : vector<8x8xf32>, vector<8x8xf32>, vector<8x8xf32> -> vector<8x8xf32>
    %cst_165 = arith.constant 0.353553385 : f32
    %241 = vector.broadcast %cst_165 : f32 to vector<8x8xf32>
    %242 = arith.mulf %240, %241 : vector<8x8xf32>
    %cst_166 = arith.constant dense<0xFF800000> : vector<8xf32>
    %243 = vector.multi_reduction <maximumf>, %242, %cst_166 [1] : vector<8x8xf32> to vector<8xf32>
    %244 = vector.shape_cast %243 : vector<8xf32> to vector<8x1xf32>
    %245 = vector.broadcast %244 : vector<8x1xf32> to vector<8x8xf32>
    %246 = arith.subf %242, %245 : vector<8x8xf32>
    %247 = math.exp %246 : vector<8x8xf32>
    %cst_167 = arith.constant dense<0.000000e+00> : vector<8xf32>
    %248 = vector.multi_reduction <add>, %247, %cst_167 [1] : vector<8x8xf32> to vector<8xf32>
    %249 = vector.shape_cast %248 : vector<8xf32> to vector<8x1xf32>
    %250 = vector.broadcast %249 : vector<8x1xf32> to vector<8x8xf32>
    %251 = arith.divf %247, %250 : vector<8x8xf32>
    %cst_168 = arith.constant dense<0.000000e+00> : vector<8x8xf32>
    %252 = tpu.matmul %251, %239, %cst_168 {dimension_numbers = #tpu.dot_dimension_numbers<[1], [0], [0], [1], [0, 0, 1, 1], [], []>} : vector<8x8xf32>, vector<8x8xf32>, vector<8x8xf32> -> vector<8x8xf32>
    %c2_169 = arith.constant 2 : index
    %c0_170 = arith.constant 0 : index
    %c0_171 = arith.constant 0 : index
    %253 = vector.load %arg13[%c2_169, %c0_170, %c0_171] : memref<4x8x32xf32, #tpu.memory_space<vmem>>, vector<1x8x32xf32>
    %254 = vector.shape_cast %253 : vector<1x8x32xf32> to vector<8x32xf32>
    %cst_172 = arith.constant dense<0.000000e+00> : vector<8x32xf32>
    %255 = tpu.matmul %252, %254, %cst_172 {dimension_numbers = #tpu.dot_dimension_numbers<[1], [0], [0], [1], [0, 0, 1, 1], [], []>} : vector<8x8xf32>, vector<8x32xf32>, vector<8x32xf32> -> vector<8x32xf32>
    %256 = arith.addf %230, %255 : vector<8x32xf32>
    %c3_173 = arith.constant 3 : index
    %c0_174 = arith.constant 0 : index
    %c0_175 = arith.constant 0 : index
    %257 = vector.load %arg10[%c3_173, %c0_174, %c0_175] : memref<4x32x8xf32, #tpu.memory_space<vmem>>, vector<1x32x8xf32>
    %258 = vector.shape_cast %257 : vector<1x32x8xf32> to vector<32x8xf32>
    %cst_176 = arith.constant dense<0.000000e+00> : vector<8x8xf32>
    %259 = tpu.matmul %177, %258, %cst_176 {dimension_numbers = #tpu.dot_dimension_numbers<[1], [0], [0], [1], [0, 0, 1, 1], [], []>} : vector<8x32xf32>, vector<32x8xf32>, vector<8x8xf32> -> vector<8x8xf32>
    %c3_177 = arith.constant 3 : index
    %c0_178 = arith.constant 0 : index
    %c0_179 = arith.constant 0 : index
    %260 = vector.load %arg11[%c3_177, %c0_178, %c0_179] : memref<4x32x8xf32, #tpu.memory_space<vmem>>, vector<1x32x8xf32>
    %261 = vector.shape_cast %260 : vector<1x32x8xf32> to vector<32x8xf32>
    %cst_180 = arith.constant dense<0.000000e+00> : vector<8x8xf32>
    %262 = tpu.matmul %177, %261, %cst_180 {dimension_numbers = #tpu.dot_dimension_numbers<[1], [0], [0], [1], [0, 0, 1, 1], [], []>} : vector<8x32xf32>, vector<32x8xf32>, vector<8x8xf32> -> vector<8x8xf32>
    %c3_181 = arith.constant 3 : index
    %c0_182 = arith.constant 0 : index
    %c0_183 = arith.constant 0 : index
    %263 = vector.load %arg12[%c3_181, %c0_182, %c0_183] : memref<4x32x8xf32, #tpu.memory_space<vmem>>, vector<1x32x8xf32>
    %264 = vector.shape_cast %263 : vector<1x32x8xf32> to vector<32x8xf32>
    %cst_184 = arith.constant dense<0.000000e+00> : vector<8x8xf32>
    %265 = tpu.matmul %177, %264, %cst_184 {dimension_numbers = #tpu.dot_dimension_numbers<[1], [0], [0], [1], [0, 0, 1, 1], [], []>} : vector<8x32xf32>, vector<32x8xf32>, vector<8x8xf32> -> vector<8x8xf32>
    %cst_185 = arith.constant dense<0.000000e+00> : vector<8x8xf32>
    %266 = tpu.matmul %259, %262, %cst_185 {dimension_numbers = #tpu.dot_dimension_numbers<[1], [1], [0], [0], [0, 0, 1, 0], [], []>} : vector<8x8xf32>, vector<8x8xf32>, vector<8x8xf32> -> vector<8x8xf32>
    %cst_186 = arith.constant 0.353553385 : f32
    %267 = vector.broadcast %cst_186 : f32 to vector<8x8xf32>
    %268 = arith.mulf %266, %267 : vector<8x8xf32>
    %cst_187 = arith.constant dense<0xFF800000> : vector<8xf32>
    %269 = vector.multi_reduction <maximumf>, %268, %cst_187 [1] : vector<8x8xf32> to vector<8xf32>
    %270 = vector.shape_cast %269 : vector<8xf32> to vector<8x1xf32>
    %271 = vector.broadcast %270 : vector<8x1xf32> to vector<8x8xf32>
    %272 = arith.subf %268, %271 : vector<8x8xf32>
    %273 = math.exp %272 : vector<8x8xf32>
    %cst_188 = arith.constant dense<0.000000e+00> : vector<8xf32>
    %274 = vector.multi_reduction <add>, %273, %cst_188 [1] : vector<8x8xf32> to vector<8xf32>
    %275 = vector.shape_cast %274 : vector<8xf32> to vector<8x1xf32>
    %276 = vector.broadcast %275 : vector<8x1xf32> to vector<8x8xf32>
    %277 = arith.divf %273, %276 : vector<8x8xf32>
    %cst_189 = arith.constant dense<0.000000e+00> : vector<8x8xf32>
    %278 = tpu.matmul %277, %265, %cst_189 {dimension_numbers = #tpu.dot_dimension_numbers<[1], [0], [0], [1], [0, 0, 1, 1], [], []>} : vector<8x8xf32>, vector<8x8xf32>, vector<8x8xf32> -> vector<8x8xf32>
    %c3_190 = arith.constant 3 : index
    %c0_191 = arith.constant 0 : index
    %c0_192 = arith.constant 0 : index
    %279 = vector.load %arg13[%c3_190, %c0_191, %c0_192] : memref<4x8x32xf32, #tpu.memory_space<vmem>>, vector<1x8x32xf32>
    %280 = vector.shape_cast %279 : vector<1x8x32xf32> to vector<8x32xf32>
    %cst_193 = arith.constant dense<0.000000e+00> : vector<8x32xf32>
    %281 = tpu.matmul %278, %280, %cst_193 {dimension_numbers = #tpu.dot_dimension_numbers<[1], [0], [0], [1], [0, 0, 1, 1], [], []>} : vector<8x8xf32>, vector<8x32xf32>, vector<8x32xf32> -> vector<8x32xf32>
    %282 = arith.addf %256, %281 : vector<8x32xf32>
    %283 = arith.addf %158, %282 : vector<8x32xf32>
    %284 = vector.shape_cast %283 : vector<8x32xf32> to vector<1x8x32xf32>
    %cst_194 = arith.constant dense<0.000000e+00> : vector<1xf32>
    %285 = vector.multi_reduction <add>, %284, %cst_194 [1, 2] : vector<1x8x32xf32> to vector<1xf32>
    %286 = vector.shape_cast %285 : vector<1xf32> to vector<1x1x1xf32>
    %287 = vector.extract %286[0, 0, 0] : f32 from vector<1x1x1xf32>
    %cst_195 = arith.constant 2.560000e+02 : f32
    %288 = arith.divf %287, %cst_195 : f32
    %289 = arith.mulf %283, %283 : vector<8x32xf32>
    %290 = vector.shape_cast %289 : vector<8x32xf32> to vector<1x8x32xf32>
    %cst_196 = arith.constant dense<0.000000e+00> : vector<1xf32>
    %291 = vector.multi_reduction <add>, %290, %cst_196 [1, 2] : vector<1x8x32xf32> to vector<1xf32>
    %292 = vector.shape_cast %291 : vector<1xf32> to vector<1x1x1xf32>
    %293 = vector.extract %292[0, 0, 0] : f32 from vector<1x1x1xf32>
    %cst_197 = arith.constant 2.560000e+02 : f32
    %294 = arith.divf %293, %cst_197 : f32
    %295 = arith.mulf %288, %288 : f32
    %296 = arith.subf %294, %295 : f32
    %297 = vector.broadcast %288 : f32 to vector<8x32xf32>
    %298 = arith.subf %283, %297 : vector<8x32xf32>
    %cst_198 = arith.constant 9.99999974E-6 : f32
    %299 = arith.addf %296, %cst_198 : f32
    %300 = math.rsqrt %299 : f32
    %301 = vector.broadcast %300 : f32 to vector<8x32xf32>
    %302 = arith.mulf %298, %301 : vector<8x32xf32>
    %c0_199 = arith.constant 0 : index
    %c0_200 = arith.constant 0 : index
    %303 = vector.load %arg14[%c0_199, %c0_200] : memref<32x64xf32, #tpu.memory_space<vmem>>, vector<32x64xf32>
    %cst_201 = arith.constant dense<0.000000e+00> : vector<8x64xf32>
    %304 = tpu.matmul %302, %303, %cst_201 {dimension_numbers = #tpu.dot_dimension_numbers<[1], [0], [0], [1], [0, 0, 1, 1], [], []>} : vector<8x32xf32>, vector<32x64xf32>, vector<8x64xf32> -> vector<8x64xf32>
    %c0_202 = arith.constant 0 : index
    %c0_203 = arith.constant 0 : index
    %305 = vector.load %arg15[%c0_202, %c0_203] : memref<1x64xf32, #tpu.memory_space<vmem>>, vector<1x64xf32>
    %306 = vector.broadcast %305 : vector<1x64xf32> to vector<8x64xf32>
    %307 = arith.addf %304, %306 : vector<8x64xf32>
    %cst_204 = arith.constant 0.000000e+00 : f32
    %308 = vector.broadcast %cst_204 : f32 to vector<8x64xf32>
    %309 = arith.maximumf %307, %308 : vector<8x64xf32>
    %c0_205 = arith.constant 0 : index
    %c0_206 = arith.constant 0 : index
    %310 = vector.load %arg16[%c0_205, %c0_206] : memref<64x32xf32, #tpu.memory_space<vmem>>, vector<64x32xf32>
    %cst_207 = arith.constant dense<0.000000e+00> : vector<8x32xf32>
    %311 = tpu.matmul %309, %310, %cst_207 {dimension_numbers = #tpu.dot_dimension_numbers<[1], [0], [0], [1], [0, 0, 1, 1], [], []>} : vector<8x64xf32>, vector<64x32xf32>, vector<8x32xf32> -> vector<8x32xf32>
    %c0_208 = arith.constant 0 : index
    %c0_209 = arith.constant 0 : index
    %312 = vector.load %arg17[%c0_208, %c0_209] : memref<1x32xf32, #tpu.memory_space<vmem>>, vector<1x32xf32>
    %313 = vector.broadcast %312 : vector<1x32xf32> to vector<8x32xf32>
    %314 = arith.addf %311, %313 : vector<8x32xf32>
    %315 = arith.addf %283, %314 : vector<8x32xf32>
    %316 = vector.shape_cast %315 : vector<8x32xf32> to vector<1x8x32xf32>
    %cst_210 = arith.constant dense<0.000000e+00> : vector<1xf32>
    %317 = vector.multi_reduction <add>, %316, %cst_210 [1, 2] : vector<1x8x32xf32> to vector<1xf32>
    %318 = vector.shape_cast %317 : vector<1xf32> to vector<1x1x1xf32>
    %319 = vector.extract %318[0, 0, 0] : f32 from vector<1x1x1xf32>
    %cst_211 = arith.constant 2.560000e+02 : f32
    %320 = arith.divf %319, %cst_211 : f32
    %321 = arith.mulf %315, %315 : vector<8x32xf32>
    %322 = vector.shape_cast %321 : vector<8x32xf32> to vector<1x8x32xf32>
    %cst_212 = arith.constant dense<0.000000e+00> : vector<1xf32>
    %323 = vector.multi_reduction <add>, %322, %cst_212 [1, 2] : vector<1x8x32xf32> to vector<1xf32>
    %324 = vector.shape_cast %323 : vector<1xf32> to vector<1x1x1xf32>
    %325 = vector.extract %324[0, 0, 0] : f32 from vector<1x1x1xf32>
    %cst_213 = arith.constant 2.560000e+02 : f32
    %326 = arith.divf %325, %cst_213 : f32
    %327 = arith.mulf %320, %320 : f32
    %328 = arith.subf %326, %327 : f32
    %329 = vector.broadcast %320 : f32 to vector<8x32xf32>
    %330 = arith.subf %315, %329 : vector<8x32xf32>
    %cst_214 = arith.constant 9.99999974E-6 : f32
    %331 = arith.addf %328, %cst_214 : f32
    %332 = math.rsqrt %331 : f32
    %333 = vector.broadcast %332 : f32 to vector<8x32xf32>
    %334 = arith.mulf %330, %333 : vector<8x32xf32>
    %cst_215 = arith.constant 0.000000e+00 : f32
    %335 = vector.broadcast %cst_215 : f32 to vector<8x32xf32>
    %c0_216 = arith.constant 0 : index
    %c0_217 = arith.constant 0 : index
    %c0_218 = arith.constant 0 : index
    %336 = vector.load %arg18[%c0_216, %c0_217, %c0_218] : memref<4x32x8xf32, #tpu.memory_space<vmem>>, vector<1x32x8xf32>
    %337 = vector.shape_cast %336 : vector<1x32x8xf32> to vector<32x8xf32>
    %cst_219 = arith.constant dense<0.000000e+00> : vector<8x8xf32>
    %338 = tpu.matmul %334, %337, %cst_219 {dimension_numbers = #tpu.dot_dimension_numbers<[1], [0], [0], [1], [0, 0, 1, 1], [], []>} : vector<8x32xf32>, vector<32x8xf32>, vector<8x8xf32> -> vector<8x8xf32>
    %c0_220 = arith.constant 0 : index
    %c0_221 = arith.constant 0 : index
    %c0_222 = arith.constant 0 : index
    %339 = vector.load %arg19[%c0_220, %c0_221, %c0_222] : memref<4x32x8xf32, #tpu.memory_space<vmem>>, vector<1x32x8xf32>
    %340 = vector.shape_cast %339 : vector<1x32x8xf32> to vector<32x8xf32>
    %cst_223 = arith.constant dense<0.000000e+00> : vector<8x8xf32>
    %341 = tpu.matmul %334, %340, %cst_223 {dimension_numbers = #tpu.dot_dimension_numbers<[1], [0], [0], [1], [0, 0, 1, 1], [], []>} : vector<8x32xf32>, vector<32x8xf32>, vector<8x8xf32> -> vector<8x8xf32>
    %c0_224 = arith.constant 0 : index
    %c0_225 = arith.constant 0 : index
    %c0_226 = arith.constant 0 : index
    %342 = vector.load %arg20[%c0_224, %c0_225, %c0_226] : memref<4x32x8xf32, #tpu.memory_space<vmem>>, vector<1x32x8xf32>
    %343 = vector.shape_cast %342 : vector<1x32x8xf32> to vector<32x8xf32>
    %cst_227 = arith.constant dense<0.000000e+00> : vector<8x8xf32>
    %344 = tpu.matmul %334, %343, %cst_227 {dimension_numbers = #tpu.dot_dimension_numbers<[1], [0], [0], [1], [0, 0, 1, 1], [], []>} : vector<8x32xf32>, vector<32x8xf32>, vector<8x8xf32> -> vector<8x8xf32>
    %cst_228 = arith.constant dense<0.000000e+00> : vector<8x8xf32>
    %345 = tpu.matmul %338, %341, %cst_228 {dimension_numbers = #tpu.dot_dimension_numbers<[1], [1], [0], [0], [0, 0, 1, 0], [], []>} : vector<8x8xf32>, vector<8x8xf32>, vector<8x8xf32> -> vector<8x8xf32>
    %cst_229 = arith.constant 0.353553385 : f32
    %346 = vector.broadcast %cst_229 : f32 to vector<8x8xf32>
    %347 = arith.mulf %345, %346 : vector<8x8xf32>
    %cst_230 = arith.constant dense<0xFF800000> : vector<8xf32>
    %348 = vector.multi_reduction <maximumf>, %347, %cst_230 [1] : vector<8x8xf32> to vector<8xf32>
    %349 = vector.shape_cast %348 : vector<8xf32> to vector<8x1xf32>
    %350 = vector.broadcast %349 : vector<8x1xf32> to vector<8x8xf32>
    %351 = arith.subf %347, %350 : vector<8x8xf32>
    %352 = math.exp %351 : vector<8x8xf32>
    %cst_231 = arith.constant dense<0.000000e+00> : vector<8xf32>
    %353 = vector.multi_reduction <add>, %352, %cst_231 [1] : vector<8x8xf32> to vector<8xf32>
    %354 = vector.shape_cast %353 : vector<8xf32> to vector<8x1xf32>
    %355 = vector.broadcast %354 : vector<8x1xf32> to vector<8x8xf32>
    %356 = arith.divf %352, %355 : vector<8x8xf32>
    %cst_232 = arith.constant dense<0.000000e+00> : vector<8x8xf32>
    %357 = tpu.matmul %356, %344, %cst_232 {dimension_numbers = #tpu.dot_dimension_numbers<[1], [0], [0], [1], [0, 0, 1, 1], [], []>} : vector<8x8xf32>, vector<8x8xf32>, vector<8x8xf32> -> vector<8x8xf32>
    %c0_233 = arith.constant 0 : index
    %c0_234 = arith.constant 0 : index
    %c0_235 = arith.constant 0 : index
    %358 = vector.load %arg21[%c0_233, %c0_234, %c0_235] : memref<4x8x32xf32, #tpu.memory_space<vmem>>, vector<1x8x32xf32>
    %359 = vector.shape_cast %358 : vector<1x8x32xf32> to vector<8x32xf32>
    %cst_236 = arith.constant dense<0.000000e+00> : vector<8x32xf32>
    %360 = tpu.matmul %357, %359, %cst_236 {dimension_numbers = #tpu.dot_dimension_numbers<[1], [0], [0], [1], [0, 0, 1, 1], [], []>} : vector<8x8xf32>, vector<8x32xf32>, vector<8x32xf32> -> vector<8x32xf32>
    %361 = arith.addf %335, %360 : vector<8x32xf32>
    %c1_237 = arith.constant 1 : index
    %c0_238 = arith.constant 0 : index
    %c0_239 = arith.constant 0 : index
    %362 = vector.load %arg18[%c1_237, %c0_238, %c0_239] : memref<4x32x8xf32, #tpu.memory_space<vmem>>, vector<1x32x8xf32>
    %363 = vector.shape_cast %362 : vector<1x32x8xf32> to vector<32x8xf32>
    %cst_240 = arith.constant dense<0.000000e+00> : vector<8x8xf32>
    %364 = tpu.matmul %334, %363, %cst_240 {dimension_numbers = #tpu.dot_dimension_numbers<[1], [0], [0], [1], [0, 0, 1, 1], [], []>} : vector<8x32xf32>, vector<32x8xf32>, vector<8x8xf32> -> vector<8x8xf32>
    %c1_241 = arith.constant 1 : index
    %c0_242 = arith.constant 0 : index
    %c0_243 = arith.constant 0 : index
    %365 = vector.load %arg19[%c1_241, %c0_242, %c0_243] : memref<4x32x8xf32, #tpu.memory_space<vmem>>, vector<1x32x8xf32>
    %366 = vector.shape_cast %365 : vector<1x32x8xf32> to vector<32x8xf32>
    %cst_244 = arith.constant dense<0.000000e+00> : vector<8x8xf32>
    %367 = tpu.matmul %334, %366, %cst_244 {dimension_numbers = #tpu.dot_dimension_numbers<[1], [0], [0], [1], [0, 0, 1, 1], [], []>} : vector<8x32xf32>, vector<32x8xf32>, vector<8x8xf32> -> vector<8x8xf32>
    %c1_245 = arith.constant 1 : index
    %c0_246 = arith.constant 0 : index
    %c0_247 = arith.constant 0 : index
    %368 = vector.load %arg20[%c1_245, %c0_246, %c0_247] : memref<4x32x8xf32, #tpu.memory_space<vmem>>, vector<1x32x8xf32>
    %369 = vector.shape_cast %368 : vector<1x32x8xf32> to vector<32x8xf32>
    %cst_248 = arith.constant dense<0.000000e+00> : vector<8x8xf32>
    %370 = tpu.matmul %334, %369, %cst_248 {dimension_numbers = #tpu.dot_dimension_numbers<[1], [0], [0], [1], [0, 0, 1, 1], [], []>} : vector<8x32xf32>, vector<32x8xf32>, vector<8x8xf32> -> vector<8x8xf32>
    %cst_249 = arith.constant dense<0.000000e+00> : vector<8x8xf32>
    %371 = tpu.matmul %364, %367, %cst_249 {dimension_numbers = #tpu.dot_dimension_numbers<[1], [1], [0], [0], [0, 0, 1, 0], [], []>} : vector<8x8xf32>, vector<8x8xf32>, vector<8x8xf32> -> vector<8x8xf32>
    %cst_250 = arith.constant 0.353553385 : f32
    %372 = vector.broadcast %cst_250 : f32 to vector<8x8xf32>
    %373 = arith.mulf %371, %372 : vector<8x8xf32>
    %cst_251 = arith.constant dense<0xFF800000> : vector<8xf32>
    %374 = vector.multi_reduction <maximumf>, %373, %cst_251 [1] : vector<8x8xf32> to vector<8xf32>
    %375 = vector.shape_cast %374 : vector<8xf32> to vector<8x1xf32>
    %376 = vector.broadcast %375 : vector<8x1xf32> to vector<8x8xf32>
    %377 = arith.subf %373, %376 : vector<8x8xf32>
    %378 = math.exp %377 : vector<8x8xf32>
    %cst_252 = arith.constant dense<0.000000e+00> : vector<8xf32>
    %379 = vector.multi_reduction <add>, %378, %cst_252 [1] : vector<8x8xf32> to vector<8xf32>
    %380 = vector.shape_cast %379 : vector<8xf32> to vector<8x1xf32>
    %381 = vector.broadcast %380 : vector<8x1xf32> to vector<8x8xf32>
    %382 = arith.divf %378, %381 : vector<8x8xf32>
    %cst_253 = arith.constant dense<0.000000e+00> : vector<8x8xf32>
    %383 = tpu.matmul %382, %370, %cst_253 {dimension_numbers = #tpu.dot_dimension_numbers<[1], [0], [0], [1], [0, 0, 1, 1], [], []>} : vector<8x8xf32>, vector<8x8xf32>, vector<8x8xf32> -> vector<8x8xf32>
    %c1_254 = arith.constant 1 : index
    %c0_255 = arith.constant 0 : index
    %c0_256 = arith.constant 0 : index
    %384 = vector.load %arg21[%c1_254, %c0_255, %c0_256] : memref<4x8x32xf32, #tpu.memory_space<vmem>>, vector<1x8x32xf32>
    %385 = vector.shape_cast %384 : vector<1x8x32xf32> to vector<8x32xf32>
    %cst_257 = arith.constant dense<0.000000e+00> : vector<8x32xf32>
    %386 = tpu.matmul %383, %385, %cst_257 {dimension_numbers = #tpu.dot_dimension_numbers<[1], [0], [0], [1], [0, 0, 1, 1], [], []>} : vector<8x8xf32>, vector<8x32xf32>, vector<8x32xf32> -> vector<8x32xf32>
    %387 = arith.addf %361, %386 : vector<8x32xf32>
    %c2_258 = arith.constant 2 : index
    %c0_259 = arith.constant 0 : index
    %c0_260 = arith.constant 0 : index
    %388 = vector.load %arg18[%c2_258, %c0_259, %c0_260] : memref<4x32x8xf32, #tpu.memory_space<vmem>>, vector<1x32x8xf32>
    %389 = vector.shape_cast %388 : vector<1x32x8xf32> to vector<32x8xf32>
    %cst_261 = arith.constant dense<0.000000e+00> : vector<8x8xf32>
    %390 = tpu.matmul %334, %389, %cst_261 {dimension_numbers = #tpu.dot_dimension_numbers<[1], [0], [0], [1], [0, 0, 1, 1], [], []>} : vector<8x32xf32>, vector<32x8xf32>, vector<8x8xf32> -> vector<8x8xf32>
    %c2_262 = arith.constant 2 : index
    %c0_263 = arith.constant 0 : index
    %c0_264 = arith.constant 0 : index
    %391 = vector.load %arg19[%c2_262, %c0_263, %c0_264] : memref<4x32x8xf32, #tpu.memory_space<vmem>>, vector<1x32x8xf32>
    %392 = vector.shape_cast %391 : vector<1x32x8xf32> to vector<32x8xf32>
    %cst_265 = arith.constant dense<0.000000e+00> : vector<8x8xf32>
    %393 = tpu.matmul %334, %392, %cst_265 {dimension_numbers = #tpu.dot_dimension_numbers<[1], [0], [0], [1], [0, 0, 1, 1], [], []>} : vector<8x32xf32>, vector<32x8xf32>, vector<8x8xf32> -> vector<8x8xf32>
    %c2_266 = arith.constant 2 : index
    %c0_267 = arith.constant 0 : index
    %c0_268 = arith.constant 0 : index
    %394 = vector.load %arg20[%c2_266, %c0_267, %c0_268] : memref<4x32x8xf32, #tpu.memory_space<vmem>>, vector<1x32x8xf32>
    %395 = vector.shape_cast %394 : vector<1x32x8xf32> to vector<32x8xf32>
    %cst_269 = arith.constant dense<0.000000e+00> : vector<8x8xf32>
    %396 = tpu.matmul %334, %395, %cst_269 {dimension_numbers = #tpu.dot_dimension_numbers<[1], [0], [0], [1], [0, 0, 1, 1], [], []>} : vector<8x32xf32>, vector<32x8xf32>, vector<8x8xf32> -> vector<8x8xf32>
    %cst_270 = arith.constant dense<0.000000e+00> : vector<8x8xf32>
    %397 = tpu.matmul %390, %393, %cst_270 {dimension_numbers = #tpu.dot_dimension_numbers<[1], [1], [0], [0], [0, 0, 1, 0], [], []>} : vector<8x8xf32>, vector<8x8xf32>, vector<8x8xf32> -> vector<8x8xf32>
    %cst_271 = arith.constant 0.353553385 : f32
    %398 = vector.broadcast %cst_271 : f32 to vector<8x8xf32>
    %399 = arith.mulf %397, %398 : vector<8x8xf32>
    %cst_272 = arith.constant dense<0xFF800000> : vector<8xf32>
    %400 = vector.multi_reduction <maximumf>, %399, %cst_272 [1] : vector<8x8xf32> to vector<8xf32>
    %401 = vector.shape_cast %400 : vector<8xf32> to vector<8x1xf32>
    %402 = vector.broadcast %401 : vector<8x1xf32> to vector<8x8xf32>
    %403 = arith.subf %399, %402 : vector<8x8xf32>
    %404 = math.exp %403 : vector<8x8xf32>
    %cst_273 = arith.constant dense<0.000000e+00> : vector<8xf32>
    %405 = vector.multi_reduction <add>, %404, %cst_273 [1] : vector<8x8xf32> to vector<8xf32>
    %406 = vector.shape_cast %405 : vector<8xf32> to vector<8x1xf32>
    %407 = vector.broadcast %406 : vector<8x1xf32> to vector<8x8xf32>
    %408 = arith.divf %404, %407 : vector<8x8xf32>
    %cst_274 = arith.constant dense<0.000000e+00> : vector<8x8xf32>
    %409 = tpu.matmul %408, %396, %cst_274 {dimension_numbers = #tpu.dot_dimension_numbers<[1], [0], [0], [1], [0, 0, 1, 1], [], []>} : vector<8x8xf32>, vector<8x8xf32>, vector<8x8xf32> -> vector<8x8xf32>
    %c2_275 = arith.constant 2 : index
    %c0_276 = arith.constant 0 : index
    %c0_277 = arith.constant 0 : index
    %410 = vector.load %arg21[%c2_275, %c0_276, %c0_277] : memref<4x8x32xf32, #tpu.memory_space<vmem>>, vector<1x8x32xf32>
    %411 = vector.shape_cast %410 : vector<1x8x32xf32> to vector<8x32xf32>
    %cst_278 = arith.constant dense<0.000000e+00> : vector<8x32xf32>
    %412 = tpu.matmul %409, %411, %cst_278 {dimension_numbers = #tpu.dot_dimension_numbers<[1], [0], [0], [1], [0, 0, 1, 1], [], []>} : vector<8x8xf32>, vector<8x32xf32>, vector<8x32xf32> -> vector<8x32xf32>
    %413 = arith.addf %387, %412 : vector<8x32xf32>
    %c3_279 = arith.constant 3 : index
    %c0_280 = arith.constant 0 : index
    %c0_281 = arith.constant 0 : index
    %414 = vector.load %arg18[%c3_279, %c0_280, %c0_281] : memref<4x32x8xf32, #tpu.memory_space<vmem>>, vector<1x32x8xf32>
    %415 = vector.shape_cast %414 : vector<1x32x8xf32> to vector<32x8xf32>
    %cst_282 = arith.constant dense<0.000000e+00> : vector<8x8xf32>
    %416 = tpu.matmul %334, %415, %cst_282 {dimension_numbers = #tpu.dot_dimension_numbers<[1], [0], [0], [1], [0, 0, 1, 1], [], []>} : vector<8x32xf32>, vector<32x8xf32>, vector<8x8xf32> -> vector<8x8xf32>
    %c3_283 = arith.constant 3 : index
    %c0_284 = arith.constant 0 : index
    %c0_285 = arith.constant 0 : index
    %417 = vector.load %arg19[%c3_283, %c0_284, %c0_285] : memref<4x32x8xf32, #tpu.memory_space<vmem>>, vector<1x32x8xf32>
    %418 = vector.shape_cast %417 : vector<1x32x8xf32> to vector<32x8xf32>
    %cst_286 = arith.constant dense<0.000000e+00> : vector<8x8xf32>
    %419 = tpu.matmul %334, %418, %cst_286 {dimension_numbers = #tpu.dot_dimension_numbers<[1], [0], [0], [1], [0, 0, 1, 1], [], []>} : vector<8x32xf32>, vector<32x8xf32>, vector<8x8xf32> -> vector<8x8xf32>
    %c3_287 = arith.constant 3 : index
    %c0_288 = arith.constant 0 : index
    %c0_289 = arith.constant 0 : index
    %420 = vector.load %arg20[%c3_287, %c0_288, %c0_289] : memref<4x32x8xf32, #tpu.memory_space<vmem>>, vector<1x32x8xf32>
    %421 = vector.shape_cast %420 : vector<1x32x8xf32> to vector<32x8xf32>
    %cst_290 = arith.constant dense<0.000000e+00> : vector<8x8xf32>
    %422 = tpu.matmul %334, %421, %cst_290 {dimension_numbers = #tpu.dot_dimension_numbers<[1], [0], [0], [1], [0, 0, 1, 1], [], []>} : vector<8x32xf32>, vector<32x8xf32>, vector<8x8xf32> -> vector<8x8xf32>
    %cst_291 = arith.constant dense<0.000000e+00> : vector<8x8xf32>
    %423 = tpu.matmul %416, %419, %cst_291 {dimension_numbers = #tpu.dot_dimension_numbers<[1], [1], [0], [0], [0, 0, 1, 0], [], []>} : vector<8x8xf32>, vector<8x8xf32>, vector<8x8xf32> -> vector<8x8xf32>
    %cst_292 = arith.constant 0.353553385 : f32
    %424 = vector.broadcast %cst_292 : f32 to vector<8x8xf32>
    %425 = arith.mulf %423, %424 : vector<8x8xf32>
    %cst_293 = arith.constant dense<0xFF800000> : vector<8xf32>
    %426 = vector.multi_reduction <maximumf>, %425, %cst_293 [1] : vector<8x8xf32> to vector<8xf32>
    %427 = vector.shape_cast %426 : vector<8xf32> to vector<8x1xf32>
    %428 = vector.broadcast %427 : vector<8x1xf32> to vector<8x8xf32>
    %429 = arith.subf %425, %428 : vector<8x8xf32>
    %430 = math.exp %429 : vector<8x8xf32>
    %cst_294 = arith.constant dense<0.000000e+00> : vector<8xf32>
    %431 = vector.multi_reduction <add>, %430, %cst_294 [1] : vector<8x8xf32> to vector<8xf32>
    %432 = vector.shape_cast %431 : vector<8xf32> to vector<8x1xf32>
    %433 = vector.broadcast %432 : vector<8x1xf32> to vector<8x8xf32>
    %434 = arith.divf %430, %433 : vector<8x8xf32>
    %cst_295 = arith.constant dense<0.000000e+00> : vector<8x8xf32>
    %435 = tpu.matmul %434, %422, %cst_295 {dimension_numbers = #tpu.dot_dimension_numbers<[1], [0], [0], [1], [0, 0, 1, 1], [], []>} : vector<8x8xf32>, vector<8x8xf32>, vector<8x8xf32> -> vector<8x8xf32>
    %c3_296 = arith.constant 3 : index
    %c0_297 = arith.constant 0 : index
    %c0_298 = arith.constant 0 : index
    %436 = vector.load %arg21[%c3_296, %c0_297, %c0_298] : memref<4x8x32xf32, #tpu.memory_space<vmem>>, vector<1x8x32xf32>
    %437 = vector.shape_cast %436 : vector<1x8x32xf32> to vector<8x32xf32>
    %cst_299 = arith.constant dense<0.000000e+00> : vector<8x32xf32>
    %438 = tpu.matmul %435, %437, %cst_299 {dimension_numbers = #tpu.dot_dimension_numbers<[1], [0], [0], [1], [0, 0, 1, 1], [], []>} : vector<8x8xf32>, vector<8x32xf32>, vector<8x32xf32> -> vector<8x32xf32>
    %439 = arith.addf %413, %438 : vector<8x32xf32>
    %440 = arith.addf %315, %439 : vector<8x32xf32>
    %441 = vector.shape_cast %440 : vector<8x32xf32> to vector<1x8x32xf32>
    %cst_300 = arith.constant dense<0.000000e+00> : vector<1xf32>
    %442 = vector.multi_reduction <add>, %441, %cst_300 [1, 2] : vector<1x8x32xf32> to vector<1xf32>
    %443 = vector.shape_cast %442 : vector<1xf32> to vector<1x1x1xf32>
    %444 = vector.extract %443[0, 0, 0] : f32 from vector<1x1x1xf32>
    %cst_301 = arith.constant 2.560000e+02 : f32
    %445 = arith.divf %444, %cst_301 : f32
    %446 = arith.mulf %440, %440 : vector<8x32xf32>
    %447 = vector.shape_cast %446 : vector<8x32xf32> to vector<1x8x32xf32>
    %cst_302 = arith.constant dense<0.000000e+00> : vector<1xf32>
    %448 = vector.multi_reduction <add>, %447, %cst_302 [1, 2] : vector<1x8x32xf32> to vector<1xf32>
    %449 = vector.shape_cast %448 : vector<1xf32> to vector<1x1x1xf32>
    %450 = vector.extract %449[0, 0, 0] : f32 from vector<1x1x1xf32>
    %cst_303 = arith.constant 2.560000e+02 : f32
    %451 = arith.divf %450, %cst_303 : f32
    %452 = arith.mulf %445, %445 : f32
    %453 = arith.subf %451, %452 : f32
    %454 = vector.broadcast %445 : f32 to vector<8x32xf32>
    %455 = arith.subf %440, %454 : vector<8x32xf32>
    %cst_304 = arith.constant 9.99999974E-6 : f32
    %456 = arith.addf %453, %cst_304 : f32
    %457 = math.rsqrt %456 : f32
    %458 = vector.broadcast %457 : f32 to vector<8x32xf32>
    %459 = arith.mulf %455, %458 : vector<8x32xf32>
    %c0_305 = arith.constant 0 : index
    %c0_306 = arith.constant 0 : index
    %460 = vector.load %arg22[%c0_305, %c0_306] : memref<32x64xf32, #tpu.memory_space<vmem>>, vector<32x64xf32>
    %cst_307 = arith.constant dense<0.000000e+00> : vector<8x64xf32>
    %461 = tpu.matmul %459, %460, %cst_307 {dimension_numbers = #tpu.dot_dimension_numbers<[1], [0], [0], [1], [0, 0, 1, 1], [], []>} : vector<8x32xf32>, vector<32x64xf32>, vector<8x64xf32> -> vector<8x64xf32>
    %c0_308 = arith.constant 0 : index
    %c0_309 = arith.constant 0 : index
    %462 = vector.load %arg23[%c0_308, %c0_309] : memref<1x64xf32, #tpu.memory_space<vmem>>, vector<1x64xf32>
    %463 = vector.broadcast %462 : vector<1x64xf32> to vector<8x64xf32>
    %464 = arith.addf %461, %463 : vector<8x64xf32>
    %cst_310 = arith.constant 0.000000e+00 : f32
    %465 = vector.broadcast %cst_310 : f32 to vector<8x64xf32>
    %466 = arith.maximumf %464, %465 : vector<8x64xf32>
    %c0_311 = arith.constant 0 : index
    %c0_312 = arith.constant 0 : index
    %467 = vector.load %arg24[%c0_311, %c0_312] : memref<64x32xf32, #tpu.memory_space<vmem>>, vector<64x32xf32>
    %cst_313 = arith.constant dense<0.000000e+00> : vector<8x32xf32>
    %468 = tpu.matmul %466, %467, %cst_313 {dimension_numbers = #tpu.dot_dimension_numbers<[1], [0], [0], [1], [0, 0, 1, 1], [], []>} : vector<8x64xf32>, vector<64x32xf32>, vector<8x32xf32> -> vector<8x32xf32>
    %c0_314 = arith.constant 0 : index
    %c0_315 = arith.constant 0 : index
    %469 = vector.load %arg25[%c0_314, %c0_315] : memref<1x32xf32, #tpu.memory_space<vmem>>, vector<1x32xf32>
    %470 = vector.broadcast %469 : vector<1x32xf32> to vector<8x32xf32>
    %471 = arith.addf %468, %470 : vector<8x32xf32>
    %472 = arith.addf %440, %471 : vector<8x32xf32>
    %c0_316 = arith.constant 0 : index
    %c0_317 = arith.constant 0 : index
    %c0_318 = arith.constant 0 : index
    %473 = vector.load %arg26[%c0_316, %c0_317, %c0_318] : memref<2x8x32xf32, #tpu.memory_space<vmem>>, vector<1x8x32xf32>
    %474 = vector.shape_cast %473 : vector<1x8x32xf32> to vector<8x32xf32>
    %475 = vector.shape_cast %472 : vector<8x32xf32> to vector<1x8x32xf32>
    tpu.vector_store %arg26[%c0_316, %c0_317, %c0_318], %475 {strides = array<i32>} : memref<2x8x32xf32, #tpu.memory_space<vmem>>, vector<1x8x32xf32>,
    %c1_319 = arith.constant 1 : index
    %c0_320 = arith.constant 0 : index
    %c0_321 = arith.constant 0 : index
    %476 = vector.load %arg1[%c1_319, %c0_320, %c0_321] : memref<2x8x32xf32, #tpu.memory_space<vmem>>, vector<1x8x32xf32>
    %477 = vector.shape_cast %476 : vector<1x8x32xf32> to vector<8x32xf32>
    %478 = vector.shape_cast %477 : vector<8x32xf32> to vector<1x8x32xf32>
    %cst_322 = arith.constant dense<0.000000e+00> : vector<1xf32>
    %479 = vector.multi_reduction <add>, %478, %cst_322 [1, 2] : vector<1x8x32xf32> to vector<1xf32>
    %480 = vector.shape_cast %479 : vector<1xf32> to vector<1x1x1xf32>
    %481 = vector.extract %480[0, 0, 0] : f32 from vector<1x1x1xf32>
    %cst_323 = arith.constant 2.560000e+02 : f32
    %482 = arith.divf %481, %cst_323 : f32
    %483 = arith.mulf %477, %477 : vector<8x32xf32>
    %484 = vector.shape_cast %483 : vector<8x32xf32> to vector<1x8x32xf32>
    %cst_324 = arith.constant dense<0.000000e+00> : vector<1xf32>
    %485 = vector.multi_reduction <add>, %484, %cst_324 [1, 2] : vector<1x8x32xf32> to vector<1xf32>
    %486 = vector.shape_cast %485 : vector<1xf32> to vector<1x1x1xf32>
    %487 = vector.extract %486[0, 0, 0] : f32 from vector<1x1x1xf32>
    %cst_325 = arith.constant 2.560000e+02 : f32
    %488 = arith.divf %487, %cst_325 : f32
    %489 = arith.mulf %482, %482 : f32
    %490 = arith.subf %488, %489 : f32
    %491 = vector.broadcast %482 : f32 to vector<8x32xf32>
    %492 = arith.subf %477, %491 : vector<8x32xf32>
    %cst_326 = arith.constant 9.99999974E-6 : f32
    %493 = arith.addf %490, %cst_326 : f32
    %494 = math.rsqrt %493 : f32
    %495 = vector.broadcast %494 : f32 to vector<8x32xf32>
    %496 = arith.mulf %492, %495 : vector<8x32xf32>
    %cst_327 = arith.constant 0.000000e+00 : f32
    %497 = vector.broadcast %cst_327 : f32 to vector<8x32xf32>
    %c0_328 = arith.constant 0 : index
    %c0_329 = arith.constant 0 : index
    %c0_330 = arith.constant 0 : index
    %498 = vector.load %arg2[%c0_328, %c0_329, %c0_330] : memref<4x32x8xf32, #tpu.memory_space<vmem>>, vector<1x32x8xf32>
    %499 = vector.shape_cast %498 : vector<1x32x8xf32> to vector<32x8xf32>
    %cst_331 = arith.constant dense<0.000000e+00> : vector<8x8xf32>
    %500 = tpu.matmul %496, %499, %cst_331 {dimension_numbers = #tpu.dot_dimension_numbers<[1], [0], [0], [1], [0, 0, 1, 1], [], []>} : vector<8x32xf32>, vector<32x8xf32>, vector<8x8xf32> -> vector<8x8xf32>
    %c0_332 = arith.constant 0 : index
    %c0_333 = arith.constant 0 : index
    %c0_334 = arith.constant 0 : index
    %501 = vector.load %arg3[%c0_332, %c0_333, %c0_334] : memref<4x32x8xf32, #tpu.memory_space<vmem>>, vector<1x32x8xf32>
    %502 = vector.shape_cast %501 : vector<1x32x8xf32> to vector<32x8xf32>
    %cst_335 = arith.constant dense<0.000000e+00> : vector<8x8xf32>
    %503 = tpu.matmul %496, %502, %cst_335 {dimension_numbers = #tpu.dot_dimension_numbers<[1], [0], [0], [1], [0, 0, 1, 1], [], []>} : vector<8x32xf32>, vector<32x8xf32>, vector<8x8xf32> -> vector<8x8xf32>
    %c0_336 = arith.constant 0 : index
    %c0_337 = arith.constant 0 : index
    %c0_338 = arith.constant 0 : index
    %504 = vector.load %arg4[%c0_336, %c0_337, %c0_338] : memref<4x32x8xf32, #tpu.memory_space<vmem>>, vector<1x32x8xf32>
    %505 = vector.shape_cast %504 : vector<1x32x8xf32> to vector<32x8xf32>
    %cst_339 = arith.constant dense<0.000000e+00> : vector<8x8xf32>
    %506 = tpu.matmul %496, %505, %cst_339 {dimension_numbers = #tpu.dot_dimension_numbers<[1], [0], [0], [1], [0, 0, 1, 1], [], []>} : vector<8x32xf32>, vector<32x8xf32>, vector<8x8xf32> -> vector<8x8xf32>
    %cst_340 = arith.constant dense<0.000000e+00> : vector<8x8xf32>
    %507 = tpu.matmul %500, %503, %cst_340 {dimension_numbers = #tpu.dot_dimension_numbers<[1], [1], [0], [0], [0, 0, 1, 0], [], []>} : vector<8x8xf32>, vector<8x8xf32>, vector<8x8xf32> -> vector<8x8xf32>
    %cst_341 = arith.constant 0.353553385 : f32
    %508 = vector.broadcast %cst_341 : f32 to vector<8x8xf32>
    %509 = arith.mulf %507, %508 : vector<8x8xf32>
    %cst_342 = arith.constant dense<0xFF800000> : vector<8xf32>
    %510 = vector.multi_reduction <maximumf>, %509, %cst_342 [1] : vector<8x8xf32> to vector<8xf32>
    %511 = vector.shape_cast %510 : vector<8xf32> to vector<8x1xf32>
    %512 = vector.broadcast %511 : vector<8x1xf32> to vector<8x8xf32>
    %513 = arith.subf %509, %512 : vector<8x8xf32>
    %514 = math.exp %513 : vector<8x8xf32>
    %cst_343 = arith.constant dense<0.000000e+00> : vector<8xf32>
    %515 = vector.multi_reduction <add>, %514, %cst_343 [1] : vector<8x8xf32> to vector<8xf32>
    %516 = vector.shape_cast %515 : vector<8xf32> to vector<8x1xf32>
    %517 = vector.broadcast %516 : vector<8x1xf32> to vector<8x8xf32>
    %518 = arith.divf %514, %517 : vector<8x8xf32>
    %cst_344 = arith.constant dense<0.000000e+00> : vector<8x8xf32>
    %519 = tpu.matmul %518, %506, %cst_344 {dimension_numbers = #tpu.dot_dimension_numbers<[1], [0], [0], [1], [0, 0, 1, 1], [], []>} : vector<8x8xf32>, vector<8x8xf32>, vector<8x8xf32> -> vector<8x8xf32>
    %c0_345 = arith.constant 0 : index
    %c0_346 = arith.constant 0 : index
    %c0_347 = arith.constant 0 : index
    %520 = vector.load %arg5[%c0_345, %c0_346, %c0_347] : memref<4x8x32xf32, #tpu.memory_space<vmem>>, vector<1x8x32xf32>
    %521 = vector.shape_cast %520 : vector<1x8x32xf32> to vector<8x32xf32>
    %cst_348 = arith.constant dense<0.000000e+00> : vector<8x32xf32>
    %522 = tpu.matmul %519, %521, %cst_348 {dimension_numbers = #tpu.dot_dimension_numbers<[1], [0], [0], [1], [0, 0, 1, 1], [], []>} : vector<8x8xf32>, vector<8x32xf32>, vector<8x32xf32> -> vector<8x32xf32>
    %523 = arith.addf %497, %522 : vector<8x32xf32>
    %c1_349 = arith.constant 1 : index
    %c0_350 = arith.constant 0 : index
    %c0_351 = arith.constant 0 : index
    %524 = vector.load %arg2[%c1_349, %c0_350, %c0_351] : memref<4x32x8xf32, #tpu.memory_space<vmem>>, vector<1x32x8xf32>
    %525 = vector.shape_cast %524 : vector<1x32x8xf32> to vector<32x8xf32>
    %cst_352 = arith.constant dense<0.000000e+00> : vector<8x8xf32>
    %526 = tpu.matmul %496, %525, %cst_352 {dimension_numbers = #tpu.dot_dimension_numbers<[1], [0], [0], [1], [0, 0, 1, 1], [], []>} : vector<8x32xf32>, vector<32x8xf32>, vector<8x8xf32> -> vector<8x8xf32>
    %c1_353 = arith.constant 1 : index
    %c0_354 = arith.constant 0 : index
    %c0_355 = arith.constant 0 : index
    %527 = vector.load %arg3[%c1_353, %c0_354, %c0_355] : memref<4x32x8xf32, #tpu.memory_space<vmem>>, vector<1x32x8xf32>
    %528 = vector.shape_cast %527 : vector<1x32x8xf32> to vector<32x8xf32>
    %cst_356 = arith.constant dense<0.000000e+00> : vector<8x8xf32>
    %529 = tpu.matmul %496, %528, %cst_356 {dimension_numbers = #tpu.dot_dimension_numbers<[1], [0], [0], [1], [0, 0, 1, 1], [], []>} : vector<8x32xf32>, vector<32x8xf32>, vector<8x8xf32> -> vector<8x8xf32>
    %c1_357 = arith.constant 1 : index
    %c0_358 = arith.constant 0 : index
    %c0_359 = arith.constant 0 : index
    %530 = vector.load %arg4[%c1_357, %c0_358, %c0_359] : memref<4x32x8xf32, #tpu.memory_space<vmem>>, vector<1x32x8xf32>
    %531 = vector.shape_cast %530 : vector<1x32x8xf32> to vector<32x8xf32>
    %cst_360 = arith.constant dense<0.000000e+00> : vector<8x8xf32>
    %532 = tpu.matmul %496, %531, %cst_360 {dimension_numbers = #tpu.dot_dimension_numbers<[1], [0], [0], [1], [0, 0, 1, 1], [], []>} : vector<8x32xf32>, vector<32x8xf32>, vector<8x8xf32> -> vector<8x8xf32>
    %cst_361 = arith.constant dense<0.000000e+00> : vector<8x8xf32>
    %533 = tpu.matmul %526, %529, %cst_361 {dimension_numbers = #tpu.dot_dimension_numbers<[1], [1], [0], [0], [0, 0, 1, 0], [], []>} : vector<8x8xf32>, vector<8x8xf32>, vector<8x8xf32> -> vector<8x8xf32>
    %cst_362 = arith.constant 0.353553385 : f32
    %534 = vector.broadcast %cst_362 : f32 to vector<8x8xf32>
    %535 = arith.mulf %533, %534 : vector<8x8xf32>
    %cst_363 = arith.constant dense<0xFF800000> : vector<8xf32>
    %536 = vector.multi_reduction <maximumf>, %535, %cst_363 [1] : vector<8x8xf32> to vector<8xf32>
    %537 = vector.shape_cast %536 : vector<8xf32> to vector<8x1xf32>
    %538 = vector.broadcast %537 : vector<8x1xf32> to vector<8x8xf32>
    %539 = arith.subf %535, %538 : vector<8x8xf32>
    %540 = math.exp %539 : vector<8x8xf32>
    %cst_364 = arith.constant dense<0.000000e+00> : vector<8xf32>
    %541 = vector.multi_reduction <add>, %540, %cst_364 [1] : vector<8x8xf32> to vector<8xf32>
    %542 = vector.shape_cast %541 : vector<8xf32> to vector<8x1xf32>
    %543 = vector.broadcast %542 : vector<8x1xf32> to vector<8x8xf32>
    %544 = arith.divf %540, %543 : vector<8x8xf32>
    %cst_365 = arith.constant dense<0.000000e+00> : vector<8x8xf32>
    %545 = tpu.matmul %544, %532, %cst_365 {dimension_numbers = #tpu.dot_dimension_numbers<[1], [0], [0], [1], [0, 0, 1, 1], [], []>} : vector<8x8xf32>, vector<8x8xf32>, vector<8x8xf32> -> vector<8x8xf32>
    %c1_366 = arith.constant 1 : index
    %c0_367 = arith.constant 0 : index
    %c0_368 = arith.constant 0 : index
    %546 = vector.load %arg5[%c1_366, %c0_367, %c0_368] : memref<4x8x32xf32, #tpu.memory_space<vmem>>, vector<1x8x32xf32>
    %547 = vector.shape_cast %546 : vector<1x8x32xf32> to vector<8x32xf32>
    %cst_369 = arith.constant dense<0.000000e+00> : vector<8x32xf32>
    %548 = tpu.matmul %545, %547, %cst_369 {dimension_numbers = #tpu.dot_dimension_numbers<[1], [0], [0], [1], [0, 0, 1, 1], [], []>} : vector<8x8xf32>, vector<8x32xf32>, vector<8x32xf32> -> vector<8x32xf32>
    %549 = arith.addf %523, %548 : vector<8x32xf32>
    %c2_370 = arith.constant 2 : index
    %c0_371 = arith.constant 0 : index
    %c0_372 = arith.constant 0 : index
    %550 = vector.load %arg2[%c2_370, %c0_371, %c0_372] : memref<4x32x8xf32, #tpu.memory_space<vmem>>, vector<1x32x8xf32>
    %551 = vector.shape_cast %550 : vector<1x32x8xf32> to vector<32x8xf32>
    %cst_373 = arith.constant dense<0.000000e+00> : vector<8x8xf32>
    %552 = tpu.matmul %496, %551, %cst_373 {dimension_numbers = #tpu.dot_dimension_numbers<[1], [0], [0], [1], [0, 0, 1, 1], [], []>} : vector<8x32xf32>, vector<32x8xf32>, vector<8x8xf32> -> vector<8x8xf32>
    %c2_374 = arith.constant 2 : index
    %c0_375 = arith.constant 0 : index
    %c0_376 = arith.constant 0 : index
    %553 = vector.load %arg3[%c2_374, %c0_375, %c0_376] : memref<4x32x8xf32, #tpu.memory_space<vmem>>, vector<1x32x8xf32>
    %554 = vector.shape_cast %553 : vector<1x32x8xf32> to vector<32x8xf32>
    %cst_377 = arith.constant dense<0.000000e+00> : vector<8x8xf32>
    %555 = tpu.matmul %496, %554, %cst_377 {dimension_numbers = #tpu.dot_dimension_numbers<[1], [0], [0], [1], [0, 0, 1, 1], [], []>} : vector<8x32xf32>, vector<32x8xf32>, vector<8x8xf32> -> vector<8x8xf32>
    %c2_378 = arith.constant 2 : index
    %c0_379 = arith.constant 0 : index
    %c0_380 = arith.constant 0 : index
    %556 = vector.load %arg4[%c2_378, %c0_379, %c0_380] : memref<4x32x8xf32, #tpu.memory_space<vmem>>, vector<1x32x8xf32>
    %557 = vector.shape_cast %556 : vector<1x32x8xf32> to vector<32x8xf32>
    %cst_381 = arith.constant dense<0.000000e+00> : vector<8x8xf32>
    %558 = tpu.matmul %496, %557, %cst_381 {dimension_numbers = #tpu.dot_dimension_numbers<[1], [0], [0], [1], [0, 0, 1, 1], [], []>} : vector<8x32xf32>, vector<32x8xf32>, vector<8x8xf32> -> vector<8x8xf32>
    %cst_382 = arith.constant dense<0.000000e+00> : vector<8x8xf32>
    %559 = tpu.matmul %552, %555, %cst_382 {dimension_numbers = #tpu.dot_dimension_numbers<[1], [1], [0], [0], [0, 0, 1, 0], [], []>} : vector<8x8xf32>, vector<8x8xf32>, vector<8x8xf32> -> vector<8x8xf32>
    %cst_383 = arith.constant 0.353553385 : f32
    %560 = vector.broadcast %cst_383 : f32 to vector<8x8xf32>
    %561 = arith.mulf %559, %560 : vector<8x8xf32>
    %cst_384 = arith.constant dense<0xFF800000> : vector<8xf32>
    %562 = vector.multi_reduction <maximumf>, %561, %cst_384 [1] : vector<8x8xf32> to vector<8xf32>
    %563 = vector.shape_cast %562 : vector<8xf32> to vector<8x1xf32>
    %564 = vector.broadcast %563 : vector<8x1xf32> to vector<8x8xf32>
    %565 = arith.subf %561, %564 : vector<8x8xf32>
    %566 = math.exp %565 : vector<8x8xf32>
    %cst_385 = arith.constant dense<0.000000e+00> : vector<8xf32>
    %567 = vector.multi_reduction <add>, %566, %cst_385 [1] : vector<8x8xf32> to vector<8xf32>
    %568 = vector.shape_cast %567 : vector<8xf32> to vector<8x1xf32>
    %569 = vector.broadcast %568 : vector<8x1xf32> to vector<8x8xf32>
    %570 = arith.divf %566, %569 : vector<8x8xf32>
    %cst_386 = arith.constant dense<0.000000e+00> : vector<8x8xf32>
    %571 = tpu.matmul %570, %558, %cst_386 {dimension_numbers = #tpu.dot_dimension_numbers<[1], [0], [0], [1], [0, 0, 1, 1], [], []>} : vector<8x8xf32>, vector<8x8xf32>, vector<8x8xf32> -> vector<8x8xf32>
    %c2_387 = arith.constant 2 : index
    %c0_388 = arith.constant 0 : index
    %c0_389 = arith.constant 0 : index
    %572 = vector.load %arg5[%c2_387, %c0_388, %c0_389] : memref<4x8x32xf32, #tpu.memory_space<vmem>>, vector<1x8x32xf32>
    %573 = vector.shape_cast %572 : vector<1x8x32xf32> to vector<8x32xf32>
    %cst_390 = arith.constant dense<0.000000e+00> : vector<8x32xf32>
    %574 = tpu.matmul %571, %573, %cst_390 {dimension_numbers = #tpu.dot_dimension_numbers<[1], [0], [0], [1], [0, 0, 1, 1], [], []>} : vector<8x8xf32>, vector<8x32xf32>, vector<8x32xf32> -> vector<8x32xf32>
    %575 = arith.addf %549, %574 : vector<8x32xf32>
    %c3_391 = arith.constant 3 : index
    %c0_392 = arith.constant 0 : index
    %c0_393 = arith.constant 0 : index
    %576 = vector.load %arg2[%c3_391, %c0_392, %c0_393] : memref<4x32x8xf32, #tpu.memory_space<vmem>>, vector<1x32x8xf32>
    %577 = vector.shape_cast %576 : vector<1x32x8xf32> to vector<32x8xf32>
    %cst_394 = arith.constant dense<0.000000e+00> : vector<8x8xf32>
    %578 = tpu.matmul %496, %577, %cst_394 {dimension_numbers = #tpu.dot_dimension_numbers<[1], [0], [0], [1], [0, 0, 1, 1], [], []>} : vector<8x32xf32>, vector<32x8xf32>, vector<8x8xf32> -> vector<8x8xf32>
    %c3_395 = arith.constant 3 : index
    %c0_396 = arith.constant 0 : index
    %c0_397 = arith.constant 0 : index
    %579 = vector.load %arg3[%c3_395, %c0_396, %c0_397] : memref<4x32x8xf32, #tpu.memory_space<vmem>>, vector<1x32x8xf32>
    %580 = vector.shape_cast %579 : vector<1x32x8xf32> to vector<32x8xf32>
    %cst_398 = arith.constant dense<0.000000e+00> : vector<8x8xf32>
    %581 = tpu.matmul %496, %580, %cst_398 {dimension_numbers = #tpu.dot_dimension_numbers<[1], [0], [0], [1], [0, 0, 1, 1], [], []>} : vector<8x32xf32>, vector<32x8xf32>, vector<8x8xf32> -> vector<8x8xf32>
    %c3_399 = arith.constant 3 : index
    %c0_400 = arith.constant 0 : index
    %c0_401 = arith.constant 0 : index
    %582 = vector.load %arg4[%c3_399, %c0_400, %c0_401] : memref<4x32x8xf32, #tpu.memory_space<vmem>>, vector<1x32x8xf32>
    %583 = vector.shape_cast %582 : vector<1x32x8xf32> to vector<32x8xf32>
    %cst_402 = arith.constant dense<0.000000e+00> : vector<8x8xf32>
    %584 = tpu.matmul %496, %583, %cst_402 {dimension_numbers = #tpu.dot_dimension_numbers<[1], [0], [0], [1], [0, 0, 1, 1], [], []>} : vector<8x32xf32>, vector<32x8xf32>, vector<8x8xf32> -> vector<8x8xf32>
    %cst_403 = arith.constant dense<0.000000e+00> : vector<8x8xf32>
    %585 = tpu.matmul %578, %581, %cst_403 {dimension_numbers = #tpu.dot_dimension_numbers<[1], [1], [0], [0], [0, 0, 1, 0], [], []>} : vector<8x8xf32>, vector<8x8xf32>, vector<8x8xf32> -> vector<8x8xf32>
    %cst_404 = arith.constant 0.353553385 : f32
    %586 = vector.broadcast %cst_404 : f32 to vector<8x8xf32>
    %587 = arith.mulf %585, %586 : vector<8x8xf32>
    %cst_405 = arith.constant dense<0xFF800000> : vector<8xf32>
    %588 = vector.multi_reduction <maximumf>, %587, %cst_405 [1] : vector<8x8xf32> to vector<8xf32>
    %589 = vector.shape_cast %588 : vector<8xf32> to vector<8x1xf32>
    %590 = vector.broadcast %589 : vector<8x1xf32> to vector<8x8xf32>
    %591 = arith.subf %587, %590 : vector<8x8xf32>
    %592 = math.exp %591 : vector<8x8xf32>
    %cst_406 = arith.constant dense<0.000000e+00> : vector<8xf32>
    %593 = vector.multi_reduction <add>, %592, %cst_406 [1] : vector<8x8xf32> to vector<8xf32>
    %594 = vector.shape_cast %593 : vector<8xf32> to vector<8x1xf32>
    %595 = vector.broadcast %594 : vector<8x1xf32> to vector<8x8xf32>
    %596 = arith.divf %592, %595 : vector<8x8xf32>
    %cst_407 = arith.constant dense<0.000000e+00> : vector<8x8xf32>
    %597 = tpu.matmul %596, %584, %cst_407 {dimension_numbers = #tpu.dot_dimension_numbers<[1], [0], [0], [1], [0, 0, 1, 1], [], []>} : vector<8x8xf32>, vector<8x8xf32>, vector<8x8xf32> -> vector<8x8xf32>
    %c3_408 = arith.constant 3 : index
    %c0_409 = arith.constant 0 : index
    %c0_410 = arith.constant 0 : index
    %598 = vector.load %arg5[%c3_408, %c0_409, %c0_410] : memref<4x8x32xf32, #tpu.memory_space<vmem>>, vector<1x8x32xf32>
    %599 = vector.shape_cast %598 : vector<1x8x32xf32> to vector<8x32xf32>
    %cst_411 = arith.constant dense<0.000000e+00> : vector<8x32xf32>
    %600 = tpu.matmul %597, %599, %cst_411 {dimension_numbers = #tpu.dot_dimension_numbers<[1], [0], [0], [1], [0, 0, 1, 1], [], []>} : vector<8x8xf32>, vector<8x32xf32>, vector<8x32xf32> -> vector<8x32xf32>
    %601 = arith.addf %575, %600 : vector<8x32xf32>
    %602 = arith.addf %477, %601 : vector<8x32xf32>
    %603 = vector.shape_cast %602 : vector<8x32xf32> to vector<1x8x32xf32>
    %cst_412 = arith.constant dense<0.000000e+00> : vector<1xf32>
    %604 = vector.multi_reduction <add>, %603, %cst_412 [1, 2] : vector<1x8x32xf32> to vector<1xf32>
    %605 = vector.shape_cast %604 : vector<1xf32> to vector<1x1x1xf32>
    %606 = vector.extract %605[0, 0, 0] : f32 from vector<1x1x1xf32>
    %cst_413 = arith.constant 2.560000e+02 : f32
    %607 = arith.divf %606, %cst_413 : f32
    %608 = arith.mulf %602, %602 : vector<8x32xf32>
    %609 = vector.shape_cast %608 : vector<8x32xf32> to vector<1x8x32xf32>
    %cst_414 = arith.constant dense<0.000000e+00> : vector<1xf32>
    %610 = vector.multi_reduction <add>, %609, %cst_414 [1, 2] : vector<1x8x32xf32> to vector<1xf32>
    %611 = vector.shape_cast %610 : vector<1xf32> to vector<1x1x1xf32>
    %612 = vector.extract %611[0, 0, 0] : f32 from vector<1x1x1xf32>
    %cst_415 = arith.constant 2.560000e+02 : f32
    %613 = arith.divf %612, %cst_415 : f32
    %614 = arith.mulf %607, %607 : f32
    %615 = arith.subf %613, %614 : f32
    %616 = vector.broadcast %607 : f32 to vector<8x32xf32>
    %617 = arith.subf %602, %616 : vector<8x32xf32>
    %cst_416 = arith.constant 9.99999974E-6 : f32
    %618 = arith.addf %615, %cst_416 : f32
    %619 = math.rsqrt %618 : f32
    %620 = vector.broadcast %619 : f32 to vector<8x32xf32>
    %621 = arith.mulf %617, %620 : vector<8x32xf32>
    %c0_417 = arith.constant 0 : index
    %c0_418 = arith.constant 0 : index
    %622 = vector.load %arg6[%c0_417, %c0_418] : memref<32x64xf32, #tpu.memory_space<vmem>>, vector<32x64xf32>
    %cst_419 = arith.constant dense<0.000000e+00> : vector<8x64xf32>
    %623 = tpu.matmul %621, %622, %cst_419 {dimension_numbers = #tpu.dot_dimension_numbers<[1], [0], [0], [1], [0, 0, 1, 1], [], []>} : vector<8x32xf32>, vector<32x64xf32>, vector<8x64xf32> -> vector<8x64xf32>
    %c0_420 = arith.constant 0 : index
    %c0_421 = arith.constant 0 : index
    %624 = vector.load %arg7[%c0_420, %c0_421] : memref<1x64xf32, #tpu.memory_space<vmem>>, vector<1x64xf32>
    %625 = vector.broadcast %624 : vector<1x64xf32> to vector<8x64xf32>
    %626 = arith.addf %623, %625 : vector<8x64xf32>
    %cst_422 = arith.constant 0.000000e+00 : f32
    %627 = vector.broadcast %cst_422 : f32 to vector<8x64xf32>
    %628 = arith.maximumf %626, %627 : vector<8x64xf32>
    %c0_423 = arith.constant 0 : index
    %c0_424 = arith.constant 0 : index
    %629 = vector.load %arg8[%c0_423, %c0_424] : memref<64x32xf32, #tpu.memory_space<vmem>>, vector<64x32xf32>
    %cst_425 = arith.constant dense<0.000000e+00> : vector<8x32xf32>
    %630 = tpu.matmul %628, %629, %cst_425 {dimension_numbers = #tpu.dot_dimension_numbers<[1], [0], [0], [1], [0, 0, 1, 1], [], []>} : vector<8x64xf32>, vector<64x32xf32>, vector<8x32xf32> -> vector<8x32xf32>
    %c0_426 = arith.constant 0 : index
    %c0_427 = arith.constant 0 : index
    %631 = vector.load %arg9[%c0_426, %c0_427] : memref<1x32xf32, #tpu.memory_space<vmem>>, vector<1x32xf32>
    %632 = vector.broadcast %631 : vector<1x32xf32> to vector<8x32xf32>
    %633 = arith.addf %630, %632 : vector<8x32xf32>
    %634 = arith.addf %602, %633 : vector<8x32xf32>
    %635 = vector.shape_cast %634 : vector<8x32xf32> to vector<1x8x32xf32>
    %cst_428 = arith.constant dense<0.000000e+00> : vector<1xf32>
    %636 = vector.multi_reduction <add>, %635, %cst_428 [1, 2] : vector<1x8x32xf32> to vector<1xf32>
    %637 = vector.shape_cast %636 : vector<1xf32> to vector<1x1x1xf32>
    %638 = vector.extract %637[0, 0, 0] : f32 from vector<1x1x1xf32>
    %cst_429 = arith.constant 2.560000e+02 : f32
    %639 = arith.divf %638, %cst_429 : f32
    %640 = arith.mulf %634, %634 : vector<8x32xf32>
    %641 = vector.shape_cast %640 : vector<8x32xf32> to vector<1x8x32xf32>
    %cst_430 = arith.constant dense<0.000000e+00> : vector<1xf32>
    %642 = vector.multi_reduction <add>, %641, %cst_430 [1, 2] : vector<1x8x32xf32> to vector<1xf32>
    %643 = vector.shape_cast %642 : vector<1xf32> to vector<1x1x1xf32>
    %644 = vector.extract %643[0, 0, 0] : f32 from vector<1x1x1xf32>
    %cst_431 = arith.constant 2.560000e+02 : f32
    %645 = arith.divf %644, %cst_431 : f32
    %646 = arith.mulf %639, %639 : f32
    %647 = arith.subf %645, %646 : f32
    %648 = vector.broadcast %639 : f32 to vector<8x32xf32>
    %649 = arith.subf %634, %648 : vector<8x32xf32>
    %cst_432 = arith.constant 9.99999974E-6 : f32
    %650 = arith.addf %647, %cst_432 : f32
    %651 = math.rsqrt %650 : f32
    %652 = vector.broadcast %651 : f32 to vector<8x32xf32>
    %653 = arith.mulf %649, %652 : vector<8x32xf32>
    %cst_433 = arith.constant 0.000000e+00 : f32
    %654 = vector.broadcast %cst_433 : f32 to vector<8x32xf32>
    %c0_434 = arith.constant 0 : index
    %c0_435 = arith.constant 0 : index
    %c0_436 = arith.constant 0 : index
    %655 = vector.load %arg10[%c0_434, %c0_435, %c0_436] : memref<4x32x8xf32, #tpu.memory_space<vmem>>, vector<1x32x8xf32>
    %656 = vector.shape_cast %655 : vector<1x32x8xf32> to vector<32x8xf32>
    %cst_437 = arith.constant dense<0.000000e+00> : vector<8x8xf32>
    %657 = tpu.matmul %653, %656, %cst_437 {dimension_numbers = #tpu.dot_dimension_numbers<[1], [0], [0], [1], [0, 0, 1, 1], [], []>} : vector<8x32xf32>, vector<32x8xf32>, vector<8x8xf32> -> vector<8x8xf32>
    %c0_438 = arith.constant 0 : index
    %c0_439 = arith.constant 0 : index
    %c0_440 = arith.constant 0 : index
    %658 = vector.load %arg11[%c0_438, %c0_439, %c0_440] : memref<4x32x8xf32, #tpu.memory_space<vmem>>, vector<1x32x8xf32>
    %659 = vector.shape_cast %658 : vector<1x32x8xf32> to vector<32x8xf32>
    %cst_441 = arith.constant dense<0.000000e+00> : vector<8x8xf32>
    %660 = tpu.matmul %653, %659, %cst_441 {dimension_numbers = #tpu.dot_dimension_numbers<[1], [0], [0], [1], [0, 0, 1, 1], [], []>} : vector<8x32xf32>, vector<32x8xf32>, vector<8x8xf32> -> vector<8x8xf32>
    %c0_442 = arith.constant 0 : index
    %c0_443 = arith.constant 0 : index
    %c0_444 = arith.constant 0 : index
    %661 = vector.load %arg12[%c0_442, %c0_443, %c0_444] : memref<4x32x8xf32, #tpu.memory_space<vmem>>, vector<1x32x8xf32>
    %662 = vector.shape_cast %661 : vector<1x32x8xf32> to vector<32x8xf32>
    %cst_445 = arith.constant dense<0.000000e+00> : vector<8x8xf32>
    %663 = tpu.matmul %653, %662, %cst_445 {dimension_numbers = #tpu.dot_dimension_numbers<[1], [0], [0], [1], [0, 0, 1, 1], [], []>} : vector<8x32xf32>, vector<32x8xf32>, vector<8x8xf32> -> vector<8x8xf32>
    %cst_446 = arith.constant dense<0.000000e+00> : vector<8x8xf32>
    %664 = tpu.matmul %657, %660, %cst_446 {dimension_numbers = #tpu.dot_dimension_numbers<[1], [1], [0], [0], [0, 0, 1, 0], [], []>} : vector<8x8xf32>, vector<8x8xf32>, vector<8x8xf32> -> vector<8x8xf32>
    %cst_447 = arith.constant 0.353553385 : f32
    %665 = vector.broadcast %cst_447 : f32 to vector<8x8xf32>
    %666 = arith.mulf %664, %665 : vector<8x8xf32>
    %cst_448 = arith.constant dense<0xFF800000> : vector<8xf32>
    %667 = vector.multi_reduction <maximumf>, %666, %cst_448 [1] : vector<8x8xf32> to vector<8xf32>
    %668 = vector.shape_cast %667 : vector<8xf32> to vector<8x1xf32>
    %669 = vector.broadcast %668 : vector<8x1xf32> to vector<8x8xf32>
    %670 = arith.subf %666, %669 : vector<8x8xf32>
    %671 = math.exp %670 : vector<8x8xf32>
    %cst_449 = arith.constant dense<0.000000e+00> : vector<8xf32>
    %672 = vector.multi_reduction <add>, %671, %cst_449 [1] : vector<8x8xf32> to vector<8xf32>
    %673 = vector.shape_cast %672 : vector<8xf32> to vector<8x1xf32>
    %674 = vector.broadcast %673 : vector<8x1xf32> to vector<8x8xf32>
    %675 = arith.divf %671, %674 : vector<8x8xf32>
    %cst_450 = arith.constant dense<0.000000e+00> : vector<8x8xf32>
    %676 = tpu.matmul %675, %663, %cst_450 {dimension_numbers = #tpu.dot_dimension_numbers<[1], [0], [0], [1], [0, 0, 1, 1], [], []>} : vector<8x8xf32>, vector<8x8xf32>, vector<8x8xf32> -> vector<8x8xf32>
    %c0_451 = arith.constant 0 : index
    %c0_452 = arith.constant 0 : index
    %c0_453 = arith.constant 0 : index
    %677 = vector.load %arg13[%c0_451, %c0_452, %c0_453] : memref<4x8x32xf32, #tpu.memory_space<vmem>>, vector<1x8x32xf32>
    %678 = vector.shape_cast %677 : vector<1x8x32xf32> to vector<8x32xf32>
    %cst_454 = arith.constant dense<0.000000e+00> : vector<8x32xf32>
    %679 = tpu.matmul %676, %678, %cst_454 {dimension_numbers = #tpu.dot_dimension_numbers<[1], [0], [0], [1], [0, 0, 1, 1], [], []>} : vector<8x8xf32>, vector<8x32xf32>, vector<8x32xf32> -> vector<8x32xf32>
    %680 = arith.addf %654, %679 : vector<8x32xf32>
    %c1_455 = arith.constant 1 : index
    %c0_456 = arith.constant 0 : index
    %c0_457 = arith.constant 0 : index
    %681 = vector.load %arg10[%c1_455, %c0_456, %c0_457] : memref<4x32x8xf32, #tpu.memory_space<vmem>>, vector<1x32x8xf32>
    %682 = vector.shape_cast %681 : vector<1x32x8xf32> to vector<32x8xf32>
    %cst_458 = arith.constant dense<0.000000e+00> : vector<8x8xf32>
    %683 = tpu.matmul %653, %682, %cst_458 {dimension_numbers = #tpu.dot_dimension_numbers<[1], [0], [0], [1], [0, 0, 1, 1], [], []>} : vector<8x32xf32>, vector<32x8xf32>, vector<8x8xf32> -> vector<8x8xf32>
    %c1_459 = arith.constant 1 : index
    %c0_460 = arith.constant 0 : index
    %c0_461 = arith.constant 0 : index
    %684 = vector.load %arg11[%c1_459, %c0_460, %c0_461] : memref<4x32x8xf32, #tpu.memory_space<vmem>>, vector<1x32x8xf32>
    %685 = vector.shape_cast %684 : vector<1x32x8xf32> to vector<32x8xf32>
    %cst_462 = arith.constant dense<0.000000e+00> : vector<8x8xf32>
    %686 = tpu.matmul %653, %685, %cst_462 {dimension_numbers = #tpu.dot_dimension_numbers<[1], [0], [0], [1], [0, 0, 1, 1], [], []>} : vector<8x32xf32>, vector<32x8xf32>, vector<8x8xf32> -> vector<8x8xf32>
    %c1_463 = arith.constant 1 : index
    %c0_464 = arith.constant 0 : index
    %c0_465 = arith.constant 0 : index
    %687 = vector.load %arg12[%c1_463, %c0_464, %c0_465] : memref<4x32x8xf32, #tpu.memory_space<vmem>>, vector<1x32x8xf32>
    %688 = vector.shape_cast %687 : vector<1x32x8xf32> to vector<32x8xf32>
    %cst_466 = arith.constant dense<0.000000e+00> : vector<8x8xf32>
    %689 = tpu.matmul %653, %688, %cst_466 {dimension_numbers = #tpu.dot_dimension_numbers<[1], [0], [0], [1], [0, 0, 1, 1], [], []>} : vector<8x32xf32>, vector<32x8xf32>, vector<8x8xf32> -> vector<8x8xf32>
    %cst_467 = arith.constant dense<0.000000e+00> : vector<8x8xf32>
    %690 = tpu.matmul %683, %686, %cst_467 {dimension_numbers = #tpu.dot_dimension_numbers<[1], [1], [0], [0], [0, 0, 1, 0], [], []>} : vector<8x8xf32>, vector<8x8xf32>, vector<8x8xf32> -> vector<8x8xf32>
    %cst_468 = arith.constant 0.353553385 : f32
    %691 = vector.broadcast %cst_468 : f32 to vector<8x8xf32>
    %692 = arith.mulf %690, %691 : vector<8x8xf32>
    %cst_469 = arith.constant dense<0xFF800000> : vector<8xf32>
    %693 = vector.multi_reduction <maximumf>, %692, %cst_469 [1] : vector<8x8xf32> to vector<8xf32>
    %694 = vector.shape_cast %693 : vector<8xf32> to vector<8x1xf32>
    %695 = vector.broadcast %694 : vector<8x1xf32> to vector<8x8xf32>
    %696 = arith.subf %692, %695 : vector<8x8xf32>
    %697 = math.exp %696 : vector<8x8xf32>
    %cst_470 = arith.constant dense<0.000000e+00> : vector<8xf32>
    %698 = vector.multi_reduction <add>, %697, %cst_470 [1] : vector<8x8xf32> to vector<8xf32>
    %699 = vector.shape_cast %698 : vector<8xf32> to vector<8x1xf32>
    %700 = vector.broadcast %699 : vector<8x1xf32> to vector<8x8xf32>
    %701 = arith.divf %697, %700 : vector<8x8xf32>
    %cst_471 = arith.constant dense<0.000000e+00> : vector<8x8xf32>
    %702 = tpu.matmul %701, %689, %cst_471 {dimension_numbers = #tpu.dot_dimension_numbers<[1], [0], [0], [1], [0, 0, 1, 1], [], []>} : vector<8x8xf32>, vector<8x8xf32>, vector<8x8xf32> -> vector<8x8xf32>
    %c1_472 = arith.constant 1 : index
    %c0_473 = arith.constant 0 : index
    %c0_474 = arith.constant 0 : index
    %703 = vector.load %arg13[%c1_472, %c0_473, %c0_474] : memref<4x8x32xf32, #tpu.memory_space<vmem>>, vector<1x8x32xf32>
    %704 = vector.shape_cast %703 : vector<1x8x32xf32> to vector<8x32xf32>
    %cst_475 = arith.constant dense<0.000000e+00> : vector<8x32xf32>
    %705 = tpu.matmul %702, %704, %cst_475 {dimension_numbers = #tpu.dot_dimension_numbers<[1], [0], [0], [1], [0, 0, 1, 1], [], []>} : vector<8x8xf32>, vector<8x32xf32>, vector<8x32xf32> -> vector<8x32xf32>
    %706 = arith.addf %680, %705 : vector<8x32xf32>
    %c2_476 = arith.constant 2 : index
    %c0_477 = arith.constant 0 : index
    %c0_478 = arith.constant 0 : index
    %707 = vector.load %arg10[%c2_476, %c0_477, %c0_478] : memref<4x32x8xf32, #tpu.memory_space<vmem>>, vector<1x32x8xf32>
    %708 = vector.shape_cast %707 : vector<1x32x8xf32> to vector<32x8xf32>
    %cst_479 = arith.constant dense<0.000000e+00> : vector<8x8xf32>
    %709 = tpu.matmul %653, %708, %cst_479 {dimension_numbers = #tpu.dot_dimension_numbers<[1], [0], [0], [1], [0, 0, 1, 1], [], []>} : vector<8x32xf32>, vector<32x8xf32>, vector<8x8xf32> -> vector<8x8xf32>
    %c2_480 = arith.constant 2 : index
    %c0_481 = arith.constant 0 : index
    %c0_482 = arith.constant 0 : index
    %710 = vector.load %arg11[%c2_480, %c0_481, %c0_482] : memref<4x32x8xf32, #tpu.memory_space<vmem>>, vector<1x32x8xf32>
    %711 = vector.shape_cast %710 : vector<1x32x8xf32> to vector<32x8xf32>
    %cst_483 = arith.constant dense<0.000000e+00> : vector<8x8xf32>
    %712 = tpu.matmul %653, %711, %cst_483 {dimension_numbers = #tpu.dot_dimension_numbers<[1], [0], [0], [1], [0, 0, 1, 1], [], []>} : vector<8x32xf32>, vector<32x8xf32>, vector<8x8xf32> -> vector<8x8xf32>
    %c2_484 = arith.constant 2 : index
    %c0_485 = arith.constant 0 : index
    %c0_486 = arith.constant 0 : index
    %713 = vector.load %arg12[%c2_484, %c0_485, %c0_486] : memref<4x32x8xf32, #tpu.memory_space<vmem>>, vector<1x32x8xf32>
    %714 = vector.shape_cast %713 : vector<1x32x8xf32> to vector<32x8xf32>
    %cst_487 = arith.constant dense<0.000000e+00> : vector<8x8xf32>
    %715 = tpu.matmul %653, %714, %cst_487 {dimension_numbers = #tpu.dot_dimension_numbers<[1], [0], [0], [1], [0, 0, 1, 1], [], []>} : vector<8x32xf32>, vector<32x8xf32>, vector<8x8xf32> -> vector<8x8xf32>
    %cst_488 = arith.constant dense<0.000000e+00> : vector<8x8xf32>
    %716 = tpu.matmul %709, %712, %cst_488 {dimension_numbers = #tpu.dot_dimension_numbers<[1], [1], [0], [0], [0, 0, 1, 0], [], []>} : vector<8x8xf32>, vector<8x8xf32>, vector<8x8xf32> -> vector<8x8xf32>
    %cst_489 = arith.constant 0.353553385 : f32
    %717 = vector.broadcast %cst_489 : f32 to vector<8x8xf32>
    %718 = arith.mulf %716, %717 : vector<8x8xf32>
    %cst_490 = arith.constant dense<0xFF800000> : vector<8xf32>
    %719 = vector.multi_reduction <maximumf>, %718, %cst_490 [1] : vector<8x8xf32> to vector<8xf32>
    %720 = vector.shape_cast %719 : vector<8xf32> to vector<8x1xf32>
    %721 = vector.broadcast %720 : vector<8x1xf32> to vector<8x8xf32>
    %722 = arith.subf %718, %721 : vector<8x8xf32>
    %723 = math.exp %722 : vector<8x8xf32>
    %cst_491 = arith.constant dense<0.000000e+00> : vector<8xf32>
    %724 = vector.multi_reduction <add>, %723, %cst_491 [1] : vector<8x8xf32> to vector<8xf32>
    %725 = vector.shape_cast %724 : vector<8xf32> to vector<8x1xf32>
    %726 = vector.broadcast %725 : vector<8x1xf32> to vector<8x8xf32>
    %727 = arith.divf %723, %726 : vector<8x8xf32>
    %cst_492 = arith.constant dense<0.000000e+00> : vector<8x8xf32>
    %728 = tpu.matmul %727, %715, %cst_492 {dimension_numbers = #tpu.dot_dimension_numbers<[1], [0], [0], [1], [0, 0, 1, 1], [], []>} : vector<8x8xf32>, vector<8x8xf32>, vector<8x8xf32> -> vector<8x8xf32>
    %c2_493 = arith.constant 2 : index
    %c0_494 = arith.constant 0 : index
    %c0_495 = arith.constant 0 : index
    %729 = vector.load %arg13[%c2_493, %c0_494, %c0_495] : memref<4x8x32xf32, #tpu.memory_space<vmem>>, vector<1x8x32xf32>
    %730 = vector.shape_cast %729 : vector<1x8x32xf32> to vector<8x32xf32>
    %cst_496 = arith.constant dense<0.000000e+00> : vector<8x32xf32>
    %731 = tpu.matmul %728, %730, %cst_496 {dimension_numbers = #tpu.dot_dimension_numbers<[1], [0], [0], [1], [0, 0, 1, 1], [], []>} : vector<8x8xf32>, vector<8x32xf32>, vector<8x32xf32> -> vector<8x32xf32>
    %732 = arith.addf %706, %731 : vector<8x32xf32>
    %c3_497 = arith.constant 3 : index
    %c0_498 = arith.constant 0 : index
    %c0_499 = arith.constant 0 : index
    %733 = vector.load %arg10[%c3_497, %c0_498, %c0_499] : memref<4x32x8xf32, #tpu.memory_space<vmem>>, vector<1x32x8xf32>
    %734 = vector.shape_cast %733 : vector<1x32x8xf32> to vector<32x8xf32>
    %cst_500 = arith.constant dense<0.000000e+00> : vector<8x8xf32>
    %735 = tpu.matmul %653, %734, %cst_500 {dimension_numbers = #tpu.dot_dimension_numbers<[1], [0], [0], [1], [0, 0, 1, 1], [], []>} : vector<8x32xf32>, vector<32x8xf32>, vector<8x8xf32> -> vector<8x8xf32>
    %c3_501 = arith.constant 3 : index
    %c0_502 = arith.constant 0 : index
    %c0_503 = arith.constant 0 : index
    %736 = vector.load %arg11[%c3_501, %c0_502, %c0_503] : memref<4x32x8xf32, #tpu.memory_space<vmem>>, vector<1x32x8xf32>
    %737 = vector.shape_cast %736 : vector<1x32x8xf32> to vector<32x8xf32>
    %cst_504 = arith.constant dense<0.000000e+00> : vector<8x8xf32>
    %738 = tpu.matmul %653, %737, %cst_504 {dimension_numbers = #tpu.dot_dimension_numbers<[1], [0], [0], [1], [0, 0, 1, 1], [], []>} : vector<8x32xf32>, vector<32x8xf32>, vector<8x8xf32> -> vector<8x8xf32>
    %c3_505 = arith.constant 3 : index
    %c0_506 = arith.constant 0 : index
    %c0_507 = arith.constant 0 : index
    %739 = vector.load %arg12[%c3_505, %c0_506, %c0_507] : memref<4x32x8xf32, #tpu.memory_space<vmem>>, vector<1x32x8xf32>
    %740 = vector.shape_cast %739 : vector<1x32x8xf32> to vector<32x8xf32>
    %cst_508 = arith.constant dense<0.000000e+00> : vector<8x8xf32>
    %741 = tpu.matmul %653, %740, %cst_508 {dimension_numbers = #tpu.dot_dimension_numbers<[1], [0], [0], [1], [0, 0, 1, 1], [], []>} : vector<8x32xf32>, vector<32x8xf32>, vector<8x8xf32> -> vector<8x8xf32>
    %cst_509 = arith.constant dense<0.000000e+00> : vector<8x8xf32>
    %742 = tpu.matmul %735, %738, %cst_509 {dimension_numbers = #tpu.dot_dimension_numbers<[1], [1], [0], [0], [0, 0, 1, 0], [], []>} : vector<8x8xf32>, vector<8x8xf32>, vector<8x8xf32> -> vector<8x8xf32>
    %cst_510 = arith.constant 0.353553385 : f32
    %743 = vector.broadcast %cst_510 : f32 to vector<8x8xf32>
    %744 = arith.mulf %742, %743 : vector<8x8xf32>
    %cst_511 = arith.constant dense<0xFF800000> : vector<8xf32>
    %745 = vector.multi_reduction <maximumf>, %744, %cst_511 [1] : vector<8x8xf32> to vector<8xf32>
    %746 = vector.shape_cast %745 : vector<8xf32> to vector<8x1xf32>
    %747 = vector.broadcast %746 : vector<8x1xf32> to vector<8x8xf32>
    %748 = arith.subf %744, %747 : vector<8x8xf32>
    %749 = math.exp %748 : vector<8x8xf32>
    %cst_512 = arith.constant dense<0.000000e+00> : vector<8xf32>
    %750 = vector.multi_reduction <add>, %749, %cst_512 [1] : vector<8x8xf32> to vector<8xf32>
    %751 = vector.shape_cast %750 : vector<8xf32> to vector<8x1xf32>
    %752 = vector.broadcast %751 : vector<8x1xf32> to vector<8x8xf32>
    %753 = arith.divf %749, %752 : vector<8x8xf32>
    %cst_513 = arith.constant dense<0.000000e+00> : vector<8x8xf32>
    %754 = tpu.matmul %753, %741, %cst_513 {dimension_numbers = #tpu.dot_dimension_numbers<[1], [0], [0], [1], [0, 0, 1, 1], [], []>} : vector<8x8xf32>, vector<8x8xf32>, vector<8x8xf32> -> vector<8x8xf32>
    %c3_514 = arith.constant 3 : index
    %c0_515 = arith.constant 0 : index
    %c0_516 = arith.constant 0 : index
    %755 = vector.load %arg13[%c3_514, %c0_515, %c0_516] : memref<4x8x32xf32, #tpu.memory_space<vmem>>, vector<1x8x32xf32>
    %756 = vector.shape_cast %755 : vector<1x8x32xf32> to vector<8x32xf32>
    %cst_517 = arith.constant dense<0.000000e+00> : vector<8x32xf32>
    %757 = tpu.matmul %754, %756, %cst_517 {dimension_numbers = #tpu.dot_dimension_numbers<[1], [0], [0], [1], [0, 0, 1, 1], [], []>} : vector<8x8xf32>, vector<8x32xf32>, vector<8x32xf32> -> vector<8x32xf32>
    %758 = arith.addf %732, %757 : vector<8x32xf32>
    %759 = arith.addf %634, %758 : vector<8x32xf32>
    %760 = vector.shape_cast %759 : vector<8x32xf32> to vector<1x8x32xf32>
    %cst_518 = arith.constant dense<0.000000e+00> : vector<1xf32>
    %761 = vector.multi_reduction <add>, %760, %cst_518 [1, 2] : vector<1x8x32xf32> to vector<1xf32>
    %762 = vector.shape_cast %761 : vector<1xf32> to vector<1x1x1xf32>
    %763 = vector.extract %762[0, 0, 0] : f32 from vector<1x1x1xf32>
    %cst_519 = arith.constant 2.560000e+02 : f32
    %764 = arith.divf %763, %cst_519 : f32
    %765 = arith.mulf %759, %759 : vector<8x32xf32>
    %766 = vector.shape_cast %765 : vector<8x32xf32> to vector<1x8x32xf32>
    %cst_520 = arith.constant dense<0.000000e+00> : vector<1xf32>
    %767 = vector.multi_reduction <add>, %766, %cst_520 [1, 2] : vector<1x8x32xf32> to vector<1xf32>
    %768 = vector.shape_cast %767 : vector<1xf32> to vector<1x1x1xf32>
    %769 = vector.extract %768[0, 0, 0] : f32 from vector<1x1x1xf32>
    %cst_521 = arith.constant 2.560000e+02 : f32
    %770 = arith.divf %769, %cst_521 : f32
    %771 = arith.mulf %764, %764 : f32
    %772 = arith.subf %770, %771 : f32
    %773 = vector.broadcast %764 : f32 to vector<8x32xf32>
    %774 = arith.subf %759, %773 : vector<8x32xf32>
    %cst_522 = arith.constant 9.99999974E-6 : f32
    %775 = arith.addf %772, %cst_522 : f32
    %776 = math.rsqrt %775 : f32
    %777 = vector.broadcast %776 : f32 to vector<8x32xf32>
    %778 = arith.mulf %774, %777 : vector<8x32xf32>
    %c0_523 = arith.constant 0 : index
    %c0_524 = arith.constant 0 : index
    %779 = vector.load %arg14[%c0_523, %c0_524] : memref<32x64xf32, #tpu.memory_space<vmem>>, vector<32x64xf32>
    %cst_525 = arith.constant dense<0.000000e+00> : vector<8x64xf32>
    %780 = tpu.matmul %778, %779, %cst_525 {dimension_numbers = #tpu.dot_dimension_numbers<[1], [0], [0], [1], [0, 0, 1, 1], [], []>} : vector<8x32xf32>, vector<32x64xf32>, vector<8x64xf32> -> vector<8x64xf32>
    %c0_526 = arith.constant 0 : index
    %c0_527 = arith.constant 0 : index
    %781 = vector.load %arg15[%c0_526, %c0_527] : memref<1x64xf32, #tpu.memory_space<vmem>>, vector<1x64xf32>
    %782 = vector.broadcast %781 : vector<1x64xf32> to vector<8x64xf32>
    %783 = arith.addf %780, %782 : vector<8x64xf32>
    %cst_528 = arith.constant 0.000000e+00 : f32
    %784 = vector.broadcast %cst_528 : f32 to vector<8x64xf32>
    %785 = arith.maximumf %783, %784 : vector<8x64xf32>
    %c0_529 = arith.constant 0 : index
    %c0_530 = arith.constant 0 : index
    %786 = vector.load %arg16[%c0_529, %c0_530] : memref<64x32xf32, #tpu.memory_space<vmem>>, vector<64x32xf32>
    %cst_531 = arith.constant dense<0.000000e+00> : vector<8x32xf32>
    %787 = tpu.matmul %785, %786, %cst_531 {dimension_numbers = #tpu.dot_dimension_numbers<[1], [0], [0], [1], [0, 0, 1, 1], [], []>} : vector<8x64xf32>, vector<64x32xf32>, vector<8x32xf32> -> vector<8x32xf32>
    %c0_532 = arith.constant 0 : index
    %c0_533 = arith.constant 0 : index
    %788 = vector.load %arg17[%c0_532, %c0_533] : memref<1x32xf32, #tpu.memory_space<vmem>>, vector<1x32xf32>
    %789 = vector.broadcast %788 : vector<1x32xf32> to vector<8x32xf32>
    %790 = arith.addf %787, %789 : vector<8x32xf32>
    %791 = arith.addf %759, %790 : vector<8x32xf32>
    %792 = vector.shape_cast %791 : vector<8x32xf32> to vector<1x8x32xf32>
    %cst_534 = arith.constant dense<0.000000e+00> : vector<1xf32>
    %793 = vector.multi_reduction <add>, %792, %cst_534 [1, 2] : vector<1x8x32xf32> to vector<1xf32>
    %794 = vector.shape_cast %793 : vector<1xf32> to vector<1x1x1xf32>
    %795 = vector.extract %794[0, 0, 0] : f32 from vector<1x1x1xf32>
    %cst_535 = arith.constant 2.560000e+02 : f32
    %796 = arith.divf %795, %cst_535 : f32
    %797 = arith.mulf %791, %791 : vector<8x32xf32>
    %798 = vector.shape_cast %797 : vector<8x32xf32> to vector<1x8x32xf32>
    %cst_536 = arith.constant dense<0.000000e+00> : vector<1xf32>
    %799 = vector.multi_reduction <add>, %798, %cst_536 [1, 2] : vector<1x8x32xf32> to vector<1xf32>
    %800 = vector.shape_cast %799 : vector<1xf32> to vector<1x1x1xf32>
    %801 = vector.extract %800[0, 0, 0] : f32 from vector<1x1x1xf32>
    %cst_537 = arith.constant 2.560000e+02 : f32
    %802 = arith.divf %801, %cst_537 : f32
    %803 = arith.mulf %796, %796 : f32
    %804 = arith.subf %802, %803 : f32
    %805 = vector.broadcast %796 : f32 to vector<8x32xf32>
    %806 = arith.subf %791, %805 : vector<8x32xf32>
    %cst_538 = arith.constant 9.99999974E-6 : f32
    %807 = arith.addf %804, %cst_538 : f32
    %808 = math.rsqrt %807 : f32
    %809 = vector.broadcast %808 : f32 to vector<8x32xf32>
    %810 = arith.mulf %806, %809 : vector<8x32xf32>
    %cst_539 = arith.constant 0.000000e+00 : f32
    %811 = vector.broadcast %cst_539 : f32 to vector<8x32xf32>
    %c0_540 = arith.constant 0 : index
    %c0_541 = arith.constant 0 : index
    %c0_542 = arith.constant 0 : index
    %812 = vector.load %arg18[%c0_540, %c0_541, %c0_542] : memref<4x32x8xf32, #tpu.memory_space<vmem>>, vector<1x32x8xf32>
    %813 = vector.shape_cast %812 : vector<1x32x8xf32> to vector<32x8xf32>
    %cst_543 = arith.constant dense<0.000000e+00> : vector<8x8xf32>
    %814 = tpu.matmul %810, %813, %cst_543 {dimension_numbers = #tpu.dot_dimension_numbers<[1], [0], [0], [1], [0, 0, 1, 1], [], []>} : vector<8x32xf32>, vector<32x8xf32>, vector<8x8xf32> -> vector<8x8xf32>
    %c0_544 = arith.constant 0 : index
    %c0_545 = arith.constant 0 : index
    %c0_546 = arith.constant 0 : index
    %815 = vector.load %arg19[%c0_544, %c0_545, %c0_546] : memref<4x32x8xf32, #tpu.memory_space<vmem>>, vector<1x32x8xf32>
    %816 = vector.shape_cast %815 : vector<1x32x8xf32> to vector<32x8xf32>
    %cst_547 = arith.constant dense<0.000000e+00> : vector<8x8xf32>
    %817 = tpu.matmul %810, %816, %cst_547 {dimension_numbers = #tpu.dot_dimension_numbers<[1], [0], [0], [1], [0, 0, 1, 1], [], []>} : vector<8x32xf32>, vector<32x8xf32>, vector<8x8xf32> -> vector<8x8xf32>
    %c0_548 = arith.constant 0 : index
    %c0_549 = arith.constant 0 : index
    %c0_550 = arith.constant 0 : index
    %818 = vector.load %arg20[%c0_548, %c0_549, %c0_550] : memref<4x32x8xf32, #tpu.memory_space<vmem>>, vector<1x32x8xf32>
    %819 = vector.shape_cast %818 : vector<1x32x8xf32> to vector<32x8xf32>
    %cst_551 = arith.constant dense<0.000000e+00> : vector<8x8xf32>
    %820 = tpu.matmul %810, %819, %cst_551 {dimension_numbers = #tpu.dot_dimension_numbers<[1], [0], [0], [1], [0, 0, 1, 1], [], []>} : vector<8x32xf32>, vector<32x8xf32>, vector<8x8xf32> -> vector<8x8xf32>
    %cst_552 = arith.constant dense<0.000000e+00> : vector<8x8xf32>
    %821 = tpu.matmul %814, %817, %cst_552 {dimension_numbers = #tpu.dot_dimension_numbers<[1], [1], [0], [0], [0, 0, 1, 0], [], []>} : vector<8x8xf32>, vector<8x8xf32>, vector<8x8xf32> -> vector<8x8xf32>
    %cst_553 = arith.constant 0.353553385 : f32
    %822 = vector.broadcast %cst_553 : f32 to vector<8x8xf32>
    %823 = arith.mulf %821, %822 : vector<8x8xf32>
    %cst_554 = arith.constant dense<0xFF800000> : vector<8xf32>
    %824 = vector.multi_reduction <maximumf>, %823, %cst_554 [1] : vector<8x8xf32> to vector<8xf32>
    %825 = vector.shape_cast %824 : vector<8xf32> to vector<8x1xf32>
    %826 = vector.broadcast %825 : vector<8x1xf32> to vector<8x8xf32>
    %827 = arith.subf %823, %826 : vector<8x8xf32>
    %828 = math.exp %827 : vector<8x8xf32>
    %cst_555 = arith.constant dense<0.000000e+00> : vector<8xf32>
    %829 = vector.multi_reduction <add>, %828, %cst_555 [1] : vector<8x8xf32> to vector<8xf32>
    %830 = vector.shape_cast %829 : vector<8xf32> to vector<8x1xf32>
    %831 = vector.broadcast %830 : vector<8x1xf32> to vector<8x8xf32>
    %832 = arith.divf %828, %831 : vector<8x8xf32>
    %cst_556 = arith.constant dense<0.000000e+00> : vector<8x8xf32>
    %833 = tpu.matmul %832, %820, %cst_556 {dimension_numbers = #tpu.dot_dimension_numbers<[1], [0], [0], [1], [0, 0, 1, 1], [], []>} : vector<8x8xf32>, vector<8x8xf32>, vector<8x8xf32> -> vector<8x8xf32>
    %c0_557 = arith.constant 0 : index
    %c0_558 = arith.constant 0 : index
    %c0_559 = arith.constant 0 : index
    %834 = vector.load %arg21[%c0_557, %c0_558, %c0_559] : memref<4x8x32xf32, #tpu.memory_space<vmem>>, vector<1x8x32xf32>
    %835 = vector.shape_cast %834 : vector<1x8x32xf32> to vector<8x32xf32>
    %cst_560 = arith.constant dense<0.000000e+00> : vector<8x32xf32>
    %836 = tpu.matmul %833, %835, %cst_560 {dimension_numbers = #tpu.dot_dimension_numbers<[1], [0], [0], [1], [0, 0, 1, 1], [], []>} : vector<8x8xf32>, vector<8x32xf32>, vector<8x32xf32> -> vector<8x32xf32>
    %837 = arith.addf %811, %836 : vector<8x32xf32>
    %c1_561 = arith.constant 1 : index
    %c0_562 = arith.constant 0 : index
    %c0_563 = arith.constant 0 : index
    %838 = vector.load %arg18[%c1_561, %c0_562, %c0_563] : memref<4x32x8xf32, #tpu.memory_space<vmem>>, vector<1x32x8xf32>
    %839 = vector.shape_cast %838 : vector<1x32x8xf32> to vector<32x8xf32>
    %cst_564 = arith.constant dense<0.000000e+00> : vector<8x8xf32>
    %840 = tpu.matmul %810, %839, %cst_564 {dimension_numbers = #tpu.dot_dimension_numbers<[1], [0], [0], [1], [0, 0, 1, 1], [], []>} : vector<8x32xf32>, vector<32x8xf32>, vector<8x8xf32> -> vector<8x8xf32>
    %c1_565 = arith.constant 1 : index
    %c0_566 = arith.constant 0 : index
    %c0_567 = arith.constant 0 : index
    %841 = vector.load %arg19[%c1_565, %c0_566, %c0_567] : memref<4x32x8xf32, #tpu.memory_space<vmem>>, vector<1x32x8xf32>
    %842 = vector.shape_cast %841 : vector<1x32x8xf32> to vector<32x8xf32>
    %cst_568 = arith.constant dense<0.000000e+00> : vector<8x8xf32>
    %843 = tpu.matmul %810, %842, %cst_568 {dimension_numbers = #tpu.dot_dimension_numbers<[1], [0], [0], [1], [0, 0, 1, 1], [], []>} : vector<8x32xf32>, vector<32x8xf32>, vector<8x8xf32> -> vector<8x8xf32>
    %c1_569 = arith.constant 1 : index
    %c0_570 = arith.constant 0 : index
    %c0_571 = arith.constant 0 : index
    %844 = vector.load %arg20[%c1_569, %c0_570, %c0_571] : memref<4x32x8xf32, #tpu.memory_space<vmem>>, vector<1x32x8xf32>
    %845 = vector.shape_cast %844 : vector<1x32x8xf32> to vector<32x8xf32>
    %cst_572 = arith.constant dense<0.000000e+00> : vector<8x8xf32>
    %846 = tpu.matmul %810, %845, %cst_572 {dimension_numbers = #tpu.dot_dimension_numbers<[1], [0], [0], [1], [0, 0, 1, 1], [], []>} : vector<8x32xf32>, vector<32x8xf32>, vector<8x8xf32> -> vector<8x8xf32>
    %cst_573 = arith.constant dense<0.000000e+00> : vector<8x8xf32>
    %847 = tpu.matmul %840, %843, %cst_573 {dimension_numbers = #tpu.dot_dimension_numbers<[1], [1], [0], [0], [0, 0, 1, 0], [], []>} : vector<8x8xf32>, vector<8x8xf32>, vector<8x8xf32> -> vector<8x8xf32>
    %cst_574 = arith.constant 0.353553385 : f32
    %848 = vector.broadcast %cst_574 : f32 to vector<8x8xf32>
    %849 = arith.mulf %847, %848 : vector<8x8xf32>
    %cst_575 = arith.constant dense<0xFF800000> : vector<8xf32>
    %850 = vector.multi_reduction <maximumf>, %849, %cst_575 [1] : vector<8x8xf32> to vector<8xf32>
    %851 = vector.shape_cast %850 : vector<8xf32> to vector<8x1xf32>
    %852 = vector.broadcast %851 : vector<8x1xf32> to vector<8x8xf32>
    %853 = arith.subf %849, %852 : vector<8x8xf32>
    %854 = math.exp %853 : vector<8x8xf32>
    %cst_576 = arith.constant dense<0.000000e+00> : vector<8xf32>
    %855 = vector.multi_reduction <add>, %854, %cst_576 [1] : vector<8x8xf32> to vector<8xf32>
    %856 = vector.shape_cast %855 : vector<8xf32> to vector<8x1xf32>
    %857 = vector.broadcast %856 : vector<8x1xf32> to vector<8x8xf32>
    %858 = arith.divf %854, %857 : vector<8x8xf32>
    %cst_577 = arith.constant dense<0.000000e+00> : vector<8x8xf32>
    %859 = tpu.matmul %858, %846, %cst_577 {dimension_numbers = #tpu.dot_dimension_numbers<[1], [0], [0], [1], [0, 0, 1, 1], [], []>} : vector<8x8xf32>, vector<8x8xf32>, vector<8x8xf32> -> vector<8x8xf32>
    %c1_578 = arith.constant 1 : index
    %c0_579 = arith.constant 0 : index
    %c0_580 = arith.constant 0 : index
    %860 = vector.load %arg21[%c1_578, %c0_579, %c0_580] : memref<4x8x32xf32, #tpu.memory_space<vmem>>, vector<1x8x32xf32>
    %861 = vector.shape_cast %860 : vector<1x8x32xf32> to vector<8x32xf32>
    %cst_581 = arith.constant dense<0.000000e+00> : vector<8x32xf32>
    %862 = tpu.matmul %859, %861, %cst_581 {dimension_numbers = #tpu.dot_dimension_numbers<[1], [0], [0], [1], [0, 0, 1, 1], [], []>} : vector<8x8xf32>, vector<8x32xf32>, vector<8x32xf32> -> vector<8x32xf32>
    %863 = arith.addf %837, %862 : vector<8x32xf32>
    %c2_582 = arith.constant 2 : index
    %c0_583 = arith.constant 0 : index
    %c0_584 = arith.constant 0 : index
    %864 = vector.load %arg18[%c2_582, %c0_583, %c0_584] : memref<4x32x8xf32, #tpu.memory_space<vmem>>, vector<1x32x8xf32>
    %865 = vector.shape_cast %864 : vector<1x32x8xf32> to vector<32x8xf32>
    %cst_585 = arith.constant dense<0.000000e+00> : vector<8x8xf32>
    %866 = tpu.matmul %810, %865, %cst_585 {dimension_numbers = #tpu.dot_dimension_numbers<[1], [0], [0], [1], [0, 0, 1, 1], [], []>} : vector<8x32xf32>, vector<32x8xf32>, vector<8x8xf32> -> vector<8x8xf32>
    %c2_586 = arith.constant 2 : index
    %c0_587 = arith.constant 0 : index
    %c0_588 = arith.constant 0 : index
    %867 = vector.load %arg19[%c2_586, %c0_587, %c0_588] : memref<4x32x8xf32, #tpu.memory_space<vmem>>, vector<1x32x8xf32>
    %868 = vector.shape_cast %867 : vector<1x32x8xf32> to vector<32x8xf32>
    %cst_589 = arith.constant dense<0.000000e+00> : vector<8x8xf32>
    %869 = tpu.matmul %810, %868, %cst_589 {dimension_numbers = #tpu.dot_dimension_numbers<[1], [0], [0], [1], [0, 0, 1, 1], [], []>} : vector<8x32xf32>, vector<32x8xf32>, vector<8x8xf32> -> vector<8x8xf32>
    %c2_590 = arith.constant 2 : index
    %c0_591 = arith.constant 0 : index
    %c0_592 = arith.constant 0 : index
    %870 = vector.load %arg20[%c2_590, %c0_591, %c0_592] : memref<4x32x8xf32, #tpu.memory_space<vmem>>, vector<1x32x8xf32>
    %871 = vector.shape_cast %870 : vector<1x32x8xf32> to vector<32x8xf32>
    %cst_593 = arith.constant dense<0.000000e+00> : vector<8x8xf32>
    %872 = tpu.matmul %810, %871, %cst_593 {dimension_numbers = #tpu.dot_dimension_numbers<[1], [0], [0], [1], [0, 0, 1, 1], [], []>} : vector<8x32xf32>, vector<32x8xf32>, vector<8x8xf32> -> vector<8x8xf32>
    %cst_594 = arith.constant dense<0.000000e+00> : vector<8x8xf32>
    %873 = tpu.matmul %866, %869, %cst_594 {dimension_numbers = #tpu.dot_dimension_numbers<[1], [1], [0], [0], [0, 0, 1, 0], [], []>} : vector<8x8xf32>, vector<8x8xf32>, vector<8x8xf32> -> vector<8x8xf32>
    %cst_595 = arith.constant 0.353553385 : f32
    %874 = vector.broadcast %cst_595 : f32 to vector<8x8xf32>
    %875 = arith.mulf %873, %874 : vector<8x8xf32>
    %cst_596 = arith.constant dense<0xFF800000> : vector<8xf32>
    %876 = vector.multi_reduction <maximumf>, %875, %cst_596 [1] : vector<8x8xf32> to vector<8xf32>
    %877 = vector.shape_cast %876 : vector<8xf32> to vector<8x1xf32>
    %878 = vector.broadcast %877 : vector<8x1xf32> to vector<8x8xf32>
    %879 = arith.subf %875, %878 : vector<8x8xf32>
    %880 = math.exp %879 : vector<8x8xf32>
    %cst_597 = arith.constant dense<0.000000e+00> : vector<8xf32>
    %881 = vector.multi_reduction <add>, %880, %cst_597 [1] : vector<8x8xf32> to vector<8xf32>
    %882 = vector.shape_cast %881 : vector<8xf32> to vector<8x1xf32>
    %883 = vector.broadcast %882 : vector<8x1xf32> to vector<8x8xf32>
    %884 = arith.divf %880, %883 : vector<8x8xf32>
    %cst_598 = arith.constant dense<0.000000e+00> : vector<8x8xf32>
    %885 = tpu.matmul %884, %872, %cst_598 {dimension_numbers = #tpu.dot_dimension_numbers<[1], [0], [0], [1], [0, 0, 1, 1], [], []>} : vector<8x8xf32>, vector<8x8xf32>, vector<8x8xf32> -> vector<8x8xf32>
    %c2_599 = arith.constant 2 : index
    %c0_600 = arith.constant 0 : index
    %c0_601 = arith.constant 0 : index
    %886 = vector.load %arg21[%c2_599, %c0_600, %c0_601] : memref<4x8x32xf32, #tpu.memory_space<vmem>>, vector<1x8x32xf32>
    %887 = vector.shape_cast %886 : vector<1x8x32xf32> to vector<8x32xf32>
    %cst_602 = arith.constant dense<0.000000e+00> : vector<8x32xf32>
    %888 = tpu.matmul %885, %887, %cst_602 {dimension_numbers = #tpu.dot_dimension_numbers<[1], [0], [0], [1], [0, 0, 1, 1], [], []>} : vector<8x8xf32>, vector<8x32xf32>, vector<8x32xf32> -> vector<8x32xf32>
    %889 = arith.addf %863, %888 : vector<8x32xf32>
    %c3_603 = arith.constant 3 : index
    %c0_604 = arith.constant 0 : index
    %c0_605 = arith.constant 0 : index
    %890 = vector.load %arg18[%c3_603, %c0_604, %c0_605] : memref<4x32x8xf32, #tpu.memory_space<vmem>>, vector<1x32x8xf32>
    %891 = vector.shape_cast %890 : vector<1x32x8xf32> to vector<32x8xf32>
    %cst_606 = arith.constant dense<0.000000e+00> : vector<8x8xf32>
    %892 = tpu.matmul %810, %891, %cst_606 {dimension_numbers = #tpu.dot_dimension_numbers<[1], [0], [0], [1], [0, 0, 1, 1], [], []>} : vector<8x32xf32>, vector<32x8xf32>, vector<8x8xf32> -> vector<8x8xf32>
    %c3_607 = arith.constant 3 : index
    %c0_608 = arith.constant 0 : index
    %c0_609 = arith.constant 0 : index
    %893 = vector.load %arg19[%c3_607, %c0_608, %c0_609] : memref<4x32x8xf32, #tpu.memory_space<vmem>>, vector<1x32x8xf32>
    %894 = vector.shape_cast %893 : vector<1x32x8xf32> to vector<32x8xf32>
    %cst_610 = arith.constant dense<0.000000e+00> : vector<8x8xf32>
    %895 = tpu.matmul %810, %894, %cst_610 {dimension_numbers = #tpu.dot_dimension_numbers<[1], [0], [0], [1], [0, 0, 1, 1], [], []>} : vector<8x32xf32>, vector<32x8xf32>, vector<8x8xf32> -> vector<8x8xf32>
    %c3_611 = arith.constant 3 : index
    %c0_612 = arith.constant 0 : index
    %c0_613 = arith.constant 0 : index
    %896 = vector.load %arg20[%c3_611, %c0_612, %c0_613] : memref<4x32x8xf32, #tpu.memory_space<vmem>>, vector<1x32x8xf32>
    %897 = vector.shape_cast %896 : vector<1x32x8xf32> to vector<32x8xf32>
    %cst_614 = arith.constant dense<0.000000e+00> : vector<8x8xf32>
    %898 = tpu.matmul %810, %897, %cst_614 {dimension_numbers = #tpu.dot_dimension_numbers<[1], [0], [0], [1], [0, 0, 1, 1], [], []>} : vector<8x32xf32>, vector<32x8xf32>, vector<8x8xf32> -> vector<8x8xf32>
    %cst_615 = arith.constant dense<0.000000e+00> : vector<8x8xf32>
    %899 = tpu.matmul %892, %895, %cst_615 {dimension_numbers = #tpu.dot_dimension_numbers<[1], [1], [0], [0], [0, 0, 1, 0], [], []>} : vector<8x8xf32>, vector<8x8xf32>, vector<8x8xf32> -> vector<8x8xf32>
    %cst_616 = arith.constant 0.353553385 : f32
    %900 = vector.broadcast %cst_616 : f32 to vector<8x8xf32>
    %901 = arith.mulf %899, %900 : vector<8x8xf32>
    %cst_617 = arith.constant dense<0xFF800000> : vector<8xf32>
    %902 = vector.multi_reduction <maximumf>, %901, %cst_617 [1] : vector<8x8xf32> to vector<8xf32>
    %903 = vector.shape_cast %902 : vector<8xf32> to vector<8x1xf32>
    %904 = vector.broadcast %903 : vector<8x1xf32> to vector<8x8xf32>
    %905 = arith.subf %901, %904 : vector<8x8xf32>
    %906 = math.exp %905 : vector<8x8xf32>
    %cst_618 = arith.constant dense<0.000000e+00> : vector<8xf32>
    %907 = vector.multi_reduction <add>, %906, %cst_618 [1] : vector<8x8xf32> to vector<8xf32>
    %908 = vector.shape_cast %907 : vector<8xf32> to vector<8x1xf32>
    %909 = vector.broadcast %908 : vector<8x1xf32> to vector<8x8xf32>
    %910 = arith.divf %906, %909 : vector<8x8xf32>
    %cst_619 = arith.constant dense<0.000000e+00> : vector<8x8xf32>
    %911 = tpu.matmul %910, %898, %cst_619 {dimension_numbers = #tpu.dot_dimension_numbers<[1], [0], [0], [1], [0, 0, 1, 1], [], []>} : vector<8x8xf32>, vector<8x8xf32>, vector<8x8xf32> -> vector<8x8xf32>
    %c3_620 = arith.constant 3 : index
    %c0_621 = arith.constant 0 : index
    %c0_622 = arith.constant 0 : index
    %912 = vector.load %arg21[%c3_620, %c0_621, %c0_622] : memref<4x8x32xf32, #tpu.memory_space<vmem>>, vector<1x8x32xf32>
    %913 = vector.shape_cast %912 : vector<1x8x32xf32> to vector<8x32xf32>
    %cst_623 = arith.constant dense<0.000000e+00> : vector<8x32xf32>
    %914 = tpu.matmul %911, %913, %cst_623 {dimension_numbers = #tpu.dot_dimension_numbers<[1], [0], [0], [1], [0, 0, 1, 1], [], []>} : vector<8x8xf32>, vector<8x32xf32>, vector<8x32xf32> -> vector<8x32xf32>
    %915 = arith.addf %889, %914 : vector<8x32xf32>
    %916 = arith.addf %791, %915 : vector<8x32xf32>
    %917 = vector.shape_cast %916 : vector<8x32xf32> to vector<1x8x32xf32>
    %cst_624 = arith.constant dense<0.000000e+00> : vector<1xf32>
    %918 = vector.multi_reduction <add>, %917, %cst_624 [1, 2] : vector<1x8x32xf32> to vector<1xf32>
    %919 = vector.shape_cast %918 : vector<1xf32> to vector<1x1x1xf32>
    %920 = vector.extract %919[0, 0, 0] : f32 from vector<1x1x1xf32>
    %cst_625 = arith.constant 2.560000e+02 : f32
    %921 = arith.divf %920, %cst_625 : f32
    %922 = arith.mulf %916, %916 : vector<8x32xf32>
    %923 = vector.shape_cast %922 : vector<8x32xf32> to vector<1x8x32xf32>
    %cst_626 = arith.constant dense<0.000000e+00> : vector<1xf32>
    %924 = vector.multi_reduction <add>, %923, %cst_626 [1, 2] : vector<1x8x32xf32> to vector<1xf32>
    %925 = vector.shape_cast %924 : vector<1xf32> to vector<1x1x1xf32>
    %926 = vector.extract %925[0, 0, 0] : f32 from vector<1x1x1xf32>
    %cst_627 = arith.constant 2.560000e+02 : f32
    %927 = arith.divf %926, %cst_627 : f32
    %928 = arith.mulf %921, %921 : f32
    %929 = arith.subf %927, %928 : f32
    %930 = vector.broadcast %921 : f32 to vector<8x32xf32>
    %931 = arith.subf %916, %930 : vector<8x32xf32>
    %cst_628 = arith.constant 9.99999974E-6 : f32
    %932 = arith.addf %929, %cst_628 : f32
    %933 = math.rsqrt %932 : f32
    %934 = vector.broadcast %933 : f32 to vector<8x32xf32>
    %935 = arith.mulf %931, %934 : vector<8x32xf32>
    %c0_629 = arith.constant 0 : index
    %c0_630 = arith.constant 0 : index
    %936 = vector.load %arg22[%c0_629, %c0_630] : memref<32x64xf32, #tpu.memory_space<vmem>>, vector<32x64xf32>
    %cst_631 = arith.constant dense<0.000000e+00> : vector<8x64xf32>
    %937 = tpu.matmul %935, %936, %cst_631 {dimension_numbers = #tpu.dot_dimension_numbers<[1], [0], [0], [1], [0, 0, 1, 1], [], []>} : vector<8x32xf32>, vector<32x64xf32>, vector<8x64xf32> -> vector<8x64xf32>
    %c0_632 = arith.constant 0 : index
    %c0_633 = arith.constant 0 : index
    %938 = vector.load %arg23[%c0_632, %c0_633] : memref<1x64xf32, #tpu.memory_space<vmem>>, vector<1x64xf32>
    %939 = vector.broadcast %938 : vector<1x64xf32> to vector<8x64xf32>
    %940 = arith.addf %937, %939 : vector<8x64xf32>
    %cst_634 = arith.constant 0.000000e+00 : f32
    %941 = vector.broadcast %cst_634 : f32 to vector<8x64xf32>
    %942 = arith.maximumf %940, %941 : vector<8x64xf32>
    %c0_635 = arith.constant 0 : index
    %c0_636 = arith.constant 0 : index
    %943 = vector.load %arg24[%c0_635, %c0_636] : memref<64x32xf32, #tpu.memory_space<vmem>>, vector<64x32xf32>
    %cst_637 = arith.constant dense<0.000000e+00> : vector<8x32xf32>
    %944 = tpu.matmul %942, %943, %cst_637 {dimension_numbers = #tpu.dot_dimension_numbers<[1], [0], [0], [1], [0, 0, 1, 1], [], []>} : vector<8x64xf32>, vector<64x32xf32>, vector<8x32xf32> -> vector<8x32xf32>
    %c0_638 = arith.constant 0 : index
    %c0_639 = arith.constant 0 : index
    %945 = vector.load %arg25[%c0_638, %c0_639] : memref<1x32xf32, #tpu.memory_space<vmem>>, vector<1x32xf32>
    %946 = vector.broadcast %945 : vector<1x32xf32> to vector<8x32xf32>
    %947 = arith.addf %944, %946 : vector<8x32xf32>
    %948 = arith.addf %916, %947 : vector<8x32xf32>
    %c1_640 = arith.constant 1 : index
    %c0_641 = arith.constant 0 : index
    %c0_642 = arith.constant 0 : index
    %949 = vector.load %arg26[%c1_640, %c0_641, %c0_642] : memref<2x8x32xf32, #tpu.memory_space<vmem>>, vector<1x8x32xf32>
    %950 = vector.shape_cast %949 : vector<1x8x32xf32> to vector<8x32xf32>
    %951 = vector.shape_cast %948 : vector<8x32xf32> to vector<1x8x32xf32>
    tpu.vector_store %arg26[%c1_640, %c0_641, %c0_642], %951 {strides = array<i32>} : memref<2x8x32xf32, #tpu.memory_space<vmem>>, vector<1x8x32xf32>,
    return
  }
  func.func @transform_0(%arg0: i32) -> (i32, i32, i32) {
    %c0_i32 = arith.constant 0 : i32
    %c0_i32_0 = arith.constant 0 : i32
    %c0_i32_1 = arith.constant 0 : i32
    return %arg0, %c0_i32, %c0_i32_0 : i32, i32, i32
  }
  func.func @transform_1(%arg0: i32) -> (i32, i32, i32) {
    %c0_i32 = arith.constant 0 : i32
    %c0_i32_0 = arith.constant 0 : i32
    %c0_i32_1 = arith.constant 0 : i32
    %c0_i32_2 = arith.constant 0 : i32
    return %c0_i32, %c0_i32_0, %c0_i32_1 : i32, i32, i32
  }
  func.func @transform_2(%arg0: i32) -> (i32, i32, i32) {
    %c0_i32 = arith.constant 0 : i32
    %c0_i32_0 = arith.constant 0 : i32
    %c0_i32_1 = arith.constant 0 : i32
    %c0_i32_2 = arith.constant 0 : i32
    return %c0_i32, %c0_i32_0, %c0_i32_1 : i32, i32, i32
  }
  func.func @transform_3(%arg0: i32) -> (i32, i32, i32) {
    %c0_i32 = arith.constant 0 : i32
    %c0_i32_0 = arith.constant 0 : i32
    %c0_i32_1 = arith.constant 0 : i32
    %c0_i32_2 = arith.constant 0 : i32
    return %c0_i32, %c0_i32_0, %c0_i32_1 : i32, i32, i32
  }
  func.func @transform_4(%arg0: i32) -> (i32, i32, i32) {
    %c0_i32 = arith.constant 0 : i32
    %c0_i32_0 = arith.constant 0 : i32
    %c0_i32_1 = arith.constant 0 : i32
    %c0_i32_2 = arith.constant 0 : i32
    return %c0_i32, %c0_i32_0, %c0_i32_1 : i32, i32, i32
  }
  func.func @transform_5(%arg0: i32) -> (i32, i32) {
    %c0_i32 = arith.constant 0 : i32
    %c0_i32_0 = arith.constant 0 : i32
    %c0_i32_1 = arith.constant 0 : i32
    return %c0_i32, %c0_i32_0 : i32, i32
  }
  func.func @transform_6(%arg0: i32) -> (i32, i32) {
    %c0_i32 = arith.constant 0 : i32
    %c0_i32_0 = arith.constant 0 : i32
    %c0_i32_1 = arith.constant 0 : i32
    return %c0_i32, %c0_i32_0 : i32, i32
  }
  func.func @transform_7(%arg0: i32) -> (i32, i32) {
    %c0_i32 = arith.constant 0 : i32
    %c0_i32_0 = arith.constant 0 : i32
    %c0_i32_1 = arith.constant 0 : i32
    return %c0_i32, %c0_i32_0 : i32, i32
  }
  func.func @transform_8(%arg0: i32) -> (i32, i32) {
    %c0_i32 = arith.constant 0 : i32
    %c0_i32_0 = arith.constant 0 : i32
    %c0_i32_1 = arith.constant 0 : i32
    return %c0_i32, %c0_i32_0 : i32, i32
  }
  func.func @transform_9(%arg0: i32) -> (i32, i32, i32) {
    %c0_i32 = arith.constant 0 : i32
    %c0_i32_0 = arith.constant 0 : i32
    %c0_i32_1 = arith.constant 0 : i32
    %c0_i32_2 = arith.constant 0 : i32
    return %c0_i32, %c0_i32_0, %c0_i32_1 : i32, i32, i32
  }
  func.func @transform_10(%arg0: i32) -> (i32, i32, i32) {
    %c0_i32 = arith.constant 0 : i32
    %c0_i32_0 = arith.constant 0 : i32
    %c0_i32_1 = arith.constant 0 : i32
    %c0_i32_2 = arith.constant 0 : i32
    return %c0_i32, %c0_i32_0, %c0_i32_1 : i32, i32, i32
  }
  func.func @transform_11(%arg0: i32) -> (i32, i32, i32) {
    %c0_i32 = arith.constant 0 : i32
    %c0_i32_0 = arith.constant 0 : i32
    %c0_i32_1 = arith.constant 0 : i32
    %c0_i32_2 = arith.constant 0 : i32
    return %c0_i32, %c0_i32_0, %c0_i32_1 : i32, i32, i32
  }
  func.func @transform_12(%arg0: i32) -> (i32, i32, i32) {
    %c0_i32 = arith.constant 0 : i32
    %c0_i32_0 = arith.constant 0 : i32
    %c0_i32_1 = arith.constant 0 : i32
    %c0_i32_2 = arith.constant 0 : i32
    return %c0_i32, %c0_i32_0, %c0_i32_1 : i32, i32, i32
  }
  func.func @transform_13(%arg0: i32) -> (i32, i32) {
    %c0_i32 = arith.constant 0 : i32
    %c0_i32_0 = arith.constant 0 : i32
    %c0_i32_1 = arith.constant 0 : i32
    return %c0_i32, %c0_i32_0 : i32, i32
  }
  func.func @transform_14(%arg0: i32) -> (i32, i32) {
    %c0_i32 = arith.constant 0 : i32
    %c0_i32_0 = arith.constant 0 : i32
    %c0_i32_1 = arith.constant 0 : i32
    return %c0_i32, %c0_i32_0 : i32, i32
  }
  func.func @transform_15(%arg0: i32) -> (i32, i32) {
    %c0_i32 = arith.constant 0 : i32
    %c0_i32_0 = arith.constant 0 : i32
    %c0_i32_1 = arith.constant 0 : i32
    return %c0_i32, %c0_i32_0 : i32, i32
  }
  func.func @transform_16(%arg0: i32) -> (i32, i32) {
    %c0_i32 = arith.constant 0 : i32
    %c0_i32_0 = arith.constant 0 : i32
    %c0_i32_1 = arith.constant 0 : i32
    return %c0_i32, %c0_i32_0 : i32, i32
  }
  func.func @transform_17(%arg0: i32) -> (i32, i32, i32) {
    %c0_i32 = arith.constant 0 : i32
    %c0_i32_0 = arith.constant 0 : i32
    %c0_i32_1 = arith.constant 0 : i32
    %c0_i32_2 = arith.constant 0 : i32
    return %c0_i32, %c0_i32_0, %c0_i32_1 : i32, i32, i32
  }
  func.func @transform_18(%arg0: i32) -> (i32, i32, i32) {
    %c0_i32 = arith.constant 0 : i32
    %c0_i32_0 = arith.constant 0 : i32
    %c0_i32_1 = arith.constant 0 : i32
    %c0_i32_2 = arith.constant 0 : i32
    return %c0_i32, %c0_i32_0, %c0_i32_1 : i32, i32, i32
  }
  func.func @transform_19(%arg0: i32) -> (i32, i32, i32) {
    %c0_i32 = arith.constant 0 : i32
    %c0_i32_0 = arith.constant 0 : i32
    %c0_i32_1 = arith.constant 0 : i32
    %c0_i32_2 = arith.constant 0 : i32
    return %c0_i32, %c0_i32_0, %c0_i32_1 : i32, i32, i32
  }
  func.func @transform_20(%arg0: i32) -> (i32, i32, i32) {
    %c0_i32 = arith.constant 0 : i32
    %c0_i32_0 = arith.constant 0 : i32
    %c0_i32_1 = arith.constant 0 : i32
    %c0_i32_2 = arith.constant 0 : i32
    return %c0_i32, %c0_i32_0, %c0_i32_1 : i32, i32, i32
  }
  func.func @transform_21(%arg0: i32) -> (i32, i32) {
    %c0_i32 = arith.constant 0 : i32
    %c0_i32_0 = arith.constant 0 : i32
    %c0_i32_1 = arith.constant 0 : i32
    return %c0_i32, %c0_i32_0 : i32, i32
  }
  func.func @transform_22(%arg0: i32) -> (i32, i32) {
    %c0_i32 = arith.constant 0 : i32
    %c0_i32_0 = arith.constant 0 : i32
    %c0_i32_1 = arith.constant 0 : i32
    return %c0_i32, %c0_i32_0 : i32, i32
  }
  func.func @transform_23(%arg0: i32) -> (i32, i32) {
    %c0_i32 = arith.constant 0 : i32
    %c0_i32_0 = arith.constant 0 : i32
    %c0_i32_1 = arith.constant 0 : i32
    return %c0_i32, %c0_i32_0 : i32, i32
  }
  func.func @transform_24(%arg0: i32) -> (i32, i32) {
    %c0_i32 = arith.constant 0 : i32
    %c0_i32_0 = arith.constant 0 : i32
    %c0_i32_1 = arith.constant 0 : i32
    return %c0_i32, %c0_i32_0 : i32, i32
  }
  func.func @transform_25(%arg0: i32) -> (i32, i32, i32) {
    %c0_i32 = arith.constant 0 : i32
    %c0_i32_0 = arith.constant 0 : i32
    %c0_i32_1 = arith.constant 0 : i32
    return %arg0, %c0_i32, %c0_i32_0 : i32, i32, i32
  }
}

</mosaic_0001>

<bundles_post_ra>
// kernel: tpu_custom_call.1
= control target key start
LH: loop header
LB: loop body
LE: loop exit
PB: predicated region body
PF: predicated region fallthrough
CT: control target
= control target key end

     0   :  { %s18094_s0 = inlined_call_operand.vmem [shape: f32[2,8,32], index: 0, kind: input, shape index: {}]   ;;  %s18095_s1 = inlined_call_operand.vmem [shape: f32[4,32,8], index: 1, kind: input, shape index: {}]   ;;  %s18096_s2 = inlined_call_operand.vmem [shape: f32[4,32,8], index: 2, kind: input, shape index: {}]   ;;  %s18097_s3 = inlined_call_operand.vmem [shape: f32[4,32,8], index: 3, kind: input, shape index: {}]   ;;  %s18098_s4 = inlined_call_operand.vmem [shape: f32[4,8,32], index: 4, kind: input, shape index: {}]   ;;  %s18099_s5 = inlined_call_operand.vmem [shape: f32[32,64], index: 5, kind: input, shape index: {}]   ;;  %s18100_s6 = inlined_call_operand.vmem [shape: f32[1,64], index: 6, kind: input, shape index: {}]   ;;  %s18101_s7 = inlined_call_operand.vmem [shape: f32[64,32], index: 7, kind: input, shape index: {}]   ;;  %s18102_s8 = inlined_call_operand.vmem [shape: f32[1,32], index: 8, kind: input, shape index: {}]   ;;  %s18103_s9 = inlined_call_operand.vmem [shape: f32[4,32,8], index: 9, kind: input, shape index: {}]   ;;  %s18104_s10 = inlined_call_operand.vmem [shape: f32[4,32,8], index: 10, kind: input, shape index: {}]   ;;  %s18105_s11 = inlined_call_operand.vmem [shape: f32[4,32,8], index: 11, kind: input, shape index: {}]   ;;  %s18106_s12 = inlined_call_operand.vmem [shape: f32[4,8,32], index: 12, kind: input, shape index: {}]   ;;  %s18107_s13 = inlined_call_operand.vmem [shape: f32[32,64], index: 13, kind: input, shape index: {}]   ;;  %s18108_s14 = inlined_call_operand.vmem [shape: f32[1,64], index: 14, kind: input, shape index: {}]   ;;  %s18109_s15 = inlined_call_operand.vmem [shape: f32[64,32], index: 15, kind: input, shape index: {}]   ;;  %s18110_s16 = inlined_call_operand.vmem [shape: f32[1,32], index: 16, kind: input, shape index: {}]   ;;  %s18111_s17 = inlined_call_operand.vmem [shape: f32[4,32,8], index: 17, kind: input, shape index: {}]   ;;  %s18112_s18 = inlined_call_operand.vmem [shape: f32[4,32,8], index: 18, kind: input, shape index: {}]   ;;  %s18113_s19 = inlined_call_operand.vmem [shape: f32[4,32,8], index: 19, kind: input, shape index: {}]   ;;  %s18114_s20 = inlined_call_operand.vmem [shape: f32[4,8,32], index: 20, kind: input, shape index: {}]   ;;  %s18115_s21 = inlined_call_operand.vmem [shape: f32[32,64], index: 21, kind: input, shape index: {}]   ;;  %s18116_s22 = inlined_call_operand.vmem [shape: f32[1,64], index: 22, kind: input, shape index: {}]   ;;  %s18117_s23 = inlined_call_operand.vmem [shape: f32[64,32], index: 23, kind: input, shape index: {}]   ;;  %s18118_s24 = inlined_call_operand.vmem [shape: f32[1,32], index: 24, kind: input, shape index: {}]   ;;  %s18119_s25 = inlined_call_operand.hbm [shape: f32[2,8,32], index: 25, kind: output, shape index: {}]  }
   0x1   :  { %18134 = sst [smem:[#allocation5_spill]] %s18094_s0 }
   0x2   :  { %18135 = sst [smem:[#allocation6_spill]] %s18095_s1 }
   0x3   :  { %18136 = sst [smem:[#allocation7_spill]] %s18096_s2 }
   0x4   :  { %18137 = sst [smem:[#allocation8_spill]] %s18097_s3 }
   0x5   :  { %18138 = sst [smem:[#allocation9_spill]] %s18098_s4 }
   0x6   :  { %18139 = sst [smem:[#allocation10_spill]] %s18099_s5 }
   0x7   :  { %18140 = sst [smem:[#allocation11_spill]] %s18100_s6 }
   0x8   :  { %18141 = sst [smem:[#allocation12_spill]] %s18101_s7 }
   0x9   :  { %18142 = sst [smem:[#allocation13_spill]] %s18102_s8 }
   0xa   :  { %18143 = sst [smem:[#allocation14_spill]] %s18103_s9 }
   0xb   :  { %18144 = sst [smem:[#allocation15_spill]] %s18119_s25 }
   0xc   :  { %s18145_s6 = sld [smem:[#allocation5_spill]]  ;;  %vm82_vm0 = vcmask 261120  }
  0x12   :  { %v15882_v0 = vld [vmem:[%s18145_s6] sm:$0xff] }
  0x13   :  { %30 = vsyncpa [#allocation3], 0  ;;  %v83_v1 = vsel %vm82_vm0, %v15882_v0, 0.0  ;;  %v96_v2 = vmul.f32 %v15882_v0, %v15882_v0  ;;  %s18146_s3 = sld [smem:[#allocation6_spill]]  ;;  %s18147_s4 = sld [smem:[#allocation7_spill]]  ;;  %v15743_v7 = vmov 0.0|0.0  }
  0x14   :  { %84 = vadd.xlane.f32.xlu0 %v83_v1  ;;  %14981 = vmatprep.subr.bf16.mxu0 %v15743_v7  ;;  %vm15744_vm1 = vmmov 0   ;;  %v15745_v27 = vmov 0.0   ;;  %s18148_s7 = sld [smem:[#allocation8_spill]]  ;;  %vm345_vm2 = vcmask 64512   ;;  %s18149_s26 = sld [smem:[#allocation9_spill]]  ;;  %vm2104_vm3 = vcmask 523264  }
  0x15   :  { %v97_v3 = vsel %vm82_vm0, %v96_v2, 0.0  ;;  %14987 = vmatprep.subr.bf16.mxu1 %v15743_v7  ;;  %13657 = vmatprep.mubr.msk.f32.mxu0 %vm15744_vm1, %v15745_v27 }
  0x16   :  { %13668 = vmatprep.mubr.msk.f32.mxu1 %vm15744_vm1, %v15745_v27 }
  0x18   :  { %98 = vadd.xlane.f32.xlu0 %v97_v3 }
  0x19   :  { %v120_v4 = vld [vmem:[%s18146_s3] sm:$0xff]  ;;  %v121_v5 = vld [vmem:[%s18146_s3 + $0x8] sm:$0xff]  ;;  %v122_v14 = vld [vmem:[%s18146_s3 + $0x10] sm:$0xff] }
  0x1a   :  { %v197_v6 = vld [vmem:[%s18147_s4] sm:$0xff]  ;;  %v14982_v8 = vpack.c.bf16 %v121_v5, %v120_v4  ;;  %v198_v9 = vld [vmem:[%s18147_s4 + $0x8] sm:$0xff]  ;;  %v123_v15 = vld [vmem:[%s18146_s3 + $0x18] sm:$0xff] }
  0x1b   :  { %v14988_v10 = vpack.c.bf16 %v198_v9, %v197_v6  ;;  %v14985_v17 = vpack.c.bf16 %v123_v15, %v122_v14  ;;  %v199_v18 = vld [vmem:[%s18147_s4 + $0x10] sm:$0xff]  ;;  %v200_v19 = vld [vmem:[%s18147_s4 + $0x18] sm:$0xff]  ;;  %v271_v35 = vld [vmem:[%s18148_s7] sm:$0xff] }
  0x1c   :  { %14983 = vmatpush3.bf16.msra.mxu0 %v14982_v8  ;;  %v14991_v22 = vpack.c.bf16 %v200_v19, %v199_v18  ;;  %v272_v36 = vld [vmem:[%s18148_s7 + $0x8] sm:$0xff]  ;;  %v273_v41 = vld [vmem:[%s18148_s7 + $0x10] sm:$0xff]  ;;  %v274_v42 = vld [vmem:[%s18148_s7 + $0x18] sm:$0xff] }
  0x1d   :  { %14989 = vmatpush3.bf16.msra.mxu1 %v14988_v10  ;;  %14984 = vmatprep.subr.bf16.mxu0 %v15743_v7  ;;  %v14994_v39 = vpack.c.bf16 %v272_v36, %v271_v35  ;;  %v14997_v43 = vpack.c.bf16 %v274_v42, %v273_v41  ;;  %v12640_v44 = vld [vmem:[%s18146_s3 + $0x20] sm:$0xff]  ;;  %v12641_v45 = vld [vmem:[%s18146_s3 + $0x28] sm:$0xff]  ;;  %v12642_v51 = vld [vmem:[%s18146_s3 + $0x30] sm:$0xff] }
  0x1e   :  { %14990 = vmatprep.subr.bf16.mxu1 %v15743_v7  ;;  %v15000_v50 = vpack.c.bf16 %v12641_v45, %v12640_v44  ;;  %v12643_v52 = vld [vmem:[%s18146_s3 + $0x38] sm:$0xff]  ;;  %v12650_v54 = vld [vmem:[%s18148_s7 + $0x20] sm:$0xff]  ;;  %v12651_v55 = vld [vmem:[%s18148_s7 + $0x28] sm:$0xff] }
  0x1f   :  { %v15003_v53 = vpack.c.bf16 %v12643_v52, %v12642_v51  ;;  %v15012_v58 = vpack.c.bf16 %v12651_v55, %v12650_v54  ;;  %v12652_v59 = vld [vmem:[%s18148_s7 + $0x30] sm:$0xff]  ;;  %v12653_v60 = vld [vmem:[%s18148_s7 + $0x38] sm:$0xff]  ;;  %v12645_v14 = vld [vmem:[%s18147_s4 + $0x20] sm:$0xff] }
  0x20   :  { %14986 = vmatpush3.bf16.msra.mxu0 %v14985_v17  ;;  %v15015_v61 = vpack.c.bf16 %v12653_v60, %v12652_v59  ;;  %v12646_v15 = vld [vmem:[%s18147_s4 + $0x28] sm:$0xff]  ;;  %v12647_v19 = vld [vmem:[%s18147_s4 + $0x30] sm:$0xff]  ;;  %v507_v41 = vld [vmem:[%s18149_s26] sm:$0xff] }
  0x21   :  { %14992 = vmatpush3.bf16.msra.mxu1 %v14991_v22  ;;  %14993 = vmatprep.subr.bf16.mxu0 %v15743_v7  ;;  %v15006_v17 = vpack.c.bf16 %v12646_v15, %v12645_v14  ;;  %v12658_v36 = vld [vmem:[%s18149_s26 + $0x8] sm:$0xff]  ;;  %v12666_v42 = vld [vmem:[%s18147_s4 + $0x40] sm:$0xff]  ;;  %v12668_v45 = vld [vmem:[%s18147_s4 + $0x50] sm:$0xff] }
  0x22   :  { %13687 = vmatprep.subr.mxu1 %v15745_v27  ;;  %v12663_v51 = vld [vmem:[%s18146_s3 + $0x50] sm:$0xff]  ;;  %v12664_v52 = vld [vmem:[%s18146_s3 + $0x58] sm:$0xff] }
  0x23   :  { %v15021_v55 = vpack.c.bf16 %v12664_v52, %v12663_v51 }
  0xa1   :  { %v85_v11 = vpop.xlane.xlu0 %84 }
  0xa2   :  { %v86_v12 = vrot.slane %v85_v11, 4 }
  0xa4   :  { %v87_v13 = vadd.f32 %v86_v12, %v85_v11 }
  0xa5   :  { %v99_v16 = vpop.xlane.xlu0 %98 }
  0xa6   :  { %v88_v20 = vrot.slane %v87_v13, 2  ;;  %v100_v21 = vrot.slane %v99_v16, 4 }
  0xa8   :  { %v101_v23 = vadd.f32 %v100_v21, %v99_v16  ;;  %v89_v24 = vadd.f32 %v88_v20, %v87_v13  ;;  %v12648_v20 = vld [vmem:[%s18147_s4 + $0x38] sm:$0xff] }
  0xa9   :  { %v15009_v21 = vpack.c.bf16 %v12648_v20, %v12647_v19  ;;  %v12679_v20 = vld [vmem:[%s18149_s26 + $0x10] sm:$0xff] }
  0xaa   :  { %v102_v25 = vrot.slane %v101_v23, 2  ;;  %v90_v26 = vrot.slane %v89_v24, 1 }
  0xac   :  { %v91_v28 = vadd.f32 %v90_v26, %v89_v24  ;;  %v103_v29 = vadd.f32 %v102_v25, %v101_v23 }
  0xae   :  { %15521 = vpush %v91_v28  ;;  %v104_v30 = vrot.slane %v103_v29, 1 }
  0xb0   :  { %v105_v31 = vadd.f32 %v104_v30, %v103_v29 }
  0xb2   :  { %15523 = vpush %v105_v31 }
  0xdf   :  { %s15522_s8 = spop %15521 }
  0xe0   :  { %s95_s27 = smul.f32 0.00390625, %s15522_s8 }
  0xe2   :  { %s110_s28 = smul.f32 %s95_s27, %s95_s27  ;;  %v112_v34 = vstv %s95_s27 }
  0xe3   :  { %s15524_s9 = spop %15523  ;;  %v113_v37 = vsub.f32 %v15882_v0, %v112_v34 }
  0xe4   :  { %s109_s5 = smul.f32 0.00390625, %s15524_s9 }
  0xe6   :  { %s111_s0 = ssub.f32 %s109_s5, %s110_s28  ;;  %s18151_s5 = sld [smem:[#allocation12_spill]] }
  0xe8   :  { %s114_s29 = sadd.f32 1e-05, %s111_s0  ;;  %s18150_s0 = sld [smem:[#allocation10_spill]] }
  0xea   :  { %v115_v32 = vstv %s114_s29 }
  0xeb   :  { %15599 = vrsqrt.f32 %v115_v32 }
  0xf5   :  { %v15600_v33 = vpop.eup %15599 }
  0xf6   :  { %15525 = vpush %v15600_v33 }
 0x127   :  { %s15526_s8 = spop %15525 }
 0x128   :  { %v118_v38 = vstv %s15526_s8 }
 0x129   :  { %v15930_v40 = vmul.f32 %v118_v38, %v113_v37 }
 0x12b   :  { %13658 = vmatmul.mubr.msk.f32.vlgmr.msra.gmra.mrb[0].mxu0 %vm82_vm0, %v15930_v40  ;;  %13669 = vmatmul.mubr.msk.f32.vlgmr.msra.gmra.mrb[0].mxu1 %vm82_vm0, %v15930_v40 }
 0x12c   :  { %14995 = vmatpush3.bf16.msra.mxu0 %v14994_v39  ;;  %13679 = vmatprep.mubr.msk.f32.mxu0 %vm15744_vm1, %v15745_v27 }
 0x12d   :  { %14996 = vmatprep.subr.bf16.mxu0 %v15743_v7  ;;  %13689 = vmatprep.mubr.msk.f32.mxu1 %vm15744_vm1, %v15745_v27 }
 0x130   :  { %14998 = vmatpush3.bf16.msra.mxu0 %v14997_v43  ;;  %v12667_v43 = vld [vmem:[%s18147_s4 + $0x48] sm:$0xff] }
 0x131   :  { %13682 = vmatprep.subr.mxu0 %v15745_v27  ;;  %v15024_v44 = vpack.c.bf16 %v12667_v43, %v12666_v42  ;;  %v12689_v42 = vld [vmem:[%s18147_s4 + $0x78] sm:$0xff] }
 0x133   :  { %13680 = vmatmul.mubr.msk.f32.vlgmr.msra.gmra.mrb[2].mxu0 %vm82_vm0, %v15930_v40 }
 0x134   :  { %13684 = vmatprep.mubr.msk.f32.mxu0 %vm15744_vm1, %v15745_v27 }
 0x1fe   :  { %v193_v46 = vpop.f32.mrb[0].mxu0  ;;  %v267_v47 = vpop.f32.mrb[0].mxu1 }
 0x1ff   :  { %v13659_v48 = vpop.f32.mrb[1].mxu0  ;;  %v13670_v49 = vpop.f32.mrb[1].mxu1  ;;  %13683 = vmatpush3.xpose.msk.msra.mxu0 %vm345_vm2, %v267_v47 }
 0x200   :  { %14999 = vmatprep.subr.bf16.mxu0 %v15743_v7  ;;  %v12661_v48 = vld [vmem:[%s18146_s3 + $0x40] sm:$0xff]  ;;  %v12662_v49 = vld [vmem:[%s18146_s3 + $0x48] sm:$0xff] }
 0x202   :  { %13685 = vmatmul.mubr.msk.f32.vlgmr.msra.gmra.mrb[4].mxu0 %vm345_vm2, %v193_v46  ;;  %v12669_v46 = vld [vmem:[%s18147_s4 + $0x58] sm:$0xff] }
 0x203   :  { %15001 = vmatpush3.bf16.msra.mxu0 %v15000_v50  ;;  %13700 = vmatprep.mubr.msk.f32.mxu0 %vm15744_vm1, %v15745_v27  ;;  %v15027_v47 = vpack.c.bf16 %v12669_v46, %v12668_v45  ;;  %v15018_v50 = vpack.c.bf16 %v12662_v49, %v12661_v48 }
 0x204   :  { %15002 = vmatprep.subr.bf16.mxu0 %v15743_v7 }
 0x206   :  { %v341_v56 = vpop.f32.mrb[2].mxu0 }
 0x207   :  { %v13681_v57 = vpop.f32.mrb[3].mxu0  ;;  %13688 = vmatpush3.msra.mxu1 %v341_v56  ;;  %15004 = vmatpush3.bf16.msra.mxu0 %v15003_v53  ;;  %v12671_v56 = vld [vmem:[%s18148_s7 + $0x40] sm:$0xff] }
 0x208   :  { %15011 = vmatprep.subr.bf16.mxu0 %v15743_v7  ;;  %15005 = vmatprep.subr.bf16.mxu1 %v15743_v7  ;;  %v12672_v57 = vld [vmem:[%s18148_s7 + $0x48] sm:$0xff] }
 0x209   :  { %v15030_v60 = vpack.c.bf16 %v12672_v57, %v12671_v56 }
 0x20a   :  { %13701 = vmatmul.mubr.msk.f32.vlgmr.msra.gmra.mrb[6].mxu0 %vm82_vm0, %v15930_v40 }
 0x20b   :  { %15013 = vmatpush3.bf16.msra.mxu0 %v15012_v58  ;;  %13722 = vmatprep.mubr.msk.f32.mxu0 %vm15744_vm1, %v15745_v27 }
 0x20c   :  { %15014 = vmatprep.subr.bf16.mxu0 %v15743_v7 }
 0x20f   :  { %15016 = vmatpush3.bf16.msra.mxu0 %v15015_v61  ;;  %v12673_v61 = vld [vmem:[%s18148_s7 + $0x50] sm:$0xff] }
 0x210   :  { %13735 = vmatprep.subr.mxu0 %v15745_v27 }
 0x212   :  { %13723 = vmatmul.mubr.msk.f32.vlgmr.msra.gmra.mrb[8].mxu0 %vm82_vm0, %v15930_v40 }
 0x213   :  { %13737 = vmatprep.mubr.msk.f32.mxu0 %vm15744_vm1, %v15745_v27  ;;  %13736 = vmatpush3.msra.mxu0 %v12658_v36 }
 0x214   :  { %15017 = vmatprep.subr.bf16.mxu0 %v15743_v7 }
 0x2d5   :  { %v418_v62 = vpop.f32.mrb[4].mxu0 }
 0x2d6   :  { %v422_v63 = vmul.f32 0.35355338, %v418_v62  ;;  %v13686_v1 = vpop.f32.mrb[5].mxu0  ;;  %v12674_v62 = vld [vmem:[%s18148_s7 + $0x58] sm:$0xff] }
 0x2d8   :  { %v423_v2 = vsel %vm345_vm2, %v422_v63, -inf }
 0x2d9   :  { %424 = vmax.xlane.f32.xlu1 %v423_v2 }
 0x2dd   :  { %v579_v3 = vpop.f32.mrb[6].mxu0 }
 0x2de   :  { %v13702_v4 = vpop.f32.mrb[7].mxu0 }
 0x2e5   :  { %v729_v5 = vpop.f32.mrb[8].mxu0 }
 0x2e6   :  { %v13724_v6 = vpop.f32.mrb[9].mxu0 }
 0x366   :  { %v425_v8 = vpop.xlane.xlu1 %424 }
 0x367   :  { %v426_v9 = vsub.f32 %v422_v63, %v425_v8  ;;  %v15033_v63 = vpack.c.bf16 %v12674_v62, %v12673_v61 }
 0x369   :  { %v427_v10 = vmul.f32 1.442695, %v426_v9 }
 0x36b   :  { %15601 = vpow2.f32 %v427_v10 }
 0x375   :  { %v15602_v11 = vpop.eup %15601 }
 0x376   :  { %v429_v12 = vsel %vm345_vm2, %v15602_v11, 0.0 }
 0x377   :  { %430 = vadd.xlane.f32.xlu1 %v429_v12 }
 0x404   :  { %v431_v13 = vpop.xlane.xlu1 %430 }
 0x405   :  { %15603 = vrcp.f32 %v431_v13 }
 0x40f   :  { %v15604_v16 = vpop.eup %15603 }
 0x410   :  { %v433_v18 = vmul.f32 %v15604_v16, %v15602_v11 }
 0x412   :  { %13690 = vmatmul.mubr.msk.f32.vlgmr.msra.gmra.mrb[2].mxu1 %vm345_vm2, %v433_v18 }
 0x413   :  { %15007 = vmatpush3.bf16.msra.mxu1 %v15006_v17  ;;  %13711 = vmatprep.mubr.msk.f32.mxu1 %vm15744_vm1, %v15745_v27 }
 0x414   :  { %15008 = vmatprep.subr.bf16.mxu1 %v15743_v7 }
 0x417   :  { %15010 = vmatpush3.bf16.msra.mxu1 %v15009_v21 }
 0x418   :  { %13725 = vmatprep.subr.mxu1 %v15745_v27 }
 0x41a   :  { %13712 = vmatmul.mubr.msk.f32.vlgmr.msra.gmra.mrb[4].mxu1 %vm82_vm0, %v15930_v40 }
 0x41b   :  { %13727 = vmatprep.mubr.msk.f32.mxu1 %vm15744_vm1, %v15745_v27 }
 0x4e5   :  { %v503_v22 = vpop.f32.mrb[2].mxu1 }
 0x4e6   :  { %v13691_v23 = vpop.f32.mrb[3].mxu1 }
 0x4e7   :  { %v12682_v23 = vld [vmem:[%s18146_s3 + $0x68] sm:$0xff] }
 0x4ed   :  { %v654_v24 = vpop.f32.mrb[4].mxu1 }
 0x4ee   :  { %v13713_v25 = vpop.f32.mrb[5].mxu1  ;;  %13726 = vmatpush3.xpose.msk.msra.mxu1 %vm345_vm2, %v654_v24 }
 0x4ef   :  { %13730 = vmatprep.subr.mxu1 %v15745_v27 }
 0x4f1   :  { %13728 = vmatmul.mubr.msk.f32.vlgmr.msra.gmra.mrb[6].mxu1 %vm345_vm2, %v579_v3 }
 0x4f2   :  { %13731 = vmatpush3.msra.mxu1 %v729_v5  ;;  %13732 = vmatprep.mubr.msk.f32.mxu1 %vm15744_vm1, %v15745_v27 }
 0x4f3   :  { %13740 = vmatprep.subr.mxu1 %v15745_v27 }
 0x5c4   :  { %v805_v26 = vpop.f32.mrb[6].mxu1 }
 0x5c5   :  { %v809_v28 = vmul.f32 0.35355338, %v805_v26  ;;  %v13729_v29 = vpop.f32.mrb[7].mxu1 }
 0x5c6   :  { %v12684_v29 = vld [vmem:[%s18146_s3 + $0x78] sm:$0xff] }
 0x5c7   :  { %v810_v30 = vsel %vm345_vm2, %v809_v28, -inf }
 0x5c8   :  { %811 = vmax.xlane.f32.xlu0 %v810_v30 }
 0x655   :  { %v812_v31 = vpop.xlane.xlu0 %811 }
 0x656   :  { %v813_v32 = vsub.f32 %v809_v28, %v812_v31  ;;  %v12683_v28 = vld [vmem:[%s18146_s3 + $0x70] sm:$0xff]  ;;  %v12691_v31 = vld [vmem:[%s18148_s7 + $0x60] sm:$0xff] }
 0x657   :  { %v15039_v30 = vpack.c.bf16 %v12684_v29, %v12683_v28 }
 0x658   :  { %v814_v33 = vmul.f32 1.442695, %v813_v32  ;;  %v12692_v32 = vld [vmem:[%s18148_s7 + $0x68] sm:$0xff] }
 0x65a   :  { %15605 = vpow2.f32 %v814_v33  ;;  %v15048_v33 = vpack.c.bf16 %v12692_v32, %v12691_v31  ;;  %v2089_v31 = vld [vmem:[%s18151_s5] sm:$0xff]  ;;  %v2090_v32 = vld [vmem:[%s18151_s5 + $0x8] sm:$0xff] }
 0x664   :  { %v15606_v34 = vpop.eup %15605 }
 0x665   :  { %v816_v35 = vsel %vm345_vm2, %v15606_v34, 0.0 }
 0x666   :  { %817 = vadd.xlane.f32.xlu1 %v816_v35  ;;  %v12694_v35 = vld [vmem:[%s18148_s7 + $0x78] sm:$0xff] }
 0x6f3   :  { %v818_v37 = vpop.xlane.xlu1 %817 }
 0x6f4   :  { %15607 = vrcp.f32 %v818_v37  ;;  %v12686_v37 = vld [vmem:[%s18147_s4 + $0x60] sm:$0xff] }
 0x6fe   :  { %v15608_v38 = vpop.eup %15607 }
 0x6ff   :  { %v820_v39 = vmul.f32 %v15608_v38, %v15606_v34  ;;  %v12693_v34 = vld [vmem:[%s18148_s7 + $0x70] sm:$0xff]  ;;  %v12687_v38 = vld [vmem:[%s18147_s4 + $0x68] sm:$0xff] }
 0x700   :  { %v15051_v36 = vpack.c.bf16 %v12694_v35, %v12693_v34  ;;  %v15060_v34 = vpack.c.bf16 %v2090_v32, %v2089_v31  ;;  %v2092_v35 = vld [vmem:[%s18151_s5 + $0x18] sm:$0xff]  ;;  %v2293_v32 = vld [vmem:[%s18104_s10] sm:$0xff] }
 0x701   :  { %13733 = vmatmul.mubr.msk.f32.vlgmr.msra.gmra.mrb[8].mxu1 %vm345_vm2, %v820_v39  ;;  %v15042_v39 = vpack.c.bf16 %v12687_v38, %v12686_v37 }
 0x702   :  { %13741 = vmatpush3.msra.mxu1 %v507_v41  ;;  %13742 = vmatprep.mubr.msk.f32.mxu1 %vm15744_vm1, %v15745_v27  ;;  %v12688_v41 = vld [vmem:[%s18147_s4 + $0x70] sm:$0xff] }
 0x703   :  { %15023 = vmatprep.subr.bf16.mxu1 %v15743_v7  ;;  %v15045_v45 = vpack.c.bf16 %v12689_v42, %v12688_v41  ;;  %v2093_v41 = vld [vmem:[%s18151_s5 + $0x20] sm:$0xff]  ;;  %v2094_v42 = vld [vmem:[%s18151_s5 + $0x28] sm:$0xff] }
 0x705   :  { %13743 = vmatmul.mubr.msk.f32.vlgmr.msra.gmra.mrb[10].mxu1 %vm345_vm2, %v503_v22  ;;  %v12681_v22 = vld [vmem:[%s18146_s3 + $0x60] sm:$0xff] }
 0x706   :  { %15025 = vmatpush3.bf16.msra.mxu1 %v15024_v44  ;;  %13764 = vmatprep.mubr.msk.f32.mxu1 %vm15744_vm1, %v15745_v27  ;;  %v15036_v25 = vpack.c.bf16 %v12682_v23, %v12681_v22  ;;  %v2007_v22 = vld [vmem:[%s18150_s0 + $0x18] sm:$0xff] }
 0x707   :  { %15026 = vmatprep.subr.bf16.mxu1 %v15743_v7 }
 0x70a   :  { %15028 = vmatpush3.bf16.msra.mxu1 %v15027_v47 }
 0x70b   :  { %13778 = vmatprep.subr.mxu1 %v15745_v27 }
 0x70d   :  { %13765 = vmatmul.mubr.msk.f32.vlgmr.msra.gmra.mrb[12].mxu1 %vm82_vm0, %v15930_v40 }
 0x70e   :  { %13780 = vmatprep.mubr.msk.f32.mxu1 %vm15744_vm1, %v15745_v27 }
 0x7d4   :  { %v890_v53 = vpop.f32.mrb[8].mxu1 }
 0x7d5   :  { %v13734_v54 = vpop.f32.mrb[9].mxu1  ;;  %13738 = vmatmul.mubr.msk.f32.vlgmr.msra.gmra.mrb[10].mxu0 %vm345_vm2, %v890_v53 }
 0x7d6   :  { %15019 = vmatpush3.bf16.msra.mxu0 %v15018_v50  ;;  %13753 = vmatprep.mubr.msk.f32.mxu0 %vm15744_vm1, %v15745_v27 }
 0x7d7   :  { %15020 = vmatprep.subr.bf16.mxu0 %v15743_v7 }
 0x7d8   :  { %v1038_v58 = vpop.f32.mrb[10].mxu1 }
 0x7d9   :  { %v13744_v59 = vpop.f32.mrb[11].mxu1 }
 0x7da   :  { %15022 = vmatpush3.bf16.msra.mxu0 %v15021_v55 }
 0x7db   :  { %15029 = vmatprep.subr.bf16.mxu0 %v15743_v7 }
 0x7dd   :  { %13754 = vmatmul.mubr.msk.f32.vlgmr.msra.gmra.mrb[12].mxu0 %vm82_vm0, %v15930_v40 }
 0x7de   :  { %15031 = vmatpush3.bf16.msra.mxu0 %v15030_v60  ;;  %13775 = vmatprep.mubr.msk.f32.mxu0 %vm15744_vm1, %v15745_v27 }
 0x7df   :  { %15032 = vmatprep.subr.bf16.mxu0 %v15743_v7 }
 0x7e0   :  { %v1188_v1 = vpop.f32.mrb[12].mxu1 }
 0x7e1   :  { %v13766_v2 = vpop.f32.mrb[13].mxu1  ;;  %13779 = vmatpush3.xpose.msk.msra.mxu1 %vm345_vm2, %v1188_v1 }
 0x7e2   :  { %15034 = vmatpush3.bf16.msra.mxu0 %v15033_v63  ;;  %13783 = vmatprep.subr.mxu1 %v15745_v27  ;;  %v12699_v63 = vld [vmem:[%s18149_s26 + $0x18] sm:$0xff] }
 0x7e3   :  { %13788 = vmatprep.subr.mxu0 %v15745_v27 }
 0x7e5   :  { %13776 = vmatmul.mubr.msk.f32.vlgmr.msra.gmra.mrb[14].mxu0 %vm82_vm0, %v15930_v40 }
 0x7e6   :  { %13790 = vmatprep.mubr.msk.f32.mxu0 %vm15744_vm1, %v15745_v27  ;;  %13789 = vmatpush3.msra.mxu0 %v12679_v20 }
 0x7e7   :  { %15041 = vmatprep.subr.bf16.mxu0 %v15743_v7 }
 0x8a8   :  { %v965_v3 = vpop.f32.mrb[10].mxu0 }
 0x8a9   :  { %v16098_v4 = vadd.f32 %v1038_v58, %v965_v3  ;;  %v13739_v5 = vpop.f32.mrb[11].mxu0 }
 0x8b0   :  { %v1113_v6 = vpop.f32.mrb[12].mxu0 }
 0x8b1   :  { %v13755_v8 = vpop.f32.mrb[13].mxu0  ;;  %13781 = vmatmul.mubr.msk.f32.vlgmr.msra.gmra.mrb[14].mxu1 %vm345_vm2, %v1113_v6 }
 0x8b2   :  { %13785 = vmatprep.mubr.msk.f32.mxu1 %vm15744_vm1, %v15745_v27 }
 0x8b8   :  { %v1263_v9 = vpop.f32.mrb[14].mxu0 }
 0x8b9   :  { %v13777_v10 = vpop.f32.mrb[15].mxu0  ;;  %13784 = vmatpush3.msra.mxu1 %v1263_v9 }
 0x8ba   :  { %15035 = vmatprep.subr.bf16.mxu1 %v15743_v7 }
 0x984   :  { %v1339_v11 = vpop.f32.mrb[14].mxu1 }
 0x985   :  { %v1343_v12 = vmul.f32 0.35355338, %v1339_v11  ;;  %v13782_v13 = vpop.f32.mrb[15].mxu1 }
 0x987   :  { %v1344_v14 = vsel %vm345_vm2, %v1343_v12, -inf }
 0x988   :  { %1345 = vmax.xlane.f32.xlu0 %v1344_v14  ;;  %v2004_v14 = vld [vmem:[%s18150_s0] sm:$0xff] }
 0xa15   :  { %v1346_v15 = vpop.xlane.xlu0 %1345 }
 0xa16   :  { %v1347_v16 = vsub.f32 %v1343_v12, %v1346_v15  ;;  %v2005_v15 = vld [vmem:[%s18150_s0 + $0x8] sm:$0xff] }
 0xa18   :  { %v1348_v17 = vmul.f32 1.442695, %v1347_v16 }
 0xa1a   :  { %15609 = vpow2.f32 %v1348_v17 }
 0xa24   :  { %v15610_v18 = vpop.eup %15609 }
 0xa25   :  { %v1350_v19 = vsel %vm345_vm2, %v15610_v18, 0.0 }
 0xa26   :  { %1351 = vadd.xlane.f32.xlu1 %v1350_v19 }
 0xab3   :  { %v1352_v21 = vpop.xlane.xlu1 %1351 }
 0xab4   :  { %15611 = vrcp.f32 %v1352_v21  ;;  %v2006_v21 = vld [vmem:[%s18150_s0 + $0x10] sm:$0xff] }
 0xab5   :  { %v15057_v23 = vpack.c.bf16 %v2007_v22, %v2006_v21 }
 0xabe   :  { %v15612_v24 = vpop.eup %15611 }
 0xabf   :  { %v1354_v26 = vmul.f32 %v15612_v24, %v15610_v18 }
 0xac1   :  { %13786 = vmatmul.mubr.msk.f32.vlgmr.msra.gmra.mrb[16].mxu1 %vm345_vm2, %v1354_v26 }
 0xac2   :  { %15037 = vmatpush3.bf16.msra.mxu1 %v15036_v25  ;;  %13801 = vmatprep.mubr.msk.f32.mxu1 %vm15744_vm1, %v15745_v27 }
 0xac3   :  { %15038 = vmatprep.subr.bf16.mxu1 %v15743_v7 }
 0xac6   :  { %15040 = vmatpush3.bf16.msra.mxu1 %v15039_v30 }
 0xac7   :  { %15047 = vmatprep.subr.bf16.mxu1 %v15743_v7 }
 0xac9   :  { %13802 = vmatmul.mubr.msk.f32.vlgmr.msra.gmra.mrb[18].mxu1 %vm82_vm0, %v15930_v40 }
 0xaca   :  { %15049 = vmatpush3.bf16.msra.mxu1 %v15048_v33  ;;  %13823 = vmatprep.mubr.msk.f32.mxu1 %vm15744_vm1, %v15745_v27  ;;  %v2091_v33 = vld [vmem:[%s18151_s5 + $0x10] sm:$0xff] }
 0xacb   :  { %15050 = vmatprep.subr.bf16.mxu1 %v15743_v7  ;;  %v15063_v38 = vpack.c.bf16 %v2092_v35, %v2091_v33  ;;  %v2294_v33 = vld [vmem:[%s18104_s10 + $0x8] sm:$0xff] }
 0xace   :  { %15052 = vmatpush3.bf16.msra.mxu1 %v15051_v36 }
 0xacf   :  { %13836 = vmatprep.subr.mxu1 %v15745_v27 }
 0xad1   :  { %13824 = vmatmul.mubr.msk.f32.vlgmr.msra.gmra.mrb[20].mxu1 %vm82_vm0, %v15930_v40 }
 0xad2   :  { %13838 = vmatprep.mubr.msk.f32.mxu1 %vm15744_vm1, %v15745_v27  ;;  %13837 = vmatpush3.msra.mxu1 %v12699_v63 }
 0xad3   :  { %15059 = vmatprep.subr.bf16.mxu1 %v15743_v7 }
 0xb94   :  { %v1424_v43 = vpop.f32.mrb[16].mxu1 }
 0xb95   :  { %v13787_v44 = vpop.f32.mrb[17].mxu1  ;;  %13791 = vmatmul.mubr.msk.f32.vlgmr.msra.gmra.mrb[16].mxu0 %vm345_vm2, %v1424_v43  ;;  %v15066_v43 = vpack.c.bf16 %v2094_v42, %v2093_v41 }
 0xb96   :  { %15043 = vmatpush3.bf16.msra.mxu0 %v15042_v39  ;;  %13812 = vmatprep.mubr.msk.f32.mxu0 %vm15744_vm1, %v15745_v27 }
 0xb97   :  { %15044 = vmatprep.subr.bf16.mxu0 %v15743_v7 }
 0xb9a   :  { %15046 = vmatpush3.bf16.msra.mxu0 %v15045_v45 }
 0xb9b   :  { %13826 = vmatprep.subr.mxu0 %v15745_v27 }
 0xb9c   :  { %v1575_v46 = vpop.f32.mrb[18].mxu1 }
 0xb9d   :  { %v13803_v47 = vpop.f32.mrb[19].mxu1  ;;  %13813 = vmatmul.mubr.msk.f32.vlgmr.msra.gmra.mrb[18].mxu0 %vm82_vm0, %v15930_v40 }
 0xb9e   :  { %13828 = vmatprep.mubr.msk.f32.mxu0 %vm15744_vm1, %v15745_v27 }
 0xba4   :  { %v1725_v48 = vpop.f32.mrb[20].mxu1 }
 0xba5   :  { %v13825_v49 = vpop.f32.mrb[21].mxu1 }
 0xc68   :  { %v1499_v50 = vpop.f32.mrb[16].mxu0 }
 0xc69   :  { %v1503_v51 = vadd.f32 %v1499_v50, %v16098_v4  ;;  %v13792_v52 = vpop.f32.mrb[17].mxu0  ;;  %v2095_v50 = vld [vmem:[%s18151_s5 + $0x30] sm:$0xff] }
 0xc70   :  { %v1650_v53 = vpop.f32.mrb[18].mxu0 }
 0xc71   :  { %v13814_v54 = vpop.f32.mrb[19].mxu0  ;;  %13827 = vmatpush3.xpose.msk.msra.mxu0 %vm345_vm2, %v1650_v53 }
 0xc72   :  { %13831 = vmatprep.subr.mxu0 %v15745_v27 }
 0xc74   :  { %13829 = vmatmul.mubr.msk.f32.vlgmr.msra.gmra.mrb[20].mxu0 %vm345_vm2, %v1575_v46 }
 0xc75   :  { %13832 = vmatpush3.msra.mxu0 %v1725_v48  ;;  %13833 = vmatprep.mubr.msk.f32.mxu0 %vm15744_vm1, %v15745_v27 }
 0xc76   :  { %15053 = vmatprep.subr.bf16.mxu0 %v15743_v7 }
 0xd47   :  { %v1801_v40 = vpop.f32.mrb[20].mxu0 }
 0xd48   :  { %v1805_v55 = vmul.f32 0.35355338, %v1801_v40  ;;  %v13830_v56 = vpop.f32.mrb[21].mxu0 }
 0xd4a   :  { %v1806_v57 = vsel %vm345_vm2, %v1805_v55, -inf }
 0xd4b   :  { %1807 = vmax.xlane.f32.xlu0 %v1806_v57 }
 0xdd8   :  { %v1808_v58 = vpop.xlane.xlu0 %1807 }
 0xdd9   :  { %v1809_v59 = vsub.f32 %v1805_v55, %v1808_v58 }
 0xddb   :  { %v1810_v60 = vmul.f32 1.442695, %v1809_v59 }
 0xddd   :  { %15613 = vpow2.f32 %v1810_v60 }
 0xde7   :  { %v15614_v61 = vpop.eup %15613 }
 0xde8   :  { %v1812_v62 = vsel %vm345_vm2, %v15614_v61, 0.0 }
 0xde9   :  { %1813 = vadd.xlane.f32.xlu1 %v1812_v62 }
 0xe76   :  { %v1814_v1 = vpop.xlane.xlu1 %1813 }
 0xe77   :  { %15615 = vrcp.f32 %v1814_v1 }
 0xe81   :  { %v15616_v2 = vpop.eup %15615 }
 0xe82   :  { %v1816_v3 = vmul.f32 %v15616_v2, %v15614_v61 }
 0xe84   :  { %13834 = vmatmul.mubr.msk.f32.vlgmr.msra.gmra.mrb[22].mxu0 %vm345_vm2, %v1816_v3 }
 0xe85   :  { %13849 = vmatprep.mubr.msk.f32.mxu0 %vm15744_vm1, %v15745_v27 }
 0xf57   :  { %v1886_v4 = vpop.f32.mrb[22].mxu0 }
 0xf58   :  { %v13835_v5 = vpop.f32.mrb[23].mxu0  ;;  %13839 = vmatmul.mubr.msk.f32.vlgmr.msra.gmra.mrb[22].mxu1 %vm345_vm2, %v1886_v4  ;;  %v2367_v4 = vld [vmem:[%s18105_s11] sm:$0xff] }
 0xf59   :  { %13868 = vmatprep.mubr.msk.f32.mxu1 %vm15744_vm1, %v15745_v27  ;;  %15061 = vmatpush3.bf16.msra.mxu1 %v15060_v34 }
 0xf5a   :  { %15062 = vmatprep.subr.bf16.mxu1 %v15743_v7 }
 0xf5d   :  { %15064 = vmatpush3.bf16.msra.mxu1 %v15063_v38  ;;  %v2295_v38 = vld [vmem:[%s18104_s10 + $0x10] sm:$0xff] }
 0xf5e   :  { %15065 = vmatprep.subr.bf16.mxu1 %v15743_v7 }
 0xf61   :  { %15067 = vmatpush3.bf16.msra.mxu1 %v15066_v43 }
 0xf62   :  { %15068 = vmatprep.subr.bf16.mxu1 %v15743_v7 }
0x102b   :  { %v1961_v6 = vpop.f32.mrb[22].mxu1 }
0x102c   :  { %v1965_v8 = vadd.f32 %v1961_v6, %v1503_v51  ;;  %v13840_v9 = vpop.f32.mrb[23].mxu1  ;;  %v2096_v51 = vld [vmem:[%s18151_s5 + $0x38] sm:$0xff]  ;;  %v2368_v6 = vld [vmem:[%s18105_s11 + $0x8] sm:$0xff] }
0x102d   :  { %v15069_v52 = vpack.c.bf16 %v2096_v51, %v2095_v50 }
0x102e   :  { %v16190_v10 = vadd.f32 %v1965_v8, %v15882_v0  ;;  %v15054_v0 = vpack.c.bf16 %v2005_v15, %v2004_v14  ;;  %v15084_v8 = vpack.c.bf16 %v2368_v6, %v2367_v4 }
0x102f   :  { %15070 = vmatpush3.bf16.msra.mxu1 %v15069_v52 }
0x1030   :  { %v1967_v11 = vsel %vm82_vm0, %v16190_v10, 0.0  ;;  %v1980_v12 = vmul.f32 %v16190_v10, %v16190_v10  ;;  %15055 = vmatpush3.bf16.msra.mxu0 %v15054_v0  ;;  %15083 = vmatprep.subr.bf16.mxu1 %v15743_v7 }
0x1031   :  { %1968 = vadd.xlane.f32.xlu0 %v1967_v11  ;;  %15056 = vmatprep.subr.bf16.mxu0 %v15743_v7 }
0x1032   :  { %v1981_v13 = vsel %vm82_vm0, %v1980_v12, 0.0 }
0x1033   :  { %1982 = vadd.xlane.f32.xlu1 %v1981_v13 }
0x1034   :  { %15058 = vmatpush3.bf16.msra.mxu0 %v15057_v23 }
0x1035   :  { %15071 = vmatprep.subr.bf16.mxu0 %v15743_v7 }
0x10be   :  { %v1969_v16 = vpop.xlane.xlu0 %1968 }
0x10bf   :  { %v1970_v17 = vrot.slane %v1969_v16, 4 }
0x10c0   :  { %v1983_v18 = vpop.xlane.xlu1 %1982 }
0x10c1   :  { %v1971_v19 = vadd.f32 %v1970_v17, %v1969_v16  ;;  %v1984_v20 = vrot.slane %v1983_v18, 4  ;;  %v2369_v16 = vld [vmem:[%s18105_s11 + $0x10] sm:$0xff]  ;;  %v2370_v17 = vld [vmem:[%s18105_s11 + $0x18] sm:$0xff] }
0x10c3   :  { %v1972_v24 = vrot.slane %v1971_v19, 2  ;;  %v1985_v25 = vadd.f32 %v1984_v20, %v1983_v18  ;;  %v15087_v18 = vpack.c.bf16 %v2370_v17, %v2369_v16  ;;  %v12718_v16 = vld [vmem:[%s18104_s10 + $0x30] sm:$0xff]  ;;  %v12719_v17 = vld [vmem:[%s18104_s10 + $0x38] sm:$0xff] }
0x10c5   :  { %v1986_v26 = vrot.slane %v1985_v25, 2  ;;  %v1973_v28 = vadd.f32 %v1972_v24, %v1971_v19 }
0x10c7   :  { %v1974_v29 = vrot.slane %v1973_v28, 1  ;;  %v1987_v30 = vadd.f32 %v1986_v26, %v1985_v25 }
0x10c9   :  { %v1975_v36 = vadd.f32 %v1974_v29, %v1973_v28  ;;  %v1988_v37 = vrot.slane %v1987_v30, 1 }
0x10cb   :  { %15527 = vpush %v1975_v36  ;;  %v1989_v39 = vadd.f32 %v1988_v37, %v1987_v30  ;;  %v15078_v36 = vpack.c.bf16 %v2294_v33, %v2293_v32  ;;  %v12729_v33 = vld [vmem:[%s18106_s12 + $0x8] sm:$0xff] }
0x10cd   :  { %15529 = vpush %v1989_v39  ;;  %v2296_v39 = vld [vmem:[%s18104_s10 + $0x18] sm:$0xff] }
0x10ce   :  { %v15081_v41 = vpack.c.bf16 %v2296_v39, %v2295_v38  ;;  %v2602_v38 = vld [vmem:[%s18106_s12] sm:$0xff] }
0x10cf   :  { %v12737_v39 = vld [vmem:[%s18104_s10 + $0x40] sm:$0xff] }
0x10fc   :  { %s15528_s30 = spop %15527 }
0x10fd   :  { %s1979_s1 = smul.f32 0.00390625, %s15528_s30 }
0x10fe   :  { %s15530_s8 = spop %15529 }
0x10ff   :  { %s1994_s28 = smul.f32 %s1979_s1, %s1979_s1  ;;  %v1996_v46 = vstv %s1979_s1 }
0x1100   :  { %s1993_s25 = smul.f32 0.00390625, %s15530_s8  ;;  %v1997_v47 = vsub.f32 %v16190_v10, %v1996_v46  ;;  %s18152_s8 = sld [smem:[#allocation11_spill]] }
0x1102   :  { %s1995_s0 = ssub.f32 %s1993_s25, %s1994_s28  ;;  %s18154_s25 = sld [smem:[#allocation14_spill]] }
0x1104   :  { %s1998_s9 = sadd.f32 1e-05, %s1995_s0 }
0x1106   :  { %v1999_v44 = vstv %s1998_s9  ;;  %v12701_v53 = vld [vmem:[%s18152_s8] ss:$0 sm:$0xff] }
0x1107   :  { %15617 = vrsqrt.f32 %v1999_v44 }
0x1108   :  { %v2216_v2 = vld [vmem:[%s18154_s25] sm:$0xff]  ;;  %v2217_v3 = vld [vmem:[%s18154_s25 + $0x8] sm:$0xff]  ;;  %v2218_v12 = vld [vmem:[%s18154_s25 + $0x10] sm:$0xff] }
0x1109   :  { %v15072_v5 = vpack.c.bf16 %v2217_v3, %v2216_v2  ;;  %v2219_v13 = vld [vmem:[%s18154_s25 + $0x18] sm:$0xff]  ;;  %v12711_v46 = vld [vmem:[%s18154_s25 + $0x20] sm:$0xff]  ;;  %v12713_v51 = vld [vmem:[%s18154_s25 + $0x30] sm:$0xff] }
0x110a   :  { %v15075_v0 = vpack.c.bf16 %v2219_v13, %v2218_v12  ;;  %v12714_v52 = vld [vmem:[%s18154_s25 + $0x38] sm:$0xff]  ;;  %v12716_v12 = vld [vmem:[%s18104_s10 + $0x20] sm:$0xff]  ;;  %v12717_v13 = vld [vmem:[%s18104_s10 + $0x28] sm:$0xff] }
0x1111   :  { %v15618_v45 = vpop.eup %15617 }
0x1112   :  { %15531 = vpush %v15618_v45 }
0x1143   :  { %s15532_s27 = spop %15531 }
0x1144   :  { %v2002_v48 = vstv %s15532_s27  ;;  %s18153_s27 = sld [smem:[#allocation13_spill]] }
0x1145   :  { %v2003_v49 = vmul.f32 %v2002_v48, %v1997_v47  ;;  %v12712_v47 = vld [vmem:[%s18154_s25 + $0x28] sm:$0xff] }
0x1146   :  { %v15090_v50 = vpack.c.bf16 %v12712_v47, %v12711_v46  ;;  %v12732_v46 = vld [vmem:[%s18154_s25 + $0x40] sm:$0xff]  ;;  %v12733_v47 = vld [vmem:[%s18154_s25 + $0x48] sm:$0xff] }
0x1147   :  { %13850 = vmatmul.mubr.msk.f32.vlgmr.msra.gmra.mrb[24].mxu0 %vm82_vm0, %v2003_v49 }
0x1148   :  { %13879 = vmatprep.mubr.msk.f32.mxu0 %vm15744_vm1, %v15745_v27  ;;  %15073 = vmatpush3.bf16.msra.mxu0 %v15072_v5 }
0x1149   :  { %15074 = vmatprep.subr.bf16.mxu0 %v15743_v7 }
0x114a   :  { %v12703_v57 = vld [vmem:[%s18153_s27] ss:$0 sm:$0xff] }
0x114c   :  { %15076 = vmatpush3.bf16.msra.mxu0 %v15075_v0 }
0x114d   :  { %15077 = vmatprep.subr.bf16.mxu0 %v15743_v7 }
0x121a   :  { %v2084_v54 = vpop.f32.mrb[24].mxu0 }
0x121b   :  { %v2085_v40 = vadd.f32 %v12701_v53, %v2084_v54  ;;  %v13851_v55 = vpop.f32.mrb[25].mxu0  ;;  %v15093_v53 = vpack.c.bf16 %v12714_v52, %v12713_v51  ;;  %v12721_v54 = vld [vmem:[%s18105_s11 + $0x20] sm:$0xff] }
0x121d   :  { %v2088_v56 = vmax.f32 %v2085_v40, 0.0  ;;  %v12722_v40 = vld [vmem:[%s18105_s11 + $0x28] sm:$0xff] }
0x121e   :  { %v15102_v55 = vpack.c.bf16 %v12722_v40, %v12721_v54  ;;  %v12742_v54 = vld [vmem:[%s18105_s11 + $0x40] sm:$0xff]  ;;  %v12743_v40 = vld [vmem:[%s18105_s11 + $0x48] sm:$0xff] }
0x121f   :  { %13869 = vmatmul.mubr.msk.f32.vlgmr.msra.gmra.mrb[24].mxu1 %vm2104_vm3, %v2088_v56  ;;  %v12723_v56 = vld [vmem:[%s18105_s11 + $0x30] sm:$0xff] }
0x1220   :  { %13901 = vmatprep.mubr.msk.f32.mxu1 %vm15744_vm1, %v15745_v27  ;;  %15085 = vmatpush3.bf16.msra.mxu1 %v15084_v8 }
0x1221   :  { %15086 = vmatprep.subr.bf16.mxu1 %v15743_v7 }
0x1224   :  { %15088 = vmatpush3.bf16.msra.mxu1 %v15087_v18  ;;  %v15099_v18 = vpack.c.bf16 %v12719_v17, %v12718_v16  ;;  %v12750_v17 = vld [vmem:[%s18106_s12 + $0x10] sm:$0xff] }
0x1225   :  { %13909 = vmatprep.subr.mxu1 %v15745_v27 }
0x12f2   :  { %v2174_v58 = vpop.f32.mrb[24].mxu1 }
0x12f3   :  { %v2175_v59 = vadd.f32 %v12703_v57, %v2174_v58  ;;  %v13870_v60 = vpop.f32.mrb[25].mxu1  ;;  %v12724_v57 = vld [vmem:[%s18105_s11 + $0x38] sm:$0xff] }
0x12f4   :  { %v15105_v58 = vpack.c.bf16 %v12724_v57, %v12723_v56  ;;  %v15120_v57 = vpack.c.bf16 %v12743_v40, %v12742_v54 }
0x12f5   :  { %v16253_v61 = vadd.f32 %v2175_v59, %v16190_v10 }
0x12f7   :  { %v2179_v62 = vsel %vm82_vm0, %v16253_v61, 0.0  ;;  %v2192_v63 = vmul.f32 %v16253_v61, %v16253_v61 }
0x12f8   :  { %2180 = vadd.xlane.f32.xlu0 %v2179_v62 }
0x12f9   :  { %v2193_v1 = vsel %vm82_vm0, %v2192_v63, 0.0 }
0x12fa   :  { %2194 = vadd.xlane.f32.xlu1 %v2193_v1 }
0x1385   :  { %v2181_v9 = vpop.xlane.xlu0 %2180 }
0x1386   :  { %v2182_v10 = vrot.slane %v2181_v9, 4 }
0x1387   :  { %v2195_v11 = vpop.xlane.xlu1 %2194 }
0x1388   :  { %v2183_v14 = vadd.f32 %v2182_v10, %v2181_v9  ;;  %v2196_v15 = vrot.slane %v2195_v11, 4 }
0x138a   :  { %v2184_v19 = vrot.slane %v2183_v14, 2  ;;  %v2197_v20 = vadd.f32 %v2196_v15, %v2195_v11  ;;  %v15096_v15 = vpack.c.bf16 %v12717_v13, %v12716_v12 }
0x138c   :  { %v2198_v21 = vrot.slane %v2197_v20, 2  ;;  %v2185_v22 = vadd.f32 %v2184_v19, %v2183_v14 }
0x138e   :  { %v2186_v23 = vrot.slane %v2185_v22, 1  ;;  %v2199_v24 = vadd.f32 %v2198_v21, %v2197_v20 }
0x1390   :  { %v2187_v25 = vadd.f32 %v2186_v23, %v2185_v22  ;;  %v2200_v26 = vrot.slane %v2199_v24, 1 }
0x1392   :  { %15533 = vpush %v2187_v25  ;;  %v2201_v28 = vadd.f32 %v2200_v26, %v2199_v24 }
0x1394   :  { %15535 = vpush %v2201_v28 }
0x13c3   :  { %s15534_s29 = spop %15533 }
0x13c4   :  { %s2191_s2 = smul.f32 0.00390625, %s15534_s29 }
0x13c5   :  { %s15536_s0 = spop %15535 }
0x13c6   :  { %s2206_s30 = smul.f32 %s2191_s2, %s2191_s2  ;;  %v2208_v31 = vstv %s2191_s2 }
0x13c7   :  { %s2205_s27 = smul.f32 0.00390625, %s15536_s0  ;;  %v2209_v34 = vsub.f32 %v16253_v61, %v2208_v31 }
0x13c9   :  { %s2207_s1 = ssub.f32 %s2205_s27, %s2206_s30 }
0x13cb   :  { %s2210_s28 = sadd.f32 1e-05, %s2207_s1 }
0x13cd   :  { %v2211_v29 = vstv %s2210_s28 }
0x13ce   :  { %15619 = vrsqrt.f32 %v2211_v29 }
0x13d8   :  { %v15620_v30 = vpop.eup %15619 }
0x13d9   :  { %15537 = vpush %v15620_v30 }
0x140a   :  { %s15538_s29 = spop %15537 }
0x140b   :  { %v2214_v35 = vstv %s15538_s29 }
0x140c   :  { %v16295_v37 = vmul.f32 %v2214_v35, %v2209_v34 }
0x140e   :  { %13880 = vmatmul.mubr.msk.f32.vlgmr.msra.gmra.mrb[26].mxu0 %vm82_vm0, %v16295_v37  ;;  %13902 = vmatmul.mubr.msk.f32.vlgmr.msra.gmra.mrb[26].mxu1 %vm82_vm0, %v16295_v37 }
0x140f   :  { %15079 = vmatpush3.bf16.msra.mxu0 %v15078_v36  ;;  %13890 = vmatprep.mubr.msk.f32.mxu0 %vm15744_vm1, %v15745_v27 }
0x1410   :  { %15080 = vmatprep.subr.bf16.mxu0 %v15743_v7  ;;  %13911 = vmatprep.mubr.msk.f32.mxu1 %vm15744_vm1, %v15745_v27 }
0x1413   :  { %15082 = vmatpush3.bf16.msra.mxu0 %v15081_v41  ;;  %v12738_v41 = vld [vmem:[%s18104_s10 + $0x48] sm:$0xff] }
0x1414   :  { %13904 = vmatprep.subr.mxu0 %v15745_v27 }
0x1416   :  { %13891 = vmatmul.mubr.msk.f32.vlgmr.msra.gmra.mrb[28].mxu0 %vm82_vm0, %v16295_v37 }
0x1417   :  { %13906 = vmatprep.mubr.msk.f32.mxu0 %vm15744_vm1, %v15745_v27 }
0x14e1   :  { %v2289_v42 = vpop.f32.mrb[26].mxu0  ;;  %v2437_v43 = vpop.f32.mrb[26].mxu1 }
0x14e2   :  { %v13881_v44 = vpop.f32.mrb[27].mxu0  ;;  %v13903_v45 = vpop.f32.mrb[27].mxu1  ;;  %13910 = vmatpush3.msra.mxu1 %v2437_v43  ;;  %v12739_v43 = vld [vmem:[%s18104_s10 + $0x50] sm:$0xff] }
0x14e3   :  { %15095 = vmatprep.subr.bf16.mxu1 %v15743_v7  ;;  %v12740_v44 = vld [vmem:[%s18104_s10 + $0x58] sm:$0xff] }
0x14e4   :  { %v15117_v45 = vpack.c.bf16 %v12740_v44, %v12739_v43 }
0x14e9   :  { %v2363_v48 = vpop.f32.mrb[28].mxu0 }
0x14ea   :  { %v13892_v49 = vpop.f32.mrb[29].mxu0  ;;  %13905 = vmatpush3.xpose.msk.msra.mxu0 %vm345_vm2, %v2363_v48  ;;  %v15108_v48 = vpack.c.bf16 %v12733_v47, %v12732_v46 }
0x14eb   :  { %15089 = vmatprep.subr.bf16.mxu0 %v15743_v7  ;;  %v12734_v49 = vld [vmem:[%s18154_s25 + $0x50] sm:$0xff] }
0x14ed   :  { %13907 = vmatmul.mubr.msk.f32.vlgmr.msra.gmra.mrb[30].mxu0 %vm345_vm2, %v2289_v42  ;;  %v15114_v42 = vpack.c.bf16 %v12738_v41, %v12737_v39  ;;  %v12760_v39 = vld [vmem:[%s18104_s10 + $0x78] sm:$0xff] }
0x14ee   :  { %15091 = vmatpush3.bf16.msra.mxu0 %v15090_v50  ;;  %13922 = vmatprep.mubr.msk.f32.mxu0 %vm15744_vm1, %v15745_v27  ;;  %v12735_v50 = vld [vmem:[%s18154_s25 + $0x58] sm:$0xff] }
0x14ef   :  { %15092 = vmatprep.subr.bf16.mxu0 %v15743_v7 }
0x14f2   :  { %15094 = vmatpush3.bf16.msra.mxu0 %v15093_v53  ;;  %v15111_v53 = vpack.c.bf16 %v12735_v50, %v12734_v49 }
0x14f3   :  { %15101 = vmatprep.subr.bf16.mxu0 %v15743_v7 }
0x14f5   :  { %13923 = vmatmul.mubr.msk.f32.vlgmr.msra.gmra.mrb[32].mxu0 %vm82_vm0, %v16295_v37 }
0x14f6   :  { %15103 = vmatpush3.bf16.msra.mxu0 %v15102_v55  ;;  %13944 = vmatprep.mubr.msk.f32.mxu0 %vm15744_vm1, %v15745_v27 }
0x14f7   :  { %15104 = vmatprep.subr.bf16.mxu0 %v15743_v7 }
0x14fa   :  { %15106 = vmatpush3.bf16.msra.mxu0 %v15105_v58  ;;  %v12744_v58 = vld [vmem:[%s18105_s11 + $0x50] sm:$0xff] }
0x14fb   :  { %13957 = vmatprep.subr.mxu0 %v15745_v27 }
0x14fd   :  { %13945 = vmatmul.mubr.msk.f32.vlgmr.msra.gmra.mrb[34].mxu0 %vm82_vm0, %v16295_v37 }
0x14fe   :  { %13959 = vmatprep.mubr.msk.f32.mxu0 %vm15744_vm1, %v15745_v27  ;;  %13958 = vmatpush3.msra.mxu0 %v12729_v33 }
0x14ff   :  { %15107 = vmatprep.subr.bf16.mxu0 %v15743_v7 }
0x15c0   :  { %v2513_v59 = vpop.f32.mrb[30].mxu0 }
0x15c1   :  { %v2517_v60 = vmul.f32 0.35355338, %v2513_v59  ;;  %v13908_v62 = vpop.f32.mrb[31].mxu0  ;;  %v12745_v59 = vld [vmem:[%s18105_s11 + $0x58] sm:$0xff] }
0x15c3   :  { %v2518_v63 = vsel %vm345_vm2, %v2517_v60, -inf }
0x15c4   :  { %2519 = vmax.xlane.f32.xlu0 %v2518_v63 }
0x15c8   :  { %v2674_v1 = vpop.f32.mrb[32].mxu0 }
0x15c9   :  { %v13924_v2 = vpop.f32.mrb[33].mxu0 }
0x15d0   :  { %v2824_v3 = vpop.f32.mrb[34].mxu0 }
0x15d1   :  { %v13946_v4 = vpop.f32.mrb[35].mxu0 }
0x1651   :  { %v2520_v5 = vpop.xlane.xlu0 %2519 }
0x1652   :  { %v2521_v6 = vsub.f32 %v2517_v60, %v2520_v5  ;;  %v15123_v60 = vpack.c.bf16 %v12745_v59, %v12744_v58 }
0x1654   :  { %v2522_v8 = vmul.f32 1.442695, %v2521_v6 }
0x1656   :  { %15621 = vpow2.f32 %v2522_v8 }
0x1660   :  { %v15622_v9 = vpop.eup %15621 }
0x1661   :  { %v2524_v10 = vsel %vm345_vm2, %v15622_v9, 0.0 }
0x1662   :  { %2525 = vadd.xlane.f32.xlu1 %v2524_v10 }
0x16ef   :  { %v2526_v11 = vpop.xlane.xlu1 %2525 }
0x16f0   :  { %15623 = vrcp.f32 %v2526_v11 }
0x16fa   :  { %v15624_v14 = vpop.eup %15623 }
0x16fb   :  { %v2528_v0 = vmul.f32 %v15624_v14, %v15622_v9 }
0x16fd   :  { %13912 = vmatmul.mubr.msk.f32.vlgmr.msra.gmra.mrb[28].mxu1 %vm345_vm2, %v2528_v0 }
0x16fe   :  { %15097 = vmatpush3.bf16.msra.mxu1 %v15096_v15  ;;  %13933 = vmatprep.mubr.msk.f32.mxu1 %vm15744_vm1, %v15745_v27 }
0x16ff   :  { %15098 = vmatprep.subr.bf16.mxu1 %v15743_v7 }
0x1702   :  { %15100 = vmatpush3.bf16.msra.mxu1 %v15099_v18 }
0x1703   :  { %13947 = vmatprep.subr.mxu1 %v15745_v27 }
0x1705   :  { %13934 = vmatmul.mubr.msk.f32.vlgmr.msra.gmra.mrb[30].mxu1 %vm82_vm0, %v16295_v37 }
0x1706   :  { %13949 = vmatprep.mubr.msk.f32.mxu1 %vm15744_vm1, %v15745_v27 }
0x17d0   :  { %v2598_v19 = vpop.f32.mrb[28].mxu1 }
0x17d1   :  { %v13913_v20 = vpop.f32.mrb[29].mxu1 }
0x17d2   :  { %v12753_v20 = vld [vmem:[%s18154_s25 + $0x68] sm:$0xff] }
0x17d8   :  { %v2749_v21 = vpop.f32.mrb[30].mxu1 }
0x17d9   :  { %v13935_v22 = vpop.f32.mrb[31].mxu1  ;;  %13948 = vmatpush3.xpose.msk.msra.mxu1 %vm345_vm2, %v2749_v21 }
0x17da   :  { %13952 = vmatprep.subr.mxu1 %v15745_v27 }
0x17dc   :  { %13950 = vmatmul.mubr.msk.f32.vlgmr.msra.gmra.mrb[32].mxu1 %vm345_vm2, %v2674_v1 }
0x17dd   :  { %13953 = vmatpush3.msra.mxu1 %v2824_v3  ;;  %13954 = vmatprep.mubr.msk.f32.mxu1 %vm15744_vm1, %v15745_v27 }
0x17de   :  { %13962 = vmatprep.subr.mxu1 %v15745_v27 }
0x18af   :  { %v2900_v23 = vpop.f32.mrb[32].mxu1 }
0x18b0   :  { %v2904_v24 = vmul.f32 0.35355338, %v2900_v23  ;;  %v13951_v25 = vpop.f32.mrb[33].mxu1 }
0x18b1   :  { %v12755_v25 = vld [vmem:[%s18154_s25 + $0x78] sm:$0xff] }
0x18b2   :  { %v2905_v26 = vsel %vm345_vm2, %v2904_v24, -inf }
0x18b3   :  { %2906 = vmax.xlane.f32.xlu0 %v2905_v26 }
0x1940   :  { %v2907_v28 = vpop.xlane.xlu0 %2906 }
0x1941   :  { %v2908_v29 = vsub.f32 %v2904_v24, %v2907_v28  ;;  %v12754_v24 = vld [vmem:[%s18154_s25 + $0x70] sm:$0xff]  ;;  %v12762_v28 = vld [vmem:[%s18105_s11 + $0x60] sm:$0xff] }
0x1942   :  { %v15129_v26 = vpack.c.bf16 %v12755_v25, %v12754_v24 }
0x1943   :  { %v2909_v30 = vmul.f32 1.442695, %v2908_v29  ;;  %v12763_v29 = vld [vmem:[%s18105_s11 + $0x68] sm:$0xff] }
0x1945   :  { %15625 = vpow2.f32 %v2909_v30  ;;  %v15138_v30 = vpack.c.bf16 %v12763_v29, %v12762_v28  ;;  %v4184_v28 = vld [vmem:[%s18109_s15] sm:$0xff]  ;;  %v4185_v29 = vld [vmem:[%s18109_s15 + $0x8] sm:$0xff] }
0x194f   :  { %v15626_v31 = vpop.eup %15625 }
0x1950   :  { %v2911_v32 = vsel %vm345_vm2, %v15626_v31, 0.0 }
0x1951   :  { %2912 = vadd.xlane.f32.xlu1 %v2911_v32  ;;  %v12765_v32 = vld [vmem:[%s18105_s11 + $0x78] sm:$0xff] }
0x19de   :  { %v2913_v34 = vpop.xlane.xlu1 %2912 }
0x19df   :  { %15627 = vrcp.f32 %v2913_v34  ;;  %v12757_v34 = vld [vmem:[%s18104_s10 + $0x60] sm:$0xff] }
0x19e9   :  { %v15628_v35 = vpop.eup %15627 }
0x19ea   :  { %v2915_v36 = vmul.f32 %v15628_v35, %v15626_v31  ;;  %v12764_v31 = vld [vmem:[%s18105_s11 + $0x70] sm:$0xff]  ;;  %v12758_v35 = vld [vmem:[%s18104_s10 + $0x68] sm:$0xff] }
0x19eb   :  { %v15141_v33 = vpack.c.bf16 %v12765_v32, %v12764_v31  ;;  %v15150_v31 = vpack.c.bf16 %v4185_v29, %v4184_v28  ;;  %v4187_v32 = vld [vmem:[%s18109_s15 + $0x18] sm:$0xff]  ;;  %v4387_v29 = vld [vmem:[%s18112_s18] sm:$0xff] }
0x19ec   :  { %13955 = vmatmul.mubr.msk.f32.vlgmr.msra.gmra.mrb[34].mxu1 %vm345_vm2, %v2915_v36  ;;  %v15132_v36 = vpack.c.bf16 %v12758_v35, %v12757_v34 }
0x19ed   :  { %13963 = vmatpush3.msra.mxu1 %v2602_v38  ;;  %13964 = vmatprep.mubr.msk.f32.mxu1 %vm15744_vm1, %v15745_v27  ;;  %v12759_v38 = vld [vmem:[%s18104_s10 + $0x70] sm:$0xff] }
0x19ee   :  { %15113 = vmatprep.subr.bf16.mxu1 %v15743_v7  ;;  %v15135_v43 = vpack.c.bf16 %v12760_v39, %v12759_v38  ;;  %v4188_v38 = vld [vmem:[%s18109_s15 + $0x20] sm:$0xff]  ;;  %v4189_v39 = vld [vmem:[%s18109_s15 + $0x28] sm:$0xff] }
0x19f0   :  { %13965 = vmatmul.mubr.msk.f32.vlgmr.msra.gmra.mrb[36].mxu1 %vm345_vm2, %v2598_v19  ;;  %v12752_v19 = vld [vmem:[%s18154_s25 + $0x60] sm:$0xff] }
0x19f1   :  { %15115 = vmatpush3.bf16.msra.mxu1 %v15114_v42  ;;  %13986 = vmatprep.mubr.msk.f32.mxu1 %vm15744_vm1, %v15745_v27  ;;  %v15126_v22 = vpack.c.bf16 %v12753_v20, %v12752_v19  ;;  %v4102_v19 = vld [vmem:[%s18107_s13 + $0x18] sm:$0xff] }
0x19f2   :  { %15116 = vmatprep.subr.bf16.mxu1 %v15743_v7 }
0x19f5   :  { %15118 = vmatpush3.bf16.msra.mxu1 %v15117_v45 }
0x19f6   :  { %14000 = vmatprep.subr.mxu1 %v15745_v27 }
0x19f8   :  { %13987 = vmatmul.mubr.msk.f32.vlgmr.msra.gmra.mrb[38].mxu1 %vm82_vm0, %v16295_v37 }
0x19f9   :  { %14002 = vmatprep.mubr.msk.f32.mxu1 %vm15744_vm1, %v15745_v27 }
0x1abf   :  { %v2985_v51 = vpop.f32.mrb[34].mxu1 }
0x1ac0   :  { %v13956_v52 = vpop.f32.mrb[35].mxu1  ;;  %13960 = vmatmul.mubr.msk.f32.vlgmr.msra.gmra.mrb[36].mxu0 %vm345_vm2, %v2985_v51 }
0x1ac1   :  { %15109 = vmatpush3.bf16.msra.mxu0 %v15108_v48  ;;  %13975 = vmatprep.mubr.msk.f32.mxu0 %vm15744_vm1, %v15745_v27 }
0x1ac2   :  { %15110 = vmatprep.subr.bf16.mxu0 %v15743_v7 }
0x1ac3   :  { %v3133_v55 = vpop.f32.mrb[36].mxu1 }
0x1ac4   :  { %v13966_v56 = vpop.f32.mrb[37].mxu1 }
0x1ac5   :  { %15112 = vmatpush3.bf16.msra.mxu0 %v15111_v53 }
0x1ac6   :  { %15119 = vmatprep.subr.bf16.mxu0 %v15743_v7 }
0x1ac8   :  { %13976 = vmatmul.mubr.msk.f32.vlgmr.msra.gmra.mrb[38].mxu0 %vm82_vm0, %v16295_v37 }
0x1ac9   :  { %15121 = vmatpush3.bf16.msra.mxu0 %v15120_v57  ;;  %13997 = vmatprep.mubr.msk.f32.mxu0 %vm15744_vm1, %v15745_v27 }
0x1aca   :  { %15122 = vmatprep.subr.bf16.mxu0 %v15743_v7 }
0x1acb   :  { %v3283_v62 = vpop.f32.mrb[38].mxu1 }
0x1acc   :  { %v13988_v63 = vpop.f32.mrb[39].mxu1  ;;  %14001 = vmatpush3.xpose.msk.msra.mxu1 %vm345_vm2, %v3283_v62 }
0x1acd   :  { %15124 = vmatpush3.bf16.msra.mxu0 %v15123_v60  ;;  %14005 = vmatprep.subr.mxu1 %v15745_v27  ;;  %v12770_v60 = vld [vmem:[%s18106_s12 + $0x18] sm:$0xff] }
0x1ace   :  { %14010 = vmatprep.subr.mxu0 %v15745_v27 }
0x1ad0   :  { %13998 = vmatmul.mubr.msk.f32.vlgmr.msra.gmra.mrb[40].mxu0 %vm82_vm0, %v16295_v37 }
0x1ad1   :  { %14012 = vmatprep.mubr.msk.f32.mxu0 %vm15744_vm1, %v15745_v27  ;;  %14011 = vmatpush3.msra.mxu0 %v12750_v17 }
0x1ad2   :  { %15131 = vmatprep.subr.bf16.mxu0 %v15743_v7 }
0x1b93   :  { %v3060_v1 = vpop.f32.mrb[36].mxu0 }
0x1b94   :  { %v16463_v2 = vadd.f32 %v3133_v55, %v3060_v1  ;;  %v13961_v3 = vpop.f32.mrb[37].mxu0 }
0x1b9b   :  { %v3208_v4 = vpop.f32.mrb[38].mxu0 }
0x1b9c   :  { %v13977_v5 = vpop.f32.mrb[39].mxu0  ;;  %14003 = vmatmul.mubr.msk.f32.vlgmr.msra.gmra.mrb[40].mxu1 %vm345_vm2, %v3208_v4 }
0x1b9d   :  { %14007 = vmatprep.mubr.msk.f32.mxu1 %vm15744_vm1, %v15745_v27 }
0x1ba3   :  { %v3358_v6 = vpop.f32.mrb[40].mxu0 }
0x1ba4   :  { %v13999_v8 = vpop.f32.mrb[41].mxu0  ;;  %14006 = vmatpush3.msra.mxu1 %v3358_v6 }
0x1ba5   :  { %15125 = vmatprep.subr.bf16.mxu1 %v15743_v7 }
0x1c6f   :  { %v3434_v9 = vpop.f32.mrb[40].mxu1 }
0x1c70   :  { %v3438_v10 = vmul.f32 0.35355338, %v3434_v9  ;;  %v14004_v11 = vpop.f32.mrb[41].mxu1 }
0x1c72   :  { %v3439_v12 = vsel %vm345_vm2, %v3438_v10, -inf }
0x1c73   :  { %3440 = vmax.xlane.f32.xlu0 %v3439_v12  ;;  %v4099_v12 = vld [vmem:[%s18107_s13] sm:$0xff] }
0x1d00   :  { %v3441_v13 = vpop.xlane.xlu0 %3440 }
0x1d01   :  { %v3442_v14 = vsub.f32 %v3438_v10, %v3441_v13  ;;  %v4100_v13 = vld [vmem:[%s18107_s13 + $0x8] sm:$0xff] }
0x1d03   :  { %v3443_v15 = vmul.f32 1.442695, %v3442_v14 }
0x1d05   :  { %15629 = vpow2.f32 %v3443_v15 }
0x1d0f   :  { %v15630_v0 = vpop.eup %15629 }
0x1d10   :  { %v3445_v16 = vsel %vm345_vm2, %v15630_v0, 0.0 }
0x1d11   :  { %3446 = vadd.xlane.f32.xlu1 %v3445_v16 }
0x1d9e   :  { %v3447_v18 = vpop.xlane.xlu1 %3446 }
0x1d9f   :  { %15631 = vrcp.f32 %v3447_v18  ;;  %v4101_v18 = vld [vmem:[%s18107_s13 + $0x10] sm:$0xff] }
0x1da0   :  { %v15147_v20 = vpack.c.bf16 %v4102_v19, %v4101_v18 }
0x1da9   :  { %v15632_v21 = vpop.eup %15631 }
0x1daa   :  { %v3449_v23 = vmul.f32 %v15632_v21, %v15630_v0 }
0x1dac   :  { %14008 = vmatmul.mubr.msk.f32.vlgmr.msra.gmra.mrb[42].mxu1 %vm345_vm2, %v3449_v23 }
0x1dad   :  { %15127 = vmatpush3.bf16.msra.mxu1 %v15126_v22  ;;  %14023 = vmatprep.mubr.msk.f32.mxu1 %vm15744_vm1, %v15745_v27 }
0x1dae   :  { %15128 = vmatprep.subr.bf16.mxu1 %v15743_v7 }
0x1db1   :  { %15130 = vmatpush3.bf16.msra.mxu1 %v15129_v26 }
0x1db2   :  { %15137 = vmatprep.subr.bf16.mxu1 %v15743_v7 }
0x1db4   :  { %14024 = vmatmul.mubr.msk.f32.vlgmr.msra.gmra.mrb[44].mxu1 %vm82_vm0, %v16295_v37 }
0x1db5   :  { %15139 = vmatpush3.bf16.msra.mxu1 %v15138_v30  ;;  %14045 = vmatprep.mubr.msk.f32.mxu1 %vm15744_vm1, %v15745_v27  ;;  %v4186_v30 = vld [vmem:[%s18109_s15 + $0x10] sm:$0xff] }
0x1db6   :  { %15140 = vmatprep.subr.bf16.mxu1 %v15743_v7  ;;  %v15153_v35 = vpack.c.bf16 %v4187_v32, %v4186_v30  ;;  %v4388_v30 = vld [vmem:[%s18112_s18 + $0x8] sm:$0xff] }
0x1db9   :  { %15142 = vmatpush3.bf16.msra.mxu1 %v15141_v33 }
0x1dba   :  { %14058 = vmatprep.subr.mxu1 %v15745_v27 }
0x1dbc   :  { %14046 = vmatmul.mubr.msk.f32.vlgmr.msra.gmra.mrb[46].mxu1 %vm82_vm0, %v16295_v37 }
0x1dbd   :  { %14060 = vmatprep.mubr.msk.f32.mxu1 %vm15744_vm1, %v15745_v27  ;;  %14059 = vmatpush3.msra.mxu1 %v12770_v60 }
0x1dbe   :  { %15149 = vmatprep.subr.bf16.mxu1 %v15743_v7 }
0x1e7f   :  { %v3519_v41 = vpop.f32.mrb[42].mxu1 }
0x1e80   :  { %v14009_v42 = vpop.f32.mrb[43].mxu1  ;;  %14013 = vmatmul.mubr.msk.f32.vlgmr.msra.gmra.mrb[42].mxu0 %vm345_vm2, %v3519_v41  ;;  %v15156_v41 = vpack.c.bf16 %v4189_v39, %v4188_v38 }
0x1e81   :  { %15133 = vmatpush3.bf16.msra.mxu0 %v15132_v36  ;;  %14034 = vmatprep.mubr.msk.f32.mxu0 %vm15744_vm1, %v15745_v27 }
0x1e82   :  { %15134 = vmatprep.subr.bf16.mxu0 %v15743_v7 }
0x1e85   :  { %15136 = vmatpush3.bf16.msra.mxu0 %v15135_v43 }
0x1e86   :  { %14048 = vmatprep.subr.mxu0 %v15745_v27 }
0x1e87   :  { %v3670_v44 = vpop.f32.mrb[44].mxu1 }
0x1e88   :  { %v14025_v45 = vpop.f32.mrb[45].mxu1  ;;  %14035 = vmatmul.mubr.msk.f32.vlgmr.msra.gmra.mrb[44].mxu0 %vm82_vm0, %v16295_v37 }
0x1e89   :  { %14050 = vmatprep.mubr.msk.f32.mxu0 %vm15744_vm1, %v15745_v27 }
0x1e8f   :  { %v3820_v46 = vpop.f32.mrb[46].mxu1 }
0x1e90   :  { %v14047_v47 = vpop.f32.mrb[47].mxu1 }
0x1f53   :  { %v3594_v48 = vpop.f32.mrb[42].mxu0 }
0x1f54   :  { %v3598_v49 = vadd.f32 %v3594_v48, %v16463_v2  ;;  %v14014_v50 = vpop.f32.mrb[43].mxu0  ;;  %v4190_v48 = vld [vmem:[%s18109_s15 + $0x30] sm:$0xff] }
0x1f5b   :  { %v3745_v51 = vpop.f32.mrb[44].mxu0 }
0x1f5c   :  { %v14036_v52 = vpop.f32.mrb[45].mxu0  ;;  %14049 = vmatpush3.xpose.msk.msra.mxu0 %vm345_vm2, %v3745_v51  ;;  %v12772_v51 = vld [vmem:[%s18108_s14] ss:$0 sm:$0xff] }
0x1f5d   :  { %14053 = vmatprep.subr.mxu0 %v15745_v27 }
0x1f5f   :  { %14051 = vmatmul.mubr.msk.f32.vlgmr.msra.gmra.mrb[46].mxu0 %vm345_vm2, %v3670_v44 }
0x1f60   :  { %14054 = vmatpush3.msra.mxu0 %v3820_v46  ;;  %14055 = vmatprep.mubr.msk.f32.mxu0 %vm15744_vm1, %v15745_v27 }
0x1f61   :  { %15143 = vmatprep.subr.bf16.mxu0 %v15743_v7 }
0x2032   :  { %v3896_v37 = vpop.f32.mrb[46].mxu0 }
0x2033   :  { %v3900_v53 = vmul.f32 0.35355338, %v3896_v37  ;;  %v14052_v54 = vpop.f32.mrb[47].mxu0 }
0x2035   :  { %v3901_v40 = vsel %vm345_vm2, %v3900_v53, -inf }
0x2036   :  { %3902 = vmax.xlane.f32.xlu0 %v3901_v40  ;;  %v12774_v40 = vld [vmem:[%s18110_s16] ss:$0 sm:$0xff] }
0x20c3   :  { %v3903_v55 = vpop.xlane.xlu0 %3902 }
0x20c4   :  { %v3904_v56 = vsub.f32 %v3900_v53, %v3903_v55 }
0x20c6   :  { %v3905_v57 = vmul.f32 1.442695, %v3904_v56 }
0x20c8   :  { %15633 = vpow2.f32 %v3905_v57 }
0x20d2   :  { %v15634_v58 = vpop.eup %15633 }
0x20d3   :  { %v3907_v59 = vsel %vm345_vm2, %v15634_v58, 0.0 }
0x20d4   :  { %3908 = vadd.xlane.f32.xlu1 %v3907_v59 }
0x2161   :  { %v3909_v62 = vpop.xlane.xlu1 %3908 }
0x2162   :  { %15635 = vrcp.f32 %v3909_v62 }
0x216c   :  { %v15636_v63 = vpop.eup %15635 }
0x216d   :  { %v3911_v1 = vmul.f32 %v15636_v63, %v15634_v58  ;;  %v4310_v63 = vld [vmem:[%s18111_s17] sm:$0xff] }
0x216f   :  { %14056 = vmatmul.mubr.msk.f32.vlgmr.msra.gmra.mrb[48].mxu0 %vm345_vm2, %v3911_v1  ;;  %v4311_v1 = vld [vmem:[%s18111_s17 + $0x8] sm:$0xff] }
0x2170   :  { %14071 = vmatprep.mubr.msk.f32.mxu0 %vm15744_vm1, %v15745_v27 }
0x2242   :  { %v3981_v2 = vpop.f32.mrb[48].mxu0 }
0x2243   :  { %v14057_v3 = vpop.f32.mrb[49].mxu0  ;;  %14061 = vmatmul.mubr.msk.f32.vlgmr.msra.gmra.mrb[48].mxu1 %vm345_vm2, %v3981_v2  ;;  %v4461_v2 = vld [vmem:[%s18113_s19] sm:$0xff] }
0x2244   :  { %14090 = vmatprep.mubr.msk.f32.mxu1 %vm15744_vm1, %v15745_v27  ;;  %15151 = vmatpush3.bf16.msra.mxu1 %v15150_v31  ;;  %v15162_v3 = vpack.c.bf16 %v4311_v1, %v4310_v63 }
0x2245   :  { %15152 = vmatprep.subr.bf16.mxu1 %v15743_v7 }
0x2248   :  { %15154 = vmatpush3.bf16.msra.mxu1 %v15153_v35  ;;  %v4389_v35 = vld [vmem:[%s18112_s18 + $0x10] sm:$0xff] }
0x2249   :  { %15155 = vmatprep.subr.bf16.mxu1 %v15743_v7 }
0x224c   :  { %15157 = vmatpush3.bf16.msra.mxu1 %v15156_v41 }
0x224d   :  { %15158 = vmatprep.subr.bf16.mxu1 %v15743_v7 }
0x2316   :  { %v4056_v4 = vpop.f32.mrb[48].mxu1 }
0x2317   :  { %v4060_v5 = vadd.f32 %v4056_v4, %v3598_v49  ;;  %v14062_v6 = vpop.f32.mrb[49].mxu1  ;;  %v4191_v49 = vld [vmem:[%s18109_s15 + $0x38] sm:$0xff]  ;;  %v4462_v4 = vld [vmem:[%s18113_s19 + $0x8] sm:$0xff] }
0x2318   :  { %v15159_v50 = vpack.c.bf16 %v4191_v49, %v4190_v48  ;;  %v12784_v49 = vld [vmem:[%s18111_s17 + $0x30] sm:$0xff] }
0x2319   :  { %v16555_v8 = vadd.f32 %v4060_v5, %v16253_v61  ;;  %v15144_v61 = vpack.c.bf16 %v4100_v13, %v4099_v12  ;;  %v15174_v5 = vpack.c.bf16 %v4462_v4, %v4461_v2 }
0x231a   :  { %15160 = vmatpush3.bf16.msra.mxu1 %v15159_v50  ;;  %v12785_v50 = vld [vmem:[%s18111_s17 + $0x38] sm:$0xff] }
0x231b   :  { %v4062_v9 = vsel %vm82_vm0, %v16555_v8, 0.0  ;;  %v4075_v10 = vmul.f32 %v16555_v8, %v16555_v8  ;;  %15145 = vmatpush3.bf16.msra.mxu0 %v15144_v61  ;;  %15173 = vmatprep.subr.bf16.mxu1 %v15743_v7 }
0x231c   :  { %4063 = vadd.xlane.f32.xlu0 %v4062_v9  ;;  %15146 = vmatprep.subr.bf16.mxu0 %v15743_v7 }
0x231d   :  { %v4076_v11 = vsel %vm82_vm0, %v4075_v10, 0.0  ;;  %v4312_v10 = vld [vmem:[%s18111_s17 + $0x10] sm:$0xff] }
0x231e   :  { %4077 = vadd.xlane.f32.xlu1 %v4076_v11  ;;  %v4313_v11 = vld [vmem:[%s18111_s17 + $0x18] sm:$0xff] }
0x231f   :  { %15148 = vmatpush3.bf16.msra.mxu0 %v15147_v20  ;;  %v15165_v61 = vpack.c.bf16 %v4313_v11, %v4312_v10  ;;  %v12787_v10 = vld [vmem:[%s18112_s18 + $0x20] sm:$0xff]  ;;  %v12788_v11 = vld [vmem:[%s18112_s18 + $0x28] sm:$0xff] }
0x2320   :  { %15161 = vmatprep.subr.bf16.mxu0 %v15743_v7 }
0x23a9   :  { %v4064_v14 = vpop.xlane.xlu0 %4063 }
0x23aa   :  { %v4065_v15 = vrot.slane %v4064_v14, 4 }
0x23ab   :  { %v4078_v0 = vpop.xlane.xlu1 %4077 }
0x23ac   :  { %v4066_v16 = vadd.f32 %v4065_v15, %v4064_v14  ;;  %v4079_v17 = vrot.slane %v4078_v0, 4  ;;  %v4463_v14 = vld [vmem:[%s18113_s19 + $0x10] sm:$0xff]  ;;  %v4464_v15 = vld [vmem:[%s18113_s19 + $0x18] sm:$0xff] }
0x23ae   :  { %v4067_v21 = vrot.slane %v4066_v16, 2  ;;  %v4080_v22 = vadd.f32 %v4079_v17, %v4078_v0  ;;  %v15177_v0 = vpack.c.bf16 %v4464_v15, %v4463_v14  ;;  %v12789_v14 = vld [vmem:[%s18112_s18 + $0x30] sm:$0xff]  ;;  %v12790_v15 = vld [vmem:[%s18112_s18 + $0x38] sm:$0xff] }
0x23b0   :  { %v4081_v23 = vrot.slane %v4080_v22, 2  ;;  %v4068_v24 = vadd.f32 %v4067_v21, %v4066_v16 }
0x23b2   :  { %v4069_v25 = vrot.slane %v4068_v24, 1  ;;  %v4082_v26 = vadd.f32 %v4081_v23, %v4080_v22 }
0x23b4   :  { %v4070_v33 = vadd.f32 %v4069_v25, %v4068_v24  ;;  %v4083_v34 = vrot.slane %v4082_v26, 1 }
0x23b6   :  { %15539 = vpush %v4070_v33  ;;  %v4084_v36 = vadd.f32 %v4083_v34, %v4082_v26  ;;  %v15168_v33 = vpack.c.bf16 %v4388_v30, %v4387_v29  ;;  %v12800_v30 = vld [vmem:[%s18114_s20 + $0x8] sm:$0xff] }
0x23b8   :  { %15541 = vpush %v4084_v36  ;;  %v4390_v36 = vld [vmem:[%s18112_s18 + $0x18] sm:$0xff] }
0x23b9   :  { %v15171_v38 = vpack.c.bf16 %v4390_v36, %v4389_v35  ;;  %v4696_v35 = vld [vmem:[%s18114_s20] sm:$0xff] }
0x23ba   :  { %v12808_v36 = vld [vmem:[%s18112_s18 + $0x40] sm:$0xff] }
0x23e7   :  { %s15540_s5 = spop %15539 }
0x23e8   :  { %s4074_s8 = smul.f32 0.00390625, %s15540_s5 }
0x23e9   :  { %s15542_s1 = spop %15541 }
0x23ea   :  { %s4089_s28 = smul.f32 %s4074_s8, %s4074_s8  ;;  %v4091_v44 = vstv %s4074_s8 }
0x23eb   :  { %s4088_s9 = smul.f32 0.00390625, %s15542_s1  ;;  %v4092_v45 = vsub.f32 %v16555_v8, %v4091_v44  ;;  %v12782_v44 = vld [vmem:[%s18111_s17 + $0x20] sm:$0xff] }
0x23ed   :  { %s4090_s29 = ssub.f32 %s4088_s9, %s4089_s28 }
0x23ef   :  { %s4093_s0 = sadd.f32 1e-05, %s4090_s29 }
0x23f1   :  { %v4094_v42 = vstv %s4093_s0 }
0x23f2   :  { %15637 = vrsqrt.f32 %v4094_v42 }
0x23fc   :  { %v15638_v43 = vpop.eup %15637 }
0x23fd   :  { %15543 = vpush %v15638_v43 }
0x242e   :  { %s15544_s30 = spop %15543 }
0x242f   :  { %v4097_v46 = vstv %s15544_s30 }
0x2430   :  { %v4098_v47 = vmul.f32 %v4097_v46, %v4092_v45  ;;  %v12783_v45 = vld [vmem:[%s18111_s17 + $0x28] sm:$0xff] }
0x2431   :  { %v15180_v48 = vpack.c.bf16 %v12783_v45, %v12782_v44  ;;  %v12803_v44 = vld [vmem:[%s18111_s17 + $0x40] sm:$0xff]  ;;  %v12804_v45 = vld [vmem:[%s18111_s17 + $0x48] sm:$0xff] }
0x2432   :  { %14072 = vmatmul.mubr.msk.f32.vlgmr.msra.gmra.mrb[50].mxu0 %vm82_vm0, %v4098_v47 }
0x2433   :  { %14101 = vmatprep.mubr.msk.f32.mxu0 %vm15744_vm1, %v15745_v27  ;;  %15163 = vmatpush3.bf16.msra.mxu0 %v15162_v3 }
0x2434   :  { %15164 = vmatprep.subr.bf16.mxu0 %v15743_v7 }
0x2437   :  { %15166 = vmatpush3.bf16.msra.mxu0 %v15165_v61 }
0x2438   :  { %15167 = vmatprep.subr.bf16.mxu0 %v15743_v7 }
0x2505   :  { %v4179_v52 = vpop.f32.mrb[50].mxu0 }
0x2506   :  { %v4180_v37 = vadd.f32 %v12772_v51, %v4179_v52  ;;  %v14073_v53 = vpop.f32.mrb[51].mxu0  ;;  %v15183_v51 = vpack.c.bf16 %v12785_v50, %v12784_v49  ;;  %v12792_v52 = vld [vmem:[%s18113_s19 + $0x20] sm:$0xff] }
0x2508   :  { %v4183_v54 = vmax.f32 %v4180_v37, 0.0  ;;  %v12793_v37 = vld [vmem:[%s18113_s19 + $0x28] sm:$0xff] }
0x2509   :  { %v15192_v53 = vpack.c.bf16 %v12793_v37, %v12792_v52  ;;  %v12813_v52 = vld [vmem:[%s18113_s19 + $0x40] sm:$0xff]  ;;  %v12814_v37 = vld [vmem:[%s18113_s19 + $0x48] sm:$0xff] }
0x250a   :  { %14091 = vmatmul.mubr.msk.f32.vlgmr.msra.gmra.mrb[50].mxu1 %vm2104_vm3, %v4183_v54  ;;  %v12794_v54 = vld [vmem:[%s18113_s19 + $0x30] sm:$0xff] }
0x250b   :  { %14123 = vmatprep.mubr.msk.f32.mxu1 %vm15744_vm1, %v15745_v27  ;;  %15175 = vmatpush3.bf16.msra.mxu1 %v15174_v5 }
0x250c   :  { %15176 = vmatprep.subr.bf16.mxu1 %v15743_v7 }
0x250f   :  { %15178 = vmatpush3.bf16.msra.mxu1 %v15177_v0  ;;  %v15189_v0 = vpack.c.bf16 %v12790_v15, %v12789_v14  ;;  %v12821_v15 = vld [vmem:[%s18114_s20 + $0x10] sm:$0xff] }
0x2510   :  { %14131 = vmatprep.subr.mxu1 %v15745_v27 }
0x25dd   :  { %v4268_v55 = vpop.f32.mrb[50].mxu1 }
0x25de   :  { %v4269_v56 = vadd.f32 %v12774_v40, %v4268_v55  ;;  %v14092_v57 = vpop.f32.mrb[51].mxu1  ;;  %v12795_v40 = vld [vmem:[%s18113_s19 + $0x38] sm:$0xff] }
0x25df   :  { %v15195_v55 = vpack.c.bf16 %v12795_v40, %v12794_v54  ;;  %v15210_v40 = vpack.c.bf16 %v12814_v37, %v12813_v52 }
0x25e0   :  { %v16618_v58 = vadd.f32 %v4269_v56, %v16555_v8 }
0x25e2   :  { %v4273_v59 = vsel %vm82_vm0, %v16618_v58, 0.0  ;;  %v4286_v60 = vmul.f32 %v16618_v58, %v16618_v58 }
0x25e3   :  { %4274 = vadd.xlane.f32.xlu0 %v4273_v59 }
0x25e4   :  { %v4287_v62 = vsel %vm82_vm0, %v4286_v60, 0.0 }
0x25e5   :  { %4288 = vadd.xlane.f32.xlu1 %v4287_v62 }
0x2670   :  { %v4275_v6 = vpop.xlane.xlu0 %4274 }
0x2671   :  { %v4276_v8 = vrot.slane %v4275_v6, 4 }
0x2672   :  { %v4289_v9 = vpop.xlane.xlu1 %4288 }
0x2673   :  { %v4277_v12 = vadd.f32 %v4276_v8, %v4275_v6  ;;  %v4290_v13 = vrot.slane %v4289_v9, 4 }
0x2675   :  { %v4278_v16 = vrot.slane %v4277_v12, 2  ;;  %v4291_v17 = vadd.f32 %v4290_v13, %v4289_v9  ;;  %v15186_v13 = vpack.c.bf16 %v12788_v11, %v12787_v10 }
0x2677   :  { %v4292_v18 = vrot.slane %v4291_v17, 2  ;;  %v4279_v19 = vadd.f32 %v4278_v16, %v4277_v12 }
0x2679   :  { %v4280_v20 = vrot.slane %v4279_v19, 1  ;;  %v4293_v21 = vadd.f32 %v4292_v18, %v4291_v17 }
0x267b   :  { %v4281_v22 = vadd.f32 %v4280_v20, %v4279_v19  ;;  %v4294_v23 = vrot.slane %v4293_v21, 1 }
0x267d   :  { %15545 = vpush %v4281_v22  ;;  %v4295_v24 = vadd.f32 %v4294_v23, %v4293_v21 }
0x267f   :  { %15547 = vpush %v4295_v24 }
0x26ae   :  { %s15546_s26 = spop %15545 }
0x26af   :  { %s4285_s5 = smul.f32 0.00390625, %s15546_s26 }
0x26b0   :  { %s15548_s8 = spop %15547 }
0x26b1   :  { %s4300_s1 = smul.f32 %s4285_s5, %s4285_s5  ;;  %v4302_v28 = vstv %s4285_s5 }
0x26b2   :  { %s4299_s28 = smul.f32 0.00390625, %s15548_s8  ;;  %v4303_v31 = vsub.f32 %v16618_v58, %v4302_v28 }
0x26b4   :  { %s4301_s9 = ssub.f32 %s4299_s28, %s4300_s1 }
0x26b6   :  { %s4304_s29 = sadd.f32 1e-05, %s4301_s9 }
0x26b8   :  { %v4305_v25 = vstv %s4304_s29 }
0x26b9   :  { %15639 = vrsqrt.f32 %v4305_v25 }
0x26c3   :  { %v15640_v26 = vpop.eup %15639 }
0x26c4   :  { %15549 = vpush %v15640_v26 }
0x26f5   :  { %s15550_s26 = spop %15549 }
0x26f6   :  { %v4308_v32 = vstv %s15550_s26 }
0x26f7   :  { %v16660_v34 = vmul.f32 %v4308_v32, %v4303_v31 }
0x26f9   :  { %14102 = vmatmul.mubr.msk.f32.vlgmr.msra.gmra.mrb[52].mxu0 %vm82_vm0, %v16660_v34  ;;  %14124 = vmatmul.mubr.msk.f32.vlgmr.msra.gmra.mrb[52].mxu1 %vm82_vm0, %v16660_v34 }
0x26fa   :  { %15169 = vmatpush3.bf16.msra.mxu0 %v15168_v33  ;;  %14112 = vmatprep.mubr.msk.f32.mxu0 %vm15744_vm1, %v15745_v27 }
0x26fb   :  { %15170 = vmatprep.subr.bf16.mxu0 %v15743_v7  ;;  %14133 = vmatprep.mubr.msk.f32.mxu1 %vm15744_vm1, %v15745_v27 }
0x26fe   :  { %15172 = vmatpush3.bf16.msra.mxu0 %v15171_v38  ;;  %v12809_v38 = vld [vmem:[%s18112_s18 + $0x48] sm:$0xff] }
0x26ff   :  { %14126 = vmatprep.subr.mxu0 %v15745_v27 }
0x2701   :  { %14113 = vmatmul.mubr.msk.f32.vlgmr.msra.gmra.mrb[54].mxu0 %vm82_vm0, %v16660_v34 }
0x2702   :  { %14128 = vmatprep.mubr.msk.f32.mxu0 %vm15744_vm1, %v15745_v27 }
0x27cc   :  { %v4383_v39 = vpop.f32.mrb[52].mxu0  ;;  %v4531_v41 = vpop.f32.mrb[52].mxu1 }
0x27cd   :  { %v14103_v42 = vpop.f32.mrb[53].mxu0  ;;  %v14125_v43 = vpop.f32.mrb[53].mxu1  ;;  %14132 = vmatpush3.msra.mxu1 %v4531_v41  ;;  %v12810_v41 = vld [vmem:[%s18112_s18 + $0x50] sm:$0xff] }
0x27ce   :  { %15185 = vmatprep.subr.bf16.mxu1 %v15743_v7  ;;  %v12811_v42 = vld [vmem:[%s18112_s18 + $0x58] sm:$0xff] }
0x27cf   :  { %v15207_v43 = vpack.c.bf16 %v12811_v42, %v12810_v41 }
0x27d4   :  { %v4457_v46 = vpop.f32.mrb[54].mxu0 }
0x27d5   :  { %v14114_v47 = vpop.f32.mrb[55].mxu0  ;;  %14127 = vmatpush3.xpose.msk.msra.mxu0 %vm345_vm2, %v4457_v46  ;;  %v15198_v46 = vpack.c.bf16 %v12804_v45, %v12803_v44 }
0x27d6   :  { %15179 = vmatprep.subr.bf16.mxu0 %v15743_v7  ;;  %v12805_v47 = vld [vmem:[%s18111_s17 + $0x50] sm:$0xff] }
0x27d8   :  { %14129 = vmatmul.mubr.msk.f32.vlgmr.msra.gmra.mrb[56].mxu0 %vm345_vm2, %v4383_v39  ;;  %v15204_v39 = vpack.c.bf16 %v12809_v38, %v12808_v36  ;;  %v12831_v36 = vld [vmem:[%s18112_s18 + $0x78] sm:$0xff] }
0x27d9   :  { %15181 = vmatpush3.bf16.msra.mxu0 %v15180_v48  ;;  %14144 = vmatprep.mubr.msk.f32.mxu0 %vm15744_vm1, %v15745_v27  ;;  %v12806_v48 = vld [vmem:[%s18111_s17 + $0x58] sm:$0xff] }
0x27da   :  { %15182 = vmatprep.subr.bf16.mxu0 %v15743_v7 }
0x27dd   :  { %15184 = vmatpush3.bf16.msra.mxu0 %v15183_v51  ;;  %v15201_v51 = vpack.c.bf16 %v12806_v48, %v12805_v47 }
0x27de   :  { %15191 = vmatprep.subr.bf16.mxu0 %v15743_v7 }
0x27e0   :  { %14145 = vmatmul.mubr.msk.f32.vlgmr.msra.gmra.mrb[58].mxu0 %vm82_vm0, %v16660_v34 }
0x27e1   :  { %15193 = vmatpush3.bf16.msra.mxu0 %v15192_v53  ;;  %14166 = vmatprep.mubr.msk.f32.mxu0 %vm15744_vm1, %v15745_v27 }
0x27e2   :  { %15194 = vmatprep.subr.bf16.mxu0 %v15743_v7 }
0x27e5   :  { %15196 = vmatpush3.bf16.msra.mxu0 %v15195_v55  ;;  %v12815_v55 = vld [vmem:[%s18113_s19 + $0x50] sm:$0xff] }
0x27e6   :  { %14179 = vmatprep.subr.mxu0 %v15745_v27 }
0x27e8   :  { %14167 = vmatmul.mubr.msk.f32.vlgmr.msra.gmra.mrb[60].mxu0 %vm82_vm0, %v16660_v34 }
0x27e9   :  { %14181 = vmatprep.mubr.msk.f32.mxu0 %vm15744_vm1, %v15745_v27  ;;  %14180 = vmatpush3.msra.mxu0 %v12800_v30 }
0x27ea   :  { %15197 = vmatprep.subr.bf16.mxu0 %v15743_v7 }
0x28ab   :  { %v4607_v56 = vpop.f32.mrb[56].mxu0 }
0x28ac   :  { %v4611_v57 = vmul.f32 0.35355338, %v4607_v56  ;;  %v14130_v59 = vpop.f32.mrb[57].mxu0  ;;  %v12816_v56 = vld [vmem:[%s18113_s19 + $0x58] sm:$0xff] }
0x28ae   :  { %v4612_v60 = vsel %vm345_vm2, %v4611_v57, -inf }
0x28af   :  { %4613 = vmax.xlane.f32.xlu0 %v4612_v60 }
0x28b3   :  { %v4768_v62 = vpop.f32.mrb[58].mxu0 }
0x28b4   :  { %v14146_v63 = vpop.f32.mrb[59].mxu0 }
0x28bb   :  { %v4918_v1 = vpop.f32.mrb[60].mxu0 }
0x28bc   :  { %v14168_v2 = vpop.f32.mrb[61].mxu0 }
0x293c   :  { %v4614_v3 = vpop.xlane.xlu0 %4613 }
0x293d   :  { %v4615_v4 = vsub.f32 %v4611_v57, %v4614_v3  ;;  %v15213_v57 = vpack.c.bf16 %v12816_v56, %v12815_v55 }
0x293f   :  { %v4616_v5 = vmul.f32 1.442695, %v4615_v4 }
0x2941   :  { %15641 = vpow2.f32 %v4616_v5 }
0x294b   :  { %v15642_v6 = vpop.eup %15641 }
0x294c   :  { %v4618_v8 = vsel %vm345_vm2, %v15642_v6, 0.0 }
0x294d   :  { %4619 = vadd.xlane.f32.xlu1 %v4618_v8 }
0x29da   :  { %v4620_v9 = vpop.xlane.xlu1 %4619 }
0x29db   :  { %15643 = vrcp.f32 %v4620_v9 }
0x29e5   :  { %v15644_v12 = vpop.eup %15643 }
0x29e6   :  { %v4622_v61 = vmul.f32 %v15644_v12, %v15642_v6 }
0x29e8   :  { %14134 = vmatmul.mubr.msk.f32.vlgmr.msra.gmra.mrb[54].mxu1 %vm345_vm2, %v4622_v61 }
0x29e9   :  { %15187 = vmatpush3.bf16.msra.mxu1 %v15186_v13  ;;  %14155 = vmatprep.mubr.msk.f32.mxu1 %vm15744_vm1, %v15745_v27 }
0x29ea   :  { %15188 = vmatprep.subr.bf16.mxu1 %v15743_v7 }
0x29ed   :  { %15190 = vmatpush3.bf16.msra.mxu1 %v15189_v0 }
0x29ee   :  { %14169 = vmatprep.subr.mxu1 %v15745_v27 }
0x29f0   :  { %14156 = vmatmul.mubr.msk.f32.vlgmr.msra.gmra.mrb[56].mxu1 %vm82_vm0, %v16660_v34 }
0x29f1   :  { %14171 = vmatprep.mubr.msk.f32.mxu1 %vm15744_vm1, %v15745_v27 }
0x2abb   :  { %v4692_v16 = vpop.f32.mrb[54].mxu1 }
0x2abc   :  { %v14135_v17 = vpop.f32.mrb[55].mxu1 }
0x2abd   :  { %v12824_v17 = vld [vmem:[%s18111_s17 + $0x68] sm:$0xff] }
0x2ac3   :  { %v4843_v18 = vpop.f32.mrb[56].mxu1 }
0x2ac4   :  { %v14157_v19 = vpop.f32.mrb[57].mxu1  ;;  %14170 = vmatpush3.xpose.msk.msra.mxu1 %vm345_vm2, %v4843_v18 }
0x2ac5   :  { %14174 = vmatprep.subr.mxu1 %v15745_v27 }
0x2ac7   :  { %14172 = vmatmul.mubr.msk.f32.vlgmr.msra.gmra.mrb[58].mxu1 %vm345_vm2, %v4768_v62 }
0x2ac8   :  { %14175 = vmatpush3.msra.mxu1 %v4918_v1  ;;  %14176 = vmatprep.mubr.msk.f32.mxu1 %vm15744_vm1, %v15745_v27 }
0x2ac9   :  { %14184 = vmatprep.subr.mxu1 %v15745_v27 }
0x2b9a   :  { %v4994_v20 = vpop.f32.mrb[58].mxu1 }
0x2b9b   :  { %v4998_v21 = vmul.f32 0.35355338, %v4994_v20  ;;  %v14173_v22 = vpop.f32.mrb[59].mxu1 }
0x2b9c   :  { %v12826_v22 = vld [vmem:[%s18111_s17 + $0x78] sm:$0xff] }
0x2b9d   :  { %v4999_v23 = vsel %vm345_vm2, %v4998_v21, -inf }
0x2b9e   :  { %5000 = vmax.xlane.f32.xlu0 %v4999_v23 }
0x2c2b   :  { %v5001_v24 = vpop.xlane.xlu0 %5000 }
0x2c2c   :  { %v5002_v25 = vsub.f32 %v4998_v21, %v5001_v24  ;;  %v12825_v21 = vld [vmem:[%s18111_s17 + $0x70] sm:$0xff]  ;;  %v12833_v24 = vld [vmem:[%s18113_s19 + $0x60] sm:$0xff] }
0x2c2d   :  { %v15219_v23 = vpack.c.bf16 %v12826_v22, %v12825_v21  ;;  %v6195_v21 = vld [vmem:[%s18115_s21 + $0x10] sm:$0xff]  ;;  %v6196_v22 = vld [vmem:[%s18115_s21 + $0x18] sm:$0xff] }
0x2c2e   :  { %v5003_v26 = vmul.f32 1.442695, %v5002_v25  ;;  %v12834_v25 = vld [vmem:[%s18113_s19 + $0x68] sm:$0xff] }
0x2c30   :  { %15645 = vpow2.f32 %v5003_v26  ;;  %v15228_v26 = vpack.c.bf16 %v12834_v25, %v12833_v24 }
0x2c3a   :  { %v15646_v28 = vpop.eup %15645 }
0x2c3b   :  { %v5005_v29 = vsel %vm345_vm2, %v15646_v28, 0.0 }
0x2c3c   :  { %5006 = vadd.xlane.f32.xlu1 %v5005_v29  ;;  %v12836_v29 = vld [vmem:[%s18113_s19 + $0x78] sm:$0xff] }
0x2cc9   :  { %v5007_v31 = vpop.xlane.xlu1 %5006 }
0x2cca   :  { %15647 = vrcp.f32 %v5007_v31  ;;  %v12828_v31 = vld [vmem:[%s18112_s18 + $0x60] sm:$0xff] }
0x2cd4   :  { %v15648_v32 = vpop.eup %15647 }
0x2cd5   :  { %v5009_v33 = vmul.f32 %v15648_v32, %v15646_v28  ;;  %v12835_v28 = vld [vmem:[%s18113_s19 + $0x70] sm:$0xff]  ;;  %v12829_v32 = vld [vmem:[%s18112_s18 + $0x68] sm:$0xff] }
0x2cd6   :  { %v15231_v30 = vpack.c.bf16 %v12836_v29, %v12835_v28 }
0x2cd7   :  { %14177 = vmatmul.mubr.msk.f32.vlgmr.msra.gmra.mrb[60].mxu1 %vm345_vm2, %v5009_v33  ;;  %v15222_v33 = vpack.c.bf16 %v12829_v32, %v12828_v31 }
0x2cd8   :  { %14185 = vmatpush3.msra.mxu1 %v4696_v35  ;;  %14186 = vmatprep.mubr.msk.f32.mxu1 %vm15744_vm1, %v15745_v27  ;;  %v12830_v35 = vld [vmem:[%s18112_s18 + $0x70] sm:$0xff] }
0x2cd9   :  { %15203 = vmatprep.subr.bf16.mxu1 %v15743_v7  ;;  %v15225_v41 = vpack.c.bf16 %v12831_v36, %v12830_v35 }
0x2cdb   :  { %14187 = vmatmul.mubr.msk.f32.vlgmr.msra.gmra.mrb[62].mxu1 %vm345_vm2, %v4692_v16  ;;  %v12823_v16 = vld [vmem:[%s18111_s17 + $0x60] sm:$0xff] }
0x2cdc   :  { %15205 = vmatpush3.bf16.msra.mxu1 %v15204_v39  ;;  %14208 = vmatprep.mubr.msk.f32.mxu1 %vm15744_vm1, %v15745_v27  ;;  %v15216_v19 = vpack.c.bf16 %v12824_v17, %v12823_v16 }
0x2cdd   :  { %15206 = vmatprep.subr.bf16.mxu1 %v15743_v7 }
0x2ce0   :  { %15208 = vmatpush3.bf16.msra.mxu1 %v15207_v43 }
0x2ce1   :  { %14222 = vmatprep.subr.mxu1 %v15745_v27 }
0x2ce3   :  { %14209 = vmatmul.mubr.msk.f32.vlgmr.msra.gmra.mrb[64].mxu1 %vm82_vm0, %v16660_v34 }
0x2ce4   :  { %14224 = vmatprep.mubr.msk.f32.mxu1 %vm15744_vm1, %v15745_v27 }
0x2daa   :  { %v5079_v49 = vpop.f32.mrb[60].mxu1 }
0x2dab   :  { %v14178_v50 = vpop.f32.mrb[61].mxu1  ;;  %14182 = vmatmul.mubr.msk.f32.vlgmr.msra.gmra.mrb[62].mxu0 %vm345_vm2, %v5079_v49 }
0x2dac   :  { %15199 = vmatpush3.bf16.msra.mxu0 %v15198_v46  ;;  %14197 = vmatprep.mubr.msk.f32.mxu0 %vm15744_vm1, %v15745_v27 }
0x2dad   :  { %15200 = vmatprep.subr.bf16.mxu0 %v15743_v7 }
0x2dae   :  { %v5227_v53 = vpop.f32.mrb[62].mxu1 }
0x2daf   :  { %v14188_v54 = vpop.f32.mrb[63].mxu1 }
0x2db0   :  { %15202 = vmatpush3.bf16.msra.mxu0 %v15201_v51 }
0x2db1   :  { %15209 = vmatprep.subr.bf16.mxu0 %v15743_v7 }
0x2db3   :  { %14198 = vmatmul.mubr.msk.f32.vlgmr.msra.gmra.mrb[64].mxu0 %vm82_vm0, %v16660_v34 }
0x2db4   :  { %15211 = vmatpush3.bf16.msra.mxu0 %v15210_v40  ;;  %14219 = vmatprep.mubr.msk.f32.mxu0 %vm15744_vm1, %v15745_v27 }
0x2db5   :  { %15212 = vmatprep.subr.bf16.mxu0 %v15743_v7 }
0x2db6   :  { %v5377_v59 = vpop.f32.mrb[64].mxu1 }
0x2db7   :  { %v14210_v60 = vpop.f32.mrb[65].mxu1  ;;  %14223 = vmatpush3.xpose.msk.msra.mxu1 %vm345_vm2, %v5377_v59 }
0x2db8   :  { %15214 = vmatpush3.bf16.msra.mxu0 %v15213_v57  ;;  %14227 = vmatprep.subr.mxu1 %v15745_v27  ;;  %v12841_v57 = vld [vmem:[%s18114_s20 + $0x18] sm:$0xff] }
0x2db9   :  { %14232 = vmatprep.subr.mxu0 %v15745_v27 }
0x2dbb   :  { %14220 = vmatmul.mubr.msk.f32.vlgmr.msra.gmra.mrb[66].mxu0 %vm82_vm0, %v16660_v34 }
0x2dbc   :  { %14234 = vmatprep.mubr.msk.f32.mxu0 %vm15744_vm1, %v15745_v27  ;;  %14233 = vmatpush3.msra.mxu0 %v12821_v15 }
0x2dbd   :  { %15221 = vmatprep.subr.bf16.mxu0 %v15743_v7 }
0x2e7e   :  { %v5154_v62 = vpop.f32.mrb[62].mxu0 }
0x2e7f   :  { %v16828_v63 = vadd.f32 %v5227_v53, %v5154_v62  ;;  %v14183_v1 = vpop.f32.mrb[63].mxu0 }
0x2e86   :  { %v5302_v2 = vpop.f32.mrb[64].mxu0 }
0x2e87   :  { %v14199_v3 = vpop.f32.mrb[65].mxu0  ;;  %14225 = vmatmul.mubr.msk.f32.vlgmr.msra.gmra.mrb[66].mxu1 %vm345_vm2, %v5302_v2 }
0x2e88   :  { %14229 = vmatprep.mubr.msk.f32.mxu1 %vm15744_vm1, %v15745_v27 }
0x2e8e   :  { %v5452_v4 = vpop.f32.mrb[66].mxu0 }
0x2e8f   :  { %v14221_v5 = vpop.f32.mrb[67].mxu0  ;;  %14228 = vmatpush3.msra.mxu1 %v5452_v4 }
0x2e90   :  { %15215 = vmatprep.subr.bf16.mxu1 %v15743_v7  ;;  %v16922_v5 = vld [vmem:[%s18145_s6 + $0x8] sm:$0xff] }
0x2f5a   :  { %v5528_v6 = vpop.f32.mrb[66].mxu1 }
0x2f5b   :  { %v5532_v8 = vmul.f32 0.35355338, %v5528_v6  ;;  %v14226_v9 = vpop.f32.mrb[67].mxu1 }
0x2f5d   :  { %v5533_v10 = vsel %vm345_vm2, %v5532_v8, -inf }
0x2f5e   :  { %5534 = vmax.xlane.f32.xlu0 %v5533_v10  ;;  %v6383_v10 = vmul.f32 %v16922_v5, %v16922_v5 }
0x2feb   :  { %v5535_v11 = vpop.xlane.xlu0 %5534 }
0x2fec   :  { %v5536_v12 = vsub.f32 %v5532_v8, %v5535_v11 }
0x2fee   :  { %v5537_v13 = vmul.f32 1.442695, %v5536_v12  ;;  %v6370_v12 = vsel %vm82_vm0, %v16922_v5, 0.0 }
0x2ff0   :  { %15649 = vpow2.f32 %v5537_v13  ;;  %v6384_v13 = vsel %vm82_vm0, %v6383_v10, 0.0 }
0x2ffa   :  { %v15650_v61 = vpop.eup %15649 }
0x2ffb   :  { %v5539_v14 = vsel %vm345_vm2, %v15650_v61, 0.0 }
0x2ffc   :  { %5540 = vadd.xlane.f32.xlu1 %v5539_v14 }
0x3089   :  { %v5541_v0 = vpop.xlane.xlu1 %5540 }
0x308a   :  { %15651 = vrcp.f32 %v5541_v0 }
0x3094   :  { %v15652_v18 = vpop.eup %15651 }
0x3095   :  { %v5543_v20 = vmul.f32 %v15652_v18, %v15650_v61  ;;  %v6194_v61 = vld [vmem:[%s18115_s21 + $0x8] sm:$0xff] }
0x3097   :  { %14230 = vmatmul.mubr.msk.f32.vlgmr.msra.gmra.mrb[68].mxu1 %vm345_vm2, %v5543_v20 }
0x3098   :  { %15217 = vmatpush3.bf16.msra.mxu1 %v15216_v19  ;;  %14245 = vmatprep.mubr.msk.f32.mxu1 %vm15744_vm1, %v15745_v27 }
0x3099   :  { %15218 = vmatprep.subr.bf16.mxu1 %v15743_v7 }
0x309c   :  { %15220 = vmatpush3.bf16.msra.mxu1 %v15219_v23  ;;  %v15237_v23 = vpack.c.bf16 %v6196_v22, %v6195_v21  ;;  %v12843_v21 = vld [vmem:[%s18116_s22] ss:$0 sm:$0xff] }
0x309d   :  { %15227 = vmatprep.subr.bf16.mxu1 %v15743_v7  ;;  %v6558_v22 = vld [vmem:[%s18148_s7] sm:$0xff] }
0x309f   :  { %14246 = vmatmul.mubr.msk.f32.vlgmr.msra.gmra.mrb[70].mxu1 %vm82_vm0, %v16660_v34 }
0x30a0   :  { %15229 = vmatpush3.bf16.msra.mxu1 %v15228_v26  ;;  %14267 = vmatprep.mubr.msk.f32.mxu1 %vm15744_vm1, %v15745_v27 }
0x30a1   :  { %15230 = vmatprep.subr.bf16.mxu1 %v15743_v7 }
0x30a4   :  { %15232 = vmatpush3.bf16.msra.mxu1 %v15231_v30 }
0x30a5   :  { %14280 = vmatprep.subr.mxu1 %v15745_v27 }
0x30a7   :  { %14268 = vmatmul.mubr.msk.f32.vlgmr.msra.gmra.mrb[72].mxu1 %vm82_vm0, %v16660_v34 }
0x30a8   :  { %14282 = vmatprep.mubr.msk.f32.mxu1 %vm15744_vm1, %v15745_v27  ;;  %14281 = vmatpush3.msra.mxu1 %v12841_v57 }
0x30a9   :  { %15239 = vmatprep.subr.bf16.mxu1 %v15743_v7 }
0x316a   :  { %v5613_v38 = vpop.f32.mrb[68].mxu1 }
0x316b   :  { %v14231_v39 = vpop.f32.mrb[69].mxu1  ;;  %14235 = vmatmul.mubr.msk.f32.vlgmr.msra.gmra.mrb[68].mxu0 %vm345_vm2, %v5613_v38 }
0x316c   :  { %15223 = vmatpush3.bf16.msra.mxu0 %v15222_v33  ;;  %14256 = vmatprep.mubr.msk.f32.mxu0 %vm15744_vm1, %v15745_v27 }
0x316d   :  { %15224 = vmatprep.subr.bf16.mxu0 %v15743_v7 }
0x3170   :  { %15226 = vmatpush3.bf16.msra.mxu0 %v15225_v41 }
0x3171   :  { %14270 = vmatprep.subr.mxu0 %v15745_v27 }
0x3172   :  { %v5764_v42 = vpop.f32.mrb[70].mxu1 }
0x3173   :  { %v14247_v43 = vpop.f32.mrb[71].mxu1  ;;  %14257 = vmatmul.mubr.msk.f32.vlgmr.msra.gmra.mrb[70].mxu0 %vm82_vm0, %v16660_v34 }
0x3174   :  { %14272 = vmatprep.mubr.msk.f32.mxu0 %vm15744_vm1, %v15745_v27 }
0x317a   :  { %v5914_v44 = vpop.f32.mrb[72].mxu1 }
0x317b   :  { %v14269_v45 = vpop.f32.mrb[73].mxu1 }
0x323e   :  { %v5688_v46 = vpop.f32.mrb[68].mxu0 }
0x323f   :  { %v5692_v47 = vadd.f32 %v5688_v46, %v16828_v63  ;;  %v14236_v48 = vpop.f32.mrb[69].mxu0 }
0x3246   :  { %v5839_v49 = vpop.f32.mrb[70].mxu0 }
0x3247   :  { %v14258_v50 = vpop.f32.mrb[71].mxu0  ;;  %14271 = vmatpush3.xpose.msk.msra.mxu0 %vm345_vm2, %v5839_v49 }
0x3248   :  { %14275 = vmatprep.subr.mxu0 %v15745_v27 }
0x324a   :  { %14273 = vmatmul.mubr.msk.f32.vlgmr.msra.gmra.mrb[72].mxu0 %vm345_vm2, %v5764_v42 }
0x324b   :  { %14276 = vmatpush3.msra.mxu0 %v5914_v44  ;;  %14277 = vmatprep.mubr.msk.f32.mxu0 %vm15744_vm1, %v15745_v27 }
0x324c   :  { %15233 = vmatprep.subr.bf16.mxu0 %v15743_v7 }
0x331d   :  { %v5990_v34 = vpop.f32.mrb[72].mxu0 }
0x331e   :  { %v5994_v51 = vmul.f32 0.35355338, %v5990_v34  ;;  %v14274_v52 = vpop.f32.mrb[73].mxu0  ;;  %v6278_v34 = vld [vmem:[%s18117_s23] sm:$0xff] }
0x331f   :  { %v6280_v52 = vld [vmem:[%s18117_s23 + $0x10] sm:$0xff] }
0x3320   :  { %v5995_v37 = vsel %vm345_vm2, %v5994_v51, -inf }
0x3321   :  { %5996 = vmax.xlane.f32.xlu0 %v5995_v37 }
0x33ae   :  { %v5997_v53 = vpop.xlane.xlu0 %5996 }
0x33af   :  { %v5998_v54 = vsub.f32 %v5994_v51, %v5997_v53  ;;  %v6279_v51 = vld [vmem:[%s18117_s23 + $0x8] sm:$0xff]  ;;  %v6281_v53 = vld [vmem:[%s18117_s23 + $0x18] sm:$0xff] }
0x33b0   :  { %v15240_v37 = vpack.c.bf16 %v6279_v51, %v6278_v34  ;;  %v12845_v51 = vld [vmem:[%s18118_s24] ss:$0 sm:$0xff] }
0x33b1   :  { %v5999_v40 = vmul.f32 1.442695, %v5998_v54  ;;  %v15243_v54 = vpack.c.bf16 %v6281_v53, %v6280_v52 }
0x33b3   :  { %15653 = vpow2.f32 %v5999_v40  ;;  %v6282_v40 = vld [vmem:[%s18117_s23 + $0x20] sm:$0xff] }
0x33bd   :  { %v15654_v55 = vpop.eup %15653 }
0x33be   :  { %v6001_v56 = vsel %vm345_vm2, %v15654_v55, 0.0 }
0x33bf   :  { %6002 = vadd.xlane.f32.xlu1 %v6001_v56 }
0x344c   :  { %v6003_v59 = vpop.xlane.xlu1 %6002 }
0x344d   :  { %15655 = vrcp.f32 %v6003_v59  ;;  %v6407_v59 = vld [vmem:[%s18146_s3] sm:$0xff] }
0x3457   :  { %v15656_v60 = vpop.eup %15655 }
0x3458   :  { %v6005_v62 = vmul.f32 %v15656_v60, %v15654_v55  ;;  %v6283_v55 = vld [vmem:[%s18117_s23 + $0x28] sm:$0xff] }
0x3459   :  { %v15246_v56 = vpack.c.bf16 %v6283_v55, %v6282_v40  ;;  %v6408_v60 = vld [vmem:[%s18146_s3 + $0x8] sm:$0xff] }
0x345a   :  { %14278 = vmatmul.mubr.msk.f32.vlgmr.msra.gmra.mrb[74].mxu0 %vm345_vm2, %v6005_v62 }
0x345b   :  { %14293 = vmatprep.mubr.msk.f32.mxu0 %vm15744_vm1, %v15745_v27 }
0x352d   :  { %v6075_v63 = vpop.f32.mrb[74].mxu0 }
0x352e   :  { %v14279_v1 = vpop.f32.mrb[75].mxu0  ;;  %14283 = vmatmul.mubr.msk.f32.vlgmr.msra.gmra.mrb[74].mxu1 %vm345_vm2, %v6075_v63 }
0x352f   :  { %14312 = vmatprep.mubr.msk.f32.mxu1 %vm15744_vm1, %v15745_v27  ;;  %15241 = vmatpush3.bf16.msra.mxu1 %v15240_v37  ;;  %v15252_v1 = vpack.c.bf16 %v6408_v60, %v6407_v59 }
0x3530   :  { %15242 = vmatprep.subr.bf16.mxu1 %v15743_v7 }
0x3533   :  { %15244 = vmatpush3.bf16.msra.mxu1 %v15243_v54 }
0x3534   :  { %15245 = vmatprep.subr.bf16.mxu1 %v15743_v7 }
0x3537   :  { %15247 = vmatpush3.bf16.msra.mxu1 %v15246_v56 }
0x3538   :  { %15248 = vmatprep.subr.bf16.mxu1 %v15743_v7 }
0x3601   :  { %v6150_v2 = vpop.f32.mrb[74].mxu1 }
0x3602   :  { %v6154_v3 = vadd.f32 %v6150_v2, %v5692_v47  ;;  %v14284_v4 = vpop.f32.mrb[75].mxu1 }
0x3603   :  { %v6410_v4 = vld [vmem:[%s18146_s3 + $0x18] sm:$0xff] }
0x3604   :  { %v16925_v6 = vadd.f32 %v6154_v3, %v16618_v58  ;;  %v6193_v58 = vld [vmem:[%s18115_s21] sm:$0xff]  ;;  %v6409_v3 = vld [vmem:[%s18146_s3 + $0x10] sm:$0xff] }
0x3605   :  { %v15234_v14 = vpack.c.bf16 %v6194_v61, %v6193_v58 }
0x3606   :  { %v6156_v8 = vsel %vm82_vm0, %v16925_v6, 0.0  ;;  %v6169_v9 = vmul.f32 %v16925_v6, %v16925_v6 }
0x3607   :  { %6157 = vadd.xlane.f32.xlu0 %v6156_v8  ;;  %15235 = vmatpush3.bf16.msra.mxu0 %v15234_v14  ;;  %v15255_v8 = vpack.c.bf16 %v6410_v4, %v6409_v3 }
0x3608   :  { %v6170_v11 = vsel %vm82_vm0, %v6169_v9, 0.0  ;;  %15236 = vmatprep.subr.bf16.mxu0 %v15743_v7 }
0x3609   :  { %6171 = vadd.xlane.f32.xlu1 %v6170_v11 }
0x360b   :  { %6371 = vadd.xlane.f32.xlu0 %v6370_v12  ;;  %15238 = vmatpush3.bf16.msra.mxu0 %v15237_v23  ;;  %v6484_v12 = vld [vmem:[%s18147_s4] sm:$0xff]  ;;  %v6559_v23 = vld [vmem:[%s18148_s7 + $0x8] sm:$0xff] }
0x360c   :  { %15251 = vmatprep.subr.bf16.mxu0 %v15743_v7 }
0x360d   :  { %6385 = vadd.xlane.f32.xlu1 %v6384_v13  ;;  %v6485_v13 = vld [vmem:[%s18147_s4 + $0x8] sm:$0xff] }
0x360e   :  { %v15258_v14 = vpack.c.bf16 %v6485_v13, %v6484_v12  ;;  %v12860_v12 = vld [vmem:[%s18147_s4 + $0x28] sm:$0xff] }
0x3694   :  { %v6158_v15 = vpop.xlane.xlu0 %6157 }
0x3695   :  { %v6159_v0 = vrot.slane %v6158_v15, 4 }
0x3696   :  { %v6172_v16 = vpop.xlane.xlu1 %6171 }
0x3697   :  { %v6160_v17 = vadd.f32 %v6159_v0, %v6158_v15  ;;  %v6173_v18 = vrot.slane %v6172_v16, 4  ;;  %v6486_v0 = vld [vmem:[%s18147_s4 + $0x10] sm:$0xff] }
0x3698   :  { %v6372_v32 = vpop.xlane.xlu0 %6371 }
0x3699   :  { %v6161_v19 = vrot.slane %v6160_v17, 2  ;;  %v6174_v20 = vadd.f32 %v6173_v18, %v6172_v16  ;;  %v6373_v35 = vrot.slane %v6372_v32, 4  ;;  %v6487_v16 = vld [vmem:[%s18147_s4 + $0x18] sm:$0xff]  ;;  %v6284_v18 = vld [vmem:[%s18117_s23 + $0x30] sm:$0xff] }
0x369a   :  { %v6386_v33 = vpop.xlane.xlu1 %6385 }
0x369b   :  { %v6175_v24 = vrot.slane %v6174_v20, 2  ;;  %v6162_v25 = vadd.f32 %v6161_v19, %v6160_v17  ;;  %v6387_v36 = vrot.slane %v6386_v33, 4  ;;  %v6374_v38 = vadd.f32 %v6373_v35, %v6372_v32  ;;  %v6285_v19 = vld [vmem:[%s18117_s23 + $0x38] sm:$0xff] }
0x369c   :  { %v15261_v17 = vpack.c.bf16 %v6487_v16, %v6486_v0  ;;  %v12862_v0 = vld [vmem:[%s18147_s4 + $0x38] sm:$0xff] }
0x369d   :  { %v6163_v26 = vrot.slane %v6162_v25, 1  ;;  %v6176_v28 = vadd.f32 %v6175_v24, %v6174_v20  ;;  %v6388_v39 = vadd.f32 %v6387_v36, %v6386_v33  ;;  %v6375_v41 = vrot.slane %v6374_v38, 2  ;;  %v12854_v36 = vld [vmem:[%s18146_s3 + $0x20] sm:$0xff] }
0x369e   :  { %v15249_v20 = vpack.c.bf16 %v6285_v19, %v6284_v18 }
0x369f   :  { %v6164_v29 = vadd.f32 %v6163_v26, %v6162_v25  ;;  %v6177_v30 = vrot.slane %v6176_v28, 1  ;;  %v6389_v43 = vrot.slane %v6388_v39, 2  ;;  %v6376_v44 = vadd.f32 %v6375_v41, %v6374_v38  ;;  %v12855_v38 = vld [vmem:[%s18146_s3 + $0x28] sm:$0xff] }
0x36a0   :  { %15250 = vmatpush3.bf16.msra.mxu1 %v15249_v20 }
0x36a1   :  { %15551 = vpush %v6164_v29  ;;  %v6178_v31 = vadd.f32 %v6177_v30, %v6176_v28  ;;  %v6390_v45 = vadd.f32 %v6389_v43, %v6388_v39  ;;  %v6377_v46 = vrot.slane %v6376_v44, 1  ;;  %15263 = vmatprep.subr.bf16.mxu1 %v15743_v7  ;;  %v15264_v28 = vpack.c.bf16 %v6559_v23, %v6558_v22  ;;  %v6560_v30 = vld [vmem:[%s18148_s7 + $0x10] sm:$0xff] }
0x36a2   :  { %v12856_v43 = vld [vmem:[%s18146_s3 + $0x30] sm:$0xff] }
0x36a3   :  { %15553 = vpush %v6178_v31  ;;  %v6391_v47 = vrot.slane %v6390_v45, 1  ;;  %v6378_v49 = vadd.f32 %v6377_v46, %v6376_v44  ;;  %v6561_v31 = vld [vmem:[%s18148_s7 + $0x18] sm:$0xff]  ;;  %v12864_v46 = vld [vmem:[%s18148_s7 + $0x20] sm:$0xff] }
0x36a4   :  { %v15267_v32 = vpack.c.bf16 %v6561_v31, %v6560_v30  ;;  %v12857_v44 = vld [vmem:[%s18146_s3 + $0x38] sm:$0xff] }
0x36a5   :  { %v6392_v50 = vadd.f32 %v6391_v47, %v6390_v45  ;;  %v15273_v45 = vpack.c.bf16 %v12857_v44, %v12856_v43  ;;  %v12865_v47 = vld [vmem:[%s18148_s7 + $0x28] sm:$0xff]  ;;  %v12883_v43 = vld [vmem:[%s18147_s4 + $0x58] sm:$0xff] }
0x36d2   :  { %s15552_s29 = spop %15551 }
0x36d3   :  { %s16951_s0 = smul.f32 0.00390625, %s15552_s29 }
0x36d4   :  { %s15554_s30 = spop %15553 }
0x36d5   :  { %s6183_s2 = smul.f32 %s16951_s0, %s16951_s0  ;;  %v6185_v57 = vstv %s16951_s0 }
0x36d6   :  { %s6182_s6 = smul.f32 0.00390625, %s15554_s30  ;;  %v6186_v62 = vsub.f32 %v16925_v6, %v6185_v57 }
0x36d8   :  { %s6184_s27 = ssub.f32 %s6182_s6, %s6183_s2 }
0x36da   :  { %s6187_s26 = sadd.f32 1e-05, %s6184_s27  ;;  %s18155_s27 = sld [smem:[#allocation9_spill]] }
0x36dc   :  { %v6188_v42 = vstv %s6187_s26 }
0x36dd   :  { %15657 = vrsqrt.f32 %v6188_v42  ;;  %v15270_v42 = vpack.c.bf16 %v12855_v38, %v12854_v36  ;;  %v12880_v38 = vld [vmem:[%s18147_s4 + $0x40] sm:$0xff] }
0x36e0   :  { %v12872_v31 = vld [vmem:[%s18155_s27 + $0x8] sm:$0xff]  ;;  %v6793_v36 = vld [vmem:[%s18155_s27] sm:$0xff] }
0x36e7   :  { %v15658_v48 = vpop.eup %15657 }
0x36e8   :  { %15555 = vpush %v15658_v48  ;;  %v15282_v48 = vpack.c.bf16 %v12865_v47, %v12864_v46  ;;  %v12876_v46 = vld [vmem:[%s18146_s3 + $0x48] sm:$0xff] }
0x36e9   :  { %15557 = vpush %v6378_v49  ;;  %v12866_v49 = vld [vmem:[%s18148_s7 + $0x30] sm:$0xff] }
0x36ea   :  { %15559 = vpush %v6392_v50  ;;  %v12867_v50 = vld [vmem:[%s18148_s7 + $0x38] sm:$0xff] }
0x36eb   :  { %v15285_v34 = vpack.c.bf16 %v12867_v50, %v12866_v49  ;;  %v12878_v49 = vld [vmem:[%s18146_s3 + $0x58] sm:$0xff] }
0x3719   :  { %s15556_s29 = spop %15555 }
0x371a   :  { %v6191_v63 = vstv %s15556_s29  ;;  %s15558_s30 = spop %15557 }
0x371b   :  { %v6192_v2 = vmul.f32 %v6191_v63, %v6186_v62  ;;  %s6382_s2 = smul.f32 0.00390625, %s15558_s30  ;;  %s15560_s6 = spop %15559 }
0x371c   :  { %s6396_s1 = smul.f32 0.00390625, %s15560_s6 }
0x371d   :  { %s6397_s5 = smul.f32 %s6382_s2, %s6382_s2  ;;  %14294 = vmatmul.mubr.msk.f32.vlgmr.msra.gmra.mrb[76].mxu0 %vm82_vm0, %v6192_v2  ;;  %v6399_v11 = vstv %s6382_s2 }
0x371e   :  { %15253 = vmatpush3.bf16.msra.mxu0 %v15252_v1  ;;  %14323 = vmatprep.mubr.msk.f32.mxu0 %vm15744_vm1, %v15745_v27  ;;  %v6400_v58 = vsub.f32 %v16922_v5, %v6399_v11  ;;  %v12859_v11 = vld [vmem:[%s18147_s4 + $0x20] sm:$0xff] }
0x371f   :  { %s6398_s28 = ssub.f32 %s6396_s1, %s6397_s5  ;;  %15254 = vmatprep.subr.bf16.mxu0 %v15743_v7  ;;  %s18157_s1 = sld [smem:[#allocation12_spill]] }
0x3721   :  { %s6401_s9 = sadd.f32 1e-05, %s6398_s28 }
0x3722   :  { %15256 = vmatpush3.bf16.msra.mxu0 %v15255_v8 }
0x3723   :  { %v6402_v9 = vstv %s6401_s9  ;;  %15257 = vmatprep.subr.bf16.mxu0 %v15743_v7  ;;  %s18156_s9 = sld [smem:[#allocation10_spill]] }
0x3724   :  { %15659 = vrsqrt.f32 %v6402_v9 }
0x372e   :  { %v15660_v10 = vpop.eup %15659 }
0x372f   :  { %15561 = vpush %v15660_v10 }
0x3760   :  { %s15562_s26 = spop %15561 }
0x3761   :  { %v6405_v61 = vstv %s15562_s26 }
0x3762   :  { %v17002_v15 = vmul.f32 %v6405_v61, %v6400_v58  ;;  %v15276_v58 = vpack.c.bf16 %v12860_v12, %v12859_v11 }
0x3764   :  { %14324 = vmatmul.mubr.msk.f32.vlgmr.msra.gmra.mrb[78].mxu0 %vm82_vm0, %v17002_v15 }
0x3765   :  { %15259 = vmatpush3.bf16.msra.mxu0 %v15258_v14  ;;  %14334 = vmatprep.mubr.msk.f32.mxu0 %vm15744_vm1, %v15745_v27  ;;  %v12861_v14 = vld [vmem:[%s18147_s4 + $0x30] sm:$0xff] }
0x3766   :  { %15260 = vmatprep.subr.bf16.mxu0 %v15743_v7  ;;  %v15279_v16 = vpack.c.bf16 %v12862_v0, %v12861_v14  ;;  %v12893_v0 = vld [vmem:[%s18155_s27 + $0x10] sm:$0xff] }
0x3769   :  { %15262 = vmatpush3.bf16.msra.mxu0 %v15261_v17 }
0x376a   :  { %14348 = vmatprep.subr.mxu0 %v15745_v27 }
0x376c   :  { %14335 = vmatmul.mubr.msk.f32.vlgmr.msra.gmra.mrb[80].mxu0 %vm82_vm0, %v17002_v15 }
0x376d   :  { %14350 = vmatprep.mubr.msk.f32.mxu0 %vm15744_vm1, %v15745_v27 }
0x37f0   :  { %v6273_v24 = vpop.f32.mrb[76].mxu0 }
0x37f1   :  { %v6274_v25 = vadd.f32 %v12843_v21, %v6273_v24  ;;  %v14295_v26 = vpop.f32.mrb[77].mxu0 }
0x37f3   :  { %v6277_v29 = vmax.f32 %v6274_v25, 0.0 }
0x37f5   :  { %14313 = vmatmul.mubr.msk.f32.vlgmr.msra.gmra.mrb[76].mxu1 %vm2104_vm3, %v6277_v29 }
0x37f6   :  { %15265 = vmatpush3.bf16.msra.mxu1 %v15264_v28  ;;  %14345 = vmatprep.mubr.msk.f32.mxu1 %vm15744_vm1, %v15745_v27 }
0x37f7   :  { %15266 = vmatprep.subr.bf16.mxu1 %v15743_v7 }
0x37fa   :  { %15268 = vmatpush3.bf16.msra.mxu1 %v15267_v32 }
0x37fb   :  { %14353 = vmatprep.subr.mxu1 %v15745_v27 }
0x37fd   :  { %14346 = vmatmul.mubr.msk.f32.vlgmr.msra.gmra.mrb[78].mxu1 %vm82_vm0, %v17002_v15 }
0x37fe   :  { %14355 = vmatprep.mubr.msk.f32.mxu1 %vm15744_vm1, %v15745_v27 }
0x3837   :  { %v6480_v33 = vpop.f32.mrb[78].mxu0 }
0x3838   :  { %v14325_v35 = vpop.f32.mrb[79].mxu0 }
0x383f   :  { %v6554_v39 = vpop.f32.mrb[80].mxu0 }
0x3840   :  { %v14336_v41 = vpop.f32.mrb[81].mxu0  ;;  %14349 = vmatpush3.xpose.msk.msra.mxu0 %vm345_vm2, %v6554_v39  ;;  %v12881_v39 = vld [vmem:[%s18147_s4 + $0x48] sm:$0xff] }
0x3841   :  { %15269 = vmatprep.subr.bf16.mxu0 %v15743_v7  ;;  %v15294_v41 = vpack.c.bf16 %v12881_v39, %v12880_v38  ;;  %v12903_v38 = vld [vmem:[%s18147_s4 + $0x78] sm:$0xff] }
0x3843   :  { %14351 = vmatmul.mubr.msk.f32.vlgmr.msra.gmra.mrb[82].mxu0 %vm345_vm2, %v6480_v33 }
0x3844   :  { %15271 = vmatpush3.bf16.msra.mxu0 %v15270_v42  ;;  %14366 = vmatprep.mubr.msk.f32.mxu0 %vm15744_vm1, %v15745_v27  ;;  %v12882_v42 = vld [vmem:[%s18147_s4 + $0x50] sm:$0xff] }
0x3845   :  { %15272 = vmatprep.subr.bf16.mxu0 %v15743_v7  ;;  %v15297_v44 = vpack.c.bf16 %v12883_v43, %v12882_v42 }
0x3848   :  { %15274 = vmatpush3.bf16.msra.mxu0 %v15273_v45  ;;  %v12875_v45 = vld [vmem:[%s18146_s3 + $0x40] sm:$0xff] }
0x3849   :  { %15281 = vmatprep.subr.bf16.mxu0 %v15743_v7  ;;  %v15288_v47 = vpack.c.bf16 %v12876_v46, %v12875_v45 }
0x384b   :  { %14367 = vmatmul.mubr.msk.f32.vlgmr.msra.gmra.mrb[84].mxu0 %vm82_vm0, %v17002_v15 }
0x384c   :  { %15283 = vmatpush3.bf16.msra.mxu0 %v15282_v48  ;;  %14388 = vmatprep.mubr.msk.f32.mxu0 %vm15744_vm1, %v15745_v27  ;;  %v12877_v48 = vld [vmem:[%s18146_s3 + $0x50] sm:$0xff] }
0x384d   :  { %15284 = vmatprep.subr.bf16.mxu0 %v15743_v7 }
0x3850   :  { %15286 = vmatpush3.bf16.msra.mxu0 %v15285_v34 }
0x3851   :  { %14401 = vmatprep.subr.mxu0 %v15745_v27 }
0x3853   :  { %14389 = vmatmul.mubr.msk.f32.vlgmr.msra.gmra.mrb[86].mxu0 %vm82_vm0, %v17002_v15 }
0x3854   :  { %14403 = vmatprep.mubr.msk.f32.mxu0 %vm15744_vm1, %v15745_v27  ;;  %14402 = vmatpush3.msra.mxu0 %v12872_v31 }
0x3855   :  { %15287 = vmatprep.subr.bf16.mxu0 %v15743_v7 }
0x38c8   :  { %v6362_v52 = vpop.f32.mrb[76].mxu1 }
0x38c9   :  { %v6363_v37 = vadd.f32 %v12845_v51, %v6362_v52  ;;  %v14314_v53 = vpop.f32.mrb[77].mxu1  ;;  %v15291_v51 = vpack.c.bf16 %v12878_v49, %v12877_v48  ;;  %v12885_v52 = vld [vmem:[%s18148_s7 + $0x40] sm:$0xff] }
0x38cb   :  { %v6366_v54 = vadd.f32 %v6363_v37, %v16925_v6  ;;  %v12886_v37 = vld [vmem:[%s18148_s7 + $0x48] sm:$0xff] }
0x38cd   :  { %6367 = vst.msk [vmem:[#allocation2] sm:$0xff] %vm82_vm0, %v6366_v54 }
0x38d0   :  { %v6628_v40 = vpop.f32.mrb[78].mxu1 }
0x38d1   :  { %v14347_v55 = vpop.f32.mrb[79].mxu1  ;;  %14354 = vmatpush3.msra.mxu1 %v6628_v40  ;;  %v15300_v40 = vpack.c.bf16 %v12886_v37, %v12885_v52 }
0x38d2   :  { %15275 = vmatprep.subr.bf16.mxu1 %v15743_v7  ;;  %v12887_v55 = vld [vmem:[%s18148_s7 + $0x50] sm:$0xff] }
0x3916   :  { %v6704_v56 = vpop.f32.mrb[82].mxu0 }
0x3917   :  { %v6708_v57 = vmul.f32 0.35355338, %v6704_v56  ;;  %v14352_v59 = vpop.f32.mrb[83].mxu0  ;;  %v12888_v56 = vld [vmem:[%s18148_s7 + $0x58] sm:$0xff] }
0x3919   :  { %v6709_v60 = vsel %vm345_vm2, %v6708_v57, -inf }
0x391a   :  { %6710 = vmax.xlane.f32.xlu0 %v6709_v60 }
0x391e   :  { %v6864_v62 = vpop.f32.mrb[84].mxu0 }
0x391f   :  { %v14368_v63 = vpop.f32.mrb[85].mxu0 }
0x3926   :  { %v7012_v1 = vpop.f32.mrb[86].mxu0 }
0x3927   :  { %v14390_v2 = vpop.f32.mrb[87].mxu0 }
0x39a7   :  { %v6711_v3 = vpop.xlane.xlu0 %6710 }
0x39a8   :  { %v6712_v4 = vsub.f32 %v6708_v57, %v6711_v3  ;;  %v15303_v57 = vpack.c.bf16 %v12888_v56, %v12887_v55 }
0x39aa   :  { %v6713_v6 = vmul.f32 1.442695, %v6712_v4 }
0x39ac   :  { %15661 = vpow2.f32 %v6713_v6 }
0x39b6   :  { %v15662_v8 = vpop.eup %15661 }
0x39b7   :  { %v6715_v9 = vsel %vm345_vm2, %v15662_v8, 0.0 }
0x39b8   :  { %6716 = vadd.xlane.f32.xlu1 %v6715_v9 }
0x3a45   :  { %v6717_v10 = vpop.xlane.xlu1 %6716 }
0x3a46   :  { %15663 = vrcp.f32 %v6717_v10 }
0x3a50   :  { %v15664_v13 = vpop.eup %15663 }
0x3a51   :  { %v6719_v61 = vmul.f32 %v15664_v13, %v15662_v8 }
0x3a53   :  { %14356 = vmatmul.mubr.msk.f32.vlgmr.msra.gmra.mrb[80].mxu1 %vm345_vm2, %v6719_v61 }
0x3a54   :  { %15277 = vmatpush3.bf16.msra.mxu1 %v15276_v58  ;;  %14377 = vmatprep.mubr.msk.f32.mxu1 %vm15744_vm1, %v15745_v27 }
0x3a55   :  { %15278 = vmatprep.subr.bf16.mxu1 %v15743_v7 }
0x3a58   :  { %15280 = vmatpush3.bf16.msra.mxu1 %v15279_v16 }
0x3a59   :  { %14391 = vmatprep.subr.mxu1 %v15745_v27 }
0x3a5b   :  { %14378 = vmatmul.mubr.msk.f32.vlgmr.msra.gmra.mrb[82].mxu1 %vm82_vm0, %v17002_v15 }
0x3a5c   :  { %14393 = vmatprep.mubr.msk.f32.mxu1 %vm15744_vm1, %v15745_v27 }
0x3b26   :  { %v6789_v17 = vpop.f32.mrb[80].mxu1 }
0x3b27   :  { %v14357_v18 = vpop.f32.mrb[81].mxu1 }
0x3b28   :  { %v12896_v18 = vld [vmem:[%s18146_s3 + $0x68] sm:$0xff] }
0x3b2e   :  { %v6938_v19 = vpop.f32.mrb[82].mxu1 }
0x3b2f   :  { %v14379_v20 = vpop.f32.mrb[83].mxu1  ;;  %14392 = vmatpush3.xpose.msk.msra.mxu1 %vm345_vm2, %v6938_v19 }
0x3b30   :  { %14396 = vmatprep.subr.mxu1 %v15745_v27 }
0x3b32   :  { %14394 = vmatmul.mubr.msk.f32.vlgmr.msra.gmra.mrb[84].mxu1 %vm345_vm2, %v6864_v62 }
0x3b33   :  { %14397 = vmatpush3.msra.mxu1 %v7012_v1  ;;  %14398 = vmatprep.mubr.msk.f32.mxu1 %vm15744_vm1, %v15745_v27 }
0x3b34   :  { %14406 = vmatprep.subr.mxu1 %v15745_v27 }
0x3c05   :  { %v7088_v21 = vpop.f32.mrb[84].mxu1 }
0x3c06   :  { %v7092_v22 = vmul.f32 0.35355338, %v7088_v21  ;;  %v14395_v23 = vpop.f32.mrb[85].mxu1 }
0x3c07   :  { %v12898_v23 = vld [vmem:[%s18146_s3 + $0x78] sm:$0xff] }
0x3c08   :  { %v7093_v24 = vsel %vm345_vm2, %v7092_v22, -inf }
0x3c09   :  { %7094 = vmax.xlane.f32.xlu0 %v7093_v24 }
0x3c96   :  { %v7095_v25 = vpop.xlane.xlu0 %7094 }
0x3c97   :  { %v7096_v26 = vsub.f32 %v7092_v22, %v7095_v25  ;;  %v12897_v22 = vld [vmem:[%s18146_s3 + $0x70] sm:$0xff]  ;;  %v12905_v25 = vld [vmem:[%s18148_s7 + $0x60] sm:$0xff] }
0x3c98   :  { %v15309_v24 = vpack.c.bf16 %v12898_v23, %v12897_v22 }
0x3c99   :  { %v7097_v28 = vmul.f32 1.442695, %v7096_v26  ;;  %v12906_v26 = vld [vmem:[%s18148_s7 + $0x68] sm:$0xff] }
0x3c9b   :  { %15665 = vpow2.f32 %v7097_v28  ;;  %v15318_v28 = vpack.c.bf16 %v12906_v26, %v12905_v25  ;;  %v8363_v25 = vld [vmem:[%s18157_s1] sm:$0xff]  ;;  %v8364_v26 = vld [vmem:[%s18157_s1 + $0x8] sm:$0xff] }
0x3ca5   :  { %v15666_v29 = vpop.eup %15665 }
0x3ca6   :  { %v7099_v30 = vsel %vm345_vm2, %v15666_v29, 0.0 }
0x3ca7   :  { %7100 = vadd.xlane.f32.xlu1 %v7099_v30  ;;  %v12908_v30 = vld [vmem:[%s18148_s7 + $0x78] sm:$0xff] }
0x3d34   :  { %v7101_v32 = vpop.xlane.xlu1 %7100 }
0x3d35   :  { %15667 = vrcp.f32 %v7101_v32  ;;  %v12900_v32 = vld [vmem:[%s18147_s4 + $0x60] sm:$0xff] }
0x3d3f   :  { %v15668_v33 = vpop.eup %15667 }
0x3d40   :  { %v7103_v35 = vmul.f32 %v15668_v33, %v15666_v29  ;;  %v12907_v29 = vld [vmem:[%s18148_s7 + $0x70] sm:$0xff]  ;;  %v12901_v33 = vld [vmem:[%s18147_s4 + $0x68] sm:$0xff] }
0x3d41   :  { %v15321_v31 = vpack.c.bf16 %v12908_v30, %v12907_v29  ;;  %v15330_v29 = vpack.c.bf16 %v8364_v26, %v8363_v25  ;;  %v8366_v30 = vld [vmem:[%s18157_s1 + $0x18] sm:$0xff]  ;;  %v8566_v26 = vld [vmem:[%s18104_s10] sm:$0xff] }
0x3d42   :  { %14399 = vmatmul.mubr.msk.f32.vlgmr.msra.gmra.mrb[86].mxu1 %vm345_vm2, %v7103_v35  ;;  %v15312_v35 = vpack.c.bf16 %v12901_v33, %v12900_v32 }
0x3d43   :  { %14407 = vmatpush3.msra.mxu1 %v6793_v36  ;;  %14408 = vmatprep.mubr.msk.f32.mxu1 %vm15744_vm1, %v15745_v27  ;;  %v12902_v36 = vld [vmem:[%s18147_s4 + $0x70] sm:$0xff] }
0x3d44   :  { %15293 = vmatprep.subr.bf16.mxu1 %v15743_v7  ;;  %v15315_v42 = vpack.c.bf16 %v12903_v38, %v12902_v36  ;;  %v8367_v36 = vld [vmem:[%s18157_s1 + $0x20] sm:$0xff]  ;;  %v8368_v38 = vld [vmem:[%s18157_s1 + $0x28] sm:$0xff] }
0x3d46   :  { %14409 = vmatmul.mubr.msk.f32.vlgmr.msra.gmra.mrb[88].mxu1 %vm345_vm2, %v6789_v17  ;;  %v12895_v17 = vld [vmem:[%s18146_s3 + $0x60] sm:$0xff] }
0x3d47   :  { %15295 = vmatpush3.bf16.msra.mxu1 %v15294_v41  ;;  %14430 = vmatprep.mubr.msk.f32.mxu1 %vm15744_vm1, %v15745_v27  ;;  %v15306_v20 = vpack.c.bf16 %v12896_v18, %v12895_v17  ;;  %v8281_v17 = vld [vmem:[%s18156_s9 + $0x18] sm:$0xff] }
0x3d48   :  { %15296 = vmatprep.subr.bf16.mxu1 %v15743_v7 }
0x3d4b   :  { %15298 = vmatpush3.bf16.msra.mxu1 %v15297_v44 }
0x3d4c   :  { %14444 = vmatprep.subr.mxu1 %v15745_v27 }
0x3d4e   :  { %14431 = vmatmul.mubr.msk.f32.vlgmr.msra.gmra.mrb[90].mxu1 %vm82_vm0, %v17002_v15 }
0x3d4f   :  { %14446 = vmatprep.mubr.msk.f32.mxu1 %vm15744_vm1, %v15745_v27 }
0x3e15   :  { %v7173_v50 = vpop.f32.mrb[86].mxu1 }
0x3e16   :  { %v14400_v34 = vpop.f32.mrb[87].mxu1  ;;  %14404 = vmatmul.mubr.msk.f32.vlgmr.msra.gmra.mrb[88].mxu0 %vm345_vm2, %v7173_v50 }
0x3e17   :  { %15289 = vmatpush3.bf16.msra.mxu0 %v15288_v47  ;;  %14419 = vmatprep.mubr.msk.f32.mxu0 %vm15744_vm1, %v15745_v27 }
0x3e18   :  { %15290 = vmatprep.subr.bf16.mxu0 %v15743_v7 }
0x3e19   :  { %v7320_v53 = vpop.f32.mrb[88].mxu1 }
0x3e1a   :  { %v14410_v54 = vpop.f32.mrb[89].mxu1 }
0x3e1b   :  { %15292 = vmatpush3.bf16.msra.mxu0 %v15291_v51 }
0x3e1c   :  { %15299 = vmatprep.subr.bf16.mxu0 %v15743_v7 }
0x3e1e   :  { %14420 = vmatmul.mubr.msk.f32.vlgmr.msra.gmra.mrb[90].mxu0 %vm82_vm0, %v17002_v15 }
0x3e1f   :  { %15301 = vmatpush3.bf16.msra.mxu0 %v15300_v40  ;;  %14441 = vmatprep.mubr.msk.f32.mxu0 %vm15744_vm1, %v15745_v27 }
0x3e20   :  { %15302 = vmatprep.subr.bf16.mxu0 %v15743_v7 }
0x3e21   :  { %v7468_v59 = vpop.f32.mrb[90].mxu1 }
0x3e22   :  { %v14432_v60 = vpop.f32.mrb[91].mxu1  ;;  %14445 = vmatpush3.xpose.msk.msra.mxu1 %vm345_vm2, %v7468_v59 }
0x3e23   :  { %15304 = vmatpush3.bf16.msra.mxu0 %v15303_v57  ;;  %14449 = vmatprep.subr.mxu1 %v15745_v27  ;;  %v12913_v57 = vld [vmem:[%s18155_s27 + $0x18] sm:$0xff] }
0x3e24   :  { %14454 = vmatprep.subr.mxu0 %v15745_v27 }
0x3e26   :  { %14442 = vmatmul.mubr.msk.f32.vlgmr.msra.gmra.mrb[92].mxu0 %vm82_vm0, %v17002_v15 }
0x3e27   :  { %14456 = vmatprep.mubr.msk.f32.mxu0 %vm15744_vm1, %v15745_v27  ;;  %14455 = vmatpush3.msra.mxu0 %v12893_v0 }
0x3e28   :  { %15311 = vmatprep.subr.bf16.mxu0 %v15743_v7 }
0x3ee9   :  { %v7247_v62 = vpop.f32.mrb[88].mxu0 }
0x3eea   :  { %v17202_v63 = vadd.f32 %v7320_v53, %v7247_v62  ;;  %v14405_v1 = vpop.f32.mrb[89].mxu0 }
0x3ef1   :  { %v7394_v2 = vpop.f32.mrb[90].mxu0 }
0x3ef2   :  { %v14421_v3 = vpop.f32.mrb[91].mxu0  ;;  %14447 = vmatmul.mubr.msk.f32.vlgmr.msra.gmra.mrb[92].mxu1 %vm345_vm2, %v7394_v2 }
0x3ef3   :  { %14451 = vmatprep.mubr.msk.f32.mxu1 %vm15744_vm1, %v15745_v27 }
0x3ef9   :  { %v7542_v4 = vpop.f32.mrb[92].mxu0 }
0x3efa   :  { %v14443_v6 = vpop.f32.mrb[93].mxu0  ;;  %14450 = vmatpush3.msra.mxu1 %v7542_v4 }
0x3efb   :  { %15305 = vmatprep.subr.bf16.mxu1 %v15743_v7 }
0x3fc5   :  { %v7618_v8 = vpop.f32.mrb[92].mxu1 }
0x3fc6   :  { %v7622_v9 = vmul.f32 0.35355338, %v7618_v8  ;;  %v14448_v10 = vpop.f32.mrb[93].mxu1 }
0x3fc8   :  { %v7623_v11 = vsel %vm345_vm2, %v7622_v9, -inf }
0x3fc9   :  { %7624 = vmax.xlane.f32.xlu0 %v7623_v11  ;;  %v8278_v11 = vld [vmem:[%s18156_s9] sm:$0xff] }
0x4056   :  { %v7625_v12 = vpop.xlane.xlu0 %7624 }
0x4057   :  { %v7626_v13 = vsub.f32 %v7622_v9, %v7625_v12  ;;  %v8279_v12 = vld [vmem:[%s18156_s9 + $0x8] sm:$0xff] }
0x4059   :  { %v7627_v58 = vmul.f32 1.442695, %v7626_v13 }
0x405b   :  { %15669 = vpow2.f32 %v7627_v58 }
0x4065   :  { %v15670_v61 = vpop.eup %15669 }
0x4066   :  { %v7629_v14 = vsel %vm345_vm2, %v15670_v61, 0.0 }
0x4067   :  { %7630 = vadd.xlane.f32.xlu1 %v7629_v14 }
0x40f4   :  { %v7631_v16 = vpop.xlane.xlu1 %7630 }
0x40f5   :  { %15671 = vrcp.f32 %v7631_v16  ;;  %v8280_v16 = vld [vmem:[%s18156_s9 + $0x10] sm:$0xff] }
0x40f6   :  { %v15327_v18 = vpack.c.bf16 %v8281_v17, %v8280_v16 }
0x40ff   :  { %v15672_v19 = vpop.eup %15671 }
0x4100   :  { %v7633_v21 = vmul.f32 %v15672_v19, %v15670_v61 }
0x4102   :  { %14452 = vmatmul.mubr.msk.f32.vlgmr.msra.gmra.mrb[94].mxu1 %vm345_vm2, %v7633_v21 }
0x4103   :  { %15307 = vmatpush3.bf16.msra.mxu1 %v15306_v20  ;;  %14467 = vmatprep.mubr.msk.f32.mxu1 %vm15744_vm1, %v15745_v27 }
0x4104   :  { %15308 = vmatprep.subr.bf16.mxu1 %v15743_v7 }
0x4107   :  { %15310 = vmatpush3.bf16.msra.mxu1 %v15309_v24 }
0x4108   :  { %15317 = vmatprep.subr.bf16.mxu1 %v15743_v7 }
0x410a   :  { %14468 = vmatmul.mubr.msk.f32.vlgmr.msra.gmra.mrb[96].mxu1 %vm82_vm0, %v17002_v15 }
0x410b   :  { %15319 = vmatpush3.bf16.msra.mxu1 %v15318_v28  ;;  %14489 = vmatprep.mubr.msk.f32.mxu1 %vm15744_vm1, %v15745_v27  ;;  %v8365_v28 = vld [vmem:[%s18157_s1 + $0x10] sm:$0xff] }
0x410c   :  { %15320 = vmatprep.subr.bf16.mxu1 %v15743_v7  ;;  %v15333_v33 = vpack.c.bf16 %v8366_v30, %v8365_v28  ;;  %v8567_v28 = vld [vmem:[%s18104_s10 + $0x8] sm:$0xff] }
0x410f   :  { %15322 = vmatpush3.bf16.msra.mxu1 %v15321_v31 }
0x4110   :  { %14502 = vmatprep.subr.mxu1 %v15745_v27 }
0x4112   :  { %14490 = vmatmul.mubr.msk.f32.vlgmr.msra.gmra.mrb[98].mxu1 %vm82_vm0, %v17002_v15 }
0x4113   :  { %14504 = vmatprep.mubr.msk.f32.mxu1 %vm15744_vm1, %v15745_v27  ;;  %14503 = vmatpush3.msra.mxu1 %v12913_v57 }
0x4114   :  { %15329 = vmatprep.subr.bf16.mxu1 %v15743_v7 }
0x41d5   :  { %v7703_v39 = vpop.f32.mrb[94].mxu1 }
0x41d6   :  { %v14453_v41 = vpop.f32.mrb[95].mxu1  ;;  %14457 = vmatmul.mubr.msk.f32.vlgmr.msra.gmra.mrb[94].mxu0 %vm345_vm2, %v7703_v39  ;;  %v15336_v39 = vpack.c.bf16 %v8368_v38, %v8367_v36 }
0x41d7   :  { %15313 = vmatpush3.bf16.msra.mxu0 %v15312_v35  ;;  %14478 = vmatprep.mubr.msk.f32.mxu0 %vm15744_vm1, %v15745_v27 }
0x41d8   :  { %15314 = vmatprep.subr.bf16.mxu0 %v15743_v7 }
0x41db   :  { %15316 = vmatpush3.bf16.msra.mxu0 %v15315_v42 }
0x41dc   :  { %14492 = vmatprep.subr.mxu0 %v15745_v27 }
0x41dd   :  { %v7852_v43 = vpop.f32.mrb[96].mxu1 }
0x41de   :  { %v14469_v44 = vpop.f32.mrb[97].mxu1  ;;  %14479 = vmatmul.mubr.msk.f32.vlgmr.msra.gmra.mrb[96].mxu0 %vm82_vm0, %v17002_v15 }
0x41df   :  { %14494 = vmatprep.mubr.msk.f32.mxu0 %vm15744_vm1, %v15745_v27 }
0x41e5   :  { %v8000_v45 = vpop.f32.mrb[98].mxu1 }
0x41e6   :  { %v14491_v46 = vpop.f32.mrb[99].mxu1 }
0x42a9   :  { %v7777_v47 = vpop.f32.mrb[94].mxu0 }
0x42aa   :  { %v7781_v48 = vadd.f32 %v7777_v47, %v17202_v63  ;;  %v14458_v49 = vpop.f32.mrb[95].mxu0  ;;  %v8369_v47 = vld [vmem:[%s18157_s1 + $0x30] sm:$0xff] }
0x42b1   :  { %v7926_v50 = vpop.f32.mrb[96].mxu0 }
0x42b2   :  { %v14480_v34 = vpop.f32.mrb[97].mxu0  ;;  %14493 = vmatpush3.xpose.msk.msra.mxu0 %vm345_vm2, %v7926_v50 }
0x42b3   :  { %14497 = vmatprep.subr.mxu0 %v15745_v27 }
0x42b5   :  { %14495 = vmatmul.mubr.msk.f32.vlgmr.msra.gmra.mrb[98].mxu0 %vm345_vm2, %v7852_v43 }
0x42b6   :  { %14498 = vmatpush3.msra.mxu0 %v8000_v45  ;;  %14499 = vmatprep.mubr.msk.f32.mxu0 %vm15744_vm1, %v15745_v27 }
0x42b7   :  { %15323 = vmatprep.subr.bf16.mxu0 %v15743_v7 }
0x4388   :  { %v8076_v15 = vpop.f32.mrb[98].mxu0 }
0x4389   :  { %v8080_v51 = vmul.f32 0.35355338, %v8076_v15  ;;  %v14496_v52 = vpop.f32.mrb[99].mxu0 }
0x438b   :  { %v8081_v37 = vsel %vm345_vm2, %v8080_v51, -inf }
0x438c   :  { %8082 = vmax.xlane.f32.xlu0 %v8081_v37 }
0x4419   :  { %v8083_v53 = vpop.xlane.xlu0 %8082 }
0x441a   :  { %v8084_v54 = vsub.f32 %v8080_v51, %v8083_v53 }
0x441c   :  { %v8085_v40 = vmul.f32 1.442695, %v8084_v54 }
0x441e   :  { %15673 = vpow2.f32 %v8085_v40 }
0x4428   :  { %v15674_v55 = vpop.eup %15673 }
0x4429   :  { %v8087_v56 = vsel %vm345_vm2, %v15674_v55, 0.0 }
0x442a   :  { %8088 = vadd.xlane.f32.xlu1 %v8087_v56 }
0x44b7   :  { %v8089_v59 = vpop.xlane.xlu1 %8088 }
0x44b8   :  { %15675 = vrcp.f32 %v8089_v59 }
0x44c2   :  { %v15676_v60 = vpop.eup %15675 }
0x44c3   :  { %v8091_v62 = vmul.f32 %v15676_v60, %v15674_v55  ;;  %v8489_v60 = vld [vmem:[%s18154_s25] sm:$0xff] }
0x44c5   :  { %14500 = vmatmul.mubr.msk.f32.vlgmr.msra.gmra.mrb[100].mxu0 %vm345_vm2, %v8091_v62  ;;  %v8490_v62 = vld [vmem:[%s18154_s25 + $0x8] sm:$0xff] }
0x44c6   :  { %14515 = vmatprep.mubr.msk.f32.mxu0 %vm15744_vm1, %v15745_v27 }
0x4598   :  { %v8161_v63 = vpop.f32.mrb[100].mxu0 }
0x4599   :  { %v14501_v1 = vpop.f32.mrb[101].mxu0  ;;  %14505 = vmatmul.mubr.msk.f32.vlgmr.msra.gmra.mrb[100].mxu1 %vm345_vm2, %v8161_v63  ;;  %v8640_v63 = vld [vmem:[%s18105_s11] sm:$0xff] }
0x459a   :  { %14534 = vmatprep.mubr.msk.f32.mxu1 %vm15744_vm1, %v15745_v27  ;;  %15331 = vmatpush3.bf16.msra.mxu1 %v15330_v29  ;;  %v15342_v1 = vpack.c.bf16 %v8490_v62, %v8489_v60 }
0x459b   :  { %15332 = vmatprep.subr.bf16.mxu1 %v15743_v7 }
0x459e   :  { %15334 = vmatpush3.bf16.msra.mxu1 %v15333_v33  ;;  %v8568_v33 = vld [vmem:[%s18104_s10 + $0x10] sm:$0xff] }
0x459f   :  { %15335 = vmatprep.subr.bf16.mxu1 %v15743_v7 }
0x45a2   :  { %15337 = vmatpush3.bf16.msra.mxu1 %v15336_v39 }
0x45a3   :  { %15338 = vmatprep.subr.bf16.mxu1 %v15743_v7 }
0x466c   :  { %v8235_v2 = vpop.f32.mrb[100].mxu1 }
0x466d   :  { %v8239_v3 = vadd.f32 %v8235_v2, %v7781_v48  ;;  %v14506_v4 = vpop.f32.mrb[101].mxu1  ;;  %v8370_v48 = vld [vmem:[%s18157_s1 + $0x38] sm:$0xff]  ;;  %s18159_s1 = sld [smem:[#allocation13_spill]]  ;;  %v8641_v2 = vld [vmem:[%s18105_s11 + $0x8] sm:$0xff] }
0x466e   :  { %v15339_v49 = vpack.c.bf16 %v8370_v48, %v8369_v47  ;;  %v12927_v48 = vld [vmem:[%s18154_s25 + $0x30] sm:$0xff] }
0x466f   :  { %v17294_v6 = vadd.f32 %v16922_v5, %v8239_v3  ;;  %v15324_v5 = vpack.c.bf16 %v8279_v12, %v8278_v11  ;;  %v15354_v3 = vpack.c.bf16 %v8641_v2, %v8640_v63 }
0x4670   :  { %15340 = vmatpush3.bf16.msra.mxu1 %v15339_v49  ;;  %v12928_v49 = vld [vmem:[%s18154_s25 + $0x38] sm:$0xff] }
0x4671   :  { %v8241_v8 = vsel %vm82_vm0, %v17294_v6, 0.0  ;;  %v8254_v9 = vmul.f32 %v17294_v6, %v17294_v6  ;;  %15325 = vmatpush3.bf16.msra.mxu0 %v15324_v5  ;;  %15353 = vmatprep.subr.bf16.mxu1 %v15743_v7 }
0x4672   :  { %8242 = vadd.xlane.f32.xlu0 %v8241_v8  ;;  %15326 = vmatprep.subr.bf16.mxu0 %v15743_v7 }
0x4673   :  { %v8255_v10 = vsel %vm82_vm0, %v8254_v9, 0.0  ;;  %v12917_v37 = vld [vmem:[%s18159_s1] ss:$0 sm:$0xff]  ;;  %v8491_v9 = vld [vmem:[%s18154_s25 + $0x10] sm:$0xff] }
0x4674   :  { %8256 = vadd.xlane.f32.xlu1 %v8255_v10  ;;  %v8492_v10 = vld [vmem:[%s18154_s25 + $0x18] sm:$0xff] }
0x4675   :  { %15328 = vmatpush3.bf16.msra.mxu0 %v15327_v18  ;;  %v15345_v5 = vpack.c.bf16 %v8492_v10, %v8491_v9  ;;  %v12930_v9 = vld [vmem:[%s18104_s10 + $0x20] sm:$0xff]  ;;  %v12931_v10 = vld [vmem:[%s18104_s10 + $0x28] sm:$0xff] }
0x4676   :  { %15341 = vmatprep.subr.bf16.mxu0 %v15743_v7 }
0x46ff   :  { %v8243_v13 = vpop.xlane.xlu0 %8242 }
0x4700   :  { %v8244_v58 = vrot.slane %v8243_v13, 4 }
0x4701   :  { %v8257_v61 = vpop.xlane.xlu1 %8256 }
0x4702   :  { %v8245_v14 = vadd.f32 %v8244_v58, %v8243_v13  ;;  %v8258_v0 = vrot.slane %v8257_v61, 4  ;;  %v8642_v13 = vld [vmem:[%s18105_s11 + $0x10] sm:$0xff]  ;;  %v8643_v58 = vld [vmem:[%s18105_s11 + $0x18] sm:$0xff] }
0x4704   :  { %v8246_v19 = vrot.slane %v8245_v14, 2  ;;  %v8259_v20 = vadd.f32 %v8258_v0, %v8257_v61  ;;  %v15357_v61 = vpack.c.bf16 %v8643_v58, %v8642_v13  ;;  %v12932_v13 = vld [vmem:[%s18104_s10 + $0x30] sm:$0xff]  ;;  %v12933_v58 = vld [vmem:[%s18104_s10 + $0x38] sm:$0xff] }
0x4706   :  { %v8260_v21 = vrot.slane %v8259_v20, 2  ;;  %v8247_v22 = vadd.f32 %v8246_v19, %v8245_v14 }
0x4708   :  { %v8248_v23 = vrot.slane %v8247_v22, 1  ;;  %v8261_v24 = vadd.f32 %v8260_v21, %v8259_v20 }
0x470a   :  { %v8249_v31 = vadd.f32 %v8248_v23, %v8247_v22  ;;  %v8262_v32 = vrot.slane %v8261_v24, 1 }
0x470c   :  { %15563 = vpush %v8249_v31  ;;  %v8263_v35 = vadd.f32 %v8262_v32, %v8261_v24  ;;  %v15348_v31 = vpack.c.bf16 %v8567_v28, %v8566_v26  ;;  %v12943_v28 = vld [vmem:[%s18106_s12 + $0x8] sm:$0xff] }
0x470e   :  { %15565 = vpush %v8263_v35  ;;  %v8569_v35 = vld [vmem:[%s18104_s10 + $0x18] sm:$0xff] }
0x470f   :  { %v15351_v36 = vpack.c.bf16 %v8569_v35, %v8568_v33  ;;  %v8875_v33 = vld [vmem:[%s18106_s12] sm:$0xff] }
0x4710   :  { %v12951_v35 = vld [vmem:[%s18104_s10 + $0x40] sm:$0xff] }
0x473d   :  { %s15564_s26 = spop %15563 }
0x473e   :  { %s8253_s0 = smul.f32 0.00390625, %s15564_s26  ;;  %s18158_s26 = sld [smem:[#allocation11_spill]] }
0x473f   :  { %s15566_s8 = spop %15565 }
0x4740   :  { %s8268_s2 = smul.f32 %s8253_s0, %s8253_s0  ;;  %v8270_v43 = vstv %s8253_s0 }
0x4741   :  { %s8267_s5 = smul.f32 0.00390625, %s15566_s8  ;;  %v8271_v44 = vsub.f32 %v17294_v6, %v8270_v43  ;;  %v12925_v43 = vld [vmem:[%s18154_s25 + $0x20] sm:$0xff] }
0x4743   :  { %s8269_s4 = ssub.f32 %s8267_s5, %s8268_s2 }
0x4744   :  { %v12915_v50 = vld [vmem:[%s18158_s26] ss:$0 sm:$0xff] }
0x4745   :  { %s8272_s28 = sadd.f32 1e-05, %s8269_s4 }
0x4747   :  { %v8273_v41 = vstv %s8272_s28 }
0x4748   :  { %15677 = vrsqrt.f32 %v8273_v41 }
0x4752   :  { %v15678_v42 = vpop.eup %15677 }
0x4753   :  { %15567 = vpush %v15678_v42 }
0x4784   :  { %s15568_s27 = spop %15567 }
0x4785   :  { %v8276_v45 = vstv %s15568_s27 }
0x4786   :  { %v8277_v46 = vmul.f32 %v8276_v45, %v8271_v44  ;;  %v12926_v44 = vld [vmem:[%s18154_s25 + $0x28] sm:$0xff] }
0x4787   :  { %v15360_v47 = vpack.c.bf16 %v12926_v44, %v12925_v43  ;;  %v12946_v43 = vld [vmem:[%s18154_s25 + $0x40] sm:$0xff]  ;;  %v12947_v44 = vld [vmem:[%s18154_s25 + $0x48] sm:$0xff] }
0x4788   :  { %14516 = vmatmul.mubr.msk.f32.vlgmr.msra.gmra.mrb[102].mxu0 %vm82_vm0, %v8277_v46 }
0x4789   :  { %14545 = vmatprep.mubr.msk.f32.mxu0 %vm15744_vm1, %v15745_v27  ;;  %15343 = vmatpush3.bf16.msra.mxu0 %v15342_v1 }
0x478a   :  { %15344 = vmatprep.subr.bf16.mxu0 %v15743_v7 }
0x478d   :  { %15346 = vmatpush3.bf16.msra.mxu0 %v15345_v5 }
0x478e   :  { %15347 = vmatprep.subr.bf16.mxu0 %v15743_v7 }
0x485b   :  { %v8358_v34 = vpop.f32.mrb[102].mxu0 }
0x485c   :  { %v8359_v15 = vadd.f32 %v12915_v50, %v8358_v34  ;;  %v14517_v51 = vpop.f32.mrb[103].mxu0  ;;  %v15363_v50 = vpack.c.bf16 %v12928_v49, %v12927_v48  ;;  %v12935_v34 = vld [vmem:[%s18105_s11 + $0x20] sm:$0xff] }
0x485e   :  { %v8362_v52 = vmax.f32 %v8359_v15, 0.0  ;;  %v12936_v15 = vld [vmem:[%s18105_s11 + $0x28] sm:$0xff] }
0x485f   :  { %v15372_v51 = vpack.c.bf16 %v12936_v15, %v12935_v34  ;;  %v12956_v34 = vld [vmem:[%s18105_s11 + $0x40] sm:$0xff]  ;;  %v12957_v15 = vld [vmem:[%s18105_s11 + $0x48] sm:$0xff] }
0x4860   :  { %14535 = vmatmul.mubr.msk.f32.vlgmr.msra.gmra.mrb[102].mxu1 %vm2104_vm3, %v8362_v52  ;;  %v12937_v52 = vld [vmem:[%s18105_s11 + $0x30] sm:$0xff] }
0x4861   :  { %14567 = vmatprep.mubr.msk.f32.mxu1 %vm15744_vm1, %v15745_v27  ;;  %15355 = vmatpush3.bf16.msra.mxu1 %v15354_v3 }
0x4862   :  { %15356 = vmatprep.subr.bf16.mxu1 %v15743_v7 }
0x4865   :  { %15358 = vmatpush3.bf16.msra.mxu1 %v15357_v61  ;;  %v15369_v61 = vpack.c.bf16 %v12933_v58, %v12932_v13  ;;  %v12964_v58 = vld [vmem:[%s18106_s12 + $0x10] sm:$0xff] }
0x4866   :  { %14575 = vmatprep.subr.mxu1 %v15745_v27 }
0x4933   :  { %v8447_v53 = vpop.f32.mrb[102].mxu1 }
0x4934   :  { %v8448_v54 = vadd.f32 %v12917_v37, %v8447_v53  ;;  %v14536_v40 = vpop.f32.mrb[103].mxu1  ;;  %v12938_v37 = vld [vmem:[%s18105_s11 + $0x38] sm:$0xff] }
0x4935   :  { %v15375_v53 = vpack.c.bf16 %v12938_v37, %v12937_v52  ;;  %v15390_v37 = vpack.c.bf16 %v12957_v15, %v12956_v34 }
0x4936   :  { %v17357_v55 = vadd.f32 %v8448_v54, %v17294_v6 }
0x4938   :  { %v8452_v56 = vsel %vm82_vm0, %v17357_v55, 0.0  ;;  %v8465_v57 = vmul.f32 %v17357_v55, %v17357_v55 }
0x4939   :  { %8453 = vadd.xlane.f32.xlu0 %v8452_v56 }
0x493a   :  { %v8466_v59 = vsel %vm82_vm0, %v8465_v57, 0.0 }
0x493b   :  { %8467 = vadd.xlane.f32.xlu1 %v8466_v59 }
0x49c6   :  { %v8454_v4 = vpop.xlane.xlu0 %8453 }
0x49c7   :  { %v8455_v6 = vrot.slane %v8454_v4, 4 }
0x49c8   :  { %v8468_v8 = vpop.xlane.xlu1 %8467 }
0x49c9   :  { %v8456_v11 = vadd.f32 %v8455_v6, %v8454_v4  ;;  %v8469_v12 = vrot.slane %v8468_v8, 4 }
0x49cb   :  { %v8457_v14 = vrot.slane %v8456_v11, 2  ;;  %v8470_v0 = vadd.f32 %v8469_v12, %v8468_v8  ;;  %v15366_v12 = vpack.c.bf16 %v12931_v10, %v12930_v9 }
0x49cd   :  { %v8471_v16 = vrot.slane %v8470_v0, 2  ;;  %v8458_v17 = vadd.f32 %v8457_v14, %v8456_v11 }
0x49cf   :  { %v8459_v18 = vrot.slane %v8458_v17, 1  ;;  %v8472_v19 = vadd.f32 %v8471_v16, %v8470_v0 }
0x49d1   :  { %v8460_v20 = vadd.f32 %v8459_v18, %v8458_v17  ;;  %v8473_v21 = vrot.slane %v8472_v19, 1 }
0x49d3   :  { %15569 = vpush %v8460_v20  ;;  %v8474_v22 = vadd.f32 %v8473_v21, %v8472_v19 }
0x49d5   :  { %15571 = vpush %v8474_v22 }
0x4a04   :  { %s15570_s5 = spop %15569 }
0x4a05   :  { %s8464_s4 = smul.f32 0.00390625, %s15570_s5 }
0x4a06   :  { %s15572_s28 = spop %15571 }
0x4a07   :  { %s8479_s27 = smul.f32 %s8464_s4, %s8464_s4  ;;  %v8481_v25 = vstv %s8464_s4 }
0x4a08   :  { %s8478_s3 = smul.f32 0.00390625, %s15572_s28  ;;  %v8482_v29 = vsub.f32 %v17357_v55, %v8481_v25 }
0x4a0a   :  { %s8480_s9 = ssub.f32 %s8478_s3, %s8479_s27 }
0x4a0c   :  { %s8483_s29 = sadd.f32 1e-05, %s8480_s9 }
0x4a0e   :  { %v8484_v23 = vstv %s8483_s29 }
0x4a0f   :  { %15679 = vrsqrt.f32 %v8484_v23 }
0x4a19   :  { %v15680_v24 = vpop.eup %15679 }
0x4a1a   :  { %15573 = vpush %v15680_v24 }
0x4a4b   :  { %s15574_s0 = spop %15573 }
0x4a4c   :  { %v8487_v30 = vstv %s15574_s0 }
0x4a4d   :  { %v17399_v32 = vmul.f32 %v8487_v30, %v8482_v29 }
0x4a4f   :  { %14546 = vmatmul.mubr.msk.f32.vlgmr.msra.gmra.mrb[104].mxu0 %vm82_vm0, %v17399_v32  ;;  %14568 = vmatmul.mubr.msk.f32.vlgmr.msra.gmra.mrb[104].mxu1 %vm82_vm0, %v17399_v32 }
0x4a50   :  { %15349 = vmatpush3.bf16.msra.mxu0 %v15348_v31  ;;  %14556 = vmatprep.mubr.msk.f32.mxu0 %vm15744_vm1, %v15745_v27 }
0x4a51   :  { %15350 = vmatprep.subr.bf16.mxu0 %v15743_v7  ;;  %14577 = vmatprep.mubr.msk.f32.mxu1 %vm15744_vm1, %v15745_v27 }
0x4a54   :  { %15352 = vmatpush3.bf16.msra.mxu0 %v15351_v36  ;;  %v12952_v36 = vld [vmem:[%s18104_s10 + $0x48] sm:$0xff] }
0x4a55   :  { %14570 = vmatprep.subr.mxu0 %v15745_v27 }
0x4a57   :  { %14557 = vmatmul.mubr.msk.f32.vlgmr.msra.gmra.mrb[106].mxu0 %vm82_vm0, %v17399_v32 }
0x4a58   :  { %14572 = vmatprep.mubr.msk.f32.mxu0 %vm15744_vm1, %v15745_v27 }
0x4b22   :  { %v8562_v38 = vpop.f32.mrb[104].mxu0  ;;  %v8710_v39 = vpop.f32.mrb[104].mxu1 }
0x4b23   :  { %v14547_v41 = vpop.f32.mrb[105].mxu0  ;;  %v14569_v42 = vpop.f32.mrb[105].mxu1  ;;  %14576 = vmatpush3.msra.mxu1 %v8710_v39  ;;  %v12953_v39 = vld [vmem:[%s18104_s10 + $0x50] sm:$0xff] }
0x4b24   :  { %15365 = vmatprep.subr.bf16.mxu1 %v15743_v7  ;;  %v12954_v41 = vld [vmem:[%s18104_s10 + $0x58] sm:$0xff] }
0x4b25   :  { %v15387_v42 = vpack.c.bf16 %v12954_v41, %v12953_v39 }
0x4b2a   :  { %v8636_v45 = vpop.f32.mrb[106].mxu0 }
0x4b2b   :  { %v14558_v46 = vpop.f32.mrb[107].mxu0  ;;  %14571 = vmatpush3.xpose.msk.msra.mxu0 %vm345_vm2, %v8636_v45  ;;  %v15378_v45 = vpack.c.bf16 %v12947_v44, %v12946_v43 }
0x4b2c   :  { %15359 = vmatprep.subr.bf16.mxu0 %v15743_v7  ;;  %v12948_v46 = vld [vmem:[%s18154_s25 + $0x50] sm:$0xff] }
0x4b2e   :  { %14573 = vmatmul.mubr.msk.f32.vlgmr.msra.gmra.mrb[108].mxu0 %vm345_vm2, %v8562_v38  ;;  %v15384_v38 = vpack.c.bf16 %v12952_v36, %v12951_v35  ;;  %v12974_v35 = vld [vmem:[%s18104_s10 + $0x78] sm:$0xff] }
0x4b2f   :  { %15361 = vmatpush3.bf16.msra.mxu0 %v15360_v47  ;;  %14588 = vmatprep.mubr.msk.f32.mxu0 %vm15744_vm1, %v15745_v27  ;;  %v12949_v47 = vld [vmem:[%s18154_s25 + $0x58] sm:$0xff] }
0x4b30   :  { %15362 = vmatprep.subr.bf16.mxu0 %v15743_v7 }
0x4b33   :  { %15364 = vmatpush3.bf16.msra.mxu0 %v15363_v50  ;;  %v15381_v50 = vpack.c.bf16 %v12949_v47, %v12948_v46 }
0x4b34   :  { %15371 = vmatprep.subr.bf16.mxu0 %v15743_v7 }
0x4b36   :  { %14589 = vmatmul.mubr.msk.f32.vlgmr.msra.gmra.mrb[110].mxu0 %vm82_vm0, %v17399_v32 }
0x4b37   :  { %15373 = vmatpush3.bf16.msra.mxu0 %v15372_v51  ;;  %14610 = vmatprep.mubr.msk.f32.mxu0 %vm15744_vm1, %v15745_v27 }
0x4b38   :  { %15374 = vmatprep.subr.bf16.mxu0 %v15743_v7 }
0x4b3b   :  { %15376 = vmatpush3.bf16.msra.mxu0 %v15375_v53  ;;  %v12958_v53 = vld [vmem:[%s18105_s11 + $0x50] sm:$0xff] }
0x4b3c   :  { %14623 = vmatprep.subr.mxu0 %v15745_v27 }
0x4b3e   :  { %14611 = vmatmul.mubr.msk.f32.vlgmr.msra.gmra.mrb[112].mxu0 %vm82_vm0, %v17399_v32 }
0x4b3f   :  { %14625 = vmatprep.mubr.msk.f32.mxu0 %vm15744_vm1, %v15745_v27  ;;  %14624 = vmatpush3.msra.mxu0 %v12943_v28 }
0x4b40   :  { %15377 = vmatprep.subr.bf16.mxu0 %v15743_v7 }
0x4c01   :  { %v8786_v54 = vpop.f32.mrb[108].mxu0 }
0x4c02   :  { %v8790_v40 = vmul.f32 0.35355338, %v8786_v54  ;;  %v14574_v56 = vpop.f32.mrb[109].mxu0  ;;  %v12959_v54 = vld [vmem:[%s18105_s11 + $0x58] sm:$0xff] }
0x4c04   :  { %v8791_v57 = vsel %vm345_vm2, %v8790_v40, -inf }
0x4c05   :  { %8792 = vmax.xlane.f32.xlu0 %v8791_v57 }
0x4c09   :  { %v8946_v59 = vpop.f32.mrb[110].mxu0 }
0x4c0a   :  { %v14590_v60 = vpop.f32.mrb[111].mxu0 }
0x4c11   :  { %v9094_v62 = vpop.f32.mrb[112].mxu0 }
0x4c12   :  { %v14612_v63 = vpop.f32.mrb[113].mxu0 }
0x4c92   :  { %v8793_v1 = vpop.xlane.xlu0 %8792 }
0x4c93   :  { %v8794_v2 = vsub.f32 %v8790_v40, %v8793_v1  ;;  %v15393_v40 = vpack.c.bf16 %v12959_v54, %v12958_v53 }
0x4c95   :  { %v8795_v3 = vmul.f32 1.442695, %v8794_v2 }
0x4c97   :  { %15681 = vpow2.f32 %v8795_v3 }
0x4ca1   :  { %v15682_v4 = vpop.eup %15681 }
0x4ca2   :  { %v8797_v6 = vsel %vm345_vm2, %v15682_v4, 0.0 }
0x4ca3   :  { %8798 = vadd.xlane.f32.xlu1 %v8797_v6 }
0x4d30   :  { %v8799_v8 = vpop.xlane.xlu1 %8798 }
0x4d31   :  { %15683 = vrcp.f32 %v8799_v8 }
0x4d3b   :  { %v15684_v11 = vpop.eup %15683 }
0x4d3c   :  { %v8801_v5 = vmul.f32 %v15684_v11, %v15682_v4 }
0x4d3e   :  { %14578 = vmatmul.mubr.msk.f32.vlgmr.msra.gmra.mrb[106].mxu1 %vm345_vm2, %v8801_v5 }
0x4d3f   :  { %15367 = vmatpush3.bf16.msra.mxu1 %v15366_v12  ;;  %14599 = vmatprep.mubr.msk.f32.mxu1 %vm15744_vm1, %v15745_v27 }
0x4d40   :  { %15368 = vmatprep.subr.bf16.mxu1 %v15743_v7 }
0x4d43   :  { %15370 = vmatpush3.bf16.msra.mxu1 %v15369_v61 }
0x4d44   :  { %14613 = vmatprep.subr.mxu1 %v15745_v27 }
0x4d46   :  { %14600 = vmatmul.mubr.msk.f32.vlgmr.msra.gmra.mrb[108].mxu1 %vm82_vm0, %v17399_v32 }
0x4d47   :  { %14615 = vmatprep.mubr.msk.f32.mxu1 %vm15744_vm1, %v15745_v27 }
0x4e11   :  { %v8871_v14 = vpop.f32.mrb[106].mxu1 }
0x4e12   :  { %v14579_v0 = vpop.f32.mrb[107].mxu1 }
0x4e13   :  { %v12967_v0 = vld [vmem:[%s18154_s25 + $0x68] sm:$0xff] }
0x4e19   :  { %v9020_v16 = vpop.f32.mrb[108].mxu1 }
0x4e1a   :  { %v14601_v17 = vpop.f32.mrb[109].mxu1  ;;  %14614 = vmatpush3.xpose.msk.msra.mxu1 %vm345_vm2, %v9020_v16 }
0x4e1b   :  { %14618 = vmatprep.subr.mxu1 %v15745_v27 }
0x4e1d   :  { %14616 = vmatmul.mubr.msk.f32.vlgmr.msra.gmra.mrb[110].mxu1 %vm345_vm2, %v8946_v59 }
0x4e1e   :  { %14619 = vmatpush3.msra.mxu1 %v9094_v62  ;;  %14620 = vmatprep.mubr.msk.f32.mxu1 %vm15744_vm1, %v15745_v27 }
0x4e1f   :  { %14628 = vmatprep.subr.mxu1 %v15745_v27 }
0x4ef0   :  { %v9170_v18 = vpop.f32.mrb[110].mxu1 }
0x4ef1   :  { %v9174_v19 = vmul.f32 0.35355338, %v9170_v18  ;;  %v14617_v20 = vpop.f32.mrb[111].mxu1 }
0x4ef2   :  { %v12969_v20 = vld [vmem:[%s18154_s25 + $0x78] sm:$0xff] }
0x4ef3   :  { %v9175_v21 = vsel %vm345_vm2, %v9174_v19, -inf }
0x4ef4   :  { %9176 = vmax.xlane.f32.xlu0 %v9175_v21 }
0x4f81   :  { %v9177_v22 = vpop.xlane.xlu0 %9176 }
0x4f82   :  { %v9178_v23 = vsub.f32 %v9174_v19, %v9177_v22  ;;  %v12968_v19 = vld [vmem:[%s18154_s25 + $0x70] sm:$0xff]  ;;  %v12976_v22 = vld [vmem:[%s18105_s11 + $0x60] sm:$0xff] }
0x4f83   :  { %v15399_v21 = vpack.c.bf16 %v12969_v20, %v12968_v19 }
0x4f84   :  { %v9179_v24 = vmul.f32 1.442695, %v9178_v23  ;;  %v12977_v23 = vld [vmem:[%s18105_s11 + $0x68] sm:$0xff] }
0x4f86   :  { %15685 = vpow2.f32 %v9179_v24  ;;  %v15408_v24 = vpack.c.bf16 %v12977_v23, %v12976_v22  ;;  %v10445_v22 = vld [vmem:[%s18109_s15] sm:$0xff]  ;;  %v10446_v23 = vld [vmem:[%s18109_s15 + $0x8] sm:$0xff] }
0x4f90   :  { %v15686_v25 = vpop.eup %15685 }
0x4f91   :  { %v9181_v26 = vsel %vm345_vm2, %v15686_v25, 0.0 }
0x4f92   :  { %9182 = vadd.xlane.f32.xlu1 %v9181_v26  ;;  %v12979_v26 = vld [vmem:[%s18105_s11 + $0x78] sm:$0xff] }
0x501f   :  { %v9183_v29 = vpop.xlane.xlu1 %9182 }
0x5020   :  { %15687 = vrcp.f32 %v9183_v29  ;;  %v12971_v29 = vld [vmem:[%s18104_s10 + $0x60] sm:$0xff] }
0x502a   :  { %v15688_v30 = vpop.eup %15687 }
0x502b   :  { %v9185_v31 = vmul.f32 %v15688_v30, %v15686_v25  ;;  %v12978_v25 = vld [vmem:[%s18105_s11 + $0x70] sm:$0xff]  ;;  %v12972_v30 = vld [vmem:[%s18104_s10 + $0x68] sm:$0xff] }
0x502c   :  { %v15411_v28 = vpack.c.bf16 %v12979_v26, %v12978_v25  ;;  %v15420_v25 = vpack.c.bf16 %v10446_v23, %v10445_v22  ;;  %v10448_v26 = vld [vmem:[%s18109_s15 + $0x18] sm:$0xff]  ;;  %v10648_v23 = vld [vmem:[%s18112_s18] sm:$0xff] }
0x502d   :  { %14621 = vmatmul.mubr.msk.f32.vlgmr.msra.gmra.mrb[112].mxu1 %vm345_vm2, %v9185_v31  ;;  %v15402_v31 = vpack.c.bf16 %v12972_v30, %v12971_v29 }
0x502e   :  { %14629 = vmatpush3.msra.mxu1 %v8875_v33  ;;  %14630 = vmatprep.mubr.msk.f32.mxu1 %vm15744_vm1, %v15745_v27  ;;  %v12973_v33 = vld [vmem:[%s18104_s10 + $0x70] sm:$0xff] }
0x502f   :  { %15383 = vmatprep.subr.bf16.mxu1 %v15743_v7  ;;  %v15405_v39 = vpack.c.bf16 %v12974_v35, %v12973_v33  ;;  %v10449_v33 = vld [vmem:[%s18109_s15 + $0x20] sm:$0xff]  ;;  %v10450_v35 = vld [vmem:[%s18109_s15 + $0x28] sm:$0xff] }
0x5031   :  { %14631 = vmatmul.mubr.msk.f32.vlgmr.msra.gmra.mrb[114].mxu1 %vm345_vm2, %v8871_v14  ;;  %v12966_v14 = vld [vmem:[%s18154_s25 + $0x60] sm:$0xff] }
0x5032   :  { %15385 = vmatpush3.bf16.msra.mxu1 %v15384_v38  ;;  %14652 = vmatprep.mubr.msk.f32.mxu1 %vm15744_vm1, %v15745_v27  ;;  %v15396_v17 = vpack.c.bf16 %v12967_v0, %v12966_v14  ;;  %v10363_v14 = vld [vmem:[%s18107_s13 + $0x18] sm:$0xff] }
0x5033   :  { %15386 = vmatprep.subr.bf16.mxu1 %v15743_v7 }
0x5036   :  { %15388 = vmatpush3.bf16.msra.mxu1 %v15387_v42 }
0x5037   :  { %14666 = vmatprep.subr.mxu1 %v15745_v27 }
0x5039   :  { %14653 = vmatmul.mubr.msk.f32.vlgmr.msra.gmra.mrb[116].mxu1 %vm82_vm0, %v17399_v32 }
0x503a   :  { %14668 = vmatprep.mubr.msk.f32.mxu1 %vm15744_vm1, %v15745_v27 }
0x5100   :  { %v9255_v48 = vpop.f32.mrb[112].mxu1 }
0x5101   :  { %v14622_v49 = vpop.f32.mrb[113].mxu1  ;;  %14626 = vmatmul.mubr.msk.f32.vlgmr.msra.gmra.mrb[114].mxu0 %vm345_vm2, %v9255_v48 }
0x5102   :  { %15379 = vmatpush3.bf16.msra.mxu0 %v15378_v45  ;;  %14641 = vmatprep.mubr.msk.f32.mxu0 %vm15744_vm1, %v15745_v27 }
0x5103   :  { %15380 = vmatprep.subr.bf16.mxu0 %v15743_v7 }
0x5104   :  { %v9402_v51 = vpop.f32.mrb[114].mxu1 }
0x5105   :  { %v14632_v52 = vpop.f32.mrb[115].mxu1 }
0x5106   :  { %15382 = vmatpush3.bf16.msra.mxu0 %v15381_v50 }
0x5107   :  { %15389 = vmatprep.subr.bf16.mxu0 %v15743_v7 }
0x5109   :  { %14642 = vmatmul.mubr.msk.f32.vlgmr.msra.gmra.mrb[116].mxu0 %vm82_vm0, %v17399_v32 }
0x510a   :  { %15391 = vmatpush3.bf16.msra.mxu0 %v15390_v37  ;;  %14663 = vmatprep.mubr.msk.f32.mxu0 %vm15744_vm1, %v15745_v27 }
0x510b   :  { %15392 = vmatprep.subr.bf16.mxu0 %v15743_v7 }
0x510c   :  { %v9550_v56 = vpop.f32.mrb[116].mxu1 }
0x510d   :  { %v14654_v57 = vpop.f32.mrb[117].mxu1  ;;  %14667 = vmatpush3.xpose.msk.msra.mxu1 %vm345_vm2, %v9550_v56 }
0x510e   :  { %15394 = vmatpush3.bf16.msra.mxu0 %v15393_v40  ;;  %14671 = vmatprep.subr.mxu1 %v15745_v27  ;;  %v12984_v40 = vld [vmem:[%s18106_s12 + $0x18] sm:$0xff] }
0x510f   :  { %14676 = vmatprep.subr.mxu0 %v15745_v27 }
0x5111   :  { %14664 = vmatmul.mubr.msk.f32.vlgmr.msra.gmra.mrb[118].mxu0 %vm82_vm0, %v17399_v32 }
0x5112   :  { %14678 = vmatprep.mubr.msk.f32.mxu0 %vm15744_vm1, %v15745_v27  ;;  %14677 = vmatpush3.msra.mxu0 %v12964_v58 }
0x5113   :  { %15401 = vmatprep.subr.bf16.mxu0 %v15743_v7 }
0x51d4   :  { %v9329_v59 = vpop.f32.mrb[114].mxu0 }
0x51d5   :  { %v17567_v60 = vadd.f32 %v9402_v51, %v9329_v59  ;;  %v14627_v62 = vpop.f32.mrb[115].mxu0 }
0x51dc   :  { %v9476_v63 = vpop.f32.mrb[116].mxu0 }
0x51dd   :  { %v14643_v1 = vpop.f32.mrb[117].mxu0  ;;  %14669 = vmatmul.mubr.msk.f32.vlgmr.msra.gmra.mrb[118].mxu1 %vm345_vm2, %v9476_v63 }
0x51de   :  { %14673 = vmatprep.mubr.msk.f32.mxu1 %vm15744_vm1, %v15745_v27 }
0x51e4   :  { %v9624_v2 = vpop.f32.mrb[118].mxu0 }
0x51e5   :  { %v14665_v3 = vpop.f32.mrb[119].mxu0  ;;  %14672 = vmatpush3.msra.mxu1 %v9624_v2 }
0x51e6   :  { %15395 = vmatprep.subr.bf16.mxu1 %v15743_v7 }
0x52b0   :  { %v9700_v4 = vpop.f32.mrb[118].mxu1 }
0x52b1   :  { %v9704_v6 = vmul.f32 0.35355338, %v9700_v4  ;;  %v14670_v8 = vpop.f32.mrb[119].mxu1 }
0x52b3   :  { %v9705_v9 = vsel %vm345_vm2, %v9704_v6, -inf }
0x52b4   :  { %9706 = vmax.xlane.f32.xlu0 %v9705_v9  ;;  %v10360_v9 = vld [vmem:[%s18107_s13] sm:$0xff] }
0x5341   :  { %v9707_v10 = vpop.xlane.xlu0 %9706 }
0x5342   :  { %v9708_v11 = vsub.f32 %v9704_v6, %v9707_v10  ;;  %v10361_v10 = vld [vmem:[%s18107_s13 + $0x8] sm:$0xff] }
0x5344   :  { %v9709_v12 = vmul.f32 1.442695, %v9708_v11 }
0x5346   :  { %15689 = vpow2.f32 %v9709_v12 }
0x5350   :  { %v15690_v5 = vpop.eup %15689 }
0x5351   :  { %v9711_v13 = vsel %vm345_vm2, %v15690_v5, 0.0 }
0x5352   :  { %9712 = vadd.xlane.f32.xlu1 %v9711_v13 }
0x53df   :  { %v9713_v61 = vpop.xlane.xlu1 %9712 }
0x53e0   :  { %15691 = vrcp.f32 %v9713_v61  ;;  %v10362_v61 = vld [vmem:[%s18107_s13 + $0x10] sm:$0xff] }
0x53e1   :  { %v15417_v0 = vpack.c.bf16 %v10363_v14, %v10362_v61 }
0x53ea   :  { %v15692_v16 = vpop.eup %15691 }
0x53eb   :  { %v9715_v18 = vmul.f32 %v15692_v16, %v15690_v5 }
0x53ed   :  { %14674 = vmatmul.mubr.msk.f32.vlgmr.msra.gmra.mrb[120].mxu1 %vm345_vm2, %v9715_v18 }
0x53ee   :  { %15397 = vmatpush3.bf16.msra.mxu1 %v15396_v17  ;;  %14689 = vmatprep.mubr.msk.f32.mxu1 %vm15744_vm1, %v15745_v27 }
0x53ef   :  { %15398 = vmatprep.subr.bf16.mxu1 %v15743_v7 }
0x53f2   :  { %15400 = vmatpush3.bf16.msra.mxu1 %v15399_v21 }
0x53f3   :  { %15407 = vmatprep.subr.bf16.mxu1 %v15743_v7 }
0x53f5   :  { %14690 = vmatmul.mubr.msk.f32.vlgmr.msra.gmra.mrb[122].mxu1 %vm82_vm0, %v17399_v32 }
0x53f6   :  { %15409 = vmatpush3.bf16.msra.mxu1 %v15408_v24  ;;  %14711 = vmatprep.mubr.msk.f32.mxu1 %vm15744_vm1, %v15745_v27  ;;  %v10447_v24 = vld [vmem:[%s18109_s15 + $0x10] sm:$0xff] }
0x53f7   :  { %15410 = vmatprep.subr.bf16.mxu1 %v15743_v7  ;;  %v15423_v30 = vpack.c.bf16 %v10448_v26, %v10447_v24  ;;  %v10649_v24 = vld [vmem:[%s18112_s18 + $0x8] sm:$0xff] }
0x53fa   :  { %15412 = vmatpush3.bf16.msra.mxu1 %v15411_v28 }
0x53fb   :  { %14724 = vmatprep.subr.mxu1 %v15745_v27 }
0x53fd   :  { %14712 = vmatmul.mubr.msk.f32.vlgmr.msra.gmra.mrb[124].mxu1 %vm82_vm0, %v17399_v32 }
0x53fe   :  { %14726 = vmatprep.mubr.msk.f32.mxu1 %vm15744_vm1, %v15745_v27  ;;  %14725 = vmatpush3.msra.mxu1 %v12984_v40 }
0x53ff   :  { %15419 = vmatprep.subr.bf16.mxu1 %v15743_v7 }
0x54c0   :  { %v9785_v36 = vpop.f32.mrb[120].mxu1 }
0x54c1   :  { %v14675_v38 = vpop.f32.mrb[121].mxu1  ;;  %14679 = vmatmul.mubr.msk.f32.vlgmr.msra.gmra.mrb[120].mxu0 %vm345_vm2, %v9785_v36  ;;  %v15426_v36 = vpack.c.bf16 %v10450_v35, %v10449_v33 }
0x54c2   :  { %15403 = vmatpush3.bf16.msra.mxu0 %v15402_v31  ;;  %14700 = vmatprep.mubr.msk.f32.mxu0 %vm15744_vm1, %v15745_v27 }
0x54c3   :  { %15404 = vmatprep.subr.bf16.mxu0 %v15743_v7 }
0x54c6   :  { %15406 = vmatpush3.bf16.msra.mxu0 %v15405_v39 }
0x54c7   :  { %14714 = vmatprep.subr.mxu0 %v15745_v27 }
0x54c8   :  { %v9934_v41 = vpop.f32.mrb[122].mxu1 }
0x54c9   :  { %v14691_v42 = vpop.f32.mrb[123].mxu1  ;;  %14701 = vmatmul.mubr.msk.f32.vlgmr.msra.gmra.mrb[122].mxu0 %vm82_vm0, %v17399_v32 }
0x54ca   :  { %14716 = vmatprep.mubr.msk.f32.mxu0 %vm15744_vm1, %v15745_v27 }
0x54d0   :  { %v10082_v43 = vpop.f32.mrb[124].mxu1 }
0x54d1   :  { %v14713_v44 = vpop.f32.mrb[125].mxu1 }
0x5594   :  { %v9859_v45 = vpop.f32.mrb[120].mxu0 }
0x5595   :  { %v9863_v46 = vadd.f32 %v9859_v45, %v17567_v60  ;;  %v14680_v47 = vpop.f32.mrb[121].mxu0  ;;  %v10451_v45 = vld [vmem:[%s18109_s15 + $0x30] sm:$0xff] }
0x559c   :  { %v10008_v48 = vpop.f32.mrb[122].mxu0 }
0x559d   :  { %v14702_v49 = vpop.f32.mrb[123].mxu0  ;;  %14715 = vmatpush3.xpose.msk.msra.mxu0 %vm345_vm2, %v10008_v48  ;;  %v12986_v48 = vld [vmem:[%s18108_s14] ss:$0 sm:$0xff] }
0x559e   :  { %14719 = vmatprep.subr.mxu0 %v15745_v27 }
0x55a0   :  { %14717 = vmatmul.mubr.msk.f32.vlgmr.msra.gmra.mrb[124].mxu0 %vm345_vm2, %v9934_v41 }
0x55a1   :  { %14720 = vmatpush3.msra.mxu0 %v10082_v43  ;;  %14721 = vmatprep.mubr.msk.f32.mxu0 %vm15744_vm1, %v15745_v27 }
0x55a2   :  { %15413 = vmatprep.subr.bf16.mxu0 %v15743_v7 }
0x5673   :  { %v10158_v32 = vpop.f32.mrb[124].mxu0 }
0x5674   :  { %v10162_v50 = vmul.f32 0.35355338, %v10158_v32  ;;  %v14718_v34 = vpop.f32.mrb[125].mxu0 }
0x5676   :  { %v10163_v15 = vsel %vm345_vm2, %v10162_v50, -inf }
0x5677   :  { %10164 = vmax.xlane.f32.xlu0 %v10163_v15  ;;  %v12988_v15 = vld [vmem:[%s18110_s16] ss:$0 sm:$0xff] }
0x5704   :  { %v10165_v51 = vpop.xlane.xlu0 %10164 }
0x5705   :  { %v10166_v52 = vsub.f32 %v10162_v50, %v10165_v51 }
0x5707   :  { %v10167_v37 = vmul.f32 1.442695, %v10166_v52 }
0x5709   :  { %15693 = vpow2.f32 %v10167_v37 }
0x5713   :  { %v15694_v53 = vpop.eup %15693 }
0x5714   :  { %v10169_v54 = vsel %vm345_vm2, %v15694_v53, 0.0 }
0x5715   :  { %10170 = vadd.xlane.f32.xlu1 %v10169_v54 }
0x57a2   :  { %v10171_v56 = vpop.xlane.xlu1 %10170 }
0x57a3   :  { %15695 = vrcp.f32 %v10171_v56 }
0x57ad   :  { %v15696_v57 = vpop.eup %15695 }
0x57ae   :  { %v10173_v59 = vmul.f32 %v15696_v57, %v15694_v53  ;;  %v10571_v57 = vld [vmem:[%s18111_s17] sm:$0xff] }
0x57b0   :  { %14722 = vmatmul.mubr.msk.f32.vlgmr.msra.gmra.mrb[126].mxu0 %vm345_vm2, %v10173_v59  ;;  %v10572_v59 = vld [vmem:[%s18111_s17 + $0x8] sm:$0xff] }
0x57b1   :  { %14737 = vmatprep.mubr.msk.f32.mxu0 %vm15744_vm1, %v15745_v27 }
0x5883   :  { %v10243_v60 = vpop.f32.mrb[126].mxu0 }
0x5884   :  { %v14723_v62 = vpop.f32.mrb[127].mxu0  ;;  %14727 = vmatmul.mubr.msk.f32.vlgmr.msra.gmra.mrb[126].mxu1 %vm345_vm2, %v10243_v60  ;;  %v10722_v60 = vld [vmem:[%s18113_s19] sm:$0xff] }
0x5885   :  { %14756 = vmatprep.mubr.msk.f32.mxu1 %vm15744_vm1, %v15745_v27  ;;  %15421 = vmatpush3.bf16.msra.mxu1 %v15420_v25  ;;  %v15432_v62 = vpack.c.bf16 %v10572_v59, %v10571_v57 }
0x5886   :  { %15422 = vmatprep.subr.bf16.mxu1 %v15743_v7 }
0x5889   :  { %15424 = vmatpush3.bf16.msra.mxu1 %v15423_v30  ;;  %v10650_v30 = vld [vmem:[%s18112_s18 + $0x10] sm:$0xff] }
0x588a   :  { %15425 = vmatprep.subr.bf16.mxu1 %v15743_v7 }
0x588d   :  { %15427 = vmatpush3.bf16.msra.mxu1 %v15426_v36 }
0x588e   :  { %15428 = vmatprep.subr.bf16.mxu1 %v15743_v7 }
0x5957   :  { %v10317_v63 = vpop.f32.mrb[126].mxu1 }
0x5958   :  { %v10321_v1 = vadd.f32 %v10317_v63, %v9863_v46  ;;  %v14728_v2 = vpop.f32.mrb[127].mxu1  ;;  %v10452_v46 = vld [vmem:[%s18109_s15 + $0x38] sm:$0xff]  ;;  %v10723_v63 = vld [vmem:[%s18113_s19 + $0x8] sm:$0xff]  ;;  %s15746_s15 = smov [#allocation2]  }
0x5959   :  { %v15429_v47 = vpack.c.bf16 %v10452_v46, %v10451_v45  ;;  %v12998_v46 = vld [vmem:[%s18111_s17 + $0x30] sm:$0xff]  ;;  %s12623_s16 = sshll.u32 %s15746_s15, 4  ;;  %s12624_s16 = int_to_ptr.vmem [resolvable:$true] %s12623_s16 }
0x595a   :  { %v17659_v3 = vadd.f32 %v10321_v1, %v17357_v55  ;;  %v15414_v55 = vpack.c.bf16 %v10361_v10, %v10360_v9  ;;  %v15444_v1 = vpack.c.bf16 %v10723_v63, %v10722_v60  ;;  %p15724_p1 = scmp.lt.s32.totalorder %s12624_s16, %s12624_s16 }
0x595b   :  { %15430 = vmatpush3.bf16.msra.mxu1 %v15429_v47  ;;  %v12999_v47 = vld [vmem:[%s18111_s17 + $0x38] sm:$0xff] }
0x595c   :  { %v10323_v4 = vsel %vm82_vm0, %v17659_v3, 0.0  ;;  %v10336_v6 = vmul.f32 %v17659_v3, %v17659_v3  ;;  %15415 = vmatpush3.bf16.msra.mxu0 %v15414_v55  ;;  %15443 = vmatprep.subr.bf16.mxu1 %v15743_v7 }
0x595d   :  { %10324 = vadd.xlane.f32.xlu0 %v10323_v4  ;;  %15416 = vmatprep.subr.bf16.mxu0 %v15743_v7 }
0x595e   :  { %v10337_v8 = vsel %vm82_vm0, %v10336_v6, 0.0  ;;  %v10573_v6 = vld [vmem:[%s18111_s17 + $0x10] sm:$0xff] }
0x595f   :  { %10338 = vadd.xlane.f32.xlu1 %v10337_v8  ;;  %v10574_v8 = vld [vmem:[%s18111_s17 + $0x18] sm:$0xff] }
0x5960   :  { %15418 = vmatpush3.bf16.msra.mxu0 %v15417_v0  ;;  %v15435_v55 = vpack.c.bf16 %v10574_v8, %v10573_v6  ;;  %v13001_v6 = vld [vmem:[%s18112_s18 + $0x20] sm:$0xff]  ;;  %v13002_v8 = vld [vmem:[%s18112_s18 + $0x28] sm:$0xff] }
0x5961   :  { %15431 = vmatprep.subr.bf16.mxu0 %v15743_v7 }
0x59ea   :  { %v10325_v11 = vpop.xlane.xlu0 %10324 }
0x59eb   :  { %v10326_v12 = vrot.slane %v10325_v11, 4 }
0x59ec   :  { %v10339_v5 = vpop.xlane.xlu1 %10338 }
0x59ed   :  { %v10327_v13 = vadd.f32 %v10326_v12, %v10325_v11  ;;  %v10340_v58 = vrot.slane %v10339_v5, 4  ;;  %v10724_v11 = vld [vmem:[%s18113_s19 + $0x10] sm:$0xff]  ;;  %v10725_v12 = vld [vmem:[%s18113_s19 + $0x18] sm:$0xff] }
0x59ef   :  { %v10328_v16 = vrot.slane %v10327_v13, 2  ;;  %v10341_v17 = vadd.f32 %v10340_v58, %v10339_v5  ;;  %v15447_v5 = vpack.c.bf16 %v10725_v12, %v10724_v11  ;;  %v13003_v11 = vld [vmem:[%s18112_s18 + $0x30] sm:$0xff]  ;;  %v13004_v12 = vld [vmem:[%s18112_s18 + $0x38] sm:$0xff] }
0x59f1   :  { %v10342_v18 = vrot.slane %v10341_v17, 2  ;;  %v10329_v19 = vadd.f32 %v10328_v16, %v10327_v13 }
0x59f3   :  { %v10330_v20 = vrot.slane %v10329_v19, 1  ;;  %v10343_v21 = vadd.f32 %v10342_v18, %v10341_v17 }
0x59f5   :  { %v10331_v28 = vadd.f32 %v10330_v20, %v10329_v19  ;;  %v10344_v29 = vrot.slane %v10343_v21, 1 }
0x59f7   :  { %15575 = vpush %v10331_v28  ;;  %v10345_v31 = vadd.f32 %v10344_v29, %v10343_v21  ;;  %v15438_v28 = vpack.c.bf16 %v10649_v24, %v10648_v23  ;;  %v13014_v24 = vld [vmem:[%s18114_s20 + $0x8] sm:$0xff] }
0x59f9   :  { %15577 = vpush %v10345_v31  ;;  %v10651_v31 = vld [vmem:[%s18112_s18 + $0x18] sm:$0xff] }
0x59fa   :  { %v15441_v33 = vpack.c.bf16 %v10651_v31, %v10650_v30  ;;  %v10957_v30 = vld [vmem:[%s18114_s20] sm:$0xff] }
0x59fb   :  { %v13022_v31 = vld [vmem:[%s18112_s18 + $0x40] sm:$0xff] }
0x5a28   :  { %s15576_s12 = spop %15575 }
0x5a29   :  { %s10335_s27 = smul.f32 0.00390625, %s15576_s12 }
0x5a2a   :  { %s15578_s3 = spop %15577 }
0x5a2b   :  { %s10350_s9 = smul.f32 %s10335_s27, %s10335_s27  ;;  %v10352_v41 = vstv %s10335_s27 }
0x5a2c   :  { %s10349_s29 = smul.f32 0.00390625, %s15578_s3  ;;  %v10353_v42 = vsub.f32 %v17659_v3, %v10352_v41  ;;  %v12996_v41 = vld [vmem:[%s18111_s17 + $0x20] sm:$0xff] }
0x5a2e   :  { %s10351_s25 = ssub.f32 %s10349_s29, %s10350_s9 }
0x5a30   :  { %s10354_s30 = sadd.f32 1e-05, %s10351_s25 }
0x5a32   :  { %v10355_v38 = vstv %s10354_s30 }
0x5a33   :  { %15697 = vrsqrt.f32 %v10355_v38 }
0x5a3d   :  { %v15698_v39 = vpop.eup %15697 }
0x5a3e   :  { %15579 = vpush %v15698_v39 }
0x5a6f   :  { %s15580_s7 = spop %15579 }
0x5a70   :  { %v10358_v43 = vstv %s15580_s7 }
0x5a71   :  { %v10359_v44 = vmul.f32 %v10358_v43, %v10353_v42  ;;  %v12997_v42 = vld [vmem:[%s18111_s17 + $0x28] sm:$0xff] }
0x5a72   :  { %v15450_v45 = vpack.c.bf16 %v12997_v42, %v12996_v41  ;;  %v13017_v41 = vld [vmem:[%s18111_s17 + $0x40] sm:$0xff]  ;;  %v13018_v42 = vld [vmem:[%s18111_s17 + $0x48] sm:$0xff] }
0x5a73   :  { %14738 = vmatmul.mubr.msk.f32.vlgmr.msra.gmra.mrb[128].mxu0 %vm82_vm0, %v10359_v44 }
0x5a74   :  { %14767 = vmatprep.mubr.msk.f32.mxu0 %vm15744_vm1, %v15745_v27  ;;  %15433 = vmatpush3.bf16.msra.mxu0 %v15432_v62 }
0x5a75   :  { %15434 = vmatprep.subr.bf16.mxu0 %v15743_v7 }
0x5a78   :  { %15436 = vmatpush3.bf16.msra.mxu0 %v15435_v55 }
0x5a79   :  { %15437 = vmatprep.subr.bf16.mxu0 %v15743_v7 }
0x5b46   :  { %v10440_v49 = vpop.f32.mrb[128].mxu0 }
0x5b47   :  { %v10441_v32 = vadd.f32 %v12986_v48, %v10440_v49  ;;  %v14739_v50 = vpop.f32.mrb[129].mxu0  ;;  %v15453_v48 = vpack.c.bf16 %v12999_v47, %v12998_v46  ;;  %v13006_v49 = vld [vmem:[%s18113_s19 + $0x20] sm:$0xff] }
0x5b49   :  { %v10444_v34 = vmax.f32 %v10441_v32, 0.0  ;;  %v13007_v32 = vld [vmem:[%s18113_s19 + $0x28] sm:$0xff] }
0x5b4a   :  { %v15462_v50 = vpack.c.bf16 %v13007_v32, %v13006_v49  ;;  %v13027_v49 = vld [vmem:[%s18113_s19 + $0x40] sm:$0xff]  ;;  %v13028_v32 = vld [vmem:[%s18113_s19 + $0x48] sm:$0xff] }
0x5b4b   :  { %14757 = vmatmul.mubr.msk.f32.vlgmr.msra.gmra.mrb[128].mxu1 %vm2104_vm3, %v10444_v34  ;;  %v13008_v34 = vld [vmem:[%s18113_s19 + $0x30] sm:$0xff] }
0x5b4c   :  { %14789 = vmatprep.mubr.msk.f32.mxu1 %vm15744_vm1, %v15745_v27  ;;  %15445 = vmatpush3.bf16.msra.mxu1 %v15444_v1 }
0x5b4d   :  { %15446 = vmatprep.subr.bf16.mxu1 %v15743_v7 }
0x5b50   :  { %15448 = vmatpush3.bf16.msra.mxu1 %v15447_v5  ;;  %v15459_v5 = vpack.c.bf16 %v13004_v12, %v13003_v11  ;;  %v13035_v12 = vld [vmem:[%s18114_s20 + $0x10] sm:$0xff] }
0x5b51   :  { %14797 = vmatprep.subr.mxu1 %v15745_v27 }
0x5c1e   :  { %v10529_v51 = vpop.f32.mrb[128].mxu1 }
0x5c1f   :  { %v10530_v52 = vadd.f32 %v12988_v15, %v10529_v51  ;;  %v14758_v37 = vpop.f32.mrb[129].mxu1  ;;  %v13009_v15 = vld [vmem:[%s18113_s19 + $0x38] sm:$0xff] }
0x5c20   :  { %v15465_v51 = vpack.c.bf16 %v13009_v15, %v13008_v34  ;;  %v15480_v15 = vpack.c.bf16 %v13028_v32, %v13027_v49 }
0x5c21   :  { %v17722_v53 = vadd.f32 %v10530_v52, %v17659_v3 }
0x5c23   :  { %v10534_v54 = vsel %vm82_vm0, %v17722_v53, 0.0  ;;  %v10547_v40 = vmul.f32 %v17722_v53, %v17722_v53 }
0x5c24   :  { %10535 = vadd.xlane.f32.xlu0 %v10534_v54 }
0x5c25   :  { %v10548_v56 = vsel %vm82_vm0, %v10547_v40, 0.0 }
0x5c26   :  { %10549 = vadd.xlane.f32.xlu1 %v10548_v56 }
0x5cb1   :  { %v10536_v2 = vpop.xlane.xlu0 %10535 }
0x5cb2   :  { %v10537_v3 = vrot.slane %v10536_v2, 4 }
0x5cb3   :  { %v10550_v4 = vpop.xlane.xlu1 %10549 }
0x5cb4   :  { %v10538_v9 = vadd.f32 %v10537_v3, %v10536_v2  ;;  %v10551_v10 = vrot.slane %v10550_v4, 4 }
0x5cb6   :  { %v10539_v13 = vrot.slane %v10538_v9, 2  ;;  %v10552_v58 = vadd.f32 %v10551_v10, %v10550_v4  ;;  %v15456_v10 = vpack.c.bf16 %v13002_v8, %v13001_v6 }
0x5cb8   :  { %v10553_v61 = vrot.slane %v10552_v58, 2  ;;  %v10540_v14 = vadd.f32 %v10539_v13, %v10538_v9 }
0x5cba   :  { %v10541_v0 = vrot.slane %v10540_v14, 1  ;;  %v10554_v16 = vadd.f32 %v10553_v61, %v10552_v58 }
0x5cbc   :  { %v10542_v17 = vadd.f32 %v10541_v0, %v10540_v14  ;;  %v10555_v18 = vrot.slane %v10554_v16, 1 }
0x5cbe   :  { %15581 = vpush %v10542_v17  ;;  %v10556_v19 = vadd.f32 %v10555_v18, %v10554_v16 }
0x5cc0   :  { %15583 = vpush %v10556_v19 }
0x5cef   :  { %s15582_s11 = spop %15581 }
0x5cf0   :  { %s10546_s26 = smul.f32 0.00390625, %s15582_s11 }
0x5cf1   :  { %s15584_s0 = spop %15583 }
0x5cf2   :  { %s10561_s8 = smul.f32 %s10546_s26, %s10546_s26  ;;  %v10563_v22 = vstv %s10546_s26 }
0x5cf3   :  { %s10560_s13 = smul.f32 0.00390625, %s15584_s0  ;;  %v10564_v25 = vsub.f32 %v17722_v53, %v10563_v22 }
0x5cf5   :  { %s10562_s1 = ssub.f32 %s10560_s13, %s10561_s8 }
0x5cf7   :  { %s10565_s2 = sadd.f32 1e-05, %s10562_s1 }
0x5cf9   :  { %v10566_v20 = vstv %s10565_s2 }
0x5cfa   :  { %15699 = vrsqrt.f32 %v10566_v20 }
0x5d04   :  { %v15700_v21 = vpop.eup %15699 }
0x5d05   :  { %15585 = vpush %v15700_v21 }
0x5d36   :  { %s15586_s4 = spop %15585 }
0x5d37   :  { %v10569_v26 = vstv %s15586_s4 }
0x5d38   :  { %v17764_v29 = vmul.f32 %v10569_v26, %v10564_v25 }
0x5d3a   :  { %14768 = vmatmul.mubr.msk.f32.vlgmr.msra.gmra.mrb[130].mxu0 %vm82_vm0, %v17764_v29  ;;  %14790 = vmatmul.mubr.msk.f32.vlgmr.msra.gmra.mrb[130].mxu1 %vm82_vm0, %v17764_v29 }
0x5d3b   :  { %15439 = vmatpush3.bf16.msra.mxu0 %v15438_v28  ;;  %14778 = vmatprep.mubr.msk.f32.mxu0 %vm15744_vm1, %v15745_v27 }
0x5d3c   :  { %15440 = vmatprep.subr.bf16.mxu0 %v15743_v7  ;;  %14799 = vmatprep.mubr.msk.f32.mxu1 %vm15744_vm1, %v15745_v27 }
0x5d3f   :  { %15442 = vmatpush3.bf16.msra.mxu0 %v15441_v33  ;;  %v13023_v33 = vld [vmem:[%s18112_s18 + $0x48] sm:$0xff] }
0x5d40   :  { %14792 = vmatprep.subr.mxu0 %v15745_v27 }
0x5d42   :  { %14779 = vmatmul.mubr.msk.f32.vlgmr.msra.gmra.mrb[132].mxu0 %vm82_vm0, %v17764_v29 }
0x5d43   :  { %14794 = vmatprep.mubr.msk.f32.mxu0 %vm15744_vm1, %v15745_v27 }
0x5e0d   :  { %v10644_v35 = vpop.f32.mrb[130].mxu0  ;;  %v10792_v36 = vpop.f32.mrb[130].mxu1 }
0x5e0e   :  { %v14769_v38 = vpop.f32.mrb[131].mxu0  ;;  %v14791_v39 = vpop.f32.mrb[131].mxu1  ;;  %14798 = vmatpush3.msra.mxu1 %v10792_v36  ;;  %v13024_v36 = vld [vmem:[%s18112_s18 + $0x50] sm:$0xff] }
0x5e0f   :  { %15455 = vmatprep.subr.bf16.mxu1 %v15743_v7  ;;  %v13025_v38 = vld [vmem:[%s18112_s18 + $0x58] sm:$0xff] }
0x5e10   :  { %v15477_v39 = vpack.c.bf16 %v13025_v38, %v13024_v36 }
0x5e15   :  { %v10718_v43 = vpop.f32.mrb[132].mxu0 }
0x5e16   :  { %v14780_v44 = vpop.f32.mrb[133].mxu0  ;;  %14793 = vmatpush3.xpose.msk.msra.mxu0 %vm345_vm2, %v10718_v43  ;;  %v15468_v43 = vpack.c.bf16 %v13018_v42, %v13017_v41 }
0x5e17   :  { %15449 = vmatprep.subr.bf16.mxu0 %v15743_v7  ;;  %v13019_v44 = vld [vmem:[%s18111_s17 + $0x50] sm:$0xff] }
0x5e19   :  { %14795 = vmatmul.mubr.msk.f32.vlgmr.msra.gmra.mrb[134].mxu0 %vm345_vm2, %v10644_v35  ;;  %v15474_v35 = vpack.c.bf16 %v13023_v33, %v13022_v31  ;;  %v13045_v31 = vld [vmem:[%s18112_s18 + $0x78] sm:$0xff] }
0x5e1a   :  { %15451 = vmatpush3.bf16.msra.mxu0 %v15450_v45  ;;  %14810 = vmatprep.mubr.msk.f32.mxu0 %vm15744_vm1, %v15745_v27  ;;  %v13020_v45 = vld [vmem:[%s18111_s17 + $0x58] sm:$0xff] }
0x5e1b   :  { %15452 = vmatprep.subr.bf16.mxu0 %v15743_v7 }
0x5e1e   :  { %15454 = vmatpush3.bf16.msra.mxu0 %v15453_v48  ;;  %v15471_v48 = vpack.c.bf16 %v13020_v45, %v13019_v44 }
0x5e1f   :  { %15461 = vmatprep.subr.bf16.mxu0 %v15743_v7 }
0x5e21   :  { %14811 = vmatmul.mubr.msk.f32.vlgmr.msra.gmra.mrb[136].mxu0 %vm82_vm0, %v17764_v29 }
0x5e22   :  { %15463 = vmatpush3.bf16.msra.mxu0 %v15462_v50  ;;  %14832 = vmatprep.mubr.msk.f32.mxu0 %vm15744_vm1, %v15745_v27 }
0x5e23   :  { %15464 = vmatprep.subr.bf16.mxu0 %v15743_v7 }
0x5e26   :  { %15466 = vmatpush3.bf16.msra.mxu0 %v15465_v51  ;;  %v13029_v51 = vld [vmem:[%s18113_s19 + $0x50] sm:$0xff] }
0x5e27   :  { %14845 = vmatprep.subr.mxu0 %v15745_v27 }
0x5e29   :  { %14833 = vmatmul.mubr.msk.f32.vlgmr.msra.gmra.mrb[138].mxu0 %vm82_vm0, %v17764_v29 }
0x5e2a   :  { %14847 = vmatprep.mubr.msk.f32.mxu0 %vm15744_vm1, %v15745_v27  ;;  %14846 = vmatpush3.msra.mxu0 %v13014_v24 }
0x5e2b   :  { %15467 = vmatprep.subr.bf16.mxu0 %v15743_v7 }
0x5eec   :  { %v10868_v52 = vpop.f32.mrb[134].mxu0 }
0x5eed   :  { %v10872_v37 = vmul.f32 0.35355338, %v10868_v52  ;;  %v14796_v54 = vpop.f32.mrb[135].mxu0  ;;  %v13030_v52 = vld [vmem:[%s18113_s19 + $0x58] sm:$0xff] }
0x5eef   :  { %v10873_v40 = vsel %vm345_vm2, %v10872_v37, -inf }
0x5ef0   :  { %10874 = vmax.xlane.f32.xlu0 %v10873_v40 }
0x5ef4   :  { %v11028_v56 = vpop.f32.mrb[136].mxu0 }
0x5ef5   :  { %v14812_v57 = vpop.f32.mrb[137].mxu0 }
0x5efc   :  { %v11176_v59 = vpop.f32.mrb[138].mxu0 }
0x5efd   :  { %v14834_v60 = vpop.f32.mrb[139].mxu0 }
0x5f7d   :  { %v10875_v62 = vpop.xlane.xlu0 %10874 }
0x5f7e   :  { %v10876_v63 = vsub.f32 %v10872_v37, %v10875_v62  ;;  %v15483_v37 = vpack.c.bf16 %v13030_v52, %v13029_v51 }
0x5f80   :  { %v10877_v1 = vmul.f32 1.442695, %v10876_v63 }
0x5f82   :  { %15701 = vpow2.f32 %v10877_v1 }
0x5f8c   :  { %v15702_v2 = vpop.eup %15701 }
0x5f8d   :  { %v10879_v3 = vsel %vm345_vm2, %v15702_v2, 0.0 }
0x5f8e   :  { %10880 = vadd.xlane.f32.xlu1 %v10879_v3 }
0x601b   :  { %v10881_v4 = vpop.xlane.xlu1 %10880 }
0x601c   :  { %15703 = vrcp.f32 %v10881_v4 }
0x6026   :  { %v15704_v9 = vpop.eup %15703 }
0x6027   :  { %v10883_v55 = vmul.f32 %v15704_v9, %v15702_v2 }
0x6029   :  { %14800 = vmatmul.mubr.msk.f32.vlgmr.msra.gmra.mrb[132].mxu1 %vm345_vm2, %v10883_v55 }
0x602a   :  { %15457 = vmatpush3.bf16.msra.mxu1 %v15456_v10  ;;  %14821 = vmatprep.mubr.msk.f32.mxu1 %vm15744_vm1, %v15745_v27 }
0x602b   :  { %15458 = vmatprep.subr.bf16.mxu1 %v15743_v7 }
0x602e   :  { %15460 = vmatpush3.bf16.msra.mxu1 %v15459_v5 }
0x602f   :  { %14835 = vmatprep.subr.mxu1 %v15745_v27 }
0x6031   :  { %14822 = vmatmul.mubr.msk.f32.vlgmr.msra.gmra.mrb[134].mxu1 %vm82_vm0, %v17764_v29 }
0x6032   :  { %14837 = vmatprep.mubr.msk.f32.mxu1 %vm15744_vm1, %v15745_v27 }
0x60fc   :  { %v10953_v13 = vpop.f32.mrb[132].mxu1 }
0x60fd   :  { %v14801_v58 = vpop.f32.mrb[133].mxu1 }
0x60fe   :  { %v13038_v58 = vld [vmem:[%s18111_s17 + $0x68] sm:$0xff] }
0x6104   :  { %v11102_v61 = vpop.f32.mrb[134].mxu1 }
0x6105   :  { %v14823_v14 = vpop.f32.mrb[135].mxu1  ;;  %14836 = vmatpush3.xpose.msk.msra.mxu1 %vm345_vm2, %v11102_v61 }
0x6106   :  { %14840 = vmatprep.subr.mxu1 %v15745_v27 }
0x6108   :  { %14838 = vmatmul.mubr.msk.f32.vlgmr.msra.gmra.mrb[136].mxu1 %vm345_vm2, %v11028_v56 }
0x6109   :  { %14841 = vmatpush3.msra.mxu1 %v11176_v59  ;;  %14842 = vmatprep.mubr.msk.f32.mxu1 %vm15744_vm1, %v15745_v27 }
0x610a   :  { %14850 = vmatprep.subr.mxu1 %v15745_v27 }
0x61db   :  { %v11252_v0 = vpop.f32.mrb[136].mxu1 }
0x61dc   :  { %v11256_v16 = vmul.f32 0.35355338, %v11252_v0  ;;  %v14839_v17 = vpop.f32.mrb[137].mxu1 }
0x61dd   :  { %v13040_v17 = vld [vmem:[%s18111_s17 + $0x78] sm:$0xff] }
0x61de   :  { %v11257_v18 = vsel %vm345_vm2, %v11256_v16, -inf }
0x61df   :  { %11258 = vmax.xlane.f32.xlu0 %v11257_v18 }
0x626c   :  { %v11259_v19 = vpop.xlane.xlu0 %11258 }
0x626d   :  { %v11260_v20 = vsub.f32 %v11256_v16, %v11259_v19  ;;  %v13039_v16 = vld [vmem:[%s18111_s17 + $0x70] sm:$0xff]  ;;  %v13047_v19 = vld [vmem:[%s18113_s19 + $0x60] sm:$0xff] }
0x626e   :  { %v15489_v18 = vpack.c.bf16 %v13040_v17, %v13039_v16 }
0x626f   :  { %v11261_v21 = vmul.f32 1.442695, %v11260_v20  ;;  %v13048_v20 = vld [vmem:[%s18113_s19 + $0x68] sm:$0xff] }
0x6271   :  { %15705 = vpow2.f32 %v11261_v21  ;;  %v15498_v21 = vpack.c.bf16 %v13048_v20, %v13047_v19  ;;  %v12528_v19 = vld [vmem:[%s18117_s23 + $0x8] sm:$0xff]  ;;  %v12529_v20 = vld [vmem:[%s18117_s23 + $0x10] sm:$0xff] }
0x627b   :  { %v15706_v22 = vpop.eup %15705 }
0x627c   :  { %v11263_v23 = vsel %vm345_vm2, %v15706_v22, 0.0 }
0x627d   :  { %11264 = vadd.xlane.f32.xlu1 %v11263_v23  ;;  %v13050_v23 = vld [vmem:[%s18113_s19 + $0x78] sm:$0xff] }
0x630a   :  { %v11265_v25 = vpop.xlane.xlu1 %11264 }
0x630b   :  { %15707 = vrcp.f32 %v11265_v25  ;;  %v13042_v25 = vld [vmem:[%s18112_s18 + $0x60] sm:$0xff] }
0x6315   :  { %v15708_v26 = vpop.eup %15707 }
0x6316   :  { %v11267_v28 = vmul.f32 %v15708_v26, %v15706_v22  ;;  %v13049_v22 = vld [vmem:[%s18113_s19 + $0x70] sm:$0xff]  ;;  %v13043_v26 = vld [vmem:[%s18112_s18 + $0x68] sm:$0xff] }
0x6317   :  { %v15501_v24 = vpack.c.bf16 %v13050_v23, %v13049_v22  ;;  %v12530_v22 = vld [vmem:[%s18117_s23 + $0x18] sm:$0xff] }
0x6318   :  { %14843 = vmatmul.mubr.msk.f32.vlgmr.msra.gmra.mrb[138].mxu1 %vm345_vm2, %v11267_v28  ;;  %v15492_v28 = vpack.c.bf16 %v13043_v26, %v13042_v25  ;;  %v15513_v25 = vpack.c.bf16 %v12530_v22, %v12529_v20 }
0x6319   :  { %14851 = vmatpush3.msra.mxu1 %v10957_v30  ;;  %14852 = vmatprep.mubr.msk.f32.mxu1 %vm15744_vm1, %v15745_v27  ;;  %v13044_v30 = vld [vmem:[%s18112_s18 + $0x70] sm:$0xff] }
0x631a   :  { %15473 = vmatprep.subr.bf16.mxu1 %v15743_v7  ;;  %v15495_v36 = vpack.c.bf16 %v13045_v31, %v13044_v30  ;;  %v12532_v30 = vld [vmem:[%s18117_s23 + $0x28] sm:$0xff] }
0x631c   :  { %14853 = vmatmul.mubr.msk.f32.vlgmr.msra.gmra.mrb[140].mxu1 %vm345_vm2, %v10953_v13  ;;  %v13037_v13 = vld [vmem:[%s18111_s17 + $0x60] sm:$0xff] }
0x631d   :  { %15475 = vmatpush3.bf16.msra.mxu1 %v15474_v35  ;;  %14874 = vmatprep.mubr.msk.f32.mxu1 %vm15744_vm1, %v15745_v27  ;;  %v15486_v14 = vpack.c.bf16 %v13038_v58, %v13037_v13 }
0x631e   :  { %15476 = vmatprep.subr.bf16.mxu1 %v15743_v7 }
0x6321   :  { %15478 = vmatpush3.bf16.msra.mxu1 %v15477_v39 }
0x6322   :  { %14888 = vmatprep.subr.mxu1 %v15745_v27 }
0x6324   :  { %14875 = vmatmul.mubr.msk.f32.vlgmr.msra.gmra.mrb[142].mxu1 %vm82_vm0, %v17764_v29 }
0x6325   :  { %14890 = vmatprep.mubr.msk.f32.mxu1 %vm15744_vm1, %v15745_v27 }
0x63eb   :  { %v11337_v46 = vpop.f32.mrb[138].mxu1 }
0x63ec   :  { %v14844_v47 = vpop.f32.mrb[139].mxu1  ;;  %14848 = vmatmul.mubr.msk.f32.vlgmr.msra.gmra.mrb[140].mxu0 %vm345_vm2, %v11337_v46 }
0x63ed   :  { %15469 = vmatpush3.bf16.msra.mxu0 %v15468_v43  ;;  %14863 = vmatprep.mubr.msk.f32.mxu0 %vm15744_vm1, %v15745_v27 }
0x63ee   :  { %15470 = vmatprep.subr.bf16.mxu0 %v15743_v7 }
0x63ef   :  { %v11484_v50 = vpop.f32.mrb[140].mxu1 }
0x63f0   :  { %v14854_v34 = vpop.f32.mrb[141].mxu1 }
0x63f1   :  { %15472 = vmatpush3.bf16.msra.mxu0 %v15471_v48 }
0x63f2   :  { %15479 = vmatprep.subr.bf16.mxu0 %v15743_v7 }
0x63f4   :  { %14864 = vmatmul.mubr.msk.f32.vlgmr.msra.gmra.mrb[142].mxu0 %vm82_vm0, %v17764_v29 }
0x63f5   :  { %15481 = vmatpush3.bf16.msra.mxu0 %v15480_v15  ;;  %14885 = vmatprep.mubr.msk.f32.mxu0 %vm15744_vm1, %v15745_v27 }
0x63f6   :  { %15482 = vmatprep.subr.bf16.mxu0 %v15743_v7 }
0x63f7   :  { %v11632_v54 = vpop.f32.mrb[142].mxu1 }
0x63f8   :  { %v14876_v40 = vpop.f32.mrb[143].mxu1  ;;  %14889 = vmatpush3.xpose.msk.msra.mxu1 %vm345_vm2, %v11632_v54 }
0x63f9   :  { %15484 = vmatpush3.bf16.msra.mxu0 %v15483_v37  ;;  %14893 = vmatprep.subr.mxu1 %v15745_v27  ;;  %v13055_v37 = vld [vmem:[%s18114_s20 + $0x18] sm:$0xff] }
0x63fa   :  { %14898 = vmatprep.subr.mxu0 %v15745_v27 }
0x63fc   :  { %14886 = vmatmul.mubr.msk.f32.vlgmr.msra.gmra.mrb[144].mxu0 %vm82_vm0, %v17764_v29 }
0x63fd   :  { %14900 = vmatprep.mubr.msk.f32.mxu0 %vm15744_vm1, %v15745_v27  ;;  %14899 = vmatpush3.msra.mxu0 %v13035_v12  ;;  %v12444_v12 = vld [vmem:[%s18115_s21 + $0x10] sm:$0xff] }
0x63fe   :  { %15491 = vmatprep.subr.bf16.mxu0 %v15743_v7 }
0x64bf   :  { %v11411_v56 = vpop.f32.mrb[140].mxu0 }
0x64c0   :  { %v17932_v57 = vadd.f32 %v11484_v50, %v11411_v56  ;;  %v14849_v59 = vpop.f32.mrb[141].mxu0 }
0x64c7   :  { %v11558_v60 = vpop.f32.mrb[142].mxu0 }
0x64c8   :  { %v14865_v62 = vpop.f32.mrb[143].mxu0  ;;  %14891 = vmatmul.mubr.msk.f32.vlgmr.msra.gmra.mrb[144].mxu1 %vm345_vm2, %v11558_v60 }
0x64c9   :  { %14895 = vmatprep.mubr.msk.f32.mxu1 %vm15744_vm1, %v15745_v27 }
0x64cf   :  { %v11706_v63 = vpop.f32.mrb[144].mxu0 }
0x64d0   :  { %v14887_v1 = vpop.f32.mrb[145].mxu0  ;;  %14894 = vmatpush3.msra.mxu1 %v11706_v63 }
0x64d1   :  { %15485 = vmatprep.subr.bf16.mxu1 %v15743_v7 }
0x659b   :  { %v11782_v2 = vpop.f32.mrb[144].mxu1 }
0x659c   :  { %v11786_v3 = vmul.f32 0.35355338, %v11782_v2  ;;  %v14892_v4 = vpop.f32.mrb[145].mxu1 }
0x659e   :  { %v11787_v6 = vsel %vm345_vm2, %v11786_v3, -inf }
0x659f   :  { %11788 = vmax.xlane.f32.xlu0 %v11787_v6  ;;  %v12443_v6 = vld [vmem:[%s18115_s21 + $0x8] sm:$0xff] }
0x662c   :  { %v11789_v8 = vpop.xlane.xlu0 %11788 }
0x662d   :  { %v11790_v9 = vsub.f32 %v11786_v3, %v11789_v8 }
0x662f   :  { %v11791_v10 = vmul.f32 1.442695, %v11790_v9 }
0x6631   :  { %15709 = vpow2.f32 %v11791_v10 }
0x663b   :  { %v15710_v55 = vpop.eup %15709 }
0x663c   :  { %v11793_v11 = vsel %vm345_vm2, %v15710_v55, 0.0 }
0x663d   :  { %11794 = vadd.xlane.f32.xlu1 %v11793_v11 }
0x66ca   :  { %v11795_v5 = vpop.xlane.xlu1 %11794 }
0x66cb   :  { %15711 = vrcp.f32 %v11795_v5  ;;  %v12445_v5 = vld [vmem:[%s18115_s21 + $0x18] sm:$0xff] }
0x66cc   :  { %v15507_v13 = vpack.c.bf16 %v12445_v5, %v12444_v12 }
0x66d5   :  { %v15712_v61 = vpop.eup %15711 }
0x66d6   :  { %v11797_v0 = vmul.f32 %v15712_v61, %v15710_v55 }
0x66d8   :  { %14896 = vmatmul.mubr.msk.f32.vlgmr.msra.gmra.mrb[146].mxu1 %vm345_vm2, %v11797_v0 }
0x66d9   :  { %15487 = vmatpush3.bf16.msra.mxu1 %v15486_v14  ;;  %14911 = vmatprep.mubr.msk.f32.mxu1 %vm15744_vm1, %v15745_v27 }
0x66da   :  { %15488 = vmatprep.subr.bf16.mxu1 %v15743_v7 }
0x66dd   :  { %15490 = vmatpush3.bf16.msra.mxu1 %v15489_v18  ;;  %v12527_v18 = vld [vmem:[%s18117_s23] sm:$0xff] }
0x66de   :  { %15497 = vmatprep.subr.bf16.mxu1 %v15743_v7 }
0x66e0   :  { %14912 = vmatmul.mubr.msk.f32.vlgmr.msra.gmra.mrb[148].mxu1 %vm82_vm0, %v17764_v29 }
0x66e1   :  { %15499 = vmatpush3.bf16.msra.mxu1 %v15498_v21  ;;  %14933 = vmatprep.mubr.msk.f32.mxu1 %vm15744_vm1, %v15745_v27  ;;  %v15510_v21 = vpack.c.bf16 %v12528_v19, %v12527_v18 }
0x66e2   :  { %15500 = vmatprep.subr.bf16.mxu1 %v15743_v7 }
0x66e5   :  { %15502 = vmatpush3.bf16.msra.mxu1 %v15501_v24 }
0x66e6   :  { %14946 = vmatprep.subr.mxu1 %v15745_v27 }
0x66e8   :  { %14934 = vmatmul.mubr.msk.f32.vlgmr.msra.gmra.mrb[150].mxu1 %vm82_vm0, %v17764_v29 }
0x66e9   :  { %14948 = vmatprep.mubr.msk.f32.mxu1 %vm15744_vm1, %v15745_v27  ;;  %14947 = vmatpush3.msra.mxu1 %v13055_v37 }
0x66ea   :  { %15509 = vmatprep.subr.bf16.mxu1 %v15743_v7 }
0x67ab   :  { %v11867_v33 = vpop.f32.mrb[146].mxu1 }
0x67ac   :  { %v14897_v35 = vpop.f32.mrb[147].mxu1  ;;  %14901 = vmatmul.mubr.msk.f32.vlgmr.msra.gmra.mrb[146].mxu0 %vm345_vm2, %v11867_v33 }
0x67ad   :  { %15493 = vmatpush3.bf16.msra.mxu0 %v15492_v28  ;;  %14922 = vmatprep.mubr.msk.f32.mxu0 %vm15744_vm1, %v15745_v27  ;;  %v12531_v28 = vld [vmem:[%s18117_s23 + $0x20] sm:$0xff] }
0x67ae   :  { %15494 = vmatprep.subr.bf16.mxu0 %v15743_v7  ;;  %v15516_v31 = vpack.c.bf16 %v12532_v30, %v12531_v28 }
0x67b1   :  { %15496 = vmatpush3.bf16.msra.mxu0 %v15495_v36 }
0x67b2   :  { %14936 = vmatprep.subr.mxu0 %v15745_v27 }
0x67b3   :  { %v12016_v38 = vpop.f32.mrb[148].mxu1 }
0x67b4   :  { %v14913_v39 = vpop.f32.mrb[149].mxu1  ;;  %14923 = vmatmul.mubr.msk.f32.vlgmr.msra.gmra.mrb[148].mxu0 %vm82_vm0, %v17764_v29 }
0x67b5   :  { %14938 = vmatprep.mubr.msk.f32.mxu0 %vm15744_vm1, %v15745_v27 }
0x67bb   :  { %v12164_v41 = vpop.f32.mrb[150].mxu1 }
0x67bc   :  { %v14935_v42 = vpop.f32.mrb[151].mxu1 }
0x67bd   :  { %v12534_v42 = vld [vmem:[%s18117_s23 + $0x38] sm:$0xff] }
0x687f   :  { %v11941_v43 = vpop.f32.mrb[146].mxu0 }
0x6880   :  { %v11945_v44 = vadd.f32 %v11941_v43, %v17932_v57  ;;  %v14902_v45 = vpop.f32.mrb[147].mxu0 }
0x6887   :  { %v12090_v46 = vpop.f32.mrb[148].mxu0 }
0x6888   :  { %v14924_v47 = vpop.f32.mrb[149].mxu0  ;;  %14937 = vmatpush3.xpose.msk.msra.mxu0 %vm345_vm2, %v12090_v46 }
0x6889   :  { %14941 = vmatprep.subr.mxu0 %v15745_v27 }
0x688b   :  { %14939 = vmatmul.mubr.msk.f32.vlgmr.msra.gmra.mrb[150].mxu0 %vm345_vm2, %v12016_v38 }
0x688c   :  { %14942 = vmatpush3.msra.mxu0 %v12164_v41  ;;  %14943 = vmatprep.mubr.msk.f32.mxu0 %vm15744_vm1, %v15745_v27 }
0x688d   :  { %15503 = vmatprep.subr.bf16.mxu0 %v15743_v7 }
0x695e   :  { %v12240_v29 = vpop.f32.mrb[150].mxu0 }
0x695f   :  { %v12244_v48 = vmul.f32 0.35355338, %v12240_v29  ;;  %v14940_v49 = vpop.f32.mrb[151].mxu0 }
0x6961   :  { %v12245_v32 = vsel %vm345_vm2, %v12244_v48, -inf }
0x6962   :  { %12246 = vmax.xlane.f32.xlu0 %v12245_v32 }
0x69ef   :  { %v12247_v50 = vpop.xlane.xlu0 %12246 }
0x69f0   :  { %v12248_v34 = vsub.f32 %v12244_v48, %v12247_v50  ;;  %v13059_v48 = vld [vmem:[%s18118_s24] ss:$0 sm:$0xff] }
0x69f2   :  { %v12249_v15 = vmul.f32 1.442695, %v12248_v34 }
0x69f4   :  { %15713 = vpow2.f32 %v12249_v15 }
0x69fe   :  { %v15714_v51 = vpop.eup %15713 }
0x69ff   :  { %v12251_v52 = vsel %vm345_vm2, %v15714_v51, 0.0 }
0x6a00   :  { %12252 = vadd.xlane.f32.xlu1 %v12251_v52 }
0x6a8d   :  { %v12253_v54 = vpop.xlane.xlu1 %12252 }
0x6a8e   :  { %15715 = vrcp.f32 %v12253_v54 }
0x6a98   :  { %v15716_v40 = vpop.eup %15715 }
0x6a99   :  { %v12255_v56 = vmul.f32 %v15716_v40, %v15714_v51 }
0x6a9b   :  { %14944 = vmatmul.mubr.msk.f32.vlgmr.msra.gmra.mrb[152].mxu0 %vm345_vm2, %v12255_v56 }
0x6a9c   :  { %14959 = vmatprep.mubr.msk.f32.mxu0 %vm15744_vm1, %v15745_v27 }
0x6b6e   :  { %v12325_v57 = vpop.f32.mrb[152].mxu0 }
0x6b6f   :  { %v14945_v59 = vpop.f32.mrb[153].mxu0  ;;  %14949 = vmatmul.mubr.msk.f32.vlgmr.msra.gmra.mrb[152].mxu1 %vm345_vm2, %v12325_v57 }
0x6b70   :  { %14978 = vmatprep.mubr.msk.f32.mxu1 %vm15744_vm1, %v15745_v27  ;;  %v12442_v27 = vld [vmem:[%s18115_s21] sm:$0xff]  ;;  %15511 = vmatpush3.bf16.msra.mxu1 %v15510_v21 }
0x6b71   :  { %15512 = vmatprep.subr.bf16.mxu1 %v15743_v7 }
0x6b74   :  { %15514 = vmatpush3.bf16.msra.mxu1 %v15513_v25 }
0x6b75   :  { %15515 = vmatprep.subr.bf16.mxu1 %v15743_v7 }
0x6b78   :  { %15517 = vmatpush3.bf16.msra.mxu1 %v15516_v31 }
0x6b79   :  { %15518 = vmatprep.subr.bf16.mxu1 %v15743_v7 }
0x6c42   :  { %v12399_v60 = vpop.f32.mrb[152].mxu1 }
0x6c43   :  { %v12403_v62 = vadd.f32 %v12399_v60, %v11945_v44  ;;  %v14950_v63 = vpop.f32.mrb[153].mxu1  ;;  %v13057_v44 = vld [vmem:[%s18116_s22] ss:$0 sm:$0xff]  ;;  %s15719_s22 = scalar_lea.vmem %s12624_s16, 256 }
0x6c44   :  { %p15720_p0 = scmp.ne.s32.totalorder %s12624_s16, %s15719_s22  ;;  %p15725_p2 = scmp.lt.s32.totalorder %s15719_s22, %s15719_s22 }
0x6c45   :  { %v18024_v1 = vadd.f32 %v12403_v62, %v17722_v53  ;;  %v15504_v53 = vpack.c.bf16 %v12443_v6, %v12442_v27 }
0x6c46   :  { %p15726_p3 = por %p15725_p2, %p15724_p1 }
0x6c47   :  { %v12405_v2 = vsel %vm82_vm0, %v18024_v1, 0.0  ;;  %v12418_v3 = vmul.f32 %v18024_v1, %v18024_v1  ;;  %15505 = vmatpush3.bf16.msra.mxu0 %v15504_v53 }
0x6c48   :  { %12406 = vadd.xlane.f32.xlu0 %v12405_v2  ;;  %15506 = vmatprep.subr.bf16.mxu0 %v15743_v7  ;;  %v12533_v7 = vld [vmem:[%s18117_s23 + $0x30] sm:$0xff]  ;;  %p15727_p4 = pnand %p15726_p3, %p15720_p0 }
0x6c49   :  { %v12419_v4 = vsel %vm82_vm0, %v12418_v3, 0.0  ;;  %v15519_v43 = vpack.c.bf16 %v12534_v42, %v12533_v7 }
0x6c4a   :  { %12420 = vadd.xlane.f32.xlu1 %v12419_v4 }
0x6c4b   :  { %15508 = vmatpush3.bf16.msra.mxu0 %v15507_v13  ;;  %15520 = vmatpush3.bf16.msra.mxu1 %v15519_v43 }
0x6cd5   :  { %v12407_v8 = vpop.xlane.xlu0 %12406 }
0x6cd6   :  { %v12408_v9 = vrot.slane %v12407_v8, 4 }
0x6cd7   :  { %v12421_v10 = vpop.xlane.xlu1 %12420 }
0x6cd8   :  { %v12409_v55 = vadd.f32 %v12408_v9, %v12407_v8  ;;  %v12422_v11 = vrot.slane %v12421_v10, 4 }
0x6cda   :  { %v12410_v58 = vrot.slane %v12409_v55, 2  ;;  %v12423_v61 = vadd.f32 %v12422_v11, %v12421_v10 }
0x6cdc   :  { %v12411_v14 = vadd.f32 %v12410_v58, %v12409_v55  ;;  %v12424_v0 = vrot.slane %v12423_v61, 2 }
0x6cde   :  { %v12425_v16 = vadd.f32 %v12424_v0, %v12423_v61  ;;  %v12412_v17 = vrot.slane %v12411_v14, 1 }
0x6ce0   :  { %v12413_v23 = vadd.f32 %v12412_v17, %v12411_v14  ;;  %v12426_v24 = vrot.slane %v12425_v16, 1 }
0x6ce2   :  { %15587 = vpush %v12413_v23  ;;  %v12427_v26 = vadd.f32 %v12426_v24, %v12425_v16 }
0x6ce4   :  { %15589 = vpush %v12427_v26 }
0x6d13   :  { %s15588_s9 = spop %15587 }
0x6d14   :  { %s12417_s29 = smul.f32 0.00390625, %s15588_s9 }
0x6d15   :  { %s15590_s25 = spop %15589 }
0x6d16   :  { %s12432_s30 = smul.f32 %s12417_s29, %s12417_s29  ;;  %v12434_v36 = vstv %s12417_s29 }
0x6d17   :  { %s12431_s7 = smul.f32 0.00390625, %s15590_s25  ;;  %v12435_v38 = vsub.f32 %v18024_v1, %v12434_v36 }
0x6d19   :  { %s12433_s6 = ssub.f32 %s12431_s7, %s12432_s30 }
0x6d1b   :  { %s12436_s18 = sadd.f32 1e-05, %s12433_s6 }
0x6d1d   :  { %v12437_v33 = vstv %s12436_s18 }
0x6d1e   :  { %15717 = vrsqrt.f32 %v12437_v33 }
0x6d28   :  { %v15718_v35 = vpop.eup %15717 }
0x6d29   :  { %15591 = vpush %v15718_v35 }
0x6d5a   :  { %s15592_s11 = spop %15591 }
0x6d5b   :  { %v12440_v39 = vstv %s15592_s11 }
0x6d5c   :  { %v12441_v41 = vmul.f32 %v12440_v39, %v12435_v38 }
0x6d5e   :  { %14960 = vmatmul.mubr.msk.f32.vlgmr.msra.gmra.mrb[154].mxu0 %vm82_vm0, %v12441_v41 }
0x6e31   :  { %v12522_v45 = vpop.f32.mrb[154].mxu0 }
0x6e32   :  { %v12523_v46 = vadd.f32 %v13057_v44, %v12522_v45  ;;  %v14961_v47 = vpop.f32.mrb[155].mxu0 }
0x6e34   :  { %v12526_v29 = vmax.f32 %v12523_v46, 0.0 }
0x6e36   :  { %14979 = vmatmul.mubr.msk.f32.vlgmr.msra.gmra.mrb[154].mxu1 %vm2104_vm3, %v12526_v29 }
0x6f09   :  { %v12611_v49 = vpop.f32.mrb[154].mxu1 }
0x6f0a   :  { %v12612_v32 = vadd.f32 %v13059_v48, %v12611_v49  ;;  %v14980_v50 = vpop.f32.mrb[155].mxu1 }
0x6f0c   :  { %v12615_v34 = vadd.f32 %v12612_v32, %v18024_v1 }
0x6f0e   :  { %12617 = vst.msk [vmem:[#allocation2 + $0x8] sm:$0xff] %vm82_vm0, %v12615_v34 }
0x6f0f   :  { %15730 = shalt.err (!%p15727_p4)
}
0x6f10   :  { %s18160_s24 = sld [smem:[#allocation15_spill]] }
0x6f16   :  { %s15731_s4 = scalar_lea.hbm %s18160_s24, 256 }
0x6f17   :  { %p15732_p5 = scmp.ne.s32.totalorder %s18160_s24, %s15731_s4  ;;  %p15735_p6 = scmp.lt.u32.totalorder %s15731_s4, %s18160_s24 }
0x6f19   :  { %p15737_p7 = pnand %p15735_p6, %p15732_p5 }
0x6f1b   :  { %15740 = shalt.err (!%p15737_p7)
}
0x6f1c   :  { %s15747_s12 = smov 128   ;;  %s15748_s27 = smov 8  }
0x6f1d   :  { %12629 = dma.vmem_to_hbm [thread:$0]  %s12624_s16, 256, %s18160_s24, [#allocation3], %s15747_s12, %s15747_s12, %s15748_s27  }
0x6f1e   :  { %15741 = dma.done.wait [#allocation3], 256  }
0x6f1f   :  { %15742 = vsyncadd [#allocation3], 4294967040 }
0x6f20   :  { %12633 = vsyncpa [#allocation3], 1 }

</bundles_post_ra>
